<compile_context>
chip_gen: v6e
topology: v6e:2x2x1
jax: 0.10.0
libtpu: 0.0.40
codegen_flags: <defaults>
</compile_context>

<pallas_src>
import functools

import jax
import jax.numpy as jnp
from jax.experimental import pallas as pl
from jax.experimental.pallas import tpu as pltpu

ALPHA = 0.25   # nn.PReLU() default init
EPS_BN = 1e-5


def _round_up(n, m):
    return ((n + m - 1) // m) * m


# ----------------------------------------------------------------------------- kernel
def discriminator_kernel(px_ref, wsp_ref, sh1_ref, wt_ref, sh2_ref, wbig_ref,
                         whc_ref, bl_ref, wd_ref, bd_ref, wax_ref, bax_ref,
                         out_ref, *, Wp, factor, GW, CPAD, alpha):
    """One batch tile of the whole Discriminator forward (all operands VMEM resident).

    px_ref  : (BT, factor*Wp*K*Nc)   batch-major im2col of the raw input, cols (f,w,k,nc)
    wsp_ref : (factor*Wp*K*Nc, factor*Wp*K*C2)  space conv (+BN scale), block-diag over (f,w,k)
    sh1_ref : (1, factor*Wp*K*C2)    folded space bias + BN shift
    wt_ref  : (factor*Wp*K*C2, factor*CPAD)     time conv (+BN scale), per-f 128-lane-padded blocks
    sh2_ref : (1, factor*CPAD)
    wbig_ref: (CPAD, Wp*4*GW)        torch-.view scramble + LSTM input proj (both dirs, all t)
    whc_ref : (GW, 4*GW)             recurrent weights, one 128-lane register per gate, f32
    bl_ref  : (1, 4*GW)              LSTM biases (ih+hh)
    wd_ref  : (Wp, GW, DPAD)         dense head folded per recurrence step (row-permuted)
    bd_ref  : (1, DPAD)
    wax_ref : (DPAD, OW)             fused lane-dense adv|aux head (lane 0 adv, 1..Nf aux)
    bax_ref : (1, OW)
    out_ref : (BT, OW)               lane-dense output slab
    """
    prelu = lambda v: jnp.where(v >= 0.0, v, alpha * v)

    # ---- spatial block: conv (Nc,1)/(Nc,1) + BN (folded) + PReLU ----
    px = px_ref[...]
    py = jnp.dot(px.astype(wsp_ref.dtype), wsp_ref[...],
                 preferred_element_type=jnp.float32) + sh1_ref[...]
    py = prelu(py)                                              # (BT, factor*Wp*K*C2)

    # ---- enhanced block: conv (1,K)/(1,S) + BN (folded) -> MaxPool(1,factor) -> PReLU ----
    zp = jnp.dot(py.astype(wt_ref.dtype), wt_ref[...],
                 preferred_element_type=jnp.float32) + sh2_ref[...]
    pooled = zp[:, 0:CPAD]                                      # 128-lane-aligned pool taps
    for f in range(1, factor):
        pooled = jnp.maximum(pooled, zp[:, f * CPAD:(f + 1) * CPAD])
    z = prelu(pooled)                                           # (BT, CPAD), cols w*C4+c4 (+0 pad)

    # ---- torch .view scramble + hoisted LSTM input projection (all steps, both dirs) ----
    xi = jnp.dot(z.astype(wbig_ref.dtype), wbig_ref[...],
                 preferred_element_type=jnp.float32)            # (BT, Wp*4*GW)

    # ---- bidirectional LSTM, fwd/bwd interleaved; one full 128-lane register per gate
    #      [i | f | o | g]; every slice below is at a 128-lane boundary (no lane shuffles);
    #      pad lanes of c/h stay exactly 0 (zero wbig/whc/bl columns there).
    whc = whc_ref[...]                                          # f32 recurrence
    bl = bl_ref[...]
    bt = px.shape[0]
    h = jnp.zeros((bt, GW), jnp.float32)                        # [h_f | h_b | 0...]
    c = jnp.zeros((bt, GW), jnp.float32)                        # [c_f | c_b | 0...]
    acc = jnp.zeros((bt, bd_ref.shape[1]), jnp.float32)         # dense head accumulator
    sgw = 4 * GW
    for s in range(Wp):                                         # Wp=6, fully unrolled
        g = (xi[:, s * sgw:(s + 1) * sgw]
             + jnp.dot(h, whc, preferred_element_type=jnp.float32) + bl)   # (BT, 4*GW)
        sg = jax.nn.sigmoid(g[:, 0:3 * GW])                     # i | f | o  (3 aligned vreg groups)
        gg = jnp.tanh(g[:, 3 * GW:4 * GW])                      # cell candidate
        c = sg[:, GW:2 * GW] * c + sg[:, 0:GW] * gg
        h = sg[:, 2 * GW:3 * GW] * jnp.tanh(c)
        # dense head folded into the loop (off the recurrence's data dependence)
        acc = acc + jnp.dot(h.astype(wd_ref.dtype), wd_ref[s],
                            preferred_element_type=jnp.float32)

    # ---- dense (PReLU) + fused lane-dense adv|aux output slab ----
    d = prelu(acc + bd_ref[...])
    out_ref[...] = (jnp.dot(d.astype(wax_ref.dtype), wax_ref[...],
                            preferred_element_type=jnp.float32) + bax_ref[...])


# ----------------------------------------------------------------------------- wrapper
def discriminator_forward(x, kp, *, Nc, Nf, K, S, factor, block_b=128):
    """x: (B, 1, Nc, T) NCHW like the PyTorch module.  block_b: batch tile (rows per
    grid step); use 128 (v5e) / 256 (v6e, v7x) for large batches."""
    B = x.shape[0]
    T = x.shape[-1]
    C4 = 4 * Nc
    H = C4
    Wc = (T - K) // S + 1
    Wp = Wc // factor
    GW = _round_up(2 * H, 128)
    CPAD = _round_up(Wp * C4, 128)
    OW = kp["wax"].shape[1]

    x3 = x.reshape(B, Nc, T)
    # Batch-major im2col of the RAW input (the space conv is pointwise in time, so the
    # time-window gather commutes with it).  Columns ordered (f, w, k, nc).
    t_idx = ((jnp.arange(Wp)[None, :, None] * factor
              + jnp.arange(factor)[:, None, None]) * S
             + jnp.arange(K)[None, None, :])                    # (factor, Wp, K)
    gat = x3[:, :, t_idx]                                       # (B, Nc, factor, Wp, K)
    px = jnp.transpose(gat, (0, 2, 3, 4, 1)).reshape(B, factor * Wp * K * Nc)

    # pad the batch to a multiple of the (>=8 sublane) batch tile
    BT = _round_up(min(block_b, _round_up(B, 8)), 8)
    Bpad = _round_up(B, BT)
    if Bpad != B:
        px = jnp.pad(px, ((0, Bpad - B), (0, 0)))

    kern = functools.partial(discriminator_kernel, Wp=Wp, factor=factor,
                             GW=GW, CPAD=CPAD, alpha=ALPHA)

    def fixed(a):  # full-array block, resident across the batch grid
        zeros = (0,) * a.ndim
        return pl.BlockSpec(a.shape, lambda i, _z=zeros: _z)

    out_slab = pl.pallas_call(
        kern,
        grid=(Bpad // BT,),
        in_specs=[pl.BlockSpec((BT, px.shape[1]), lambda i: (i, 0)),
                  fixed(kp["wsp"]), fixed(kp["sh1"]), fixed(kp["wt"]), fixed(kp["sh2"]),
                  fixed(kp["wbig"]), fixed(kp["whc"]), fixed(kp["bl"]),
                  fixed(kp["wd"]), fixed(kp["bd"]), fixed(kp["wax"]), fixed(kp["bax"])],
        out_specs=pl.BlockSpec((BT, OW), lambda i: (i, 0)),
        out_shape=jax.ShapeDtypeStruct((Bpad, OW), jnp.float32),
        compiler_params=pltpu.CompilerParams(dimension_semantics=("parallel",)),
    )(px, kp["wsp"], kp["sh1"], kp["wt"], kp["sh2"], kp["wbig"],
      kp["whc"], kp["bl"], kp["wd"], kp["bd"], kp["wax"], kp["bax"])

    return out_slab[:B, 0:1], out_slab[:B, 1:1 + Nf]


# ----------------------------------------------------------------------------- parameters
def spectral_normalize(w, iters=8):
    """Divide a 2D weight by its largest singular value (spectral_norm, setup-time)."""
    v = jnp.ones((w.shape[1],), jnp.float32) / jnp.sqrt(float(w.shape[1]))
    u = jnp.ones((w.shape[0],), jnp.float32) / jnp.sqrt(float(w.shape[0]))
    for _ in range(iters):
        u = w @ v
        u = u / (jnp.linalg.norm(u) + 1e-12)
        v = w.T @ u
        v = v / (jnp.linalg.norm(v) + 1e-12)
    sigma = jnp.dot(u, w @ v)
    return w / sigma


def make_raw_params(key, *, Nc, Nf, K, S, factor, T):
    """Torch-like raw parameters (used by the pure-JAX reference and then packed)."""
    C2, C4 = 2 * Nc, 4 * Nc
    I = C4
    H = C4
    Wc = (T - K) // S + 1
    Wp = Wc // factor
    fcUnit = C4 * 1 * Wp * 2
    D = fcUnit // 20
    keys = iter(jax.random.split(key, 40))

    def unif(shape, bound):
        return jax.random.uniform(next(keys), shape, jnp.float32, -bound, bound)

    # spatial block: Conv2dWithConstraint(1, 2Nc, (Nc,1), stride (Nc,1), max_norm=1)
    bnd = 1.0 / (Nc ** 0.5)
    w_sp = unif((C2, Nc), bnd)
    nrm = jnp.sqrt(jnp.sum(w_sp * w_sp, axis=1, keepdims=True))
    w_sp = w_sp * jnp.minimum(1.0, 1.0 / (nrm + 1e-7))          # torch.renorm(p=2, dim=0, maxnorm=1)
    b_sp = unif((C2,), bnd)
    g1 = jax.random.uniform(next(keys), (C2,), jnp.float32, 0.5, 1.5)
    beta1 = 0.1 * jax.random.normal(next(keys), (C2,), jnp.float32)
    m1 = 0.1 * jax.random.normal(next(keys), (C2,), jnp.float32)
    v1 = jax.random.uniform(next(keys), (C2,), jnp.float32, 0.5, 1.5)
    scale1 = g1 / jnp.sqrt(v1 + EPS_BN)
    shift1 = beta1 - m1 * scale1

    # enhanced block: snconv2d(2Nc, 4Nc, (1,K), stride (1,S))
    bnd = 1.0 / ((C2 * K) ** 0.5)
    w_tm = spectral_normalize(unif((C4, C2 * K), bnd)).reshape(C4, C2, K)
    b_tm = unif((C4,), bnd)
    g2 = jax.random.uniform(next(keys), (C4,), jnp.float32, 0.5, 1.5)
    beta2 = 0.1 * jax.random.normal(next(keys), (C4,), jnp.float32)
    m2 = 0.1 * jax.random.normal(next(keys), (C4,), jnp.float32)
    v2 = jax.random.uniform(next(keys), (C4,), jnp.float32, 0.5, 1.5)
    scale2 = g2 / jnp.sqrt(v2 + EPS_BN)
    shift2 = beta2 - m2 * scale2

    # bidirectional LSTM(input=4Nc, hidden=4Nc), torch gate order [i, f, g, o]
    bnd = 1.0 / (H ** 0.5)

    def lstm_dir():
        wih = unif((4 * H, I), bnd)
        whh = unif((4 * H, H), bnd)
        bih = unif((4 * H,), bnd)
        bhh = unif((4 * H,), bnd)
        return wih, whh, bih + bhh

    wih_f, whh_f, b_f = lstm_dir()
    wih_b, whh_b, b_b = lstm_dir()

    # heads: snlinear(fcUnit, D) + PReLU ; snlinear(D, 1) ; snlinear(D, Nf)
    bnd = 1.0 / (fcUnit ** 0.5)
    w_d = spectral_normalize(unif((D, fcUnit), bnd))
    b_d = unif((D,), bnd)
    bnd = 1.0 / (D ** 0.5)
    w_a = spectral_normalize(unif((1, D), bnd))
    b_a = unif((1,), bnd)
    w_x = spectral_normalize(unif((Nf, D), bnd))
    b_x = unif((Nf,), bnd)

    return dict(w_sp=w_sp, b_sp=b_sp, scale1=scale1, shift1=shift1,
                w_tm=w_tm, b_tm=b_tm, scale2=scale2, shift2=shift2,
                wih_f=wih_f, whh_f=whh_f, b_f=b_f,
                wih_b=wih_b, whh_b=whh_b, b_b=b_b,
                w_d=w_d, b_d=b_d, w_a=w_a, b_a=b_a, w_x=w_x, b_x=b_x)


def pack_params(rp, *, Nc, Nf, K, S, factor, T, mxu_dtype=jnp.float32):
    """Fold BN / bias / constraints / gate layout / torch-.view scramble / flatten into
    kernel-ready, lane-padded matrices.  Feed-forward MXU matrices may be bf16."""
    C2, C4 = 2 * Nc, 4 * Nc
    H = C4
    Wp = ((T - K) // S + 1) // factor
    fcUnit = 2 * Wp * C4
    D = fcUnit // 20
    GW = _round_up(2 * H, 128)          # one full register per gate (both dirs)
    CPAD = _round_up(Wp * C4, 128)      # post-pool feature width, padded
    DPAD = _round_up(D, 128)
    OW = _round_up(1 + Nf, 128)
    P = factor * Wp                     # number of conv window positions
    f32 = jnp.float32

    # --- space conv + BN folded, block-diagonal over the P*K (position, tap) pairs ---
    a = (rp["w_sp"] * rp["scale1"][:, None]).T.astype(f32)                 # (Nc, C2)
    wsp = jnp.kron(jnp.eye(P * K, dtype=f32), a)                           # (P*K*Nc, P*K*C2)
    sh1 = jnp.tile(rp["b_sp"] * rp["scale1"] + rp["shift1"], P * K)[None, :]

    # --- time conv + BN folded, per-f 128-lane-padded output blocks (lane-aligned pool) ---
    wt_inner = (jnp.transpose(rp["w_tm"], (2, 1, 0)).reshape(K * C2, C4)
                * rp["scale2"][None, :])                                   # (K*C2, C4)
    wt = jnp.zeros((P * K * C2, factor * CPAD), f32)
    for f in range(factor):
        for w in range(Wp):
            p = f * Wp + w
            wt = wt.at[p * K * C2:(p + 1) * K * C2,
                       f * CPAD + w * C4:f * CPAD + (w + 1) * C4].set(wt_inner)
    sh2_blk = jnp.zeros((CPAD,), f32).at[:Wp * C4].set(
        jnp.tile(rp["b_tm"] * rp["scale2"] + rp["shift2"], Wp))
    sh2 = jnp.tile(sh2_blk, factor)[None, :]

    # --- LSTM: register order [i, f, o, g], each GW=128 lanes wide, both dirs interleaved
    #     (forward in lanes 0..H-1, backward in lanes H..2H-1 of each register) ---
    def place_gates(wT, d):
        # wT: (rows, 4H) in torch gate order [i, f, g, o]
        out = jnp.zeros((wT.shape[0], 4 * GW), f32)
        for reg, tg in enumerate((0, 1, 3, 2)):                 # -> [i, f, o, g]
            out = out.at[:, reg * GW + d * H:reg * GW + (d + 1) * H].set(
                wT[:, tg * H:(tg + 1) * H])
        return out

    wi_f = place_gates(rp["wih_f"].T, 0)                        # (C4, 4*GW)
    wi_b = place_gates(rp["wih_b"].T, 1)
    whc = jnp.zeros((GW, 4 * GW), f32)
    whc = whc.at[0:H, :].set(place_gates(rp["whh_f"].T, 0))
    whc = whc.at[H:2 * H, :].set(place_gates(rp["whh_b"].T, 1))
    bl = place_gates(rp["b_f"][None, :], 0) + place_gates(rp["b_b"][None, :], 1)

    # torch's channel-major .view scramble + hoisted input projection (both directions,
    # backward blocks already time-reversed): lstm_in[b,t,i] = z[b, w*C4 + c] with
    # (c, w) = divmod(t*C4 + i, Wp)
    def rows_for_t(t):
        flat = t * C4 + jnp.arange(C4)
        return (flat % Wp) * C4 + flat // Wp

    def scatter_rows(rows, m):
        return jnp.zeros((CPAD, m.shape[1]), f32).at[rows, :].set(m)

    wbig = jnp.concatenate(
        [scatter_rows(rows_for_t(s), wi_f) + scatter_rows(rows_for_t(Wp - 1 - s), wi_b)
         for s in range(Wp)], axis=1)                                       # (CPAD, Wp*4*GW)

    # --- dense head folded into the recurrence: per-step (GW, DPAD) row-permuted blocks ---
    wdT = rp["w_d"].T                                                       # (fcUnit, D)
    wd = jnp.zeros((Wp, GW, DPAD), f32)
    for s in range(Wp):
        blk = jnp.zeros((GW, DPAD), f32)
        blk = blk.at[0:H, 0:D].set(wdT[s * 2 * H:s * 2 * H + H, :])             # fwd @ time s
        blk = blk.at[H:2 * H, 0:D].set(
            wdT[(Wp - 1 - s) * 2 * H + H:(Wp - 1 - s) * 2 * H + 2 * H, :])      # bwd @ time Wp-1-s
        wd = wd.at[s].set(blk)
    bd = jnp.zeros((1, DPAD), f32).at[0, :D].set(rp["b_d"])

    # --- fused lane-dense adv|aux head: out lane 0 = adv, lanes 1..Nf = aux ---
    wax = jnp.zeros((DPAD, OW), f32)
    wax = wax.at[:D, 0:1].set(rp["w_a"].T).at[:D, 1:1 + Nf].set(rp["w_x"].T)
    bax = jnp.zeros((1, OW), f32).at[0, 0:1].set(rp["b_a"]).at[0, 1:1 + Nf].set(rp["b_x"])

    # MXU-feeding matrices optionally bf16 (activations cast in-kernel, f32 accumulation);
    # the recurrent whc, biases and all elementwise state stay f32.
    cast = lambda m: m.astype(mxu_dtype)
    return dict(wsp=cast(wsp), sh1=sh1, wt=cast(wt), sh2=sh2, wbig=cast(wbig),
                whc=whc, bl=bl, wd=cast(wd), bd=bd, wax=cast(wax), bax=bax)


# ----------------------------------------------------------------------------- reference
def reference_forward(x, rp, *, Nc, Nf, K, S, factor):
    """Pure-JAX, un-fused, un-folded replica of the torch eval-mode forward."""
    B, T = x.shape[0], x.shape[-1]
    C2, C4 = 2 * Nc, 4 * Nc
    H = C4
    Wc = (T - K) // S + 1
    Wp = Wc // factor
    prelu = lambda v: jnp.where(v >= 0.0, v, ALPHA * v)

    x3 = x.reshape(B, Nc, T)
    y = jnp.einsum('on,bnt->bot', rp["w_sp"], x3) + rp["b_sp"][None, :, None]
    y = y * rp["scale1"][None, :, None] + rp["shift1"][None, :, None]
    y = prelu(y)                                                                   # (B, C2, T)

    idx = (jnp.arange(Wc) * S)[:, None] + jnp.arange(K)[None, :]                   # (Wc, K)
    ywin = y[:, :, idx]                                                            # (B, C2, Wc, K)
    zc = jnp.einsum('ock,bcwk->bow', rp["w_tm"], ywin) + rp["b_tm"][None, :, None]
    zc = zc * rp["scale2"][None, :, None] + rp["shift2"][None, :, None]
    zc = zc[:, :, :Wp * factor].reshape(B, C4, Wp, factor).max(axis=-1)            # MaxPool
    zc = prelu(zc)                                                                 # (B, C4, Wp)

    lstm_in = zc.reshape(B, Wp, C4)                                                # torch .view semantics

    def run_dir(wih, whh, b, reverse):
        h = jnp.zeros((B, H), jnp.float32)
        c = jnp.zeros((B, H), jnp.float32)
        outs = [None] * Wp
        times = range(Wp - 1, -1, -1) if reverse else range(Wp)
        for t in times:
            g = lstm_in[:, t, :] @ wih.T + h @ whh.T + b
            i = jax.nn.sigmoid(g[:, 0:H])
            f = jax.nn.sigmoid(g[:, H:2 * H])
            gg = jnp.tanh(g[:, 2 * H:3 * H])
            o = jax.nn.sigmoid(g[:, 3 * H:4 * H])
            c = f * c + i * gg
            h = o * jnp.tanh(c)
            outs[t] = h
        return jnp.stack(outs, axis=1)                                             # (B, Wp, H)

    hf = run_dir(rp["wih_f"], rp["whh_f"], rp["b_f"], False)
    hb = run_dir(rp["wih_b"], rp["whh_b"], rp["b_b"], True)
    flat = jnp.concatenate([hf, hb], axis=-1).reshape(B, -1)                       # (B, 2*Wp*H)

    d = prelu(flat @ rp["w_d"].T + rp["b_d"][None, :])
    adv = d @ rp["w_a"].T + rp["b_a"][None, :]
    aux = d @ rp["w_x"].T + rp["b_x"][None, :]
    return adv, aux


# ----------------------------------------------------------------------------- main
if __name__ == "__main__":
    # Discriminator(Nc=4, Nt=16, Nf=3, ws=1.0, factor=2) -> self.Nt = Nt*factor = 32
    Nc, Nt, Nf, ws, factor = 4, 16, 3, 1.0, 2
    K, S = 10, 2
    T = Nt * factor

    key = jax.random.PRNGKey(0)
    kx, kparam = jax.random.split(key)
    raw = make_raw_params(kparam, Nc=Nc, Nf=Nf, K=K, S=S, factor=factor, T=T)

    def run_case(B, mxu_dtype, block_b, tol):
        x = jax.random.normal(jax.random.fold_in(kx, B), (B, 1, Nc, T), jnp.float32)
        packed = pack_params(raw, Nc=Nc, Nf=Nf, K=K, S=S, factor=factor, T=T,
                             mxu_dtype=mxu_dtype)
        fwd = jax.jit(functools.partial(discriminator_forward, Nc=Nc, Nf=Nf, K=K,
                                        S=S, factor=factor, block_b=block_b))
        adv, aux = fwd(x, packed)
        jax.block_until_ready((adv, aux))
        assert adv.shape == (B, 1), adv.shape
        assert aux.shape == (B, Nf), aux.shape
        assert bool(jnp.all(jnp.isfinite(adv))) and bool(jnp.all(jnp.isfinite(aux)))
        ref_adv, ref_aux = reference_forward(x, raw, Nc=Nc, Nf=Nf, K=K, S=S, factor=factor)
        assert bool(jnp.allclose(adv, ref_adv, atol=tol, rtol=tol)), (adv, ref_adv)
        assert bool(jnp.allclose(aux, ref_aux, atol=tol, rtol=tol)), (aux, ref_aux)

    # small config (B=2), f32 MXU operands
    run_case(B=2, mxu_dtype=jnp.float32, block_b=128, tol=5e-3)
    # batch padding (13 -> 16) + a 2-tile "parallel" batch grid
    run_case(B=13, mxu_dtype=jnp.float32, block_b=8, tol=5e-3)
    # bf16 MXU operands (weights + in-kernel activation casts); recurrence/state f32
    run_case(B=13, mxu_dtype=jnp.bfloat16, block_b=8, tol=3e-2)

    print("KERNEL_OK")
</pallas_src>

<mosaic_0001>
module attributes {stable_mosaic.version = 11 : i64} {
  func.func @discriminator_kernel(%arg0: i32, %arg1: memref<8x480xf32, #tpu.memory_space<vmem>>, %arg2: memref<480x960xf32, #tpu.memory_space<vmem>>, %arg3: memref<1x960xf32, #tpu.memory_space<vmem>>, %arg4: memref<960x256xf32, #tpu.memory_space<vmem>>, %arg5: memref<1x256xf32, #tpu.memory_space<vmem>>, %arg6: memref<128x3072xf32, #tpu.memory_space<vmem>>, %arg7: memref<128x512xf32, #tpu.memory_space<vmem>>, %arg8: memref<1x512xf32, #tpu.memory_space<vmem>>, %arg9: memref<6x128x128xf32, #tpu.memory_space<vmem>>, %arg10: memref<1x128xf32, #tpu.memory_space<vmem>>, %arg11: memref<128x128xf32, #tpu.memory_space<vmem>>, %arg12: memref<1x128xf32, #tpu.memory_space<vmem>>, %arg13: memref<8x128xf32, #tpu.memory_space<vmem>>) attributes {dimension_semantics = [#tpu.dimension_semantics<parallel>], iteration_bounds = array<i64: 1>, scalar_prefetch = 0 : i64, scratch_operands = 0 : i64, tpu.core_type = #tpu.core_type<tc>, window_params = [{transform_indices = @transform_0, window_bounds = array<i64: 8, 480>}, {pipeline_mode = #tpu.pipeline_mode<synchronous>, transform_indices = @transform_1, window_bounds = array<i64: 480, 960>}, {pipeline_mode = #tpu.pipeline_mode<synchronous>, transform_indices = @transform_2, window_bounds = array<i64: 1, 960>}, {pipeline_mode = #tpu.pipeline_mode<synchronous>, transform_indices = @transform_3, window_bounds = array<i64: 960, 256>}, {pipeline_mode = #tpu.pipeline_mode<synchronous>, transform_indices = @transform_4, window_bounds = array<i64: 1, 256>}, {pipeline_mode = #tpu.pipeline_mode<synchronous>, transform_indices = @transform_5, window_bounds = array<i64: 128, 3072>}, {pipeline_mode = #tpu.pipeline_mode<synchronous>, transform_indices = @transform_6, window_bounds = array<i64: 128, 512>}, {pipeline_mode = #tpu.pipeline_mode<synchronous>, transform_indices = @transform_7, window_bounds = array<i64: 1, 512>}, {pipeline_mode = #tpu.pipeline_mode<synchronous>, transform_indices = @transform_8, window_bounds = array<i64: 6, 128, 128>}, {pipeline_mode = #tpu.pipeline_mode<synchronous>, transform_indices = @transform_9, window_bounds = array<i64: 1, 128>}, {pipeline_mode = #tpu.pipeline_mode<synchronous>, transform_indices = @transform_10, window_bounds = array<i64: 128, 128>}, {pipeline_mode = #tpu.pipeline_mode<synchronous>, transform_indices = @transform_11, window_bounds = array<i64: 1, 128>}, {transform_indices = @transform_12, window_bounds = array<i64: 8, 128>}]} {
    %c0 = arith.constant 0 : index
    %c0_0 = arith.constant 0 : index
    %0 = vector.load %arg1[%c0, %c0_0] : memref<8x480xf32, #tpu.memory_space<vmem>>, vector<8x480xf32>
    %c0_1 = arith.constant 0 : index
    %c0_2 = arith.constant 0 : index
    %1 = vector.load %arg2[%c0_1, %c0_2] : memref<480x960xf32, #tpu.memory_space<vmem>>, vector<480x960xf32>
    %cst = arith.constant dense<0.000000e+00> : vector<8x960xf32>
    %2 = tpu.matmul %0, %1, %cst {dimension_numbers = #tpu.dot_dimension_numbers<[1], [0], [0], [1], [0, 0, 1, 1], [], []>} : vector<8x480xf32>, vector<480x960xf32>, vector<8x960xf32> -> vector<8x960xf32>
    %c0_3 = arith.constant 0 : index
    %c0_4 = arith.constant 0 : index
    %3 = vector.load %arg3[%c0_3, %c0_4] : memref<1x960xf32, #tpu.memory_space<vmem>>, vector<1x960xf32>
    %4 = vector.broadcast %3 : vector<1x960xf32> to vector<8x960xf32>
    %5 = arith.addf %2, %4 : vector<8x960xf32>
    %cst_5 = arith.constant 0.000000e+00 : f32
    %6 = vector.broadcast %cst_5 : f32 to vector<8x960xf32>
    %7 = arith.cmpf oge, %5, %6 : vector<8x960xf32>
    %cst_6 = arith.constant 2.500000e-01 : f32
    %8 = vector.broadcast %cst_6 : f32 to vector<8x960xf32>
    %9 = arith.mulf %8, %5 : vector<8x960xf32>
    %10 = arith.select %7, %5, %9 : vector<8x960xi1>, vector<8x960xf32>
    %c0_7 = arith.constant 0 : index
    %c0_8 = arith.constant 0 : index
    %11 = vector.load %arg4[%c0_7, %c0_8] : memref<960x256xf32, #tpu.memory_space<vmem>>, vector<960x256xf32>
    %cst_9 = arith.constant dense<0.000000e+00> : vector<8x256xf32>
    %12 = tpu.matmul %10, %11, %cst_9 {dimension_numbers = #tpu.dot_dimension_numbers<[1], [0], [0], [1], [0, 0, 1, 1], [], []>} : vector<8x960xf32>, vector<960x256xf32>, vector<8x256xf32> -> vector<8x256xf32>
    %c0_10 = arith.constant 0 : index
    %c0_11 = arith.constant 0 : index
    %13 = vector.load %arg5[%c0_10, %c0_11] : memref<1x256xf32, #tpu.memory_space<vmem>>, vector<1x256xf32>
    %14 = vector.broadcast %13 : vector<1x256xf32> to vector<8x256xf32>
    %15 = arith.addf %12, %14 : vector<8x256xf32>
    %16 = vector.extract_strided_slice %15 {offsets = [0, 0], sizes = [8, 128], strides = [1, 1]} : vector<8x256xf32> to vector<8x128xf32>
    %17 = vector.extract_strided_slice %15 {offsets = [0, 128], sizes = [8, 128], strides = [1, 1]} : vector<8x256xf32> to vector<8x128xf32>
    %18 = arith.maximumf %16, %17 : vector<8x128xf32>
    %cst_12 = arith.constant 0.000000e+00 : f32
    %19 = vector.broadcast %cst_12 : f32 to vector<8x128xf32>
    %20 = arith.cmpf oge, %18, %19 : vector<8x128xf32>
    %cst_13 = arith.constant 2.500000e-01 : f32
    %21 = vector.broadcast %cst_13 : f32 to vector<8x128xf32>
    %22 = arith.mulf %21, %18 : vector<8x128xf32>
    %23 = arith.select %20, %18, %22 : vector<8x128xi1>, vector<8x128xf32>
    %c0_14 = arith.constant 0 : index
    %c0_15 = arith.constant 0 : index
    %24 = vector.load %arg6[%c0_14, %c0_15] : memref<128x3072xf32, #tpu.memory_space<vmem>>, vector<128x3072xf32>
    %cst_16 = arith.constant dense<0.000000e+00> : vector<8x3072xf32>
    %25 = tpu.matmul %23, %24, %cst_16 {dimension_numbers = #tpu.dot_dimension_numbers<[1], [0], [0], [1], [0, 0, 1, 1], [], []>} : vector<8x128xf32>, vector<128x3072xf32>, vector<8x3072xf32> -> vector<8x3072xf32>
    %c0_17 = arith.constant 0 : index
    %c0_18 = arith.constant 0 : index
    %26 = vector.load %arg7[%c0_17, %c0_18] : memref<128x512xf32, #tpu.memory_space<vmem>>, vector<128x512xf32>
    %c0_19 = arith.constant 0 : index
    %c0_20 = arith.constant 0 : index
    %27 = vector.load %arg8[%c0_19, %c0_20] : memref<1x512xf32, #tpu.memory_space<vmem>>, vector<1x512xf32>
    %cst_21 = arith.constant 0.000000e+00 : f32
    %28 = vector.broadcast %cst_21 : f32 to vector<8x128xf32>
    %cst_22 = arith.constant 0.000000e+00 : f32
    %29 = vector.broadcast %cst_22 : f32 to vector<8x128xf32>
    %cst_23 = arith.constant 0.000000e+00 : f32
    %30 = vector.broadcast %cst_23 : f32 to vector<8x128xf32>
    %31 = vector.extract_strided_slice %25 {offsets = [0, 0], sizes = [8, 512], strides = [1, 1]} : vector<8x3072xf32> to vector<8x512xf32>
    %cst_24 = arith.constant dense<0.000000e+00> : vector<8x512xf32>
    %32 = tpu.matmul %28, %26, %cst_24 {dimension_numbers = #tpu.dot_dimension_numbers<[1], [0], [0], [1], [0, 0, 1, 1], [], []>} : vector<8x128xf32>, vector<128x512xf32>, vector<8x512xf32> -> vector<8x512xf32>
    %33 = arith.addf %31, %32 : vector<8x512xf32>
    %34 = vector.broadcast %27 : vector<1x512xf32> to vector<8x512xf32>
    %35 = arith.addf %33, %34 : vector<8x512xf32>
    %36 = vector.extract_strided_slice %35 {offsets = [0, 0], sizes = [8, 384], strides = [1, 1]} : vector<8x512xf32> to vector<8x384xf32>
    %37 = arith.negf %36 : vector<8x384xf32>
    %38 = math.exp %37 : vector<8x384xf32>
    %cst_25 = arith.constant 1.000000e+00 : f32
    %39 = vector.broadcast %cst_25 : f32 to vector<8x384xf32>
    %40 = arith.addf %39, %38 : vector<8x384xf32>
    %41 = arith.divf %39, %40 : vector<8x384xf32>
    %42 = vector.extract_strided_slice %35 {offsets = [0, 384], sizes = [8, 128], strides = [1, 1]} : vector<8x512xf32> to vector<8x128xf32>
    %43 = math.tanh %42 : vector<8x128xf32>
    %44 = vector.extract_strided_slice %41 {offsets = [0, 128], sizes = [8, 128], strides = [1, 1]} : vector<8x384xf32> to vector<8x128xf32>
    %45 = arith.mulf %44, %29 : vector<8x128xf32>
    %46 = vector.extract_strided_slice %41 {offsets = [0, 0], sizes = [8, 128], strides = [1, 1]} : vector<8x384xf32> to vector<8x128xf32>
    %47 = arith.mulf %46, %43 : vector<8x128xf32>
    %48 = arith.addf %45, %47 : vector<8x128xf32>
    %49 = vector.extract_strided_slice %41 {offsets = [0, 256], sizes = [8, 128], strides = [1, 1]} : vector<8x384xf32> to vector<8x128xf32>
    %50 = math.tanh %48 : vector<8x128xf32>
    %51 = arith.mulf %49, %50 : vector<8x128xf32>
    %c0_26 = arith.constant 0 : index
    %c0_27 = arith.constant 0 : index
    %c0_28 = arith.constant 0 : index
    %52 = vector.load %arg9[%c0_26, %c0_27, %c0_28] : memref<6x128x128xf32, #tpu.memory_space<vmem>>, vector<1x128x128xf32>
    %53 = vector.shape_cast %52 : vector<1x128x128xf32> to vector<128x128xf32>
    %cst_29 = arith.constant dense<0.000000e+00> : vector<8x128xf32>
    %54 = tpu.matmul %51, %53, %cst_29 {dimension_numbers = #tpu.dot_dimension_numbers<[1], [0], [0], [1], [0, 0, 1, 1], [], []>} : vector<8x128xf32>, vector<128x128xf32>, vector<8x128xf32> -> vector<8x128xf32>
    %55 = arith.addf %30, %54 : vector<8x128xf32>
    %56 = vector.extract_strided_slice %25 {offsets = [0, 512], sizes = [8, 512], strides = [1, 1]} : vector<8x3072xf32> to vector<8x512xf32>
    %cst_30 = arith.constant dense<0.000000e+00> : vector<8x512xf32>
    %57 = tpu.matmul %51, %26, %cst_30 {dimension_numbers = #tpu.dot_dimension_numbers<[1], [0], [0], [1], [0, 0, 1, 1], [], []>} : vector<8x128xf32>, vector<128x512xf32>, vector<8x512xf32> -> vector<8x512xf32>
    %58 = arith.addf %56, %57 : vector<8x512xf32>
    %59 = vector.broadcast %27 : vector<1x512xf32> to vector<8x512xf32>
    %60 = arith.addf %58, %59 : vector<8x512xf32>
    %61 = vector.extract_strided_slice %60 {offsets = [0, 0], sizes = [8, 384], strides = [1, 1]} : vector<8x512xf32> to vector<8x384xf32>
    %62 = arith.negf %61 : vector<8x384xf32>
    %63 = math.exp %62 : vector<8x384xf32>
    %cst_31 = arith.constant 1.000000e+00 : f32
    %64 = vector.broadcast %cst_31 : f32 to vector<8x384xf32>
    %65 = arith.addf %64, %63 : vector<8x384xf32>
    %66 = arith.divf %64, %65 : vector<8x384xf32>
    %67 = vector.extract_strided_slice %60 {offsets = [0, 384], sizes = [8, 128], strides = [1, 1]} : vector<8x512xf32> to vector<8x128xf32>
    %68 = math.tanh %67 : vector<8x128xf32>
    %69 = vector.extract_strided_slice %66 {offsets = [0, 128], sizes = [8, 128], strides = [1, 1]} : vector<8x384xf32> to vector<8x128xf32>
    %70 = arith.mulf %69, %48 : vector<8x128xf32>
    %71 = vector.extract_strided_slice %66 {offsets = [0, 0], sizes = [8, 128], strides = [1, 1]} : vector<8x384xf32> to vector<8x128xf32>
    %72 = arith.mulf %71, %68 : vector<8x128xf32>
    %73 = arith.addf %70, %72 : vector<8x128xf32>
    %74 = vector.extract_strided_slice %66 {offsets = [0, 256], sizes = [8, 128], strides = [1, 1]} : vector<8x384xf32> to vector<8x128xf32>
    %75 = math.tanh %73 : vector<8x128xf32>
    %76 = arith.mulf %74, %75 : vector<8x128xf32>
    %c1 = arith.constant 1 : index
    %c0_32 = arith.constant 0 : index
    %c0_33 = arith.constant 0 : index
    %77 = vector.load %arg9[%c1, %c0_32, %c0_33] : memref<6x128x128xf32, #tpu.memory_space<vmem>>, vector<1x128x128xf32>
    %78 = vector.shape_cast %77 : vector<1x128x128xf32> to vector<128x128xf32>
    %cst_34 = arith.constant dense<0.000000e+00> : vector<8x128xf32>
    %79 = tpu.matmul %76, %78, %cst_34 {dimension_numbers = #tpu.dot_dimension_numbers<[1], [0], [0], [1], [0, 0, 1, 1], [], []>} : vector<8x128xf32>, vector<128x128xf32>, vector<8x128xf32> -> vector<8x128xf32>
    %80 = arith.addf %55, %79 : vector<8x128xf32>
    %81 = vector.extract_strided_slice %25 {offsets = [0, 1024], sizes = [8, 512], strides = [1, 1]} : vector<8x3072xf32> to vector<8x512xf32>
    %cst_35 = arith.constant dense<0.000000e+00> : vector<8x512xf32>
    %82 = tpu.matmul %76, %26, %cst_35 {dimension_numbers = #tpu.dot_dimension_numbers<[1], [0], [0], [1], [0, 0, 1, 1], [], []>} : vector<8x128xf32>, vector<128x512xf32>, vector<8x512xf32> -> vector<8x512xf32>
    %83 = arith.addf %81, %82 : vector<8x512xf32>
    %84 = vector.broadcast %27 : vector<1x512xf32> to vector<8x512xf32>
    %85 = arith.addf %83, %84 : vector<8x512xf32>
    %86 = vector.extract_strided_slice %85 {offsets = [0, 0], sizes = [8, 384], strides = [1, 1]} : vector<8x512xf32> to vector<8x384xf32>
    %87 = arith.negf %86 : vector<8x384xf32>
    %88 = math.exp %87 : vector<8x384xf32>
    %cst_36 = arith.constant 1.000000e+00 : f32
    %89 = vector.broadcast %cst_36 : f32 to vector<8x384xf32>
    %90 = arith.addf %89, %88 : vector<8x384xf32>
    %91 = arith.divf %89, %90 : vector<8x384xf32>
    %92 = vector.extract_strided_slice %85 {offsets = [0, 384], sizes = [8, 128], strides = [1, 1]} : vector<8x512xf32> to vector<8x128xf32>
    %93 = math.tanh %92 : vector<8x128xf32>
    %94 = vector.extract_strided_slice %91 {offsets = [0, 128], sizes = [8, 128], strides = [1, 1]} : vector<8x384xf32> to vector<8x128xf32>
    %95 = arith.mulf %94, %73 : vector<8x128xf32>
    %96 = vector.extract_strided_slice %91 {offsets = [0, 0], sizes = [8, 128], strides = [1, 1]} : vector<8x384xf32> to vector<8x128xf32>
    %97 = arith.mulf %96, %93 : vector<8x128xf32>
    %98 = arith.addf %95, %97 : vector<8x128xf32>
    %99 = vector.extract_strided_slice %91 {offsets = [0, 256], sizes = [8, 128], strides = [1, 1]} : vector<8x384xf32> to vector<8x128xf32>
    %100 = math.tanh %98 : vector<8x128xf32>
    %101 = arith.mulf %99, %100 : vector<8x128xf32>
    %c2 = arith.constant 2 : index
    %c0_37 = arith.constant 0 : index
    %c0_38 = arith.constant 0 : index
    %102 = vector.load %arg9[%c2, %c0_37, %c0_38] : memref<6x128x128xf32, #tpu.memory_space<vmem>>, vector<1x128x128xf32>
    %103 = vector.shape_cast %102 : vector<1x128x128xf32> to vector<128x128xf32>
    %cst_39 = arith.constant dense<0.000000e+00> : vector<8x128xf32>
    %104 = tpu.matmul %101, %103, %cst_39 {dimension_numbers = #tpu.dot_dimension_numbers<[1], [0], [0], [1], [0, 0, 1, 1], [], []>} : vector<8x128xf32>, vector<128x128xf32>, vector<8x128xf32> -> vector<8x128xf32>
    %105 = arith.addf %80, %104 : vector<8x128xf32>
    %106 = vector.extract_strided_slice %25 {offsets = [0, 1536], sizes = [8, 512], strides = [1, 1]} : vector<8x3072xf32> to vector<8x512xf32>
    %cst_40 = arith.constant dense<0.000000e+00> : vector<8x512xf32>
    %107 = tpu.matmul %101, %26, %cst_40 {dimension_numbers = #tpu.dot_dimension_numbers<[1], [0], [0], [1], [0, 0, 1, 1], [], []>} : vector<8x128xf32>, vector<128x512xf32>, vector<8x512xf32> -> vector<8x512xf32>
    %108 = arith.addf %106, %107 : vector<8x512xf32>
    %109 = vector.broadcast %27 : vector<1x512xf32> to vector<8x512xf32>
    %110 = arith.addf %108, %109 : vector<8x512xf32>
    %111 = vector.extract_strided_slice %110 {offsets = [0, 0], sizes = [8, 384], strides = [1, 1]} : vector<8x512xf32> to vector<8x384xf32>
    %112 = arith.negf %111 : vector<8x384xf32>
    %113 = math.exp %112 : vector<8x384xf32>
    %cst_41 = arith.constant 1.000000e+00 : f32
    %114 = vector.broadcast %cst_41 : f32 to vector<8x384xf32>
    %115 = arith.addf %114, %113 : vector<8x384xf32>
    %116 = arith.divf %114, %115 : vector<8x384xf32>
    %117 = vector.extract_strided_slice %110 {offsets = [0, 384], sizes = [8, 128], strides = [1, 1]} : vector<8x512xf32> to vector<8x128xf32>
    %118 = math.tanh %117 : vector<8x128xf32>
    %119 = vector.extract_strided_slice %116 {offsets = [0, 128], sizes = [8, 128], strides = [1, 1]} : vector<8x384xf32> to vector<8x128xf32>
    %120 = arith.mulf %119, %98 : vector<8x128xf32>
    %121 = vector.extract_strided_slice %116 {offsets = [0, 0], sizes = [8, 128], strides = [1, 1]} : vector<8x384xf32> to vector<8x128xf32>
    %122 = arith.mulf %121, %118 : vector<8x128xf32>
    %123 = arith.addf %120, %122 : vector<8x128xf32>
    %124 = vector.extract_strided_slice %116 {offsets = [0, 256], sizes = [8, 128], strides = [1, 1]} : vector<8x384xf32> to vector<8x128xf32>
    %125 = math.tanh %123 : vector<8x128xf32>
    %126 = arith.mulf %124, %125 : vector<8x128xf32>
    %c3 = arith.constant 3 : index
    %c0_42 = arith.constant 0 : index
    %c0_43 = arith.constant 0 : index
    %127 = vector.load %arg9[%c3, %c0_42, %c0_43] : memref<6x128x128xf32, #tpu.memory_space<vmem>>, vector<1x128x128xf32>
    %128 = vector.shape_cast %127 : vector<1x128x128xf32> to vector<128x128xf32>
    %cst_44 = arith.constant dense<0.000000e+00> : vector<8x128xf32>
    %129 = tpu.matmul %126, %128, %cst_44 {dimension_numbers = #tpu.dot_dimension_numbers<[1], [0], [0], [1], [0, 0, 1, 1], [], []>} : vector<8x128xf32>, vector<128x128xf32>, vector<8x128xf32> -> vector<8x128xf32>
    %130 = arith.addf %105, %129 : vector<8x128xf32>
    %131 = vector.extract_strided_slice %25 {offsets = [0, 2048], sizes = [8, 512], strides = [1, 1]} : vector<8x3072xf32> to vector<8x512xf32>
    %cst_45 = arith.constant dense<0.000000e+00> : vector<8x512xf32>
    %132 = tpu.matmul %126, %26, %cst_45 {dimension_numbers = #tpu.dot_dimension_numbers<[1], [0], [0], [1], [0, 0, 1, 1], [], []>} : vector<8x128xf32>, vector<128x512xf32>, vector<8x512xf32> -> vector<8x512xf32>
    %133 = arith.addf %131, %132 : vector<8x512xf32>
    %134 = vector.broadcast %27 : vector<1x512xf32> to vector<8x512xf32>
    %135 = arith.addf %133, %134 : vector<8x512xf32>
    %136 = vector.extract_strided_slice %135 {offsets = [0, 0], sizes = [8, 384], strides = [1, 1]} : vector<8x512xf32> to vector<8x384xf32>
    %137 = arith.negf %136 : vector<8x384xf32>
    %138 = math.exp %137 : vector<8x384xf32>
    %cst_46 = arith.constant 1.000000e+00 : f32
    %139 = vector.broadcast %cst_46 : f32 to vector<8x384xf32>
    %140 = arith.addf %139, %138 : vector<8x384xf32>
    %141 = arith.divf %139, %140 : vector<8x384xf32>
    %142 = vector.extract_strided_slice %135 {offsets = [0, 384], sizes = [8, 128], strides = [1, 1]} : vector<8x512xf32> to vector<8x128xf32>
    %143 = math.tanh %142 : vector<8x128xf32>
    %144 = vector.extract_strided_slice %141 {offsets = [0, 128], sizes = [8, 128], strides = [1, 1]} : vector<8x384xf32> to vector<8x128xf32>
    %145 = arith.mulf %144, %123 : vector<8x128xf32>
    %146 = vector.extract_strided_slice %141 {offsets = [0, 0], sizes = [8, 128], strides = [1, 1]} : vector<8x384xf32> to vector<8x128xf32>
    %147 = arith.mulf %146, %143 : vector<8x128xf32>
    %148 = arith.addf %145, %147 : vector<8x128xf32>
    %149 = vector.extract_strided_slice %141 {offsets = [0, 256], sizes = [8, 128], strides = [1, 1]} : vector<8x384xf32> to vector<8x128xf32>
    %150 = math.tanh %148 : vector<8x128xf32>
    %151 = arith.mulf %149, %150 : vector<8x128xf32>
    %c4 = arith.constant 4 : index
    %c0_47 = arith.constant 0 : index
    %c0_48 = arith.constant 0 : index
    %152 = vector.load %arg9[%c4, %c0_47, %c0_48] : memref<6x128x128xf32, #tpu.memory_space<vmem>>, vector<1x128x128xf32>
    %153 = vector.shape_cast %152 : vector<1x128x128xf32> to vector<128x128xf32>
    %cst_49 = arith.constant dense<0.000000e+00> : vector<8x128xf32>
    %154 = tpu.matmul %151, %153, %cst_49 {dimension_numbers = #tpu.dot_dimension_numbers<[1], [0], [0], [1], [0, 0, 1, 1], [], []>} : vector<8x128xf32>, vector<128x128xf32>, vector<8x128xf32> -> vector<8x128xf32>
    %155 = arith.addf %130, %154 : vector<8x128xf32>
    %156 = vector.extract_strided_slice %25 {offsets = [0, 2560], sizes = [8, 512], strides = [1, 1]} : vector<8x3072xf32> to vector<8x512xf32>
    %cst_50 = arith.constant dense<0.000000e+00> : vector<8x512xf32>
    %157 = tpu.matmul %151, %26, %cst_50 {dimension_numbers = #tpu.dot_dimension_numbers<[1], [0], [0], [1], [0, 0, 1, 1], [], []>} : vector<8x128xf32>, vector<128x512xf32>, vector<8x512xf32> -> vector<8x512xf32>
    %158 = arith.addf %156, %157 : vector<8x512xf32>
    %159 = vector.broadcast %27 : vector<1x512xf32> to vector<8x512xf32>
    %160 = arith.addf %158, %159 : vector<8x512xf32>
    %161 = vector.extract_strided_slice %160 {offsets = [0, 0], sizes = [8, 384], strides = [1, 1]} : vector<8x512xf32> to vector<8x384xf32>
    %162 = arith.negf %161 : vector<8x384xf32>
    %163 = math.exp %162 : vector<8x384xf32>
    %cst_51 = arith.constant 1.000000e+00 : f32
    %164 = vector.broadcast %cst_51 : f32 to vector<8x384xf32>
    %165 = arith.addf %164, %163 : vector<8x384xf32>
    %166 = arith.divf %164, %165 : vector<8x384xf32>
    %167 = vector.extract_strided_slice %160 {offsets = [0, 384], sizes = [8, 128], strides = [1, 1]} : vector<8x512xf32> to vector<8x128xf32>
    %168 = math.tanh %167 : vector<8x128xf32>
    %169 = vector.extract_strided_slice %166 {offsets = [0, 128], sizes = [8, 128], strides = [1, 1]} : vector<8x384xf32> to vector<8x128xf32>
    %170 = arith.mulf %169, %148 : vector<8x128xf32>
    %171 = vector.extract_strided_slice %166 {offsets = [0, 0], sizes = [8, 128], strides = [1, 1]} : vector<8x384xf32> to vector<8x128xf32>
    %172 = arith.mulf %171, %168 : vector<8x128xf32>
    %173 = arith.addf %170, %172 : vector<8x128xf32>
    %174 = vector.extract_strided_slice %166 {offsets = [0, 256], sizes = [8, 128], strides = [1, 1]} : vector<8x384xf32> to vector<8x128xf32>
    %175 = math.tanh %173 : vector<8x128xf32>
    %176 = arith.mulf %174, %175 : vector<8x128xf32>
    %c5 = arith.constant 5 : index
    %c0_52 = arith.constant 0 : index
    %c0_53 = arith.constant 0 : index
    %177 = vector.load %arg9[%c5, %c0_52, %c0_53] : memref<6x128x128xf32, #tpu.memory_space<vmem>>, vector<1x128x128xf32>
    %178 = vector.shape_cast %177 : vector<1x128x128xf32> to vector<128x128xf32>
    %cst_54 = arith.constant dense<0.000000e+00> : vector<8x128xf32>
    %179 = tpu.matmul %176, %178, %cst_54 {dimension_numbers = #tpu.dot_dimension_numbers<[1], [0], [0], [1], [0, 0, 1, 1], [], []>} : vector<8x128xf32>, vector<128x128xf32>, vector<8x128xf32> -> vector<8x128xf32>
    %180 = arith.addf %155, %179 : vector<8x128xf32>
    %c0_55 = arith.constant 0 : index
    %c0_56 = arith.constant 0 : index
    %181 = vector.load %arg10[%c0_55, %c0_56] : memref<1x128xf32, #tpu.memory_space<vmem>>, vector<1x128xf32>
    %182 = vector.broadcast %181 : vector<1x128xf32> to vector<8x128xf32>
    %183 = arith.addf %180, %182 : vector<8x128xf32>
    %cst_57 = arith.constant 0.000000e+00 : f32
    %184 = vector.broadcast %cst_57 : f32 to vector<8x128xf32>
    %185 = arith.cmpf oge, %183, %184 : vector<8x128xf32>
    %cst_58 = arith.constant 2.500000e-01 : f32
    %186 = vector.broadcast %cst_58 : f32 to vector<8x128xf32>
    %187 = arith.mulf %186, %183 : vector<8x128xf32>
    %188 = arith.select %185, %183, %187 : vector<8x128xi1>, vector<8x128xf32>
    %c0_59 = arith.constant 0 : index
    %c0_60 = arith.constant 0 : index
    %189 = vector.load %arg11[%c0_59, %c0_60] : memref<128x128xf32, #tpu.memory_space<vmem>>, vector<128x128xf32>
    %cst_61 = arith.constant dense<0.000000e+00> : vector<8x128xf32>
    %190 = tpu.matmul %188, %189, %cst_61 {dimension_numbers = #tpu.dot_dimension_numbers<[1], [0], [0], [1], [0, 0, 1, 1], [], []>} : vector<8x128xf32>, vector<128x128xf32>, vector<8x128xf32> -> vector<8x128xf32>
    %c0_62 = arith.constant 0 : index
    %c0_63 = arith.constant 0 : index
    %191 = vector.load %arg12[%c0_62, %c0_63] : memref<1x128xf32, #tpu.memory_space<vmem>>, vector<1x128xf32>
    %192 = vector.broadcast %191 : vector<1x128xf32> to vector<8x128xf32>
    %193 = arith.addf %190, %192 : vector<8x128xf32>
    %c0_64 = arith.constant 0 : index
    %c0_65 = arith.constant 0 : index
    %194 = vector.load %arg13[%c0_64, %c0_65] : memref<8x128xf32, #tpu.memory_space<vmem>>, vector<8x128xf32>
    tpu.vector_store %arg13[%c0_64, %c0_65], %193 {strides = array<i32>} : memref<8x128xf32, #tpu.memory_space<vmem>>, vector<8x128xf32>,
    return
  }
  func.func @transform_0(%arg0: i32) -> (i32, i32) {
    %c0_i32 = arith.constant 0 : i32
    %c0_i32_0 = arith.constant 0 : i32
    return %arg0, %c0_i32 : i32, i32
  }
  func.func @transform_1(%arg0: i32) -> (i32, i32) {
    %c0_i32 = arith.constant 0 : i32
    %c0_i32_0 = arith.constant 0 : i32
    %c0_i32_1 = arith.constant 0 : i32
    return %c0_i32, %c0_i32_0 : i32, i32
  }
  func.func @transform_2(%arg0: i32) -> (i32, i32) {
    %c0_i32 = arith.constant 0 : i32
    %c0_i32_0 = arith.constant 0 : i32
    %c0_i32_1 = arith.constant 0 : i32
    return %c0_i32, %c0_i32_0 : i32, i32
  }
  func.func @transform_3(%arg0: i32) -> (i32, i32) {
    %c0_i32 = arith.constant 0 : i32
    %c0_i32_0 = arith.constant 0 : i32
    %c0_i32_1 = arith.constant 0 : i32
    return %c0_i32, %c0_i32_0 : i32, i32
  }
  func.func @transform_4(%arg0: i32) -> (i32, i32) {
    %c0_i32 = arith.constant 0 : i32
    %c0_i32_0 = arith.constant 0 : i32
    %c0_i32_1 = arith.constant 0 : i32
    return %c0_i32, %c0_i32_0 : i32, i32
  }
  func.func @transform_5(%arg0: i32) -> (i32, i32) {
    %c0_i32 = arith.constant 0 : i32
    %c0_i32_0 = arith.constant 0 : i32
    %c0_i32_1 = arith.constant 0 : i32
    return %c0_i32, %c0_i32_0 : i32, i32
  }
  func.func @transform_6(%arg0: i32) -> (i32, i32) {
    %c0_i32 = arith.constant 0 : i32
    %c0_i32_0 = arith.constant 0 : i32
    %c0_i32_1 = arith.constant 0 : i32
    return %c0_i32, %c0_i32_0 : i32, i32
  }
  func.func @transform_7(%arg0: i32) -> (i32, i32) {
    %c0_i32 = arith.constant 0 : i32
    %c0_i32_0 = arith.constant 0 : i32
    %c0_i32_1 = arith.constant 0 : i32
    return %c0_i32, %c0_i32_0 : i32, i32
  }
  func.func @transform_8(%arg0: i32) -> (i32, i32, i32) {
    %c0_i32 = arith.constant 0 : i32
    %c0_i32_0 = arith.constant 0 : i32
    %c0_i32_1 = arith.constant 0 : i32
    %c0_i32_2 = arith.constant 0 : i32
    return %c0_i32, %c0_i32_0, %c0_i32_1 : i32, i32, i32
  }
  func.func @transform_9(%arg0: i32) -> (i32, i32) {
    %c0_i32 = arith.constant 0 : i32
    %c0_i32_0 = arith.constant 0 : i32
    %c0_i32_1 = arith.constant 0 : i32
    return %c0_i32, %c0_i32_0 : i32, i32
  }
  func.func @transform_10(%arg0: i32) -> (i32, i32) {
    %c0_i32 = arith.constant 0 : i32
    %c0_i32_0 = arith.constant 0 : i32
    %c0_i32_1 = arith.constant 0 : i32
    return %c0_i32, %c0_i32_0 : i32, i32
  }
  func.func @transform_11(%arg0: i32) -> (i32, i32) {
    %c0_i32 = arith.constant 0 : i32
    %c0_i32_0 = arith.constant 0 : i32
    %c0_i32_1 = arith.constant 0 : i32
    return %c0_i32, %c0_i32_0 : i32, i32
  }
  func.func @transform_12(%arg0: i32) -> (i32, i32) {
    %c0_i32 = arith.constant 0 : i32
    %c0_i32_0 = arith.constant 0 : i32
    return %arg0, %c0_i32 : i32, i32
  }
}

</mosaic_0001>

<bundles_post_ra>
// kernel: discriminator_forward.1
= control target key start
LH: loop header
LB: loop body
LE: loop exit
PB: predicated region body
PF: predicated region fallthrough
CT: control target
= control target key end

     0   :  { %17 = vsyncpa [#allocation3], 0  ;;  %s6816_s0 = inlined_call_operand.vmem [shape: f32[8,480], index: 0, kind: input, shape index: {}]   ;;  %s6817_s1 = inlined_call_operand.hbm [shape: f32[480,960], index: 1, kind: input, shape index: {}]   ;;  %s6818_s2 = inlined_call_operand.hbm [shape: f32[1,960], index: 2, kind: input, shape index: {}]   ;;  %s6819_s3 = inlined_call_operand.hbm [shape: f32[960,256], index: 3, kind: input, shape index: {}]   ;;  %s6820_s4 = inlined_call_operand.hbm [shape: f32[1,256], index: 4, kind: input, shape index: {}]   ;;  %s6821_s5 = inlined_call_operand.hbm [shape: f32[128,3072], index: 5, kind: input, shape index: {}]   ;;  %s6822_s6 = inlined_call_operand.hbm [shape: f32[128,512], index: 6, kind: input, shape index: {}]   ;;  %s6823_s7 = inlined_call_operand.hbm [shape: f32[1,512], index: 7, kind: input, shape index: {}]   ;;  %s6824_s8 = inlined_call_operand.hbm [shape: f32[6,128,128], index: 8, kind: input, shape index: {}]   ;;  %s6825_s9 = inlined_call_operand.hbm [shape: f32[1,128], index: 9, kind: input, shape index: {}]   ;;  %s6826_s10 = inlined_call_operand.hbm [shape: f32[128,128], index: 10, kind: input, shape index: {}]   ;;  %s6827_s11 = inlined_call_operand.hbm [shape: f32[1,128], index: 11, kind: input, shape index: {}]   ;;  %s6828_s12 = inlined_call_operand.vmem [shape: f32[8,128], index: 12, kind: output, shape index: {}]  }
   0x1   :  { %18 = vsyncpa [#allocation5], 0 }
   0x2   :  { %19 = vsyncpa [#allocation8], 0 }
   0x3   :  { %20 = vsyncpa [#allocation11], 0 }
   0x4   :  { %21 = vsyncpa [#allocation14], 0 }
   0x5   :  { %22 = vsyncpa [#allocation17], 0  ;;  %s5660_s21 = smov [#allocation4]   ;;  %s5661_s23 = smov [#allocation7]  }
   0x6   :  { %s43_s22 = sshll.u32 %s5660_s21, 4  ;;  %s65_s24 = sshll.u32 %s5661_s23, 4  ;;  %s44_s22 = int_to_ptr.vmem [resolvable:$true] %s43_s22  ;;  %s66_s24 = int_to_ptr.vmem [resolvable:$true] %s65_s24 }
   0x7   :  { %s5436_s25 = scalar_lea.vmem %s44_s22, 128  ;;  %p5441_p1 = scmp.lt.s32.totalorder %s44_s22, %s44_s22 }
   0x8   :  { %p5437_p0 = scmp.ne.s32.totalorder %s44_s22, %s5436_s25  ;;  %p5442_p2 = scmp.lt.s32.totalorder %s5436_s25, %s5436_s25 }
   0xa   :  { %p5443_p3 = por %p5442_p2, %p5441_p1 }
   0xc   :  { %p5444_p4 = pnand %p5443_p3, %p5437_p0 }
   0xe   :  { %5447 = shalt.err (!%p5444_p4)
}
   0xf   :  { %46 = dma.hbm_to_vmem [thread:$0]  %s6818_s2, 128, %s44_s22, [#allocation5]  }
  0x10   :  { %s5456_s28 = scalar_lea.vmem %s66_s24, 32  ;;  %p5461_p6 = scmp.lt.s32.totalorder %s66_s24, %s66_s24 }
  0x11   :  { %p5457_p5 = scmp.ne.s32.totalorder %s66_s24, %s5456_s28  ;;  %p5462_p7 = scmp.lt.s32.totalorder %s5456_s28, %s5456_s28 }
  0x13   :  { %p5463_p8 = por %p5462_p7, %p5461_p6 }
  0x15   :  { %p5464_p9 = pnand %p5463_p8, %p5457_p5 }
  0x17   :  { %5467 = shalt.err (!%p5464_p9)
}
  0x18   :  { %68 = dma.hbm_to_vmem [thread:$0]  %s6820_s4, 32, %s66_s24, [#allocation8]  }
  0x19   :  { %s5662_s13 = smov [#allocation10]  }
  0x1a   :  { %s86_s14 = sshll.u32 %s5662_s13, 4  ;;  %s87_s14 = int_to_ptr.vmem [resolvable:$true] %s86_s14 }
  0x1b   :  { %s5476_s15 = scalar_lea.vmem %s87_s14, 8192  ;;  %p5481_p11 = scmp.lt.s32.totalorder %s87_s14, %s87_s14 }
  0x1c   :  { %p5477_p10 = scmp.ne.s32.totalorder %s87_s14, %s5476_s15  ;;  %p5482_p12 = scmp.lt.s32.totalorder %s5476_s15, %s5476_s15 }
  0x1e   :  { %p5483_p13 = por %p5482_p12, %p5481_p11 }
  0x20   :  { %p5484_p0 = pnand %p5483_p13, %p5477_p10 }
  0x22   :  { %5487 = shalt.err (!%p5484_p0)
}
  0x23   :  { %s5663_s2 = smov 512   ;;  %s5664_s16 = smov 32  }
  0x24   :  { %92 = dma.hbm_to_vmem [thread:$0]  %s6822_s6, 8192, %s87_s14, [#allocation11], %s5663_s2, %s5663_s2, %s5664_s16  }
  0x25   :  { %s5665_s19 = smov [#allocation13]  }
  0x26   :  { %s108_s20 = sshll.u32 %s5665_s19, 4  ;;  %s109_s20 = int_to_ptr.vmem [resolvable:$true] %s108_s20 }
  0x27   :  { %s5496_s4 = scalar_lea.vmem %s109_s20, 12288  ;;  %p5501_p2 = scmp.lt.s32.totalorder %s109_s20, %s109_s20 }
  0x28   :  { %p5497_p1 = scmp.ne.s32.totalorder %s109_s20, %s5496_s4  ;;  %p5502_p3 = scmp.lt.s32.totalorder %s5496_s4, %s5496_s4 }
  0x2a   :  { %p5503_p4 = por %p5502_p3, %p5501_p2 }
  0x2c   :  { %p5504_p5 = pnand %p5503_p4, %p5497_p1 }
  0x2e   :  { %5507 = shalt.err (!%p5504_p5)
}
  0x2f   :  { %s5666_s21 = smov 128   ;;  %s5667_s22 = smov 8  }
  0x30   :  { %114 = dma.hbm_to_vmem [thread:$0]  %s6824_s8, 12288, %s109_s20, [#allocation14], %s5666_s21, %s5666_s21, %s5667_s22  }
  0x31   :  { %s5668_s25 = smov [#allocation16]   ;;  %s5669_s27 = smov [#allocation2]  }
  0x32   :  { %s130_s26 = sshll.u32 %s5668_s25, 4  ;;  %s30_s6 = sshll.u32 %s5669_s27, 4  ;;  %s131_s26 = int_to_ptr.vmem [resolvable:$true] %s130_s26  ;;  %s31_s6 = int_to_ptr.vmem [resolvable:$true] %s30_s6 }
  0x33   :  { %s5516_s28 = scalar_lea.vmem %s131_s26, 2048  ;;  %p5521_p7 = scmp.lt.s32.totalorder %s131_s26, %s131_s26 }
  0x34   :  { %p5517_p6 = scmp.ne.s32.totalorder %s131_s26, %s5516_s28  ;;  %p5522_p8 = scmp.lt.s32.totalorder %s5516_s28, %s5516_s28 }
  0x36   :  { %p5523_p9 = por %p5522_p8, %p5521_p7 }
  0x38   :  { %p5524_p10 = pnand %p5523_p9, %p5517_p6 }
  0x3a   :  { %5527 = shalt.err (!%p5524_p10)
}
  0x3b   :  { %136 = dma.hbm_to_vmem [thread:$0]  %s6826_s10, 2048, %s131_s26, [#allocation17], %s5666_s21, %s5666_s21, %s5667_s22  }
  0x3c   :  { %s5536_s13 = scalar_lea.vmem %s31_s6, 61440  ;;  %p5541_p12 = scmp.lt.s32.totalorder %s31_s6, %s31_s6 }
  0x3d   :  { %p5537_p11 = scmp.ne.s32.totalorder %s31_s6, %s5536_s13  ;;  %p5542_p13 = scmp.lt.s32.totalorder %s5536_s13, %s5536_s13 }
  0x3f   :  { %p5543_p0 = por %p5542_p13, %p5541_p12 }
  0x41   :  { %p5544_p1 = pnand %p5543_p0, %p5537_p11 }
  0x43   :  { %5547 = shalt.err (!%p5544_p1)
}
  0x44   :  { %s5670_s8 = smov 1024   ;;  %s5671_s14 = smov 64  }
  0x45   :  { %36 = dma.hbm_to_vmem [thread:$0]  %s6817_s1, 61440, %s31_s6, [#allocation3], %s5670_s8, %s5670_s8, %s5671_s14  }
  0x46   :  { %s5672_s16 = smov [#allocation6]  }
  0x47   :  { %s52_s17 = sshll.u32 %s5672_s16, 4  ;;  %s53_s17 = int_to_ptr.vmem [resolvable:$true] %s52_s17 }
  0x48   :  { %s5556_s18 = scalar_lea.vmem %s53_s17, 30720  ;;  %p5561_p3 = scmp.lt.s32.totalorder %s53_s17, %s53_s17 }
  0x49   :  { %p5557_p2 = scmp.ne.s32.totalorder %s53_s17, %s5556_s18  ;;  %p5562_p4 = scmp.lt.s32.totalorder %s5556_s18, %s5556_s18 }
  0x4b   :  { %p5563_p5 = por %p5562_p4, %p5561_p3 }
  0x4d   :  { %p5564_p6 = pnand %p5563_p5, %p5557_p2 }
  0x4f   :  { %5567 = shalt.err (!%p5564_p6)
}
  0x50   :  { %s5673_s10 = smov 256   ;;  %s5674_s19 = smov 16  }
  0x51   :  { %58 = dma.hbm_to_vmem [thread:$0]  %s6819_s3, 30720, %s53_s17, [#allocation5], %s5673_s10, %s5673_s10, %s5674_s19  }
  0x52   :  { %s5675_s21 = smov [#allocation9]  }
  0x53   :  { %s74_s22 = sshll.u32 %s5675_s21, 4  ;;  %s75_s22 = int_to_ptr.vmem [resolvable:$true] %s74_s22 }
  0x54   :  { %s5576_s1 = scalar_lea.vmem %s75_s22, 49152  ;;  %p5581_p8 = scmp.lt.s32.totalorder %s75_s22, %s75_s22 }
  0x55   :  { %p5577_p7 = scmp.ne.s32.totalorder %s75_s22, %s5576_s1  ;;  %p5582_p9 = scmp.lt.s32.totalorder %s5576_s1, %s5576_s1 }
  0x57   :  { %p5583_p10 = por %p5582_p9, %p5581_p8 }
  0x59   :  { %p5584_p11 = pnand %p5583_p10, %p5577_p7 }
  0x5b   :  { %5587 = shalt.err (!%p5584_p11)
}
  0x5c   :  { %s5676_s23 = smov 3072   ;;  %s5677_s24 = smov 192  }
  0x5d   :  { %80 = dma.hbm_to_vmem [thread:$0]  %s6821_s5, 49152, %s75_s22, [#allocation8], %s5676_s23, %s5676_s23, %s5677_s24  }
  0x5e   :  { %s5678_s27 = smov [#allocation12]   ;;  %s5679_s28 = smov [#allocation15]  }
  0x5f   :  { %s99_s6 = sshll.u32 %s5678_s27, 4  ;;  %s121_s3 = sshll.u32 %s5679_s28, 4  ;;  %s100_s6 = int_to_ptr.vmem [resolvable:$true] %s99_s6  ;;  %s122_s3 = int_to_ptr.vmem [resolvable:$true] %s121_s3 }
  0x60   :  { %s5596_s29 = scalar_lea.vmem %s100_s6, 64  ;;  %p5601_p13 = scmp.lt.s32.totalorder %s100_s6, %s100_s6 }
  0x61   :  { %p5597_p12 = scmp.ne.s32.totalorder %s100_s6, %s5596_s29  ;;  %p5602_p0 = scmp.lt.s32.totalorder %s5596_s29, %s5596_s29 }
  0x63   :  { %p5603_p1 = por %p5602_p0, %p5601_p13 }
  0x65   :  { %p5604_p2 = pnand %p5603_p1, %p5597_p12 }
  0x67   :  { %5607 = shalt.err (!%p5604_p2)
}
  0x68   :  { %102 = dma.hbm_to_vmem [thread:$0]  %s6823_s7, 64, %s100_s6, [#allocation11]  }
  0x69   :  { %s5616_s8 = scalar_lea.vmem %s122_s3, 16  ;;  %s5620_s5 = scalar_lea.vmem %s122_s3, 32 }
  0x6a   :  { %p5617_p3 = scmp.ne.s32.totalorder %s122_s3, %s5616_s8  ;;  %p5621_p4 = scmp.lt.s32.totalorder %s122_s3, %s122_s3 }
  0x6b   :  { %p5622_p5 = scmp.lt.s32.totalorder %s5620_s5, %s5616_s8 }
  0x6d   :  { %p5623_p6 = por %p5622_p5, %p5621_p4 }
  0x6f   :  { %p5624_p7 = pnand %p5623_p6, %p5617_p3 }
  0x71   :  { %5627 = shalt.err (!%p5624_p7)
}
  0x72   :  { %124 = dma.hbm_to_vmem [thread:$0]  %s6825_s9, 16, %s122_s3, [#allocation14]  }
  0x73   :  { %s5680_s2 = smov [#allocation18]  }
  0x74   :  { %s143_s16 = sshll.u32 %s5680_s2, 4  ;;  %s144_s16 = int_to_ptr.vmem [resolvable:$true] %s143_s16 }
  0x75   :  { %s5636_s17 = scalar_lea.vmem %s144_s16, 16  ;;  %s5640_s18 = scalar_lea.vmem %s144_s16, 32 }
  0x76   :  { %p5637_p8 = scmp.ne.s32.totalorder %s144_s16, %s5636_s17  ;;  %p5641_p9 = scmp.lt.s32.totalorder %s144_s16, %s144_s16 }
  0x77   :  { %p5642_p10 = scmp.lt.s32.totalorder %s5640_s18, %s5636_s17 }
  0x79   :  { %p5643_p11 = por %p5642_p10, %p5641_p9 }
  0x7b   :  { %p5644_p12 = pnand %p5643_p11, %p5637_p8 }
  0x7d   :  { %5647 = shalt.err (!%p5644_p12)
}
  0x7e   :  { %146 = dma.hbm_to_vmem [thread:$0]  %s6827_s11, 16, %s144_s16, [#allocation17]  }
  0x7f   :  { %5648 = dma.done.wait [#allocation3], 61440  }
  0x80   :  { %5649 = vsyncadd [#allocation3], 4294905856 }
  0x81   :  { %5650 = dma.done.wait [#allocation5], 30848  }
  0x82   :  { %5651 = vsyncadd [#allocation5], 4294936448 }
  0x83   :  { %5652 = dma.done.wait [#allocation8], 49184  }
  0x84   :  { %5653 = vsyncadd [#allocation8], 4294918112 }
  0x85   :  { %5654 = dma.done.wait [#allocation11], 8256  }
  0x86   :  { %5655 = vsyncadd [#allocation11], 4294959040 }
  0x87   :  { %5656 = dma.done.wait [#allocation14], 12304  }
  0x88   :  { %5657 = vsyncadd [#allocation14], 4294954992 }
  0x89   :  { %5658 = dma.done.wait [#allocation17], 2064  }
  0x8a   :  { %5659 = vsyncadd [#allocation17], 4294965232  ;;  %v305_v0 = vld [vmem:[#allocation2 + $0x3c8] sm:$0xff]  ;;  %v304_v2 = vld [vmem:[#allocation2 + $0x3c0] sm:$0xff]  ;;  %vm706_vm0 = vcmask 785408   ;;  %vm1554_vm9 = vcmask 523264  }
  0x8b   :  { %v561_v1 = vld [vmem:[#allocation2 + $0xbc8] sm:$0xff]  ;;  %710 = vmatprep.subr.mxu0 %v305_v0  ;;  %v560_v3 = vld [vmem:[#allocation2 + $0xbc0] sm:$0xff]  ;;  %vm5682_vm11 = vmmov 0  }
  0x8c   :  { %781 = vmatprep.subr.mxu1 %v561_v1  ;;  %v297_v4 = vld [vmem:[#allocation2 + $0x388] sm:$0xff]  ;;  %711 = vmatpush1.msra.mxu0 %v304_v2  ;;  %v296_v6 = vld [vmem:[#allocation2 + $0x380] sm:$0xff] }
  0x8d   :  { %v553_v5 = vld [vmem:[#allocation2 + $0xb88] sm:$0xff]  ;;  %782 = vmatpush1.msra.mxu1 %v560_v3  ;;  %v552_v7 = vld [vmem:[#allocation2 + $0xb80] sm:$0xff]  ;;  %712 = vmatprep.subr.mxu0 %v297_v4 }
  0x8e   :  { %v289_v8 = vld [vmem:[#allocation2 + $0x348] sm:$0xff]  ;;  %783 = vmatprep.subr.mxu1 %v553_v5  ;;  %v288_v10 = vld [vmem:[#allocation2 + $0x340] sm:$0xff]  ;;  %713 = vmatpush1.msra.mxu0 %v296_v6 }
  0x8f   :  { %v545_v9 = vld [vmem:[#allocation2 + $0xb48] sm:$0xff]  ;;  %v544_v11 = vld [vmem:[#allocation2 + $0xb40] sm:$0xff]  ;;  %784 = vmatpush1.msra.mxu1 %v552_v7  ;;  %714 = vmatprep.subr.mxu0 %v289_v8 }
  0x90   :  { %v281_v12 = vld [vmem:[#allocation2 + $0x308] sm:$0xff]  ;;  %785 = vmatprep.subr.mxu1 %v545_v9  ;;  %v280_v14 = vld [vmem:[#allocation2 + $0x300] sm:$0xff]  ;;  %715 = vmatpush1.msra.mxu0 %v288_v10 }
  0x91   :  { %v537_v13 = vld [vmem:[#allocation2 + $0xb08] sm:$0xff]  ;;  %v536_v15 = vld [vmem:[#allocation2 + $0xb00] sm:$0xff]  ;;  %786 = vmatpush1.msra.mxu1 %v544_v11  ;;  %716 = vmatprep.subr.mxu0 %v281_v12 }
  0x92   :  { %v273_v16 = vld [vmem:[#allocation2 + $0x2c8] sm:$0xff]  ;;  %787 = vmatprep.subr.mxu1 %v537_v13  ;;  %v272_v18 = vld [vmem:[#allocation2 + $0x2c0] sm:$0xff]  ;;  %717 = vmatpush1.msra.mxu0 %v280_v14 }
  0x93   :  { %v529_v17 = vld [vmem:[#allocation2 + $0xac8] sm:$0xff]  ;;  %v528_v19 = vld [vmem:[#allocation2 + $0xac0] sm:$0xff]  ;;  %788 = vmatpush1.msra.mxu1 %v536_v15  ;;  %718 = vmatprep.subr.mxu0 %v273_v16 }
  0x94   :  { %v265_v20 = vld [vmem:[#allocation2 + $0x288] sm:$0xff]  ;;  %789 = vmatprep.subr.mxu1 %v529_v17  ;;  %v264_v22 = vld [vmem:[#allocation2 + $0x280] sm:$0xff]  ;;  %719 = vmatpush1.msra.mxu0 %v272_v18 }
  0x95   :  { %v521_v21 = vld [vmem:[#allocation2 + $0xa88] sm:$0xff]  ;;  %v520_v23 = vld [vmem:[#allocation2 + $0xa80] sm:$0xff]  ;;  %790 = vmatpush1.msra.mxu1 %v528_v19  ;;  %720 = vmatprep.subr.mxu0 %v265_v20 }
  0x96   :  { %v257_v24 = vld [vmem:[#allocation2 + $0x248] sm:$0xff]  ;;  %791 = vmatprep.subr.mxu1 %v521_v21  ;;  %v256_v26 = vld [vmem:[#allocation2 + $0x240] sm:$0xff]  ;;  %721 = vmatpush1.msra.mxu0 %v264_v22 }
  0x97   :  { %v513_v25 = vld [vmem:[#allocation2 + $0xa48] sm:$0xff]  ;;  %v512_v27 = vld [vmem:[#allocation2 + $0xa40] sm:$0xff]  ;;  %792 = vmatpush1.msra.mxu1 %v520_v23  ;;  %722 = vmatprep.subr.mxu0 %v257_v24 }
  0x98   :  { %v249_v28 = vld [vmem:[#allocation2 + $0x208] sm:$0xff]  ;;  %793 = vmatprep.subr.mxu1 %v513_v25  ;;  %v248_v30 = vld [vmem:[#allocation2 + $0x200] sm:$0xff]  ;;  %723 = vmatpush1.msra.mxu0 %v256_v26 }
  0x99   :  { %v505_v29 = vld [vmem:[#allocation2 + $0xa08] sm:$0xff]  ;;  %v504_v31 = vld [vmem:[#allocation2 + $0xa00] sm:$0xff]  ;;  %794 = vmatpush1.msra.mxu1 %v512_v27  ;;  %724 = vmatprep.subr.mxu0 %v249_v28 }
  0x9a   :  { %v241_v32 = vld [vmem:[#allocation2 + $0x1c8] sm:$0xff]  ;;  %795 = vmatprep.subr.mxu1 %v505_v29  ;;  %v240_v34 = vld [vmem:[#allocation2 + $0x1c0] sm:$0xff]  ;;  %725 = vmatpush1.msra.mxu0 %v248_v30 }
  0x9b   :  { %v497_v33 = vld [vmem:[#allocation2 + $0x9c8] sm:$0xff]  ;;  %v496_v35 = vld [vmem:[#allocation2 + $0x9c0] sm:$0xff]  ;;  %796 = vmatpush1.msra.mxu1 %v504_v31  ;;  %726 = vmatprep.subr.mxu0 %v241_v32 }
  0x9c   :  { %v233_v36 = vld [vmem:[#allocation2 + $0x188] sm:$0xff]  ;;  %797 = vmatprep.subr.mxu1 %v497_v33  ;;  %v232_v38 = vld [vmem:[#allocation2 + $0x180] sm:$0xff]  ;;  %727 = vmatpush1.msra.mxu0 %v240_v34 }
  0x9d   :  { %v489_v37 = vld [vmem:[#allocation2 + $0x988] sm:$0xff]  ;;  %v488_v39 = vld [vmem:[#allocation2 + $0x980] sm:$0xff]  ;;  %798 = vmatpush1.msra.mxu1 %v496_v35  ;;  %728 = vmatprep.subr.mxu0 %v233_v36 }
  0x9e   :  { %v225_v40 = vld [vmem:[#allocation2 + $0x148] sm:$0xff]  ;;  %799 = vmatprep.subr.mxu1 %v489_v37  ;;  %v224_v42 = vld [vmem:[#allocation2 + $0x140] sm:$0xff]  ;;  %729 = vmatpush1.msra.mxu0 %v232_v38 }
  0x9f   :  { %v481_v41 = vld [vmem:[#allocation2 + $0x948] sm:$0xff]  ;;  %v480_v43 = vld [vmem:[#allocation2 + $0x940] sm:$0xff]  ;;  %800 = vmatpush1.msra.mxu1 %v488_v39  ;;  %730 = vmatprep.subr.mxu0 %v225_v40 }
  0xa0   :  { %v217_v44 = vld [vmem:[#allocation2 + $0x108] sm:$0xff]  ;;  %801 = vmatprep.subr.mxu1 %v481_v41  ;;  %v216_v46 = vld [vmem:[#allocation2 + $0x100] sm:$0xff]  ;;  %731 = vmatpush1.msra.mxu0 %v224_v42 }
  0xa1   :  { %v473_v45 = vld [vmem:[#allocation2 + $0x908] sm:$0xff]  ;;  %v472_v47 = vld [vmem:[#allocation2 + $0x900] sm:$0xff]  ;;  %802 = vmatpush1.msra.mxu1 %v480_v43  ;;  %732 = vmatprep.subr.mxu0 %v217_v44 }
  0xa2   :  { %v209_v48 = vld [vmem:[#allocation2 + $0xc8] sm:$0xff]  ;;  %803 = vmatprep.subr.mxu1 %v473_v45  ;;  %v208_v50 = vld [vmem:[#allocation2 + $0xc0] sm:$0xff]  ;;  %733 = vmatpush1.msra.mxu0 %v216_v46 }
  0xa3   :  { %v465_v49 = vld [vmem:[#allocation2 + $0x8c8] sm:$0xff]  ;;  %v464_v51 = vld [vmem:[#allocation2 + $0x8c0] sm:$0xff]  ;;  %804 = vmatpush1.msra.mxu1 %v472_v47  ;;  %734 = vmatprep.subr.mxu0 %v209_v48  ;;  %v5784_v48 = vld [vmem:[%s6816_s0 + $0x18] sm:$0xff] }
  0xa4   :  { %v201_v52 = vld [vmem:[#allocation2 + $0x88] sm:$0xff]  ;;  %805 = vmatprep.subr.mxu1 %v465_v49  ;;  %v200_v54 = vld [vmem:[#allocation2 + $0x80] sm:$0xff]  ;;  %735 = vmatpush1.msra.mxu0 %v208_v50  ;;  %v5789_v50 = vld [vmem:[%s6816_s0 + $0x10] sm:$0xff] }
  0xa5   :  { %v457_v53 = vld [vmem:[#allocation2 + $0x888] sm:$0xff]  ;;  %v456_v55 = vld [vmem:[#allocation2 + $0x880] sm:$0xff]  ;;  %806 = vmatpush1.msra.mxu1 %v464_v51  ;;  %736 = vmatprep.subr.mxu0 %v201_v52  ;;  %v307_v51 = vld [vmem:[#allocation2 + $0x3d8] sm:$0xff] }
  0xa6   :  { %v193_v56 = vld [vmem:[#allocation2 + $0x48] sm:$0xff]  ;;  %807 = vmatprep.subr.mxu1 %v457_v53  ;;  %v192_v58 = vld [vmem:[#allocation2 + $0x40] sm:$0xff]  ;;  %737 = vmatpush1.msra.mxu0 %v200_v54  ;;  %v306_v53 = vld [vmem:[#allocation2 + $0x3d0] sm:$0xff] }
  0xa7   :  { %v449_v57 = vld [vmem:[#allocation2 + $0x848] sm:$0xff]  ;;  %v448_v59 = vld [vmem:[#allocation2 + $0x840] sm:$0xff]  ;;  %808 = vmatpush1.msra.mxu1 %v456_v55  ;;  %738 = vmatprep.subr.mxu0 %v193_v56  ;;  %v299_v55 = vld [vmem:[#allocation2 + $0x398] sm:$0xff] }
  0xa8   :  { %v185_v60 = vld [vmem:[#allocation2 + $0x8] sm:$0xff]  ;;  %809 = vmatprep.subr.mxu1 %v449_v57  ;;  %v184_v62 = vld [vmem:[#allocation2] sm:$0xff]  ;;  %739 = vmatpush1.msra.mxu0 %v192_v58  ;;  %v298_v57 = vld [vmem:[#allocation2 + $0x390] sm:$0xff] }
  0xa9   :  { %v441_v61 = vld [vmem:[#allocation2 + $0x808] sm:$0xff]  ;;  %v440_v63 = vld [vmem:[#allocation2 + $0x800] sm:$0xff]  ;;  %810 = vmatpush1.msra.mxu1 %v448_v59  ;;  %740 = vmatprep.subr.mxu0 %v185_v60  ;;  %v291_v59 = vld [vmem:[#allocation2 + $0x358] sm:$0xff] }
  0xaa   :  { %v433_v0 = vld [vmem:[#allocation2 + $0x7c8] sm:$0xff]  ;;  %811 = vmatprep.subr.mxu1 %v441_v61  ;;  %v432_v2 = vld [vmem:[#allocation2 + $0x7c0] sm:$0xff]  ;;  %741 = vmatpush1.msra.mxu0 %v184_v62  ;;  %v290_v61 = vld [vmem:[#allocation2 + $0x350] sm:$0xff] }
  0xab   :  { %v657_v1 = vld [vmem:[#allocation2 + $0xec8] sm:$0xff]  ;;  %v656_v3 = vld [vmem:[#allocation2 + $0xec0] sm:$0xff]  ;;  %812 = vmatpush1.msra.mxu1 %v440_v63  ;;  %742 = vmatprep.subr.mxu0 %v433_v0  ;;  %v283_v63 = vld [vmem:[#allocation2 + $0x318] sm:$0xff] }
  0xac   :  { %v425_v4 = vld [vmem:[#allocation2 + $0x788] sm:$0xff]  ;;  %821 = vmatprep.subr.mxu1 %v657_v1  ;;  %v424_v6 = vld [vmem:[#allocation2 + $0x780] sm:$0xff]  ;;  %743 = vmatpush2.msra.mxu0 %v432_v2  ;;  %v282_v2 = vld [vmem:[#allocation2 + $0x310] sm:$0xff] }
  0xad   :  { %v649_v5 = vld [vmem:[#allocation2 + $0xe88] sm:$0xff]  ;;  %v648_v7 = vld [vmem:[#allocation2 + $0xe80] sm:$0xff]  ;;  %822 = vmatpush2.msra.mxu1 %v656_v3  ;;  %744 = vmatprep.subr.mxu0 %v425_v4  ;;  %v275_v4 = vld [vmem:[#allocation2 + $0x2d8] sm:$0xff] }
  0xae   :  { %v417_v8 = vld [vmem:[#allocation2 + $0x748] sm:$0xff]  ;;  %823 = vmatprep.subr.mxu1 %v649_v5  ;;  %v416_v10 = vld [vmem:[#allocation2 + $0x740] sm:$0xff]  ;;  %745 = vmatpush2.msra.mxu0 %v424_v6  ;;  %v563_v5 = vld [vmem:[#allocation2 + $0xbd8] sm:$0xff] }
  0xaf   :  { %v641_v9 = vld [vmem:[#allocation2 + $0xe48] sm:$0xff]  ;;  %v640_v11 = vld [vmem:[#allocation2 + $0xe40] sm:$0xff]  ;;  %824 = vmatpush2.msra.mxu1 %v648_v7  ;;  %746 = vmatprep.subr.mxu0 %v417_v8  ;;  %v274_v6 = vld [vmem:[#allocation2 + $0x2d0] sm:$0xff] }
  0xb0   :  { %v409_v12 = vld [vmem:[#allocation2 + $0x708] sm:$0xff]  ;;  %825 = vmatprep.subr.mxu1 %v641_v9  ;;  %v408_v14 = vld [vmem:[#allocation2 + $0x700] sm:$0xff]  ;;  %747 = vmatpush2.msra.mxu0 %v416_v10  ;;  %v562_v7 = vld [vmem:[#allocation2 + $0xbd0] sm:$0xff] }
  0xb1   :  { %v633_v13 = vld [vmem:[#allocation2 + $0xe08] sm:$0xff]  ;;  %v632_v15 = vld [vmem:[#allocation2 + $0xe00] sm:$0xff]  ;;  %826 = vmatpush2.msra.mxu1 %v640_v11  ;;  %748 = vmatprep.subr.mxu0 %v409_v12  ;;  %v267_v8 = vld [vmem:[#allocation2 + $0x298] sm:$0xff] }
  0xb2   :  { %v401_v16 = vld [vmem:[#allocation2 + $0x6c8] sm:$0xff]  ;;  %827 = vmatprep.subr.mxu1 %v633_v13  ;;  %v400_v18 = vld [vmem:[#allocation2 + $0x6c0] sm:$0xff]  ;;  %749 = vmatpush2.msra.mxu0 %v408_v14  ;;  %v555_v9 = vld [vmem:[#allocation2 + $0xb98] sm:$0xff] }
  0xb3   :  { %v625_v17 = vld [vmem:[#allocation2 + $0xdc8] sm:$0xff]  ;;  %v624_v19 = vld [vmem:[#allocation2 + $0xdc0] sm:$0xff]  ;;  %828 = vmatpush2.msra.mxu1 %v632_v15  ;;  %750 = vmatprep.subr.mxu0 %v401_v16  ;;  %v266_v10 = vld [vmem:[#allocation2 + $0x290] sm:$0xff] }
  0xb4   :  { %v393_v20 = vld [vmem:[#allocation2 + $0x688] sm:$0xff]  ;;  %829 = vmatprep.subr.mxu1 %v625_v17  ;;  %v392_v22 = vld [vmem:[#allocation2 + $0x680] sm:$0xff]  ;;  %751 = vmatpush2.msra.mxu0 %v400_v18  ;;  %v554_v11 = vld [vmem:[#allocation2 + $0xb90] sm:$0xff] }
  0xb5   :  { %v617_v21 = vld [vmem:[#allocation2 + $0xd88] sm:$0xff]  ;;  %v616_v23 = vld [vmem:[#allocation2 + $0xd80] sm:$0xff]  ;;  %830 = vmatpush2.msra.mxu1 %v624_v19  ;;  %752 = vmatprep.subr.mxu0 %v393_v20  ;;  %v259_v12 = vld [vmem:[#allocation2 + $0x258] sm:$0xff] }
  0xb6   :  { %v385_v24 = vld [vmem:[#allocation2 + $0x648] sm:$0xff]  ;;  %831 = vmatprep.subr.mxu1 %v617_v21  ;;  %v384_v26 = vld [vmem:[#allocation2 + $0x640] sm:$0xff]  ;;  %753 = vmatpush2.msra.mxu0 %v392_v22  ;;  %v547_v13 = vld [vmem:[#allocation2 + $0xb58] sm:$0xff] }
  0xb7   :  { %v609_v25 = vld [vmem:[#allocation2 + $0xd48] sm:$0xff]  ;;  %v608_v27 = vld [vmem:[#allocation2 + $0xd40] sm:$0xff]  ;;  %832 = vmatpush2.msra.mxu1 %v616_v23  ;;  %754 = vmatprep.subr.mxu0 %v385_v24  ;;  %v258_v14 = vld [vmem:[#allocation2 + $0x250] sm:$0xff] }
  0xb8   :  { %v377_v28 = vld [vmem:[#allocation2 + $0x608] sm:$0xff]  ;;  %833 = vmatprep.subr.mxu1 %v609_v25  ;;  %v376_v30 = vld [vmem:[#allocation2 + $0x600] sm:$0xff]  ;;  %755 = vmatpush2.msra.mxu0 %v384_v26  ;;  %v546_v15 = vld [vmem:[#allocation2 + $0xb50] sm:$0xff] }
  0xb9   :  { %v601_v29 = vld [vmem:[#allocation2 + $0xd08] sm:$0xff]  ;;  %v600_v31 = vld [vmem:[#allocation2 + $0xd00] sm:$0xff]  ;;  %834 = vmatpush2.msra.mxu1 %v608_v27  ;;  %756 = vmatprep.subr.mxu0 %v377_v28  ;;  %v251_v16 = vld [vmem:[#allocation2 + $0x218] sm:$0xff] }
  0xba   :  { %v369_v32 = vld [vmem:[#allocation2 + $0x5c8] sm:$0xff]  ;;  %835 = vmatprep.subr.mxu1 %v601_v29  ;;  %v368_v34 = vld [vmem:[#allocation2 + $0x5c0] sm:$0xff]  ;;  %757 = vmatpush2.msra.mxu0 %v376_v30  ;;  %v539_v17 = vld [vmem:[#allocation2 + $0xb18] sm:$0xff] }
  0xbb   :  { %v593_v33 = vld [vmem:[#allocation2 + $0xcc8] sm:$0xff]  ;;  %v592_v35 = vld [vmem:[#allocation2 + $0xcc0] sm:$0xff]  ;;  %836 = vmatpush2.msra.mxu1 %v600_v31  ;;  %758 = vmatprep.subr.mxu0 %v369_v32  ;;  %v250_v18 = vld [vmem:[#allocation2 + $0x210] sm:$0xff] }
  0xbc   :  { %v361_v36 = vld [vmem:[#allocation2 + $0x588] sm:$0xff]  ;;  %837 = vmatprep.subr.mxu1 %v593_v33  ;;  %v360_v38 = vld [vmem:[#allocation2 + $0x580] sm:$0xff]  ;;  %759 = vmatpush2.msra.mxu0 %v368_v34  ;;  %v538_v19 = vld [vmem:[#allocation2 + $0xb10] sm:$0xff] }
  0xbd   :  { %v585_v37 = vld [vmem:[#allocation2 + $0xc88] sm:$0xff]  ;;  %v584_v39 = vld [vmem:[#allocation2 + $0xc80] sm:$0xff]  ;;  %838 = vmatpush2.msra.mxu1 %v592_v35  ;;  %760 = vmatprep.subr.mxu0 %v361_v36  ;;  %v243_v20 = vld [vmem:[#allocation2 + $0x1d8] sm:$0xff] }
  0xbe   :  { %v353_v40 = vld [vmem:[#allocation2 + $0x548] sm:$0xff]  ;;  %839 = vmatprep.subr.mxu1 %v585_v37  ;;  %v352_v42 = vld [vmem:[#allocation2 + $0x540] sm:$0xff]  ;;  %761 = vmatpush2.msra.mxu0 %v360_v38  ;;  %v531_v21 = vld [vmem:[#allocation2 + $0xad8] sm:$0xff] }
  0xbf   :  { %v577_v41 = vld [vmem:[#allocation2 + $0xc48] sm:$0xff]  ;;  %v576_v43 = vld [vmem:[#allocation2 + $0xc40] sm:$0xff]  ;;  %840 = vmatpush2.msra.mxu1 %v584_v39  ;;  %762 = vmatprep.subr.mxu0 %v353_v40  ;;  %v242_v22 = vld [vmem:[#allocation2 + $0x1d0] sm:$0xff] }
  0xc0   :  { %v345_v44 = vld [vmem:[#allocation2 + $0x508] sm:$0xff]  ;;  %841 = vmatprep.subr.mxu1 %v577_v41  ;;  %v344_v46 = vld [vmem:[#allocation2 + $0x500] sm:$0xff]  ;;  %763 = vmatpush2.msra.mxu0 %v352_v42  ;;  %v530_v23 = vld [vmem:[#allocation2 + $0xad0] sm:$0xff] }
  0xc1   :  { %v569_v45 = vld [vmem:[#allocation2 + $0xc08] sm:$0xff]  ;;  %v568_v47 = vld [vmem:[#allocation2 + $0xc00] sm:$0xff]  ;;  %842 = vmatpush2.msra.mxu1 %v576_v43  ;;  %764 = vmatprep.subr.mxu0 %v345_v44  ;;  %v235_v24 = vld [vmem:[#allocation2 + $0x198] sm:$0xff] }
  0xc2   :  { %v337_v49 = vld [vmem:[#allocation2 + $0x4c8] sm:$0xff]  ;;  %843 = vmatprep.subr.mxu1 %v569_v45  ;;  %765 = vmatpush2.msra.mxu0 %v344_v46  ;;  %v336_v52 = vld [vmem:[#allocation2 + $0x4c0] sm:$0xff]  ;;  %v523_v25 = vld [vmem:[#allocation2 + $0xa98] sm:$0xff] }
  0xc3   :  { %844 = vmatpush2.msra.mxu1 %v568_v47  ;;  %4852 = vmatprep.mubr.msk.f32.mxu1 %vm706_vm0, %v5784_v48  ;;  %v329_v54 = vld [vmem:[#allocation2 + $0x488] sm:$0xff]  ;;  %v328_v56 = vld [vmem:[#allocation2 + $0x480] sm:$0xff]  ;;  %v234_v26 = vld [vmem:[#allocation2 + $0x190] sm:$0xff] }
  0xc4   :  { %766 = vmatprep.subr.mxu0 %v337_v49  ;;  %846 = vmatmul.mubr.f32.vlgmr.msra.gmra.mxu1 %v5789_v50  ;;  %v321_v58 = vld [vmem:[#allocation2 + $0x448] sm:$0xff]  ;;  %v320_v60 = vld [vmem:[#allocation2 + $0x440] sm:$0xff]  ;;  %v522_v27 = vld [vmem:[#allocation2 + $0xa90] sm:$0xff] }
  0xc5   :  { %852 = vmatprep.subr.mxu1 %v307_v51  ;;  %767 = vmatpush2.msra.mxu0 %v336_v52  ;;  %v313_v62 = vld [vmem:[#allocation2 + $0x408] sm:$0xff]  ;;  %v312_v0 = vld [vmem:[#allocation2 + $0x400] sm:$0xff]  ;;  %v227_v28 = vld [vmem:[#allocation2 + $0x158] sm:$0xff] }
  0xc6   :  { %853 = vmatpush1.msra.mxu1 %v306_v53  ;;  %768 = vmatprep.subr.mxu0 %v329_v54  ;;  %v5797_v1 = vld [vmem:[%s6816_s0 + $0x8] sm:$0xff]  ;;  %v5802_v3 = vld [vmem:[%s6816_s0] sm:$0xff]  ;;  %v515_v29 = vld [vmem:[#allocation2 + $0xa58] sm:$0xff] }
  0xc7   :  { %854 = vmatprep.subr.mxu1 %v299_v55  ;;  %769 = vmatpush2.msra.mxu0 %v328_v56  ;;  %v226_v30 = vld [vmem:[#allocation2 + $0x150] sm:$0xff]  ;;  %v219_v32 = vld [vmem:[#allocation2 + $0x118] sm:$0xff] }
  0xc8   :  { %855 = vmatpush1.msra.mxu1 %v298_v57  ;;  %770 = vmatprep.subr.mxu0 %v321_v58  ;;  %v514_v31 = vld [vmem:[#allocation2 + $0xa50] sm:$0xff]  ;;  %v507_v33 = vld [vmem:[#allocation2 + $0xa18] sm:$0xff] }
  0xc9   :  { %856 = vmatprep.subr.mxu1 %v291_v59  ;;  %771 = vmatpush2.msra.mxu0 %v320_v60  ;;  %v218_v34 = vld [vmem:[#allocation2 + $0x110] sm:$0xff]  ;;  %v211_v36 = vld [vmem:[#allocation2 + $0xd8] sm:$0xff] }
  0xca   :  { %857 = vmatpush1.msra.mxu1 %v290_v61  ;;  %772 = vmatprep.subr.mxu0 %v313_v62  ;;  %v506_v35 = vld [vmem:[#allocation2 + $0xa10] sm:$0xff]  ;;  %v499_v37 = vld [vmem:[#allocation2 + $0x9d8] sm:$0xff] }
  0xcb   :  { %858 = vmatprep.subr.mxu1 %v283_v63  ;;  %773 = vmatpush2.msra.mxu0 %v312_v0  ;;  %v210_v38 = vld [vmem:[#allocation2 + $0xd0] sm:$0xff]  ;;  %v203_v40 = vld [vmem:[#allocation2 + $0x98] sm:$0xff] }
  0xcc   :  { %774 = vmatprep.mubr.f32.mxu0 %v5797_v1  ;;  %859 = vmatpush1.msra.mxu1 %v282_v2  ;;  %v498_v39 = vld [vmem:[#allocation2 + $0x9d0] sm:$0xff]  ;;  %v491_v41 = vld [vmem:[#allocation2 + $0x998] sm:$0xff] }
  0xcd   :  { %775 = vmatmul.mubr.f32.vlgmr.msra.gmra.mxu0 %v5802_v3  ;;  %860 = vmatprep.subr.mxu1 %v275_v4  ;;  %v202_v42 = vld [vmem:[#allocation2 + $0x90] sm:$0xff]  ;;  %v195_v44 = vld [vmem:[#allocation2 + $0x58] sm:$0xff] }
  0xce   :  { %923 = vmatprep.subr.mxu0 %v563_v5  ;;  %861 = vmatpush1.msra.mxu1 %v274_v6  ;;  %v490_v43 = vld [vmem:[#allocation2 + $0x990] sm:$0xff]  ;;  %v483_v45 = vld [vmem:[#allocation2 + $0x958] sm:$0xff] }
  0xcf   :  { %924 = vmatpush1.msra.mxu0 %v562_v7  ;;  %862 = vmatprep.subr.mxu1 %v267_v8  ;;  %v194_v46 = vld [vmem:[#allocation2 + $0x50] sm:$0xff]  ;;  %v187_v49 = vld [vmem:[#allocation2 + $0x18] sm:$0xff] }
  0xd0   :  { %925 = vmatprep.subr.mxu0 %v555_v9  ;;  %863 = vmatpush1.msra.mxu1 %v266_v10  ;;  %v482_v47 = vld [vmem:[#allocation2 + $0x950] sm:$0xff]  ;;  %v475_v51 = vld [vmem:[#allocation2 + $0x918] sm:$0xff] }
  0xd1   :  { %926 = vmatpush1.msra.mxu0 %v554_v11  ;;  %864 = vmatprep.subr.mxu1 %v259_v12  ;;  %v186_v52 = vld [vmem:[#allocation2 + $0x10] sm:$0xff]  ;;  %v435_v54 = vld [vmem:[#allocation2 + $0x7d8] sm:$0xff] }
  0xd2   :  { %927 = vmatprep.subr.mxu0 %v547_v13  ;;  %865 = vmatpush1.msra.mxu1 %v258_v14  ;;  %v474_v53 = vld [vmem:[#allocation2 + $0x910] sm:$0xff]  ;;  %v467_v55 = vld [vmem:[#allocation2 + $0x8d8] sm:$0xff] }
  0xd3   :  { %928 = vmatpush1.msra.mxu0 %v546_v15  ;;  %866 = vmatprep.subr.mxu1 %v251_v16  ;;  %v434_v56 = vld [vmem:[#allocation2 + $0x7d0] sm:$0xff]  ;;  %v427_v58 = vld [vmem:[#allocation2 + $0x798] sm:$0xff] }
  0xd4   :  { %929 = vmatprep.subr.mxu0 %v539_v17  ;;  %867 = vmatpush1.msra.mxu1 %v250_v18  ;;  %v466_v57 = vld [vmem:[#allocation2 + $0x8d0] sm:$0xff]  ;;  %v459_v59 = vld [vmem:[#allocation2 + $0x898] sm:$0xff] }
  0xd5   :  { %930 = vmatpush1.msra.mxu0 %v538_v19  ;;  %868 = vmatprep.subr.mxu1 %v243_v20  ;;  %v426_v60 = vld [vmem:[#allocation2 + $0x790] sm:$0xff]  ;;  %v419_v62 = vld [vmem:[#allocation2 + $0x758] sm:$0xff] }
  0xd6   :  { %931 = vmatprep.subr.mxu0 %v531_v21  ;;  %869 = vmatpush1.msra.mxu1 %v242_v22  ;;  %v458_v61 = vld [vmem:[#allocation2 + $0x890] sm:$0xff]  ;;  %v451_v63 = vld [vmem:[#allocation2 + $0x858] sm:$0xff] }
  0xd7   :  { %932 = vmatpush1.msra.mxu0 %v530_v23  ;;  %870 = vmatprep.subr.mxu1 %v235_v24  ;;  %v418_v0 = vld [vmem:[#allocation2 + $0x750] sm:$0xff]  ;;  %v411_v4 = vld [vmem:[#allocation2 + $0x718] sm:$0xff] }
  0xd8   :  { %933 = vmatprep.subr.mxu0 %v523_v25  ;;  %871 = vmatpush1.msra.mxu1 %v234_v26  ;;  %v450_v2 = vld [vmem:[#allocation2 + $0x850] sm:$0xff]  ;;  %v443_v5 = vld [vmem:[#allocation2 + $0x818] sm:$0xff] }
  0xd9   :  { %934 = vmatpush1.msra.mxu0 %v522_v27  ;;  %872 = vmatprep.subr.mxu1 %v227_v28  ;;  %v410_v6 = vld [vmem:[#allocation2 + $0x710] sm:$0xff]  ;;  %v403_v8 = vld [vmem:[#allocation2 + $0x6d8] sm:$0xff] }
  0xda   :  { %935 = vmatprep.subr.mxu0 %v515_v29  ;;  %873 = vmatpush1.msra.mxu1 %v226_v30  ;;  %v442_v7 = vld [vmem:[#allocation2 + $0x810] sm:$0xff]  ;;  %v659_v9 = vld [vmem:[#allocation2 + $0xed8] sm:$0xff] }
  0xdb   :  { %936 = vmatpush1.msra.mxu0 %v514_v31  ;;  %874 = vmatprep.subr.mxu1 %v219_v32  ;;  %v402_v10 = vld [vmem:[#allocation2 + $0x6d0] sm:$0xff]  ;;  %v395_v12 = vld [vmem:[#allocation2 + $0x698] sm:$0xff] }
  0xdc   :  { %937 = vmatprep.subr.mxu0 %v507_v33  ;;  %875 = vmatpush1.msra.mxu1 %v218_v34  ;;  %v658_v11 = vld [vmem:[#allocation2 + $0xed0] sm:$0xff]  ;;  %v651_v13 = vld [vmem:[#allocation2 + $0xe98] sm:$0xff] }
  0xdd   :  { %938 = vmatpush1.msra.mxu0 %v506_v35  ;;  %876 = vmatprep.subr.mxu1 %v211_v36  ;;  %v394_v14 = vld [vmem:[#allocation2 + $0x690] sm:$0xff]  ;;  %v387_v16 = vld [vmem:[#allocation2 + $0x658] sm:$0xff] }
  0xde   :  { %939 = vmatprep.subr.mxu0 %v499_v37  ;;  %877 = vmatpush1.msra.mxu1 %v210_v38  ;;  %v650_v15 = vld [vmem:[#allocation2 + $0xe90] sm:$0xff]  ;;  %v643_v17 = vld [vmem:[#allocation2 + $0xe58] sm:$0xff] }
  0xdf   :  { %940 = vmatpush1.msra.mxu0 %v498_v39  ;;  %878 = vmatprep.subr.mxu1 %v203_v40  ;;  %v386_v18 = vld [vmem:[#allocation2 + $0x650] sm:$0xff]  ;;  %v379_v20 = vld [vmem:[#allocation2 + $0x618] sm:$0xff] }
  0xe0   :  { %941 = vmatprep.subr.mxu0 %v491_v41  ;;  %879 = vmatpush1.msra.mxu1 %v202_v42  ;;  %v642_v19 = vld [vmem:[#allocation2 + $0xe50] sm:$0xff]  ;;  %v635_v21 = vld [vmem:[#allocation2 + $0xe18] sm:$0xff] }
  0xe1   :  { %942 = vmatpush1.msra.mxu0 %v490_v43  ;;  %880 = vmatprep.subr.mxu1 %v195_v44  ;;  %v378_v22 = vld [vmem:[#allocation2 + $0x610] sm:$0xff]  ;;  %v371_v24 = vld [vmem:[#allocation2 + $0x5d8] sm:$0xff] }
  0xe2   :  { %943 = vmatprep.subr.mxu0 %v483_v45  ;;  %881 = vmatpush1.msra.mxu1 %v194_v46  ;;  %v634_v23 = vld [vmem:[#allocation2 + $0xe10] sm:$0xff]  ;;  %v627_v25 = vld [vmem:[#allocation2 + $0xdd8] sm:$0xff] }
  0xe3   :  { %944 = vmatpush1.msra.mxu0 %v482_v47  ;;  %882 = vmatprep.subr.mxu1 %v187_v49  ;;  %v370_v26 = vld [vmem:[#allocation2 + $0x5d0] sm:$0xff]  ;;  %v363_v28 = vld [vmem:[#allocation2 + $0x598] sm:$0xff] }
  0xe4   :  { %945 = vmatprep.subr.mxu0 %v475_v51  ;;  %883 = vmatpush1.msra.mxu1 %v186_v52  ;;  %v626_v27 = vld [vmem:[#allocation2 + $0xdd0] sm:$0xff]  ;;  %v619_v29 = vld [vmem:[#allocation2 + $0xd98] sm:$0xff] }
  0xe5   :  { %946 = vmatpush1.msra.mxu0 %v474_v53  ;;  %884 = vmatprep.subr.mxu1 %v435_v54  ;;  %v362_v30 = vld [vmem:[#allocation2 + $0x590] sm:$0xff]  ;;  %v355_v32 = vld [vmem:[#allocation2 + $0x558] sm:$0xff] }
  0xe6   :  { %947 = vmatprep.subr.mxu0 %v467_v55  ;;  %885 = vmatpush2.msra.mxu1 %v434_v56  ;;  %v618_v31 = vld [vmem:[#allocation2 + $0xd90] sm:$0xff]  ;;  %v611_v33 = vld [vmem:[#allocation2 + $0xd58] sm:$0xff] }
  0xe7   :  { %948 = vmatpush1.msra.mxu0 %v466_v57  ;;  %886 = vmatprep.subr.mxu1 %v427_v58  ;;  %v354_v34 = vld [vmem:[#allocation2 + $0x550] sm:$0xff]  ;;  %v347_v36 = vld [vmem:[#allocation2 + $0x518] sm:$0xff]  ;;  %v309_v58 = vld [vmem:[#allocation2 + $0x3e8] sm:$0xff] }
  0xe8   :  { %949 = vmatprep.subr.mxu0 %v459_v59  ;;  %887 = vmatpush2.msra.mxu1 %v426_v60  ;;  %v610_v35 = vld [vmem:[#allocation2 + $0xd50] sm:$0xff]  ;;  %v603_v37 = vld [vmem:[#allocation2 + $0xd18] sm:$0xff]  ;;  %v565_v59 = vld [vmem:[#allocation2 + $0xbe8] sm:$0xff] }
  0xe9   :  { %950 = vmatpush1.msra.mxu0 %v458_v61  ;;  %888 = vmatprep.subr.mxu1 %v419_v62  ;;  %v346_v38 = vld [vmem:[#allocation2 + $0x510] sm:$0xff]  ;;  %v339_v40 = vld [vmem:[#allocation2 + $0x4d8] sm:$0xff]  ;;  %v308_v60 = vld [vmem:[#allocation2 + $0x3e0] sm:$0xff] }
  0xea   :  { %951 = vmatprep.subr.mxu0 %v451_v63  ;;  %889 = vmatpush2.msra.mxu1 %v418_v0  ;;  %v602_v39 = vld [vmem:[#allocation2 + $0xd10] sm:$0xff]  ;;  %v595_v41 = vld [vmem:[#allocation2 + $0xcd8] sm:$0xff]  ;;  %v564_v61 = vld [vmem:[#allocation2 + $0xbe0] sm:$0xff] }
  0xeb   :  { %952 = vmatpush1.msra.mxu0 %v450_v2  ;;  %890 = vmatprep.subr.mxu1 %v411_v4  ;;  %v338_v42 = vld [vmem:[#allocation2 + $0x4d0] sm:$0xff]  ;;  %v331_v44 = vld [vmem:[#allocation2 + $0x498] sm:$0xff]  ;;  %v301_v62 = vld [vmem:[#allocation2 + $0x3a8] sm:$0xff] }
  0xec   :  { %953 = vmatprep.subr.mxu0 %v443_v5  ;;  %891 = vmatpush2.msra.mxu1 %v410_v6  ;;  %v594_v43 = vld [vmem:[#allocation2 + $0xcd0] sm:$0xff]  ;;  %v587_v45 = vld [vmem:[#allocation2 + $0xc98] sm:$0xff]  ;;  %v557_v63 = vld [vmem:[#allocation2 + $0xba8] sm:$0xff] }
  0xed   :  { %954 = vmatpush1.msra.mxu0 %v442_v7  ;;  %892 = vmatprep.subr.mxu1 %v403_v8  ;;  %v330_v46 = vld [vmem:[#allocation2 + $0x490] sm:$0xff]  ;;  %v323_v49 = vld [vmem:[#allocation2 + $0x458] sm:$0xff]  ;;  %v300_v0 = vld [vmem:[#allocation2 + $0x3a0] sm:$0xff] }
  0xee   :  { %963 = vmatprep.subr.mxu0 %v659_v9  ;;  %893 = vmatpush2.msra.mxu1 %v402_v10  ;;  %v586_v47 = vld [vmem:[#allocation2 + $0xc90] sm:$0xff]  ;;  %v579_v51 = vld [vmem:[#allocation2 + $0xc58] sm:$0xff]  ;;  %v556_v2 = vld [vmem:[#allocation2 + $0xba0] sm:$0xff] }
  0xef   :  { %964 = vmatpush2.msra.mxu0 %v658_v11  ;;  %894 = vmatprep.subr.mxu1 %v395_v12  ;;  %v322_v52 = vld [vmem:[#allocation2 + $0x450] sm:$0xff]  ;;  %v315_v54 = vld [vmem:[#allocation2 + $0x418] sm:$0xff]  ;;  %v293_v4 = vld [vmem:[#allocation2 + $0x368] sm:$0xff] }
  0xf0   :  { %965 = vmatprep.subr.mxu0 %v651_v13  ;;  %895 = vmatpush2.msra.mxu1 %v394_v14  ;;  %v578_v53 = vld [vmem:[#allocation2 + $0xc50] sm:$0xff]  ;;  %v571_v55 = vld [vmem:[#allocation2 + $0xc18] sm:$0xff]  ;;  %v549_v5 = vld [vmem:[#allocation2 + $0xb68] sm:$0xff] }
  0xf1   :  { %966 = vmatpush2.msra.mxu0 %v650_v15  ;;  %896 = vmatprep.subr.mxu1 %v387_v16  ;;  %v314_v56 = vld [vmem:[#allocation2 + $0x410] sm:$0xff]  ;;  %v292_v6 = vld [vmem:[#allocation2 + $0x360] sm:$0xff]  ;;  %v285_v8 = vld [vmem:[#allocation2 + $0x328] sm:$0xff] }
  0xf2   :  { %967 = vmatprep.subr.mxu0 %v643_v17  ;;  %897 = vmatpush2.msra.mxu1 %v386_v18  ;;  %v570_v57 = vld [vmem:[#allocation2 + $0xc10] sm:$0xff]  ;;  %v548_v7 = vld [vmem:[#allocation2 + $0xb60] sm:$0xff]  ;;  %v541_v9 = vld [vmem:[#allocation2 + $0xb28] sm:$0xff] }
  0xf3   :  { %968 = vmatpush2.msra.mxu0 %v642_v19  ;;  %898 = vmatprep.subr.mxu1 %v379_v20  ;;  %v284_v10 = vld [vmem:[#allocation2 + $0x320] sm:$0xff]  ;;  %v277_v12 = vld [vmem:[#allocation2 + $0x2e8] sm:$0xff] }
  0xf4   :  { %969 = vmatprep.subr.mxu0 %v635_v21  ;;  %899 = vmatpush2.msra.mxu1 %v378_v22  ;;  %v540_v11 = vld [vmem:[#allocation2 + $0xb20] sm:$0xff]  ;;  %v533_v13 = vld [vmem:[#allocation2 + $0xae8] sm:$0xff] }
  0xf5   :  { %970 = vmatpush2.msra.mxu0 %v634_v23  ;;  %900 = vmatprep.subr.mxu1 %v371_v24  ;;  %v276_v14 = vld [vmem:[#allocation2 + $0x2e0] sm:$0xff]  ;;  %v269_v16 = vld [vmem:[#allocation2 + $0x2a8] sm:$0xff] }
  0xf6   :  { %971 = vmatprep.subr.mxu0 %v627_v25  ;;  %901 = vmatpush2.msra.mxu1 %v370_v26  ;;  %v532_v15 = vld [vmem:[#allocation2 + $0xae0] sm:$0xff]  ;;  %v525_v17 = vld [vmem:[#allocation2 + $0xaa8] sm:$0xff] }
  0xf7   :  { %972 = vmatpush2.msra.mxu0 %v626_v27  ;;  %902 = vmatprep.subr.mxu1 %v363_v28  ;;  %v268_v18 = vld [vmem:[#allocation2 + $0x2a0] sm:$0xff]  ;;  %v261_v20 = vld [vmem:[#allocation2 + $0x268] sm:$0xff] }
  0xf8   :  { %973 = vmatprep.subr.mxu0 %v619_v29  ;;  %903 = vmatpush2.msra.mxu1 %v362_v30  ;;  %v524_v19 = vld [vmem:[#allocation2 + $0xaa0] sm:$0xff]  ;;  %v517_v21 = vld [vmem:[#allocation2 + $0xa68] sm:$0xff] }
  0xf9   :  { %974 = vmatpush2.msra.mxu0 %v618_v31  ;;  %904 = vmatprep.subr.mxu1 %v355_v32  ;;  %v260_v22 = vld [vmem:[#allocation2 + $0x260] sm:$0xff]  ;;  %v253_v24 = vld [vmem:[#allocation2 + $0x228] sm:$0xff] }
  0xfa   :  { %975 = vmatprep.subr.mxu0 %v611_v33  ;;  %905 = vmatpush2.msra.mxu1 %v354_v34  ;;  %v516_v23 = vld [vmem:[#allocation2 + $0xa60] sm:$0xff]  ;;  %v509_v25 = vld [vmem:[#allocation2 + $0xa28] sm:$0xff] }
  0xfb   :  { %976 = vmatpush2.msra.mxu0 %v610_v35  ;;  %906 = vmatprep.subr.mxu1 %v347_v36  ;;  %v252_v26 = vld [vmem:[#allocation2 + $0x220] sm:$0xff]  ;;  %v245_v28 = vld [vmem:[#allocation2 + $0x1e8] sm:$0xff] }
  0xfc   :  { %977 = vmatprep.subr.mxu0 %v603_v37  ;;  %907 = vmatpush2.msra.mxu1 %v346_v38  ;;  %v508_v27 = vld [vmem:[#allocation2 + $0xa20] sm:$0xff]  ;;  %v501_v29 = vld [vmem:[#allocation2 + $0x9e8] sm:$0xff] }
  0xfd   :  { %978 = vmatpush2.msra.mxu0 %v602_v39  ;;  %908 = vmatprep.subr.mxu1 %v339_v40  ;;  %v244_v30 = vld [vmem:[#allocation2 + $0x1e0] sm:$0xff]  ;;  %v237_v32 = vld [vmem:[#allocation2 + $0x1a8] sm:$0xff] }
  0xfe   :  { %979 = vmatprep.subr.mxu0 %v595_v41  ;;  %909 = vmatpush2.msra.mxu1 %v338_v42  ;;  %v500_v31 = vld [vmem:[#allocation2 + $0x9e0] sm:$0xff]  ;;  %v493_v33 = vld [vmem:[#allocation2 + $0x9a8] sm:$0xff] }
  0xff   :  { %980 = vmatpush2.msra.mxu0 %v594_v43  ;;  %910 = vmatprep.subr.mxu1 %v331_v44  ;;  %v236_v34 = vld [vmem:[#allocation2 + $0x1a0] sm:$0xff]  ;;  %v229_v36 = vld [vmem:[#allocation2 + $0x168] sm:$0xff] }
 0x100   :  { %981 = vmatprep.subr.mxu0 %v587_v45  ;;  %911 = vmatpush2.msra.mxu1 %v330_v46  ;;  %v492_v35 = vld [vmem:[#allocation2 + $0x9a0] sm:$0xff]  ;;  %v485_v37 = vld [vmem:[#allocation2 + $0x968] sm:$0xff] }
 0x101   :  { %982 = vmatpush2.msra.mxu0 %v586_v47  ;;  %912 = vmatprep.subr.mxu1 %v323_v49  ;;  %v228_v38 = vld [vmem:[#allocation2 + $0x160] sm:$0xff]  ;;  %v221_v40 = vld [vmem:[#allocation2 + $0x128] sm:$0xff] }
 0x102   :  { %983 = vmatprep.subr.mxu0 %v579_v51  ;;  %913 = vmatpush2.msra.mxu1 %v322_v52  ;;  %v484_v39 = vld [vmem:[#allocation2 + $0x960] sm:$0xff]  ;;  %v477_v41 = vld [vmem:[#allocation2 + $0x928] sm:$0xff] }
 0x103   :  { %984 = vmatpush2.msra.mxu0 %v578_v53  ;;  %914 = vmatprep.subr.mxu1 %v315_v54  ;;  %v220_v42 = vld [vmem:[#allocation2 + $0x120] sm:$0xff]  ;;  %v213_v44 = vld [vmem:[#allocation2 + $0xe8] sm:$0xff] }
 0x104   :  { %985 = vmatprep.subr.mxu0 %v571_v55  ;;  %915 = vmatpush2.msra.mxu1 %v314_v56  ;;  %v476_v43 = vld [vmem:[#allocation2 + $0x920] sm:$0xff]  ;;  %v469_v45 = vld [vmem:[#allocation2 + $0x8e8] sm:$0xff] }
 0x105   :  { %916 = vmatprep.mubr.f32.mxu1 %v5797_v1  ;;  %986 = vmatpush2.msra.mxu0 %v570_v57  ;;  %v212_v46 = vld [vmem:[#allocation2 + $0xe0] sm:$0xff]  ;;  %v205_v49 = vld [vmem:[#allocation2 + $0xa8] sm:$0xff] }
 0x106   :  { %917 = vmatmul.mubr.f32.vlgmr.msra.gmra.mxu1 %v5802_v3  ;;  %4853 = vmatprep.mubr.msk.f32.mxu0 %vm706_vm0, %v5784_v48  ;;  %v468_v47 = vld [vmem:[#allocation2 + $0x8e0] sm:$0xff]  ;;  %v461_v51 = vld [vmem:[#allocation2 + $0x8a8] sm:$0xff] }
 0x107   :  { %994 = vmatprep.subr.mxu0 %v309_v58  ;;  %1065 = vmatprep.subr.mxu1 %v565_v59  ;;  %v204_v52 = vld [vmem:[#allocation2 + $0xa0] sm:$0xff]  ;;  %v197_v54 = vld [vmem:[#allocation2 + $0x68] sm:$0xff] }
 0x108   :  { %988 = vmatmul.mubr.f32.vlgmr.msra.gmra.mxu0 %v5789_v50  ;;  %1066 = vmatpush1.msra.mxu1 %v564_v61  ;;  %v460_v53 = vld [vmem:[#allocation2 + $0x8a0] sm:$0xff]  ;;  %v453_v55 = vld [vmem:[#allocation2 + $0x868] sm:$0xff] }
 0x109   :  { %995 = vmatpush1.msra.mxu0 %v308_v60  ;;  %1067 = vmatprep.subr.mxu1 %v557_v63  ;;  %v196_v56 = vld [vmem:[#allocation2 + $0x60] sm:$0xff]  ;;  %v189_v58 = vld [vmem:[#allocation2 + $0x28] sm:$0xff] }
 0x10a   :  { %996 = vmatprep.subr.mxu0 %v301_v62  ;;  %1068 = vmatpush1.msra.mxu1 %v556_v2  ;;  %v452_v57 = vld [vmem:[#allocation2 + $0x860] sm:$0xff]  ;;  %v445_v59 = vld [vmem:[#allocation2 + $0x828] sm:$0xff] }
 0x10b   :  { %997 = vmatpush1.msra.mxu0 %v300_v0  ;;  %1069 = vmatprep.subr.mxu1 %v549_v5  ;;  %v188_v60 = vld [vmem:[#allocation2 + $0x20] sm:$0xff]  ;;  %v437_v62 = vld [vmem:[#allocation2 + $0x7e8] sm:$0xff] }
 0x10c   :  { %998 = vmatprep.subr.mxu0 %v293_v4  ;;  %1070 = vmatpush1.msra.mxu1 %v548_v7  ;;  %v444_v61 = vld [vmem:[#allocation2 + $0x820] sm:$0xff]  ;;  %v661_v63 = vld [vmem:[#allocation2 + $0xee8] sm:$0xff] }
 0x10d   :  { %999 = vmatpush1.msra.mxu0 %v292_v6  ;;  %1071 = vmatprep.subr.mxu1 %v541_v9  ;;  %v436_v0 = vld [vmem:[#allocation2 + $0x7e0] sm:$0xff]  ;;  %v429_v4 = vld [vmem:[#allocation2 + $0x7a8] sm:$0xff] }
 0x10e   :  { %1000 = vmatprep.subr.mxu0 %v285_v8  ;;  %1072 = vmatpush1.msra.mxu1 %v540_v11  ;;  %v660_v2 = vld [vmem:[#allocation2 + $0xee0] sm:$0xff]  ;;  %v653_v5 = vld [vmem:[#allocation2 + $0xea8] sm:$0xff] }
 0x10f   :  { %1001 = vmatpush1.msra.mxu0 %v284_v10  ;;  %1073 = vmatprep.subr.mxu1 %v533_v13  ;;  %v428_v6 = vld [vmem:[#allocation2 + $0x7a0] sm:$0xff]  ;;  %v421_v8 = vld [vmem:[#allocation2 + $0x768] sm:$0xff] }
 0x110   :  { %1002 = vmatprep.subr.mxu0 %v277_v12  ;;  %1074 = vmatpush1.msra.mxu1 %v532_v15  ;;  %v652_v7 = vld [vmem:[#allocation2 + $0xea0] sm:$0xff]  ;;  %v645_v9 = vld [vmem:[#allocation2 + $0xe68] sm:$0xff] }
 0x111   :  { %1003 = vmatpush1.msra.mxu0 %v276_v14  ;;  %1075 = vmatprep.subr.mxu1 %v525_v17  ;;  %v420_v10 = vld [vmem:[#allocation2 + $0x760] sm:$0xff]  ;;  %v413_v12 = vld [vmem:[#allocation2 + $0x728] sm:$0xff] }
 0x112   :  { %1004 = vmatprep.subr.mxu0 %v269_v16  ;;  %1076 = vmatpush1.msra.mxu1 %v524_v19  ;;  %v644_v11 = vld [vmem:[#allocation2 + $0xe60] sm:$0xff]  ;;  %v637_v13 = vld [vmem:[#allocation2 + $0xe28] sm:$0xff] }
 0x113   :  { %1005 = vmatpush1.msra.mxu0 %v268_v18  ;;  %1077 = vmatprep.subr.mxu1 %v517_v21  ;;  %v412_v14 = vld [vmem:[#allocation2 + $0x720] sm:$0xff]  ;;  %v405_v16 = vld [vmem:[#allocation2 + $0x6e8] sm:$0xff] }
 0x114   :  { %1006 = vmatprep.subr.mxu0 %v261_v20  ;;  %1078 = vmatpush1.msra.mxu1 %v516_v23  ;;  %v636_v15 = vld [vmem:[#allocation2 + $0xe20] sm:$0xff]  ;;  %v629_v17 = vld [vmem:[#allocation2 + $0xde8] sm:$0xff] }
 0x115   :  { %1007 = vmatpush1.msra.mxu0 %v260_v22  ;;  %1079 = vmatprep.subr.mxu1 %v509_v25  ;;  %v404_v18 = vld [vmem:[#allocation2 + $0x6e0] sm:$0xff]  ;;  %v397_v20 = vld [vmem:[#allocation2 + $0x6a8] sm:$0xff] }
 0x116   :  { %1008 = vmatprep.subr.mxu0 %v253_v24  ;;  %1080 = vmatpush1.msra.mxu1 %v508_v27  ;;  %v628_v19 = vld [vmem:[#allocation2 + $0xde0] sm:$0xff]  ;;  %v621_v21 = vld [vmem:[#allocation2 + $0xda8] sm:$0xff] }
 0x117   :  { %1009 = vmatpush1.msra.mxu0 %v252_v26  ;;  %1081 = vmatprep.subr.mxu1 %v501_v29  ;;  %v396_v22 = vld [vmem:[#allocation2 + $0x6a0] sm:$0xff]  ;;  %v389_v24 = vld [vmem:[#allocation2 + $0x668] sm:$0xff] }
 0x118   :  { %1010 = vmatprep.subr.mxu0 %v245_v28  ;;  %1082 = vmatpush1.msra.mxu1 %v500_v31  ;;  %v620_v23 = vld [vmem:[#allocation2 + $0xda0] sm:$0xff]  ;;  %v613_v25 = vld [vmem:[#allocation2 + $0xd68] sm:$0xff] }
 0x119   :  { %1011 = vmatpush1.msra.mxu0 %v244_v30  ;;  %1083 = vmatprep.subr.mxu1 %v493_v33  ;;  %v388_v26 = vld [vmem:[#allocation2 + $0x660] sm:$0xff]  ;;  %v381_v28 = vld [vmem:[#allocation2 + $0x628] sm:$0xff] }
 0x11a   :  { %1012 = vmatprep.subr.mxu0 %v237_v32  ;;  %1084 = vmatpush1.msra.mxu1 %v492_v35  ;;  %v612_v27 = vld [vmem:[#allocation2 + $0xd60] sm:$0xff]  ;;  %v605_v29 = vld [vmem:[#allocation2 + $0xd28] sm:$0xff] }
 0x11b   :  { %1013 = vmatpush1.msra.mxu0 %v236_v34  ;;  %1085 = vmatprep.subr.mxu1 %v485_v37  ;;  %v380_v30 = vld [vmem:[#allocation2 + $0x620] sm:$0xff]  ;;  %v373_v32 = vld [vmem:[#allocation2 + $0x5e8] sm:$0xff] }
 0x11c   :  { %1014 = vmatprep.subr.mxu0 %v229_v36  ;;  %1086 = vmatpush1.msra.mxu1 %v484_v39  ;;  %v604_v31 = vld [vmem:[#allocation2 + $0xd20] sm:$0xff]  ;;  %v597_v33 = vld [vmem:[#allocation2 + $0xce8] sm:$0xff] }
 0x11d   :  { %1015 = vmatpush1.msra.mxu0 %v228_v38  ;;  %1087 = vmatprep.subr.mxu1 %v477_v41  ;;  %v372_v34 = vld [vmem:[#allocation2 + $0x5e0] sm:$0xff]  ;;  %v365_v36 = vld [vmem:[#allocation2 + $0x5a8] sm:$0xff] }
 0x11e   :  { %1016 = vmatprep.subr.mxu0 %v221_v40  ;;  %1088 = vmatpush1.msra.mxu1 %v476_v43  ;;  %v596_v35 = vld [vmem:[#allocation2 + $0xce0] sm:$0xff]  ;;  %v589_v37 = vld [vmem:[#allocation2 + $0xca8] sm:$0xff] }
 0x11f   :  { %1017 = vmatpush1.msra.mxu0 %v220_v42  ;;  %1089 = vmatprep.subr.mxu1 %v469_v45  ;;  %v364_v38 = vld [vmem:[#allocation2 + $0x5a0] sm:$0xff]  ;;  %v357_v40 = vld [vmem:[#allocation2 + $0x568] sm:$0xff] }
 0x120   :  { %1018 = vmatprep.subr.mxu0 %v213_v44  ;;  %1090 = vmatpush1.msra.mxu1 %v468_v47  ;;  %v588_v39 = vld [vmem:[#allocation2 + $0xca0] sm:$0xff]  ;;  %v581_v41 = vld [vmem:[#allocation2 + $0xc68] sm:$0xff] }
 0x121   :  { %1019 = vmatpush1.msra.mxu0 %v212_v46  ;;  %1091 = vmatprep.subr.mxu1 %v461_v51  ;;  %v356_v42 = vld [vmem:[#allocation2 + $0x560] sm:$0xff]  ;;  %v349_v44 = vld [vmem:[#allocation2 + $0x528] sm:$0xff]  ;;  %v311_v51 = vld [vmem:[#allocation2 + $0x3f8] sm:$0xff] }
 0x122   :  { %1020 = vmatprep.subr.mxu0 %v205_v49  ;;  %1092 = vmatpush1.msra.mxu1 %v460_v53  ;;  %v580_v43 = vld [vmem:[#allocation2 + $0xc60] sm:$0xff]  ;;  %v573_v45 = vld [vmem:[#allocation2 + $0xc28] sm:$0xff]  ;;  %v310_v53 = vld [vmem:[#allocation2 + $0x3f0] sm:$0xff] }
 0x123   :  { %1021 = vmatpush1.msra.mxu0 %v204_v52  ;;  %1093 = vmatprep.subr.mxu1 %v453_v55  ;;  %v348_v46 = vld [vmem:[#allocation2 + $0x520] sm:$0xff]  ;;  %v341_v49 = vld [vmem:[#allocation2 + $0x4e8] sm:$0xff]  ;;  %v303_v55 = vld [vmem:[#allocation2 + $0x3b8] sm:$0xff] }
 0x124   :  { %1022 = vmatprep.subr.mxu0 %v197_v54  ;;  %1094 = vmatpush1.msra.mxu1 %v452_v57  ;;  %v572_v47 = vld [vmem:[#allocation2 + $0xc20] sm:$0xff]  ;;  %v333_v54 = vld [vmem:[#allocation2 + $0x4a8] sm:$0xff]  ;;  %v302_v57 = vld [vmem:[#allocation2 + $0x3b0] sm:$0xff] }
 0x125   :  { %1023 = vmatpush1.msra.mxu0 %v196_v56  ;;  %1095 = vmatprep.subr.mxu1 %v445_v59  ;;  %v340_v52 = vld [vmem:[#allocation2 + $0x4e0] sm:$0xff]  ;;  %v295_v59 = vld [vmem:[#allocation2 + $0x378] sm:$0xff] }
 0x126   :  { %1024 = vmatprep.subr.mxu0 %v189_v58  ;;  %1096 = vmatpush1.msra.mxu1 %v444_v61  ;;  %v332_v56 = vld [vmem:[#allocation2 + $0x4a0] sm:$0xff]  ;;  %v325_v58 = vld [vmem:[#allocation2 + $0x468] sm:$0xff]  ;;  %v294_v61 = vld [vmem:[#allocation2 + $0x370] sm:$0xff] }
 0x127   :  { %1025 = vmatpush1.msra.mxu0 %v188_v60  ;;  %1105 = vmatprep.subr.mxu1 %v661_v63  ;;  %v324_v60 = vld [vmem:[#allocation2 + $0x460] sm:$0xff] }
 0x128   :  { %1026 = vmatprep.subr.mxu0 %v437_v62  ;;  %1106 = vmatpush2.msra.mxu1 %v660_v2  ;;  %v317_v62 = vld [vmem:[#allocation2 + $0x428] sm:$0xff]  ;;  %v316_v63 = vld [vmem:[#allocation2 + $0x420] sm:$0xff]  ;;  %v567_v2 = vld [vmem:[#allocation2 + $0xbf8] sm:$0xff] }
 0x129   :  { %1027 = vmatpush2.msra.mxu0 %v436_v0  ;;  %1107 = vmatprep.subr.mxu1 %v653_v5  ;;  %v279_v0 = vld [vmem:[#allocation2 + $0x2f8] sm:$0xff]  ;;  %v566_v5 = vld [vmem:[#allocation2 + $0xbf0] sm:$0xff] }
 0x12a   :  { %1028 = vmatprep.subr.mxu0 %v429_v4  ;;  %1108 = vmatpush2.msra.mxu1 %v652_v7  ;;  %v278_v4 = vld [vmem:[#allocation2 + $0x2f0] sm:$0xff]  ;;  %v559_v7 = vld [vmem:[#allocation2 + $0xbb8] sm:$0xff] }
 0x12b   :  { %1029 = vmatpush2.msra.mxu0 %v428_v6  ;;  %1109 = vmatprep.subr.mxu1 %v645_v9  ;;  %v271_v6 = vld [vmem:[#allocation2 + $0x2b8] sm:$0xff]  ;;  %v558_v9 = vld [vmem:[#allocation2 + $0xbb0] sm:$0xff] }
 0x12c   :  { %1030 = vmatprep.subr.mxu0 %v421_v8  ;;  %1110 = vmatpush2.msra.mxu1 %v644_v11  ;;  %v270_v8 = vld [vmem:[#allocation2 + $0x2b0] sm:$0xff]  ;;  %v551_v11 = vld [vmem:[#allocation2 + $0xb78] sm:$0xff] }
 0x12d   :  { %1031 = vmatpush2.msra.mxu0 %v420_v10  ;;  %1111 = vmatprep.subr.mxu1 %v637_v13  ;;  %v263_v10 = vld [vmem:[#allocation2 + $0x278] sm:$0xff]  ;;  %v550_v13 = vld [vmem:[#allocation2 + $0xb70] sm:$0xff] }
 0x12e   :  { %1032 = vmatprep.subr.mxu0 %v413_v12  ;;  %1112 = vmatpush2.msra.mxu1 %v636_v15  ;;  %v262_v12 = vld [vmem:[#allocation2 + $0x270] sm:$0xff] }
 0x12f   :  { %1033 = vmatpush2.msra.mxu0 %v412_v14  ;;  %1113 = vmatprep.subr.mxu1 %v629_v17  ;;  %v543_v14 = vld [vmem:[#allocation2 + $0xb38] sm:$0xff]  ;;  %v542_v15 = vld [vmem:[#allocation2 + $0xb30] sm:$0xff] }
 0x130   :  { %1034 = vmatprep.subr.mxu0 %v405_v16  ;;  %1114 = vmatpush2.msra.mxu1 %v628_v19  ;;  %v247_v16 = vld [vmem:[#allocation2 + $0x1f8] sm:$0xff]  ;;  %v534_v19 = vld [vmem:[#allocation2 + $0xaf0] sm:$0xff] }
 0x131   :  { %1035 = vmatpush2.msra.mxu0 %v404_v18  ;;  %1115 = vmatprep.subr.mxu1 %v621_v21  ;;  %v535_v17 = vld [vmem:[#allocation2 + $0xaf8] sm:$0xff]  ;;  %v246_v18 = vld [vmem:[#allocation2 + $0x1f0] sm:$0xff] }
 0x132   :  { %1036 = vmatprep.subr.mxu0 %v397_v20  ;;  %1116 = vmatpush2.msra.mxu1 %v620_v23  ;;  %v239_v20 = vld [vmem:[#allocation2 + $0x1b8] sm:$0xff]  ;;  %v526_v23 = vld [vmem:[#allocation2 + $0xab0] sm:$0xff] }
 0x133   :  { %1037 = vmatpush2.msra.mxu0 %v396_v22  ;;  %1117 = vmatprep.subr.mxu1 %v613_v25  ;;  %v527_v21 = vld [vmem:[#allocation2 + $0xab8] sm:$0xff]  ;;  %v238_v22 = vld [vmem:[#allocation2 + $0x1b0] sm:$0xff] }
 0x134   :  { %1038 = vmatprep.subr.mxu0 %v389_v24  ;;  %1118 = vmatpush2.msra.mxu1 %v612_v27  ;;  %v231_v24 = vld [vmem:[#allocation2 + $0x178] sm:$0xff]  ;;  %v518_v27 = vld [vmem:[#allocation2 + $0xa70] sm:$0xff] }
 0x135   :  { %1039 = vmatpush2.msra.mxu0 %v388_v26  ;;  %1119 = vmatprep.subr.mxu1 %v605_v29  ;;  %v519_v25 = vld [vmem:[#allocation2 + $0xa78] sm:$0xff]  ;;  %v230_v26 = vld [vmem:[#allocation2 + $0x170] sm:$0xff] }
 0x136   :  { %1040 = vmatprep.subr.mxu0 %v381_v28  ;;  %1120 = vmatpush2.msra.mxu1 %v604_v31  ;;  %v223_v28 = vld [vmem:[#allocation2 + $0x138] sm:$0xff]  ;;  %v510_v31 = vld [vmem:[#allocation2 + $0xa30] sm:$0xff] }
 0x137   :  { %1041 = vmatpush2.msra.mxu0 %v380_v30  ;;  %1121 = vmatprep.subr.mxu1 %v597_v33  ;;  %v511_v29 = vld [vmem:[#allocation2 + $0xa38] sm:$0xff]  ;;  %v222_v30 = vld [vmem:[#allocation2 + $0x130] sm:$0xff] }
 0x138   :  { %1042 = vmatprep.subr.mxu0 %v373_v32  ;;  %1122 = vmatpush2.msra.mxu1 %v596_v35  ;;  %v215_v32 = vld [vmem:[#allocation2 + $0xf8] sm:$0xff]  ;;  %v502_v35 = vld [vmem:[#allocation2 + $0x9f0] sm:$0xff] }
 0x139   :  { %1043 = vmatpush2.msra.mxu0 %v372_v34  ;;  %1123 = vmatprep.subr.mxu1 %v589_v37  ;;  %v503_v33 = vld [vmem:[#allocation2 + $0x9f8] sm:$0xff]  ;;  %v214_v34 = vld [vmem:[#allocation2 + $0xf0] sm:$0xff] }
 0x13a   :  { %1044 = vmatprep.subr.mxu0 %v365_v36  ;;  %1124 = vmatpush2.msra.mxu1 %v588_v39  ;;  %v207_v36 = vld [vmem:[#allocation2 + $0xb8] sm:$0xff]  ;;  %v494_v39 = vld [vmem:[#allocation2 + $0x9b0] sm:$0xff] }
 0x13b   :  { %1045 = vmatpush2.msra.mxu0 %v364_v38  ;;  %1125 = vmatprep.subr.mxu1 %v581_v41  ;;  %v495_v37 = vld [vmem:[#allocation2 + $0x9b8] sm:$0xff]  ;;  %v206_v38 = vld [vmem:[#allocation2 + $0xb0] sm:$0xff] }
 0x13c   :  { %1046 = vmatprep.subr.mxu0 %v357_v40  ;;  %1126 = vmatpush2.msra.mxu1 %v580_v43  ;;  %v199_v40 = vld [vmem:[#allocation2 + $0x78] sm:$0xff]  ;;  %v486_v43 = vld [vmem:[#allocation2 + $0x970] sm:$0xff] }
 0x13d   :  { %1047 = vmatpush2.msra.mxu0 %v356_v42  ;;  %1127 = vmatprep.subr.mxu1 %v573_v45  ;;  %v487_v41 = vld [vmem:[#allocation2 + $0x978] sm:$0xff]  ;;  %v198_v42 = vld [vmem:[#allocation2 + $0x70] sm:$0xff] }
 0x13e   :  { %1048 = vmatprep.subr.mxu0 %v349_v44  ;;  %1128 = vmatpush2.msra.mxu1 %v572_v47  ;;  %v191_v44 = vld [vmem:[#allocation2 + $0x38] sm:$0xff]  ;;  %v478_v47 = vld [vmem:[#allocation2 + $0x930] sm:$0xff] }
 0x13f   :  { %1049 = vmatpush2.msra.mxu0 %v348_v46  ;;  %4854 = vmatprep.mubr.msk.f32.mxu1 %vm706_vm0, %v5784_v48  ;;  %v287_v48 = vld [vmem:[#allocation2 + $0x338] sm:$0xff]  ;;  %v190_v46 = vld [vmem:[#allocation2 + $0x30] sm:$0xff] }
 0x140   :  { %1050 = vmatprep.subr.mxu0 %v341_v49  ;;  %1130 = vmatmul.mubr.f32.vlgmr.msra.gmra.mxu1 %v5789_v50  ;;  %v286_v50 = vld [vmem:[#allocation2 + $0x330] sm:$0xff]  ;;  %v479_v45 = vld [vmem:[#allocation2 + $0x938] sm:$0xff] }
 0x141   :  { %1136 = vmatprep.subr.mxu1 %v311_v51  ;;  %1051 = vmatpush2.msra.mxu0 %v340_v52  ;;  %v439_v49 = vld [vmem:[#allocation2 + $0x7f8] sm:$0xff]  ;;  %v438_v52 = vld [vmem:[#allocation2 + $0x7f0] sm:$0xff] }
 0x142   :  { %1137 = vmatpush1.msra.mxu1 %v310_v53  ;;  %1052 = vmatprep.subr.mxu0 %v333_v54  ;;  %v471_v51 = vld [vmem:[#allocation2 + $0x8f8] sm:$0xff]  ;;  %v470_v53 = vld [vmem:[#allocation2 + $0x8f0] sm:$0xff] }
 0x143   :  { %1138 = vmatprep.subr.mxu1 %v303_v55  ;;  %1053 = vmatpush2.msra.mxu0 %v332_v56  ;;  %v431_v54 = vld [vmem:[#allocation2 + $0x7b8] sm:$0xff]  ;;  %v430_v56 = vld [vmem:[#allocation2 + $0x7b0] sm:$0xff] }
 0x144   :  { %1139 = vmatpush1.msra.mxu1 %v302_v57  ;;  %1054 = vmatprep.subr.mxu0 %v325_v58  ;;  %v463_v55 = vld [vmem:[#allocation2 + $0x8b8] sm:$0xff]  ;;  %v462_v57 = vld [vmem:[#allocation2 + $0x8b0] sm:$0xff] }
 0x145   :  { %1140 = vmatprep.subr.mxu1 %v295_v59  ;;  %1055 = vmatpush2.msra.mxu0 %v324_v60  ;;  %v423_v58 = vld [vmem:[#allocation2 + $0x778] sm:$0xff]  ;;  %v422_v60 = vld [vmem:[#allocation2 + $0x770] sm:$0xff] }
 0x146   :  { %1141 = vmatpush1.msra.mxu1 %v294_v61  ;;  %1056 = vmatprep.subr.mxu0 %v317_v62  ;;  %v455_v59 = vld [vmem:[#allocation2 + $0x878] sm:$0xff]  ;;  %v454_v61 = vld [vmem:[#allocation2 + $0x870] sm:$0xff] }
 0x147   :  { %1142 = vmatprep.subr.mxu1 %v287_v48  ;;  %1057 = vmatpush2.msra.mxu0 %v316_v63  ;;  %v415_v62 = vld [vmem:[#allocation2 + $0x738] sm:$0xff]  ;;  %v414_v63 = vld [vmem:[#allocation2 + $0x730] sm:$0xff] }
 0x148   :  { %1058 = vmatprep.mubr.f32.mxu0 %v5797_v1  ;;  %1143 = vmatpush1.msra.mxu1 %v286_v50  ;;  %v255_v1 = vld [vmem:[#allocation2 + $0x238] sm:$0xff]  ;;  %v446_v50 = vld [vmem:[#allocation2 + $0x830] sm:$0xff] }
 0x149   :  { %1059 = vmatmul.mubr.f32.vlgmr.msra.gmra.mxu0 %v5802_v3  ;;  %1144 = vmatprep.subr.mxu1 %v279_v0  ;;  %v254_v3 = vld [vmem:[#allocation2 + $0x230] sm:$0xff]  ;;  %v447_v48 = vld [vmem:[#allocation2 + $0x838] sm:$0xff] }
 0x14a   :  { %1207 = vmatprep.subr.mxu0 %v567_v2  ;;  %1145 = vmatpush1.msra.mxu1 %v278_v4  ;;  %v407_v0 = vld [vmem:[#allocation2 + $0x6f8] sm:$0xff]  ;;  %v406_v4 = vld [vmem:[#allocation2 + $0x6f0] sm:$0xff] }
 0x14b   :  { %1208 = vmatpush1.msra.mxu0 %v566_v5  ;;  %1146 = vmatprep.subr.mxu1 %v271_v6  ;;  %v663_v2 = vld [vmem:[#allocation2 + $0xef8] sm:$0xff]  ;;  %v662_v5 = vld [vmem:[#allocation2 + $0xef0] sm:$0xff] }
 0x14c   :  { %1209 = vmatprep.subr.mxu0 %v559_v7  ;;  %1147 = vmatpush1.msra.mxu1 %v270_v8  ;;  %v399_v6 = vld [vmem:[#allocation2 + $0x6b8] sm:$0xff]  ;;  %v398_v8 = vld [vmem:[#allocation2 + $0x6b0] sm:$0xff] }
 0x14d   :  { %1210 = vmatpush1.msra.mxu0 %v558_v9  ;;  %1148 = vmatprep.subr.mxu1 %v263_v10  ;;  %v655_v7 = vld [vmem:[#allocation2 + $0xeb8] sm:$0xff]  ;;  %v654_v9 = vld [vmem:[#allocation2 + $0xeb0] sm:$0xff] }
 0x14e   :  { %1211 = vmatprep.subr.mxu0 %v551_v11  ;;  %1149 = vmatpush1.msra.mxu1 %v262_v12  ;;  %v391_v10 = vld [vmem:[#allocation2 + $0x678] sm:$0xff]  ;;  %v390_v12 = vld [vmem:[#allocation2 + $0x670] sm:$0xff] }
 0x14f   :  { %1212 = vmatpush1.msra.mxu0 %v550_v13  ;;  %1150 = vmatprep.subr.mxu1 %v255_v1  ;;  %v647_v11 = vld [vmem:[#allocation2 + $0xe78] sm:$0xff]  ;;  %v646_v13 = vld [vmem:[#allocation2 + $0xe70] sm:$0xff] }
 0x150   :  { %1213 = vmatprep.subr.mxu0 %v543_v14  ;;  %1151 = vmatpush1.msra.mxu1 %v254_v3  ;;  %v383_v1 = vld [vmem:[#allocation2 + $0x638] sm:$0xff]  ;;  %v382_v3 = vld [vmem:[#allocation2 + $0x630] sm:$0xff] }
 0x151   :  { %1214 = vmatpush1.msra.mxu0 %v542_v15  ;;  %1152 = vmatprep.subr.mxu1 %v247_v16  ;;  %v639_v14 = vld [vmem:[#allocation2 + $0xe38] sm:$0xff]  ;;  %v638_v15 = vld [vmem:[#allocation2 + $0xe30] sm:$0xff] }
 0x152   :  { %1215 = vmatprep.subr.mxu0 %v535_v17  ;;  %1153 = vmatpush1.msra.mxu1 %v246_v18  ;;  %v375_v16 = vld [vmem:[#allocation2 + $0x5f8] sm:$0xff]  ;;  %v374_v18 = vld [vmem:[#allocation2 + $0x5f0] sm:$0xff] }
 0x153   :  { %1216 = vmatpush1.msra.mxu0 %v534_v19  ;;  %1154 = vmatprep.subr.mxu1 %v239_v20  ;;  %v631_v17 = vld [vmem:[#allocation2 + $0xdf8] sm:$0xff]  ;;  %v630_v19 = vld [vmem:[#allocation2 + $0xdf0] sm:$0xff] }
 0x154   :  { %1217 = vmatprep.subr.mxu0 %v527_v21  ;;  %1155 = vmatpush1.msra.mxu1 %v238_v22  ;;  %v367_v20 = vld [vmem:[#allocation2 + $0x5b8] sm:$0xff]  ;;  %v366_v22 = vld [vmem:[#allocation2 + $0x5b0] sm:$0xff] }
 0x155   :  { %1218 = vmatpush1.msra.mxu0 %v526_v23  ;;  %1156 = vmatprep.subr.mxu1 %v231_v24  ;;  %v623_v21 = vld [vmem:[#allocation2 + $0xdb8] sm:$0xff]  ;;  %v622_v23 = vld [vmem:[#allocation2 + $0xdb0] sm:$0xff] }
 0x156   :  { %1219 = vmatprep.subr.mxu0 %v519_v25  ;;  %1157 = vmatpush1.msra.mxu1 %v230_v26  ;;  %v359_v24 = vld [vmem:[#allocation2 + $0x578] sm:$0xff]  ;;  %v358_v26 = vld [vmem:[#allocation2 + $0x570] sm:$0xff] }
 0x157   :  { %1220 = vmatpush1.msra.mxu0 %v518_v27  ;;  %1158 = vmatprep.subr.mxu1 %v223_v28  ;;  %v615_v25 = vld [vmem:[#allocation2 + $0xd78] sm:$0xff]  ;;  %v614_v27 = vld [vmem:[#allocation2 + $0xd70] sm:$0xff] }
 0x158   :  { %1221 = vmatprep.subr.mxu0 %v511_v29  ;;  %1159 = vmatpush1.msra.mxu1 %v222_v30  ;;  %v351_v28 = vld [vmem:[#allocation2 + $0x538] sm:$0xff]  ;;  %v350_v30 = vld [vmem:[#allocation2 + $0x530] sm:$0xff] }
 0x159   :  { %1222 = vmatpush1.msra.mxu0 %v510_v31  ;;  %1160 = vmatprep.subr.mxu1 %v215_v32  ;;  %v607_v29 = vld [vmem:[#allocation2 + $0xd38] sm:$0xff]  ;;  %v606_v31 = vld [vmem:[#allocation2 + $0xd30] sm:$0xff] }
 0x15a   :  { %1223 = vmatprep.subr.mxu0 %v503_v33  ;;  %1161 = vmatpush1.msra.mxu1 %v214_v34  ;;  %v343_v32 = vld [vmem:[#allocation2 + $0x4f8] sm:$0xff]  ;;  %v342_v34 = vld [vmem:[#allocation2 + $0x4f0] sm:$0xff] }
 0x15b   :  { %1224 = vmatpush1.msra.mxu0 %v502_v35  ;;  %1162 = vmatprep.subr.mxu1 %v207_v36  ;;  %v599_v33 = vld [vmem:[#allocation2 + $0xcf8] sm:$0xff]  ;;  %v598_v35 = vld [vmem:[#allocation2 + $0xcf0] sm:$0xff] }
 0x15c   :  { %1225 = vmatprep.subr.mxu0 %v495_v37  ;;  %1163 = vmatpush1.msra.mxu1 %v206_v38  ;;  %v335_v36 = vld [vmem:[#allocation2 + $0x4b8] sm:$0xff]  ;;  %v334_v38 = vld [vmem:[#allocation2 + $0x4b0] sm:$0xff] }
 0x15d   :  { %1226 = vmatpush1.msra.mxu0 %v494_v39  ;;  %1164 = vmatprep.subr.mxu1 %v199_v40  ;;  %v591_v37 = vld [vmem:[#allocation2 + $0xcb8] sm:$0xff]  ;;  %v590_v39 = vld [vmem:[#allocation2 + $0xcb0] sm:$0xff] }
 0x15e   :  { %1227 = vmatprep.subr.mxu0 %v487_v41  ;;  %1165 = vmatpush1.msra.mxu1 %v198_v42  ;;  %v327_v40 = vld [vmem:[#allocation2 + $0x478] sm:$0xff]  ;;  %v326_v42 = vld [vmem:[#allocation2 + $0x470] sm:$0xff] }
 0x15f   :  { %1228 = vmatpush1.msra.mxu0 %v486_v43  ;;  %1166 = vmatprep.subr.mxu1 %v191_v44  ;;  %v583_v41 = vld [vmem:[#allocation2 + $0xc78] sm:$0xff]  ;;  %v582_v43 = vld [vmem:[#allocation2 + $0xc70] sm:$0xff] }
 0x160   :  { %1229 = vmatprep.subr.mxu0 %v479_v45  ;;  %1167 = vmatpush1.msra.mxu1 %v190_v46  ;;  %v319_v44 = vld [vmem:[#allocation2 + $0x438] sm:$0xff]  ;;  %v318_v46 = vld [vmem:[#allocation2 + $0x430] sm:$0xff] }
 0x161   :  { %1230 = vmatpush1.msra.mxu0 %v478_v47  ;;  %1168 = vmatprep.subr.mxu1 %v439_v49  ;;  %v575_v45 = vld [vmem:[#allocation2 + $0xc38] sm:$0xff]  ;;  %v574_v47 = vld [vmem:[#allocation2 + $0xc30] sm:$0xff]  ;;  %v5360_v49 = vld [vmem:[%s6816_s0 + $0x8] sm:$0xff] }
 0x162   :  { %1231 = vmatprep.subr.mxu0 %v471_v51  ;;  %1169 = vmatpush2.msra.mxu1 %v438_v52  ;;  %v1333_v51 = vld [vmem:[#allocation6 + $0xf8] sm:$0xff] }
 0x163   :  { %1232 = vmatpush1.msra.mxu0 %v470_v53  ;;  %1170 = vmatprep.subr.mxu1 %v431_v54  ;;  %v1397_v52 = vld [vmem:[#allocation6 + $0x2f8] sm:$0xff]  ;;  %v5361_v53 = vld [vmem:[%s6816_s0 + $0x18] sm:$0xff] }
 0x164   :  { %1233 = vmatprep.subr.mxu0 %v463_v55  ;;  %1171 = vmatpush2.msra.mxu1 %v430_v56  ;;  %v1332_v54 = vld [vmem:[#allocation6 + $0xf0] sm:$0xff]  ;;  %v666_v55 = vlaneseq }
 0x165   :  { %1234 = vmatpush1.msra.mxu0 %v462_v57  ;;  %1172 = vmatprep.subr.mxu1 %v423_v58  ;;  %v1396_v56 = vld [vmem:[#allocation6 + $0x2f0] sm:$0xff]  ;;  %v5362_v57 = vld [vmem:[%s6816_s0] sm:$0xff]  ;;  %v5363_v58 = vld [vmem:[%s6816_s0 + $0x10] sm:$0xff] }
 0x166   :  { %1235 = vmatprep.subr.mxu0 %v455_v59  ;;  %1173 = vmatpush2.msra.mxu1 %v422_v60  ;;  %v1331_v59 = vld [vmem:[#allocation6 + $0xe8] sm:$0xff] }
 0x167   :  { %1236 = vmatpush1.msra.mxu0 %v454_v61  ;;  %1174 = vmatprep.subr.mxu1 %v415_v62  ;;  %v1395_v60 = vld [vmem:[#allocation6 + $0x2e8] sm:$0xff]  ;;  %v1330_v61 = vld [vmem:[#allocation6 + $0xe0] sm:$0xff] }
 0x168   :  { %1237 = vmatprep.subr.mxu0 %v447_v48  ;;  %1175 = vmatpush2.msra.mxu1 %v414_v63  ;;  %v1394_v62 = vld [vmem:[#allocation6 + $0x2e0] sm:$0xff]  ;;  %v1329_v48 = vld [vmem:[#allocation6 + $0xd8] sm:$0xff] }
 0x169   :  { %1238 = vmatpush1.msra.mxu0 %v446_v50  ;;  %1176 = vmatprep.subr.mxu1 %v407_v0  ;;  %v1393_v63 = vld [vmem:[#allocation6 + $0x2d8] sm:$0xff]  ;;  %v1328_v50 = vld [vmem:[#allocation6 + $0xd0] sm:$0xff]  ;;  %v5829_v0 = vshrl.u32 %v666_v55, 7 }
 0x16a   :  { %1247 = vmatprep.subr.mxu0 %v663_v2  ;;  %1177 = vmatpush2.msra.mxu1 %v406_v4  ;;  %v1392_v2 = vld [vmem:[#allocation6 + $0x2d0] sm:$0xff]  ;;  %v1327_v4 = vld [vmem:[#allocation6 + $0xc8] sm:$0xff] }
 0x16b   :  { %1248 = vmatpush2.msra.mxu0 %v662_v5  ;;  %1178 = vmatprep.subr.mxu1 %v399_v6  ;;  %6914 = vst [vmem:[#allocation25_spill] sm:$0xff] %v5829_v0  ;;  %v1391_v5 = vld [vmem:[#allocation6 + $0x2c8] sm:$0xff]  ;;  %v1326_v6 = vld [vmem:[#allocation6 + $0xc0] sm:$0xff]  ;;  %v1372_v55 = vld [vmem:[#allocation6 + $0x230] sm:$0xff] }
 0x16c   :  { %1249 = vmatprep.subr.mxu0 %v655_v7  ;;  %1179 = vmatpush2.msra.mxu1 %v398_v8  ;;  %v5832_v7 = vsub.s32 1, %v5829_v0  ;;  %v1390_v8 = vld [vmem:[#allocation6 + $0x2c0] sm:$0xff] }
 0x16d   :  { %1250 = vmatpush2.msra.mxu0 %v654_v9  ;;  %1180 = vmatprep.subr.mxu1 %v391_v10  ;;  %v1325_v9 = vld [vmem:[#allocation6 + $0xb8] sm:$0xff] }
 0x16e   :  { %1251 = vmatprep.subr.mxu0 %v647_v11  ;;  %1181 = vmatpush2.msra.mxu1 %v390_v12  ;;  %6915 = vst [vmem:[#allocation26_spill] sm:$0xff] %v5832_v7  ;;  %v1389_v10 = vld [vmem:[#allocation6 + $0x2b8] sm:$0xff]  ;;  %v1324_v11 = vld [vmem:[#allocation6 + $0xb0] sm:$0xff] }
 0x16f   :  { %1252 = vmatpush2.msra.mxu0 %v646_v13  ;;  %1182 = vmatprep.subr.mxu1 %v383_v1  ;;  %v1388_v12 = vld [vmem:[#allocation6 + $0x2b0] sm:$0xff]  ;;  %v1323_v13 = vld [vmem:[#allocation6 + $0xa8] sm:$0xff]  ;;  %v5834_v1 = vld [vmem:[#allocation4] sm:$0xff] }
 0x170   :  { %1253 = vmatprep.subr.mxu0 %v639_v14  ;;  %1183 = vmatpush2.msra.mxu1 %v382_v3  ;;  %v1387_v14 = vld [vmem:[#allocation6 + $0x2a8] sm:$0xff]  ;;  %v1322_v3 = vld [vmem:[#allocation6 + $0xa0] sm:$0xff] }
 0x171   :  { %1254 = vmatpush2.msra.mxu0 %v638_v15  ;;  %1184 = vmatprep.subr.mxu1 %v375_v16  ;;  %v673_v15 = vrot.slane %v5834_v1, %v5832_v7  ;;  %v1386_v16 = vld [vmem:[#allocation6 + $0x2a0] sm:$0xff] }
 0x172   :  { %1255 = vmatprep.subr.mxu0 %v631_v17  ;;  %1185 = vmatpush2.msra.mxu1 %v374_v18  ;;  %v1321_v18 = vld [vmem:[#allocation6 + $0x98] sm:$0xff] }
 0x173   :  { %1256 = vmatpush2.msra.mxu0 %v630_v19  ;;  %1186 = vmatprep.subr.mxu1 %v367_v20  ;;  %v1385_v20 = vld [vmem:[#allocation6 + $0x298] sm:$0xff] }
 0x174   :  { %1257 = vmatprep.subr.mxu0 %v623_v21  ;;  %1187 = vmatpush2.msra.mxu1 %v366_v22  ;;  %v1320_v21 = vld [vmem:[#allocation6 + $0x90] sm:$0xff] }
 0x175   :  { %1258 = vmatpush2.msra.mxu0 %v622_v23  ;;  %1188 = vmatprep.subr.mxu1 %v359_v24  ;;  %v1384_v22 = vld [vmem:[#allocation6 + $0x290] sm:$0xff]  ;;  %v1319_v23 = vld [vmem:[#allocation6 + $0x88] sm:$0xff] }
 0x176   :  { %1259 = vmatprep.subr.mxu0 %v615_v25  ;;  %1189 = vmatpush2.msra.mxu1 %v358_v26  ;;  %v1383_v25 = vld [vmem:[#allocation6 + $0x288] sm:$0xff]  ;;  %v1318_v26 = vld [vmem:[#allocation6 + $0x80] sm:$0xff] }
 0x177   :  { %1260 = vmatpush2.msra.mxu0 %v614_v27  ;;  %1190 = vmatprep.subr.mxu1 %v351_v28  ;;  %v1382_v28 = vld [vmem:[#allocation6 + $0x280] sm:$0xff] }
 0x178   :  { %1261 = vmatprep.subr.mxu0 %v607_v29  ;;  %1191 = vmatpush2.msra.mxu1 %v350_v30  ;;  %v1317_v30 = vld [vmem:[#allocation6 + $0x78] sm:$0xff] }
 0x179   :  { %1262 = vmatpush2.msra.mxu0 %v606_v31  ;;  %1192 = vmatprep.subr.mxu1 %v343_v32  ;;  %v1381_v31 = vld [vmem:[#allocation6 + $0x278] sm:$0xff]  ;;  %v1316_v32 = vld [vmem:[#allocation6 + $0x70] sm:$0xff] }
 0x17a   :  { %1263 = vmatprep.subr.mxu0 %v599_v33  ;;  %1193 = vmatpush2.msra.mxu1 %v342_v34  ;;  %v1380_v34 = vld [vmem:[#allocation6 + $0x270] sm:$0xff] }
 0x17b   :  { %1264 = vmatpush2.msra.mxu0 %v598_v35  ;;  %1194 = vmatprep.subr.mxu1 %v335_v36  ;;  %v1315_v35 = vld [vmem:[#allocation6 + $0x68] sm:$0xff] }
 0x17c   :  { %1265 = vmatprep.subr.mxu0 %v591_v37  ;;  %1195 = vmatpush2.msra.mxu1 %v334_v38  ;;  %v1379_v36 = vld [vmem:[#allocation6 + $0x268] sm:$0xff]  ;;  %v1314_v37 = vld [vmem:[#allocation6 + $0x60] sm:$0xff] }
 0x17d   :  { %1266 = vmatpush2.msra.mxu0 %v590_v39  ;;  %1196 = vmatprep.subr.mxu1 %v327_v40  ;;  %v1313_v39 = vld [vmem:[#allocation6 + $0x58] sm:$0xff]  ;;  %v1378_v40 = vld [vmem:[#allocation6 + $0x260] sm:$0xff] }
 0x17e   :  { %1267 = vmatprep.subr.mxu0 %v583_v41  ;;  %1197 = vmatpush2.msra.mxu1 %v326_v42  ;;  %v1312_v41 = vld [vmem:[#allocation6 + $0x50] sm:$0xff] }
 0x17f   :  { %1268 = vmatpush2.msra.mxu0 %v582_v43  ;;  %1198 = vmatprep.subr.mxu1 %v319_v44  ;;  %v1377_v43 = vld [vmem:[#allocation6 + $0x258] sm:$0xff]  ;;  %v1311_v44 = vld [vmem:[#allocation6 + $0x48] sm:$0xff] }
 0x180   :  { %1269 = vmatprep.subr.mxu0 %v575_v45  ;;  %1199 = vmatpush2.msra.mxu1 %v318_v46  ;;  %v1376_v45 = vld [vmem:[#allocation6 + $0x250] sm:$0xff]  ;;  %v1310_v46 = vld [vmem:[#allocation6 + $0x40] sm:$0xff] }
 0x181   :  { %1200 = vmatprep.mubr.f32.mxu1 %v5360_v49  ;;  %1270 = vmatpush2.msra.mxu0 %v574_v47  ;;  %v1375_v47 = vld [vmem:[#allocation6 + $0x248] sm:$0xff]  ;;  %v1309_v49 = vld [vmem:[#allocation6 + $0x38] sm:$0xff] }
 0x182   :  { %4855 = vmatprep.mubr.msk.f32.mxu0 %vm706_vm0, %v5361_v53  ;;  %1201 = vmatmul.mubr.f32.vlgmr.msra.gmra.mxu1 %v5362_v57  ;;  %v1373_v53 = vld [vmem:[#allocation6 + $0x238] sm:$0xff]  ;;  %v1371_v57 = vld [vmem:[#allocation6 + $0x228] sm:$0xff] }
 0x183   :  { %1272 = vmatmul.mubr.f32.vlgmr.msra.gmra.mxu0 %v5363_v58  ;;  %1558 = vmatprep.subr.mxu0 %v1333_v51  ;;  %v1374_v51 = vld [vmem:[#allocation6 + $0x240] sm:$0xff]  ;;  %v1305_v58 = vld [vmem:[#allocation6 + $0x18] sm:$0xff] }
 0x184   :  { %1629 = vmatprep.subr.mxu1 %v1397_v52  ;;  %1559 = vmatpush1.msra.mxu0 %v1332_v54  ;;  %v5838_v17 = vpop.f32.mrf.mxu1  ;;  %v1308_v52 = vld [vmem:[#allocation6 + $0x30] sm:$0xff]  ;;  %v1307_v54 = vld [vmem:[#allocation6 + $0x28] sm:$0xff] }
 0x185   :  { %1630 = vmatpush1.msra.mxu1 %v1396_v56  ;;  %1560 = vmatprep.subr.mxu0 %v1331_v59  ;;  %v1306_v56 = vld [vmem:[#allocation6 + $0x20] sm:$0xff] }
 0x186   :  { %1631 = vmatprep.subr.mxu1 %v1395_v60  ;;  %1561 = vmatpush1.msra.mxu0 %v1330_v61  ;;  %v849_v29 = vpop.f32.mrf.mxu1  ;;  %v1370_v59 = vld [vmem:[#allocation6 + $0x220] sm:$0xff]  ;;  %v1304_v60 = vld [vmem:[#allocation6 + $0x10] sm:$0xff]  ;;  %v1369_v61 = vld [vmem:[#allocation6 + $0x218] sm:$0xff] }
 0x187   :  { %1632 = vmatpush1.msra.mxu1 %v1394_v62  ;;  %1562 = vmatprep.subr.mxu0 %v1329_v48  ;;  %v1303_v62 = vld [vmem:[#allocation6 + $0x8] sm:$0xff]  ;;  %v1368_v48 = vld [vmem:[#allocation6 + $0x210] sm:$0xff] }
 0x188   :  { %1633 = vmatprep.subr.mxu1 %v1393_v63  ;;  %1563 = vmatpush1.msra.mxu0 %v1328_v50  ;;  %v1302_v63 = vld [vmem:[#allocation6] sm:$0xff]  ;;  %v1367_v50 = vld [vmem:[#allocation6 + $0x208] sm:$0xff] }
 0x189   :  { %1634 = vmatpush1.msra.mxu1 %v1392_v2  ;;  %1564 = vmatprep.subr.mxu0 %v1327_v4  ;;  %v1365_v2 = vld [vmem:[#allocation6 + $0x1f8] sm:$0xff]  ;;  %v1366_v4 = vld [vmem:[#allocation6 + $0x200] sm:$0xff] }
 0x18a   :  { %1635 = vmatprep.subr.mxu1 %v1391_v5  ;;  %1565 = vmatpush1.msra.mxu0 %v1326_v6  ;;  %v1364_v5 = vld [vmem:[#allocation6 + $0x1f0] sm:$0xff]  ;;  %v1429_v6 = vld [vmem:[#allocation6 + $0x3f8] sm:$0xff] }
 0x18b   :  { %1636 = vmatpush1.msra.mxu1 %v1390_v8  ;;  %1566 = vmatprep.subr.mxu0 %v1325_v9  ;;  %v1363_v8 = vld [vmem:[#allocation6 + $0x1e8] sm:$0xff]  ;;  %v1428_v9 = vld [vmem:[#allocation6 + $0x3f0] sm:$0xff] }
 0x18c   :  { %1637 = vmatprep.subr.mxu1 %v1389_v10  ;;  %1567 = vmatpush1.msra.mxu0 %v1324_v11  ;;  %v1362_v10 = vld [vmem:[#allocation6 + $0x1e0] sm:$0xff]  ;;  %v1427_v11 = vld [vmem:[#allocation6 + $0x3e8] sm:$0xff] }
 0x18d   :  { %v5840_v19 = vpop.f32.mrf.mxu0  ;;  %1638 = vmatpush1.msra.mxu1 %v1388_v12  ;;  %1568 = vmatprep.subr.mxu0 %v1323_v13  ;;  %v1361_v12 = vld [vmem:[#allocation6 + $0x1d8] sm:$0xff]  ;;  %v1426_v13 = vld [vmem:[#allocation6 + $0x3e0] sm:$0xff] }
 0x18e   :  { %1639 = vmatprep.subr.mxu1 %v1387_v14  ;;  %1569 = vmatpush1.msra.mxu0 %v1322_v3  ;;  %v1360_v14 = vld [vmem:[#allocation6 + $0x1d0] sm:$0xff]  ;;  %v1425_v3 = vld [vmem:[#allocation6 + $0x3d8] sm:$0xff] }
 0x18f   :  { %v778_v24 = vpop.f32.mrf.mxu0  ;;  %1640 = vmatpush1.msra.mxu1 %v1386_v16  ;;  %1570 = vmatprep.subr.mxu0 %v1321_v18  ;;  %v1424_v16 = vld [vmem:[#allocation6 + $0x3d0] sm:$0xff]  ;;  %v1358_v18 = vld [vmem:[#allocation6 + $0x1c0] sm:$0xff] }
 0x190   :  { %v779_v27 = vadd.f32 %v778_v24, %v673_v15  ;;  %1641 = vmatprep.subr.mxu1 %v1385_v20  ;;  %1571 = vmatpush1.msra.mxu0 %v1320_v21  ;;  %v1359_v15 = vld [vmem:[#allocation6 + $0x1c8] sm:$0xff]  ;;  %v1357_v21 = vld [vmem:[#allocation6 + $0x1b8] sm:$0xff] }
 0x191   :  { %1642 = vmatpush1.msra.mxu1 %v1384_v22  ;;  %1572 = vmatprep.subr.mxu0 %v1319_v23  ;;  %v1423_v20 = vld [vmem:[#allocation6 + $0x3c8] sm:$0xff]  ;;  %v1422_v22 = vld [vmem:[#allocation6 + $0x3c0] sm:$0xff]  ;;  %v1356_v23 = vld [vmem:[#allocation6 + $0x1b0] sm:$0xff] }
 0x192   :  { %v850_v33 = vadd.f32 %v849_v29, %v779_v27  ;;  %1643 = vmatprep.subr.mxu1 %v1383_v25  ;;  %1573 = vmatpush1.msra.mxu0 %v1318_v26  ;;  %v1421_v24 = vld [vmem:[#allocation6 + $0x3b8] sm:$0xff]  ;;  %v1355_v25 = vld [vmem:[#allocation6 + $0x1a8] sm:$0xff]  ;;  %v1420_v26 = vld [vmem:[#allocation6 + $0x3b0] sm:$0xff] }
 0x193   :  { %1644 = vmatpush1.msra.mxu1 %v1382_v28  ;;  %1574 = vmatprep.subr.mxu0 %v1317_v30  ;;  %v1354_v27 = vld [vmem:[#allocation6 + $0x1a0] sm:$0xff]  ;;  %v1419_v28 = vld [vmem:[#allocation6 + $0x3a8] sm:$0xff]  ;;  %v1353_v29 = vld [vmem:[#allocation6 + $0x198] sm:$0xff] }
 0x194   :  { %vm1279_vm1 = vcmp.ge.f32.partialorder %v850_v33, 0.0  ;;  %v1287_v38 = vmul.f32 0.25, %v850_v33  ;;  %1645 = vmatprep.subr.mxu1 %v1381_v31  ;;  %1575 = vmatpush1.msra.mxu0 %v1316_v32  ;;  %v1418_v30 = vld [vmem:[#allocation6 + $0x3a0] sm:$0xff]  ;;  %v1352_v31 = vld [vmem:[#allocation6 + $0x190] sm:$0xff]  ;;  %v1417_v32 = vld [vmem:[#allocation6 + $0x398] sm:$0xff] }
 0x195   :  { %1646 = vmatpush1.msra.mxu1 %v1380_v34  ;;  %1576 = vmatprep.subr.mxu0 %v1315_v35  ;;  %v1351_v34 = vld [vmem:[#allocation6 + $0x188] sm:$0xff]  ;;  %v1416_v35 = vld [vmem:[#allocation6 + $0x390] sm:$0xff] }
 0x196   :  { %v1295_v42 = vsel %vm1279_vm1, %v850_v33, %v1287_v38  ;;  %1647 = vmatprep.subr.mxu1 %v1379_v36  ;;  %1577 = vmatpush1.msra.mxu0 %v1314_v37  ;;  %v5843_v33 = vsub.s32 0, %v5829_v0  ;;  %v1350_v36 = vld [vmem:[#allocation6 + $0x180] sm:$0xff]  ;;  %v1415_v37 = vld [vmem:[#allocation6 + $0x388] sm:$0xff]  ;;  %v1349_v38 = vld [vmem:[#allocation6 + $0x178] sm:$0xff] }
 0x197   :  { %1622 = vmatprep.mubr.f32.mxu0 %v1295_v42  ;;  %1578 = vmatprep.subr.mxu0 %v1313_v39  ;;  %v1414_v39 = vld [vmem:[#allocation6 + $0x380] sm:$0xff] }
 0x198   :  { %1648 = vmatpush1.msra.mxu1 %v1378_v40  ;;  %1579 = vmatpush1.msra.mxu0 %v1312_v41  ;;  %6916 = vst [vmem:[#allocation27_spill] sm:$0xff] %v5843_v33  ;;  %v1348_v40 = vld [vmem:[#allocation6 + $0x170] sm:$0xff]  ;;  %v1413_v41 = vld [vmem:[#allocation6 + $0x378] sm:$0xff]  ;;  %v669_v42 = vrot.slane %v5834_v1, %v5843_v33 }
 0x199   :  { %1649 = vmatprep.subr.mxu1 %v1377_v43  ;;  %1580 = vmatprep.subr.mxu0 %v1311_v44  ;;  %v1347_v43 = vld [vmem:[#allocation6 + $0x168] sm:$0xff]  ;;  %v1412_v44 = vld [vmem:[#allocation6 + $0x370] sm:$0xff] }
 0x19a   :  { %1650 = vmatpush1.msra.mxu1 %v1376_v45  ;;  %1581 = vmatpush1.msra.mxu0 %v1310_v46  ;;  %v1346_v45 = vld [vmem:[#allocation6 + $0x160] sm:$0xff]  ;;  %v1411_v46 = vld [vmem:[#allocation6 + $0x368] sm:$0xff] }
 0x19b   :  { %1651 = vmatprep.subr.mxu1 %v1375_v47  ;;  %1582 = vmatprep.subr.mxu0 %v1309_v49  ;;  %v1345_v47 = vld [vmem:[#allocation6 + $0x158] sm:$0xff]  ;;  %v1410_v49 = vld [vmem:[#allocation6 + $0x360] sm:$0xff] }
 0x19c   :  { %1652 = vmatpush1.msra.mxu1 %v1374_v51  ;;  %1583 = vmatpush1.msra.mxu0 %v1308_v52  ;;  %v1344_v51 = vld [vmem:[#allocation6 + $0x150] sm:$0xff]  ;;  %v1409_v52 = vld [vmem:[#allocation6 + $0x358] sm:$0xff] }
 0x19d   :  { %1653 = vmatprep.subr.mxu1 %v1373_v53  ;;  %1584 = vmatprep.subr.mxu0 %v1307_v54  ;;  %v777_v53 = vadd.f32 %v5840_v19, %v669_v42  ;;  %v1343_v54 = vld [vmem:[#allocation6 + $0x148] sm:$0xff]  ;;  %v1450_v42 = vld [vmem:[#allocation6 + $0x4a0] sm:$0xff] }
 0x19e   :  { %1654 = vmatpush1.msra.mxu1 %v1372_v55  ;;  %1585 = vmatpush1.msra.mxu0 %v1306_v56  ;;  %v1408_v55 = vld [vmem:[#allocation6 + $0x350] sm:$0xff]  ;;  %v1342_v56 = vld [vmem:[#allocation6 + $0x140] sm:$0xff]  ;;  %v1339_v19 = vld [vmem:[#allocation6 + $0x128] sm:$0xff] }
 0x19f   :  { %1655 = vmatprep.subr.mxu1 %v1371_v57  ;;  %1586 = vmatprep.subr.mxu0 %v1305_v58  ;;  %v1407_v57 = vld [vmem:[#allocation6 + $0x348] sm:$0xff]  ;;  %v1341_v58 = vld [vmem:[#allocation6 + $0x138] sm:$0xff] }
 0x1a0   :  { %1656 = vmatpush1.msra.mxu1 %v1370_v59  ;;  %1587 = vmatpush1.msra.mxu0 %v1304_v60  ;;  %v1406_v59 = vld [vmem:[#allocation6 + $0x340] sm:$0xff]  ;;  %v1340_v60 = vld [vmem:[#allocation6 + $0x130] sm:$0xff] }
 0x1a1   :  { %1657 = vmatprep.subr.mxu1 %v1369_v61  ;;  %1588 = vmatprep.subr.mxu0 %v1303_v62  ;;  %v1405_v61 = vld [vmem:[#allocation6 + $0x338] sm:$0xff]  ;;  %v848_v62 = vadd.f32 %v5838_v17, %v777_v53  ;;  %v6830_v17 = vsub.s32 2, %v5829_v0  ;;  %v1522_v53 = vld [vmem:[#allocation6 + $0x6e0] sm:$0xff] }
 0x1a2   :  { %1658 = vmatpush1.msra.mxu1 %v1368_v48  ;;  %1589 = vmatpush1.msra.mxu0 %v1302_v63  ;;  %v1404_v48 = vld [vmem:[#allocation6 + $0x330] sm:$0xff]  ;;  %v1338_v63 = vld [vmem:[#allocation6 + $0x120] sm:$0xff] }
 0x1a3   :  { %1659 = vmatprep.subr.mxu1 %v1367_v50  ;;  %1590 = vmatprep.subr.mxu0 %v1365_v2  ;;  %v1403_v50 = vld [vmem:[#allocation6 + $0x328] sm:$0xff]  ;;  %v1337_v2 = vld [vmem:[#allocation6 + $0x118] sm:$0xff]  ;;  %vm1278_vm2 = vcmp.ge.f32.partialorder %v848_v62, 0.0 }
 0x1a4   :  { %1660 = vmatpush1.msra.mxu1 %v1366_v4  ;;  %1591 = vmatpush2.msra.mxu0 %v1364_v5  ;;  %v1402_v4 = vld [vmem:[#allocation6 + $0x320] sm:$0xff]  ;;  %v1336_v5 = vld [vmem:[#allocation6 + $0x110] sm:$0xff] }
 0x1a5   :  { %1661 = vmatprep.subr.mxu1 %v1429_v6  ;;  %1592 = vmatprep.subr.mxu0 %v1363_v8  ;;  %v1401_v6 = vld [vmem:[#allocation6 + $0x318] sm:$0xff]  ;;  %v1286_v8 = vmul.f32 0.25, %v848_v62 }
 0x1a6   :  { %1662 = vmatpush2.msra.mxu1 %v1428_v9  ;;  %1593 = vmatpush2.msra.mxu0 %v1362_v10  ;;  %v1335_v9 = vld [vmem:[#allocation6 + $0x108] sm:$0xff]  ;;  %v1400_v10 = vld [vmem:[#allocation6 + $0x310] sm:$0xff] }
 0x1a7   :  { %1663 = vmatprep.subr.mxu1 %v1427_v11  ;;  %1594 = vmatprep.subr.mxu0 %v1361_v12  ;;  %v1334_v11 = vld [vmem:[#allocation6 + $0x100] sm:$0xff]  ;;  %v1399_v12 = vld [vmem:[#allocation6 + $0x308] sm:$0xff] }
 0x1a8   :  { %1664 = vmatpush2.msra.mxu1 %v1426_v13  ;;  %1595 = vmatpush2.msra.mxu0 %v1360_v14  ;;  %v6829_v13 = vsub.s32 3, %v5829_v0  ;;  %v1398_v14 = vld [vmem:[#allocation6 + $0x300] sm:$0xff] }
 0x1a9   :  { %1665 = vmatprep.subr.mxu1 %v1425_v3  ;;  %1596 = vmatprep.subr.mxu0 %v1359_v15  ;;  %v1461_v3 = vld [vmem:[#allocation6 + $0x4f8] sm:$0xff] }
 0x1aa   :  { %1666 = vmatpush2.msra.mxu1 %v1424_v16  ;;  %1597 = vmatpush2.msra.mxu0 %v1358_v18  ;;  %v1525_v15 = vld [vmem:[#allocation6 + $0x6f8] sm:$0xff]  ;;  %v1294_v16 = vsel %vm1278_vm2, %v848_v62, %v1286_v8  ;;  %v677_v18 = vrot.slane %v5834_v1, %v6830_v17 }
 0x1ab   :  { %1667 = vmatprep.subr.mxu1 %v1423_v20  ;;  %1598 = vmatprep.subr.mxu0 %v1357_v21  ;;  %v1460_v20 = vld [vmem:[#allocation6 + $0x4f0] sm:$0xff]  ;;  %v1459_v21 = vld [vmem:[#allocation6 + $0x4e8] sm:$0xff]  ;;  %v1441_v62 = vld [vmem:[#allocation6 + $0x458] sm:$0xff] }
 0x1ac   :  { %1668 = vmatpush2.msra.mxu1 %v1422_v22  ;;  %1599 = vmatpush2.msra.mxu0 %v1356_v23  ;;  %v681_v22 = vrot.slane %v5834_v1, %v6829_v13  ;;  %v1458_v23 = vld [vmem:[#allocation6 + $0x4e0] sm:$0xff]  ;;  %v1513_v8 = vld [vmem:[#allocation6 + $0x698] sm:$0xff] }
 0x1ad   :  { %1669 = vmatprep.subr.mxu1 %v1421_v24  ;;  %1600 = vmatprep.subr.mxu0 %v1355_v25  ;;  %v1457_v25 = vld [vmem:[#allocation6 + $0x4d8] sm:$0xff]  ;;  %v6063_v13 = vld [vmem:[#allocation10 + $0x20] sm:$0xff] }
 0x1ae   :  { %1670 = vmatpush2.msra.mxu1 %v1420_v26  ;;  %1601 = vmatpush2.msra.mxu0 %v1354_v27  ;;  %v1456_v27 = vld [vmem:[#allocation6 + $0x4d0] sm:$0xff]  ;;  %6941 = vst [vmem:[#allocation52_spill] sm:$0xff] %v6063_v13 }
 0x1af   :  { %1671 = vmatprep.subr.mxu1 %v1419_v28  ;;  %1602 = vmatprep.subr.mxu0 %v1353_v29  ;;  %v6065_v17 = vld [vmem:[#allocation10 + $0x30] sm:$0xff] }
 0x1b0   :  { %1672 = vmatpush2.msra.mxu1 %v1418_v30  ;;  %1603 = vmatpush2.msra.mxu0 %v1352_v31  ;;  %v1455_v30 = vld [vmem:[#allocation6 + $0x4c8] sm:$0xff] }
 0x1b1   :  { %1673 = vmatprep.subr.mxu1 %v1417_v32  ;;  %1604 = vmatprep.subr.mxu0 %v1351_v34  ;;  %v1454_v34 = vld [vmem:[#allocation6 + $0x4c0] sm:$0xff] }
 0x1b2   :  { %1674 = vmatpush2.msra.mxu1 %v1416_v35  ;;  %1605 = vmatpush2.msra.mxu0 %v1350_v36  ;;  %v1453_v36 = vld [vmem:[#allocation6 + $0x4b8] sm:$0xff] }
 0x1b3   :  { %1675 = vmatprep.subr.mxu1 %v1415_v37  ;;  %1606 = vmatprep.subr.mxu0 %v1349_v38  ;;  %v1452_v38 = vld [vmem:[#allocation6 + $0x4b0] sm:$0xff] }
 0x1b4   :  { %1676 = vmatpush2.msra.mxu1 %v1414_v39  ;;  %1607 = vmatpush2.msra.mxu0 %v1348_v40  ;;  %v1451_v40 = vld [vmem:[#allocation6 + $0x4a8] sm:$0xff] }
 0x1b5   :  { %1677 = vmatprep.subr.mxu1 %v1413_v41  ;;  %1608 = vmatprep.subr.mxu0 %v1347_v43  ;;  %v1449_v43 = vld [vmem:[#allocation6 + $0x498] sm:$0xff] }
 0x1b6   :  { %1678 = vmatpush2.msra.mxu1 %v1412_v44  ;;  %1609 = vmatpush2.msra.mxu0 %v1346_v45  ;;  %v1448_v45 = vld [vmem:[#allocation6 + $0x490] sm:$0xff] }
 0x1b7   :  { %1679 = vmatprep.subr.mxu1 %v1411_v46  ;;  %1610 = vmatprep.subr.mxu0 %v1345_v47  ;;  %v1524_v46 = vld [vmem:[#allocation6 + $0x6f0] sm:$0xff] }
 0x1b8   :  { %1680 = vmatpush2.msra.mxu1 %v1410_v49  ;;  %1611 = vmatpush2.msra.mxu0 %v1344_v51  ;;  %v1447_v49 = vld [vmem:[#allocation6 + $0x488] sm:$0xff] }
 0x1b9   :  { %1681 = vmatprep.subr.mxu1 %v1409_v52  ;;  %1612 = vmatprep.subr.mxu0 %v1343_v54  ;;  %v1523_v51 = vld [vmem:[#allocation6 + $0x6e8] sm:$0xff]  ;;  %v1446_v52 = vld [vmem:[#allocation6 + $0x480] sm:$0xff]  ;;  %v1445_v54 = vld [vmem:[#allocation6 + $0x478] sm:$0xff] }
 0x1ba   :  { %1682 = vmatpush2.msra.mxu1 %v1408_v55  ;;  %1613 = vmatpush2.msra.mxu0 %v1342_v56  ;;  %v1521_v55 = vld [vmem:[#allocation6 + $0x6d8] sm:$0xff]  ;;  %v1444_v56 = vld [vmem:[#allocation6 + $0x470] sm:$0xff] }
 0x1bb   :  { %1683 = vmatprep.subr.mxu1 %v1407_v57  ;;  %1614 = vmatprep.subr.mxu0 %v1341_v58  ;;  %v1520_v57 = vld [vmem:[#allocation6 + $0x6d0] sm:$0xff]  ;;  %v1443_v58 = vld [vmem:[#allocation6 + $0x468] sm:$0xff] }
 0x1bc   :  { %1684 = vmatpush2.msra.mxu1 %v1406_v59  ;;  %1615 = vmatpush2.msra.mxu0 %v1340_v60  ;;  %v1519_v59 = vld [vmem:[#allocation6 + $0x6c8] sm:$0xff]  ;;  %v1442_v60 = vld [vmem:[#allocation6 + $0x460] sm:$0xff] }
 0x1bd   :  { %1685 = vmatprep.subr.mxu1 %v1405_v61  ;;  %1616 = vmatprep.subr.mxu0 %v1339_v19  ;;  %v1518_v61 = vld [vmem:[#allocation6 + $0x6c0] sm:$0xff]  ;;  %v1517_v19 = vld [vmem:[#allocation6 + $0x6b8] sm:$0xff] }
 0x1be   :  { %1686 = vmatpush2.msra.mxu1 %v1404_v48  ;;  %1617 = vmatpush2.msra.mxu0 %v1338_v63  ;;  %v1440_v48 = vld [vmem:[#allocation6 + $0x450] sm:$0xff] }
 0x1bf   :  { %1687 = vmatprep.subr.mxu1 %v1403_v50  ;;  %1618 = vmatprep.subr.mxu0 %v1337_v2  ;;  %v1516_v63 = vld [vmem:[#allocation6 + $0x6b0] sm:$0xff]  ;;  %v1439_v50 = vld [vmem:[#allocation6 + $0x448] sm:$0xff] }
 0x1c0   :  { %1688 = vmatpush2.msra.mxu1 %v1402_v4  ;;  %1619 = vmatpush2.msra.mxu0 %v1336_v5  ;;  %v1515_v2 = vld [vmem:[#allocation6 + $0x6a8] sm:$0xff]  ;;  %v1438_v4 = vld [vmem:[#allocation6 + $0x440] sm:$0xff] }
 0x1c1   :  { %1689 = vmatprep.subr.mxu1 %v1401_v6  ;;  %1620 = vmatprep.subr.mxu0 %v1335_v9  ;;  %v1514_v5 = vld [vmem:[#allocation6 + $0x6a0] sm:$0xff]  ;;  %v1437_v6 = vld [vmem:[#allocation6 + $0x438] sm:$0xff]  ;;  %v1436_v9 = vld [vmem:[#allocation6 + $0x430] sm:$0xff] }
 0x1c2   :  { %1690 = vmatpush2.msra.mxu1 %v1400_v10  ;;  %1621 = vmatpush2.msra.mxu0 %v1334_v11  ;;  %v1512_v10 = vld [vmem:[#allocation6 + $0x690] sm:$0xff]  ;;  %v1435_v11 = vld [vmem:[#allocation6 + $0x428] sm:$0xff] }
 0x1c3   :  { %1691 = vmatprep.subr.mxu1 %v1399_v12  ;;  %1623 = vmatmul.mubr.f32.vlgmr.msra.gmra.mxu0 %v1294_v16  ;;  %v1511_v12 = vld [vmem:[#allocation6 + $0x688] sm:$0xff]  ;;  %v1509_v16 = vld [vmem:[#allocation6 + $0x678] sm:$0xff] }
 0x1c4   :  { %1692 = vmatpush2.msra.mxu1 %v1398_v14  ;;  %1700 = vmatprep.subr.mxu0 %v1461_v3  ;;  %v1434_v14 = vld [vmem:[#allocation6 + $0x420] sm:$0xff] }
 0x1c5   :  { %1771 = vmatprep.subr.mxu1 %v1525_v15  ;;  %1701 = vmatpush1.msra.mxu0 %v1460_v20  ;;  %v1510_v3 = vld [vmem:[#allocation6 + $0x680] sm:$0xff]  ;;  %v1433_v15 = vld [vmem:[#allocation6 + $0x418] sm:$0xff]  ;;  %v1508_v20 = vld [vmem:[#allocation6 + $0x670] sm:$0xff] }
 0x1c6   :  { %v918_v24 = vpop.f32.mrf.mxu1  ;;  %1702 = vmatprep.subr.mxu0 %v1459_v21  ;;  %v1431_v21 = vld [vmem:[#allocation6 + $0x408] sm:$0xff] }
 0x1c7   :  { %v919_v26 = vadd.f32 %v918_v24, %v677_v18  ;;  %1703 = vmatpush1.msra.mxu0 %v1458_v23  ;;  %v1432_v18 = vld [vmem:[#allocation6 + $0x410] sm:$0xff]  ;;  %v1430_v23 = vld [vmem:[#allocation6 + $0x400] sm:$0xff] }
 0x1c8   :  { %v989_v28 = vpop.f32.mrf.mxu0  ;;  %v920_v29 = vpop.f32.mrf.mxu1  ;;  %1704 = vmatprep.subr.mxu0 %v1457_v25  ;;  %v1506_v24 = vld [vmem:[#allocation6 + $0x660] sm:$0xff]  ;;  %v1493_v25 = vld [vmem:[#allocation6 + $0x5f8] sm:$0xff] }
 0x1c9   :  { %v990_v31 = vadd.f32 %v989_v28, %v919_v26  ;;  %v921_v32 = vadd.f32 %v920_v29, %v681_v22  ;;  %1705 = vmatpush1.msra.mxu0 %v1456_v27  ;;  %v1507_v22 = vld [vmem:[#allocation6 + $0x668] sm:$0xff]  ;;  %v1505_v26 = vld [vmem:[#allocation6 + $0x658] sm:$0xff]  ;;  %v1492_v27 = vld [vmem:[#allocation6 + $0x5f0] sm:$0xff] }
 0x1ca   :  { %v991_v35 = vpop.f32.mrf.mxu0  ;;  %1706 = vmatprep.subr.mxu0 %v1455_v30  ;;  %v1504_v28 = vld [vmem:[#allocation6 + $0x650] sm:$0xff]  ;;  %v1491_v29 = vld [vmem:[#allocation6 + $0x5e8] sm:$0xff] }
 0x1cb   :  { %v992_v37 = vadd.f32 %v991_v35, %v921_v32  ;;  %v1288_v39 = vmul.f32 0.25, %v990_v31  ;;  %1707 = vmatpush1.msra.mxu0 %v1454_v34  ;;  %vm1280_vm3 = vcmp.ge.f32.partialorder %v990_v31, 0.0  ;;  %v1503_v30 = vld [vmem:[#allocation6 + $0x648] sm:$0xff]  ;;  %v1502_v32 = vld [vmem:[#allocation6 + $0x640] sm:$0xff]  ;;  %v1489_v34 = vld [vmem:[#allocation6 + $0x5d8] sm:$0xff] }
 0x1cc   :  { %1708 = vmatprep.subr.mxu0 %v1453_v36  ;;  %v1501_v35 = vld [vmem:[#allocation6 + $0x638] sm:$0xff]  ;;  %v1488_v36 = vld [vmem:[#allocation6 + $0x5d0] sm:$0xff] }
 0x1cd   :  { %v1289_v41 = vmul.f32 0.25, %v992_v37  ;;  %vm1281_vm4 = vcmp.ge.f32.partialorder %v992_v37, 0.0  ;;  %1709 = vmatpush1.msra.mxu0 %v1452_v38  ;;  %v1296_v47 = vsel %vm1280_vm3, %v990_v31, %v1288_v39  ;;  %v1490_v31 = vld [vmem:[#allocation6 + $0x5e0] sm:$0xff]  ;;  %v1487_v38 = vld [vmem:[#allocation6 + $0x5c8] sm:$0xff] }
 0x1ce   :  { %1710 = vmatprep.subr.mxu0 %v1451_v40  ;;  %v1499_v39 = vld [vmem:[#allocation6 + $0x628] sm:$0xff]  ;;  %v1486_v40 = vld [vmem:[#allocation6 + $0x5c0] sm:$0xff] }
 0x1cf   :  { %v1297_v44 = vsel %vm1281_vm4, %v992_v37, %v1289_v41  ;;  %1711 = vmatpush1.msra.mxu0 %v1450_v42  ;;  %v1500_v37 = vld [vmem:[#allocation6 + $0x630] sm:$0xff]  ;;  %v1498_v41 = vld [vmem:[#allocation6 + $0x620] sm:$0xff]  ;;  %v1485_v42 = vld [vmem:[#allocation6 + $0x5b8] sm:$0xff] }
 0x1d0   :  { %1693 = vmatprep.mubr.f32.mxu1 %v1297_v44  ;;  %1712 = vmatprep.subr.mxu0 %v1449_v43  ;;  %v1497_v43 = vld [vmem:[#allocation6 + $0x618] sm:$0xff]  ;;  %v1484_v44 = vld [vmem:[#allocation6 + $0x5b0] sm:$0xff] }
 0x1d1   :  { %1694 = vmatmul.mubr.f32.vlgmr.msra.gmra.mxu1 %v1296_v47  ;;  %1713 = vmatpush1.msra.mxu0 %v1448_v45  ;;  %v1496_v45 = vld [vmem:[#allocation6 + $0x610] sm:$0xff]  ;;  %v1495_v47 = vld [vmem:[#allocation6 + $0x608] sm:$0xff] }
 0x1d2   :  { %1772 = vmatpush1.msra.mxu1 %v1524_v46  ;;  %1714 = vmatprep.subr.mxu0 %v1447_v49  ;;  %v1483_v46 = vld [vmem:[#allocation6 + $0x5a8] sm:$0xff]  ;;  %v1482_v49 = vld [vmem:[#allocation6 + $0x5a0] sm:$0xff] }
 0x1d3   :  { %1773 = vmatprep.subr.mxu1 %v1523_v51  ;;  %1715 = vmatpush1.msra.mxu0 %v1446_v52  ;;  %v1494_v51 = vld [vmem:[#allocation6 + $0x600] sm:$0xff]  ;;  %v1481_v52 = vld [vmem:[#allocation6 + $0x598] sm:$0xff] }
 0x1d4   :  { %1774 = vmatpush1.msra.mxu1 %v1522_v53  ;;  %1716 = vmatprep.subr.mxu0 %v1445_v54  ;;  %v1541_v53 = vld [vmem:[#allocation6 + $0x778] sm:$0xff]  ;;  %v1480_v54 = vld [vmem:[#allocation6 + $0x590] sm:$0xff] }
 0x1d5   :  { %1775 = vmatprep.subr.mxu1 %v1521_v55  ;;  %1717 = vmatpush1.msra.mxu0 %v1444_v56  ;;  %v1540_v55 = vld [vmem:[#allocation6 + $0x770] sm:$0xff]  ;;  %v1479_v56 = vld [vmem:[#allocation6 + $0x588] sm:$0xff] }
 0x1d6   :  { %1776 = vmatpush1.msra.mxu1 %v1520_v57  ;;  %1718 = vmatprep.subr.mxu0 %v1443_v58  ;;  %v1539_v57 = vld [vmem:[#allocation6 + $0x768] sm:$0xff]  ;;  %v1478_v58 = vld [vmem:[#allocation6 + $0x580] sm:$0xff] }
 0x1d7   :  { %1777 = vmatprep.subr.mxu1 %v1519_v59  ;;  %1719 = vmatpush1.msra.mxu0 %v1442_v60  ;;  %v1538_v59 = vld [vmem:[#allocation6 + $0x760] sm:$0xff]  ;;  %v1477_v60 = vld [vmem:[#allocation6 + $0x578] sm:$0xff] }
 0x1d8   :  { %1778 = vmatpush1.msra.mxu1 %v1518_v61  ;;  %1720 = vmatprep.subr.mxu0 %v1441_v62  ;;  %v1537_v61 = vld [vmem:[#allocation6 + $0x758] sm:$0xff]  ;;  %v1476_v62 = vld [vmem:[#allocation6 + $0x570] sm:$0xff] }
 0x1d9   :  { %1779 = vmatprep.subr.mxu1 %v1517_v19  ;;  %1721 = vmatpush1.msra.mxu0 %v1440_v48  ;;  %v1536_v19 = vld [vmem:[#allocation6 + $0x750] sm:$0xff]  ;;  %v1475_v48 = vld [vmem:[#allocation6 + $0x568] sm:$0xff] }
 0x1da   :  { %1780 = vmatpush1.msra.mxu1 %v1516_v63  ;;  %1722 = vmatprep.subr.mxu0 %v1439_v50  ;;  %v1535_v63 = vld [vmem:[#allocation6 + $0x748] sm:$0xff]  ;;  %v1474_v50 = vld [vmem:[#allocation6 + $0x560] sm:$0xff] }
 0x1db   :  { %1781 = vmatprep.subr.mxu1 %v1515_v2  ;;  %1723 = vmatpush1.msra.mxu0 %v1438_v4  ;;  %v1534_v2 = vld [vmem:[#allocation6 + $0x740] sm:$0xff]  ;;  %v1473_v4 = vld [vmem:[#allocation6 + $0x558] sm:$0xff] }
 0x1dc   :  { %1782 = vmatpush1.msra.mxu1 %v1514_v5  ;;  %1724 = vmatprep.subr.mxu0 %v1437_v6  ;;  %v1533_v5 = vld [vmem:[#allocation6 + $0x738] sm:$0xff]  ;;  %v1472_v6 = vld [vmem:[#allocation6 + $0x550] sm:$0xff] }
 0x1dd   :  { %1783 = vmatprep.subr.mxu1 %v1513_v8  ;;  %1725 = vmatpush1.msra.mxu0 %v1436_v9  ;;  %v1532_v8 = vld [vmem:[#allocation6 + $0x730] sm:$0xff]  ;;  %v1471_v9 = vld [vmem:[#allocation6 + $0x548] sm:$0xff] }
 0x1de   :  { %1784 = vmatpush1.msra.mxu1 %v1512_v10  ;;  %1726 = vmatprep.subr.mxu0 %v1435_v11  ;;  %v1531_v10 = vld [vmem:[#allocation6 + $0x728] sm:$0xff]  ;;  %v1470_v11 = vld [vmem:[#allocation6 + $0x540] sm:$0xff] }
 0x1df   :  { %1785 = vmatprep.subr.mxu1 %v1511_v12  ;;  %1727 = vmatpush1.msra.mxu0 %v1434_v14  ;;  %v1530_v12 = vld [vmem:[#allocation6 + $0x720] sm:$0xff]  ;;  %v1469_v14 = vld [vmem:[#allocation6 + $0x538] sm:$0xff] }
 0x1e0   :  { %1786 = vmatpush1.msra.mxu1 %v1510_v3  ;;  %1728 = vmatprep.subr.mxu0 %v1433_v15  ;;  %v1529_v3 = vld [vmem:[#allocation6 + $0x718] sm:$0xff]  ;;  %v1468_v15 = vld [vmem:[#allocation6 + $0x530] sm:$0xff] }
 0x1e1   :  { %1787 = vmatprep.subr.mxu1 %v1509_v16  ;;  %1729 = vmatpush1.msra.mxu0 %v1432_v18  ;;  %v1528_v16 = vld [vmem:[#allocation6 + $0x710] sm:$0xff]  ;;  %v1467_v18 = vld [vmem:[#allocation6 + $0x528] sm:$0xff] }
 0x1e2   :  { %1788 = vmatpush1.msra.mxu1 %v1508_v20  ;;  %1730 = vmatprep.subr.mxu0 %v1431_v21  ;;  %v1527_v20 = vld [vmem:[#allocation6 + $0x708] sm:$0xff]  ;;  %v1466_v21 = vld [vmem:[#allocation6 + $0x520] sm:$0xff] }
 0x1e3   :  { %1789 = vmatprep.subr.mxu1 %v1507_v22  ;;  %1731 = vmatpush1.msra.mxu0 %v1430_v23  ;;  %v1526_v22 = vld [vmem:[#allocation6 + $0x700] sm:$0xff]  ;;  %v1465_v23 = vld [vmem:[#allocation6 + $0x518] sm:$0xff] }
 0x1e4   :  { %1790 = vmatpush1.msra.mxu1 %v1506_v24  ;;  %1732 = vmatprep.subr.mxu0 %v1493_v25  ;;  %v1464_v24 = vld [vmem:[#allocation6 + $0x510] sm:$0xff]  ;;  %v1463_v25 = vld [vmem:[#allocation6 + $0x508] sm:$0xff] }
 0x1e5   :  { %1791 = vmatprep.subr.mxu1 %v1505_v26  ;;  %1733 = vmatpush2.msra.mxu0 %v1492_v27  ;;  %v1462_v26 = vld [vmem:[#allocation6 + $0x500] sm:$0xff]  ;;  %v684_v27 = vsub.s32 4, %v5829_v0 }
 0x1e6   :  { %1792 = vmatpush1.msra.mxu1 %v1504_v28  ;;  %1734 = vmatprep.subr.mxu0 %v1491_v29  ;;  %v688_v28 = vsub.s32 5, %v5829_v0 }
 0x1e7   :  { %1793 = vmatprep.subr.mxu1 %v1503_v30  ;;  %1735 = vmatpush2.msra.mxu0 %v1490_v31  ;;  %v685_v29 = vrot.slane %v5834_v1, %v684_v27  ;;  %v2064_v27 = vld [vmem:[#allocation9 + $0x6d0] sm:$0xff] }
 0x1e8   :  { %1794 = vmatpush1.msra.mxu1 %v1502_v32  ;;  %1736 = vmatprep.subr.mxu0 %v1489_v34  ;;  %v689_v30 = vrot.slane %v5834_v1, %v688_v28  ;;  %v2039_v28 = vld [vmem:[#allocation9 + $0x608] sm:$0xff] }
 0x1e9   :  { %1795 = vmatprep.subr.mxu1 %v1501_v35  ;;  %1737 = vmatpush2.msra.mxu0 %v1488_v36 }
 0x1ea   :  { %1796 = vmatpush1.msra.mxu1 %v1500_v37  ;;  %1738 = vmatprep.subr.mxu0 %v1487_v38 }
 0x1eb   :  { %1797 = vmatprep.subr.mxu1 %v1499_v39  ;;  %1739 = vmatpush2.msra.mxu0 %v1486_v40 }
 0x1ec   :  { %1798 = vmatpush1.msra.mxu1 %v1498_v41  ;;  %1740 = vmatprep.subr.mxu0 %v1485_v42 }
 0x1ed   :  { %1799 = vmatprep.subr.mxu1 %v1497_v43  ;;  %1741 = vmatpush2.msra.mxu0 %v1484_v44  ;;  %v692_v44 = vsub.s32 6, %v5829_v0 }
 0x1ee   :  { %1800 = vmatpush1.msra.mxu1 %v1496_v45  ;;  %1742 = vmatprep.subr.mxu0 %v1483_v46  ;;  %v696_v45 = vsub.s32 7, %v5829_v0  ;;  %v6071_v0 = vld [vmem:[#allocation10 + $0x18] sm:$0xff] }
 0x1ef   :  { %1801 = vmatprep.subr.mxu1 %v1495_v47  ;;  %1743 = vmatpush2.msra.mxu0 %v1482_v49  ;;  %v693_v46 = vrot.slane %v5834_v1, %v692_v44  ;;  %v1968_v44 = vld [vmem:[#allocation9 + $0x3d0] sm:$0xff] }
 0x1f0   :  { %1802 = vmatpush1.msra.mxu1 %v1494_v51  ;;  %1744 = vmatprep.subr.mxu0 %v1481_v52  ;;  %v697_v47 = vrot.slane %v5834_v1, %v696_v45  ;;  %v2206_v1 = vld [vmem:[#allocation9 + $0xb40] sm:$0xff]  ;;  %v1943_v45 = vld [vmem:[#allocation9 + $0x308] sm:$0xff] }
 0x1f1   :  { %1819 = vmatprep.subr.mxu1 %v1541_v53  ;;  %1745 = vmatpush2.msra.mxu0 %v1480_v54 }
 0x1f2   :  { %1820 = vmatpush2.msra.mxu1 %v1540_v55  ;;  %1746 = vmatprep.subr.mxu0 %v1479_v56 }
 0x1f3   :  { %1821 = vmatprep.subr.mxu1 %v1539_v57  ;;  %1747 = vmatpush2.msra.mxu0 %v1478_v58 }
 0x1f4   :  { %1822 = vmatpush2.msra.mxu1 %v1538_v59  ;;  %1748 = vmatprep.subr.mxu0 %v1477_v60 }
 0x1f5   :  { %1823 = vmatprep.subr.mxu1 %v1537_v61  ;;  %1749 = vmatpush2.msra.mxu0 %v1476_v62  ;;  %v2207_v62 = vld [vmem:[#allocation9 + $0xb48] sm:$0xff] }
 0x1f6   :  { %1824 = vmatpush2.msra.mxu1 %v1536_v19  ;;  %1750 = vmatprep.subr.mxu0 %v1475_v48  ;;  %v2209_v19 = vld [vmem:[#allocation9 + $0xb58] sm:$0xff]  ;;  %v2208_v48 = vld [vmem:[#allocation9 + $0xb50] sm:$0xff] }
 0x1f7   :  { %1825 = vmatprep.subr.mxu1 %v1535_v63  ;;  %1751 = vmatpush2.msra.mxu0 %v1474_v50  ;;  %v2183_v63 = vld [vmem:[#allocation9 + $0xa88] sm:$0xff]  ;;  %v2185_v50 = vld [vmem:[#allocation9 + $0xa98] sm:$0xff] }
 0x1f8   :  { %1826 = vmatpush2.msra.mxu1 %v1534_v2  ;;  %1752 = vmatprep.subr.mxu0 %v1473_v4  ;;  %v2182_v2 = vld [vmem:[#allocation9 + $0xa80] sm:$0xff]  ;;  %v2184_v4 = vld [vmem:[#allocation9 + $0xa90] sm:$0xff] }
 0x1f9   :  { %1827 = vmatprep.subr.mxu1 %v1533_v5  ;;  %1753 = vmatpush2.msra.mxu0 %v1472_v6  ;;  %v2159_v5 = vld [vmem:[#allocation9 + $0x9c8] sm:$0xff]  ;;  %v2161_v6 = vld [vmem:[#allocation9 + $0x9d8] sm:$0xff] }
 0x1fa   :  { %1828 = vmatpush2.msra.mxu1 %v1532_v8  ;;  %1754 = vmatprep.subr.mxu0 %v1471_v9  ;;  %v2158_v8 = vld [vmem:[#allocation9 + $0x9c0] sm:$0xff]  ;;  %v2160_v9 = vld [vmem:[#allocation9 + $0x9d0] sm:$0xff] }
 0x1fb   :  { %1829 = vmatprep.subr.mxu1 %v1531_v10  ;;  %1755 = vmatpush2.msra.mxu0 %v1470_v11  ;;  %v2135_v10 = vld [vmem:[#allocation9 + $0x908] sm:$0xff]  ;;  %v2137_v11 = vld [vmem:[#allocation9 + $0x918] sm:$0xff] }
 0x1fc   :  { %1830 = vmatpush2.msra.mxu1 %v1530_v12  ;;  %1756 = vmatprep.subr.mxu0 %v1469_v14  ;;  %v2134_v12 = vld [vmem:[#allocation9 + $0x900] sm:$0xff]  ;;  %v2136_v14 = vld [vmem:[#allocation9 + $0x910] sm:$0xff] }
 0x1fd   :  { %1831 = vmatprep.subr.mxu1 %v1529_v3  ;;  %1757 = vmatpush2.msra.mxu0 %v1468_v15  ;;  %v2111_v3 = vld [vmem:[#allocation9 + $0x848] sm:$0xff]  ;;  %v2113_v15 = vld [vmem:[#allocation9 + $0x858] sm:$0xff] }
 0x1fe   :  { %1832 = vmatpush2.msra.mxu1 %v1528_v16  ;;  %1758 = vmatprep.subr.mxu0 %v1467_v18  ;;  %v2110_v16 = vld [vmem:[#allocation9 + $0x840] sm:$0xff]  ;;  %v2112_v18 = vld [vmem:[#allocation9 + $0x850] sm:$0xff] }
 0x1ff   :  { %1833 = vmatprep.subr.mxu1 %v1527_v20  ;;  %1759 = vmatpush2.msra.mxu0 %v1466_v21  ;;  %v2087_v20 = vld [vmem:[#allocation9 + $0x788] sm:$0xff]  ;;  %v2089_v21 = vld [vmem:[#allocation9 + $0x798] sm:$0xff] }
 0x200   :  { %1834 = vmatpush2.msra.mxu1 %v1526_v22  ;;  %1760 = vmatprep.subr.mxu0 %v1465_v23  ;;  %v1131_v31 = vpop.f32.mrf.mxu1  ;;  %v2086_v22 = vld [vmem:[#allocation9 + $0x780] sm:$0xff]  ;;  %v2088_v23 = vld [vmem:[#allocation9 + $0x790] sm:$0xff] }
 0x201   :  { %1761 = vmatpush2.msra.mxu0 %v1464_v24  ;;  %2230 = vmatprep.subr.mxu1 %v2207_v62  ;;  %v2063_v24 = vld [vmem:[#allocation9 + $0x6c8] sm:$0xff]  ;;  %v1872_v62 = vld [vmem:[#allocation9 + $0xd0] sm:$0xff] }
 0x202   :  { %1762 = vmatprep.subr.mxu0 %v1463_v25  ;;  %v1133_v38 = vpop.f32.mrf.mxu1  ;;  %v2065_v25 = vld [vmem:[#allocation9 + $0x6d8] sm:$0xff] }
 0x203   :  { %1763 = vmatpush2.msra.mxu0 %v1462_v26  ;;  %v2062_v26 = vld [vmem:[#allocation9 + $0x6c0] sm:$0xff] }
 0x204   :  { %2301 = vmatprep.subr.mxu0 %v2209_v19  ;;  %v1847_v19 = vld [vmem:[#allocation9 + $0x8] sm:$0xff] }
 0x209   :  { %v1060_v32 = vpop.f32.mrf.mxu0 }
 0x20a   :  { %v1061_v34 = vadd.f32 %v1060_v32, %v685_v29  ;;  %v2041_v29 = vld [vmem:[#allocation9 + $0x618] sm:$0xff]  ;;  %v2015_v32 = vld [vmem:[#allocation9 + $0x548] sm:$0xff] }
 0x20b   :  { %v1062_v35 = vpop.f32.mrf.mxu0 }
 0x20c   :  { %v1132_v36 = vadd.f32 %v1131_v31, %v1061_v34  ;;  %v1063_v37 = vadd.f32 %v1062_v35, %v689_v30  ;;  %v2038_v30 = vld [vmem:[#allocation9 + $0x600] sm:$0xff]  ;;  %v2040_v31 = vld [vmem:[#allocation9 + $0x610] sm:$0xff]  ;;  %v2017_v34 = vld [vmem:[#allocation9 + $0x558] sm:$0xff] }
 0x20d   :  { %v2014_v35 = vld [vmem:[#allocation9 + $0x540] sm:$0xff] }
 0x20e   :  { %v1134_v39 = vadd.f32 %v1133_v38, %v1063_v37  ;;  %v1290_v40 = vmul.f32 0.25, %v1132_v36  ;;  %vm1282_vm6 = vcmp.ge.f32.partialorder %v1132_v36, 0.0  ;;  %v1991_v37 = vld [vmem:[#allocation9 + $0x488] sm:$0xff]  ;;  %v1993_v38 = vld [vmem:[#allocation9 + $0x498] sm:$0xff] }
 0x210   :  { %vm1283_vm5 = vcmp.ge.f32.partialorder %v1134_v39, 0.0  ;;  %v1291_v41 = vmul.f32 0.25, %v1134_v39  ;;  %v1298_v43 = vsel %vm1282_vm6, %v1132_v36, %v1290_v40  ;;  %v2016_v36 = vld [vmem:[#allocation9 + $0x550] sm:$0xff] }
 0x211   :  { %v1992_v40 = vld [vmem:[#allocation9 + $0x490] sm:$0xff] }
 0x212   :  { %v1299_v42 = vsel %vm1283_vm5, %v1134_v39, %v1291_v41  ;;  %v1990_v39 = vld [vmem:[#allocation9 + $0x480] sm:$0xff]  ;;  %v1967_v41 = vld [vmem:[#allocation9 + $0x3c8] sm:$0xff] }
 0x213   :  { %1764 = vmatprep.mubr.f32.mxu0 %v1299_v42  ;;  %v1969_v42 = vld [vmem:[#allocation9 + $0x3d8] sm:$0xff] }
 0x214   :  { %1765 = vmatmul.mubr.f32.vlgmr.msra.gmra.mxu0 %v1298_v43  ;;  %v1966_v43 = vld [vmem:[#allocation9 + $0x3c0] sm:$0xff] }
 0x215   :  { %2302 = vmatpush1.msra.mxu0 %v2208_v48  ;;  %v1846_v48 = vld [vmem:[#allocation9] sm:$0xff] }
 0x216   :  { %2303 = vmatprep.subr.mxu0 %v2185_v50  ;;  %v2211_v50 = vld [vmem:[#allocation9 + $0xb68] sm:$0xff] }
 0x217   :  { %2304 = vmatpush1.msra.mxu0 %v2184_v4  ;;  %v6831_v4 = vmov 0.0  }
 0x218   :  { %2305 = vmatprep.subr.mxu0 %v2161_v6  ;;  %2365 = vmatprep.mubr.f32.mxu0 %v6831_v4  ;;  %v1542_v6 = vld [vmem:[#allocation7] sm:$0x3] }
 0x219   :  { %2306 = vmatpush1.msra.mxu0 %v2160_v9 }
 0x21a   :  { %2307 = vmatprep.subr.mxu0 %v2137_v11  ;;  %v1551_v11 = vrot.slane %v1542_v6, %v5832_v7  ;;  %v6075_v7 = vld [vmem:[#allocation10] sm:$0xff] }
 0x21b   :  { %2308 = vmatpush1.msra.mxu0 %v2136_v14  ;;  %6943 = vst [vmem:[#allocation54_spill] sm:$0xff] %v6075_v7 }
 0x21c   :  { %2309 = vmatprep.subr.mxu0 %v2113_v15 }
 0x21d   :  { %2310 = vmatpush1.msra.mxu0 %v2112_v18 }
 0x21e   :  { %2311 = vmatprep.subr.mxu0 %v2089_v21 }
 0x21f   :  { %2312 = vmatpush1.msra.mxu0 %v2088_v23 }
 0x220   :  { %2313 = vmatprep.subr.mxu0 %v2065_v25 }
 0x221   :  { %2314 = vmatpush1.msra.mxu0 %v2064_v27 }
 0x222   :  { %2315 = vmatprep.subr.mxu0 %v2041_v29  ;;  %v2210_v29 = vld [vmem:[#allocation9 + $0xb60] sm:$0xff] }
 0x223   :  { %2316 = vmatpush1.msra.mxu0 %v2040_v31 }
 0x224   :  { %2317 = vmatprep.subr.mxu0 %v2017_v34  ;;  %v2189_v34 = vld [vmem:[#allocation9 + $0xab8] sm:$0xff] }
 0x225   :  { %2318 = vmatpush1.msra.mxu0 %v2016_v36  ;;  %v2188_v36 = vld [vmem:[#allocation9 + $0xab0] sm:$0xff] }
 0x226   :  { %2319 = vmatprep.subr.mxu0 %v1993_v38  ;;  %v2165_v38 = vld [vmem:[#allocation9 + $0x9f8] sm:$0xff] }
 0x227   :  { %2320 = vmatpush1.msra.mxu0 %v1992_v40  ;;  %v2164_v40 = vld [vmem:[#allocation9 + $0x9f0] sm:$0xff] }
 0x228   :  { %2321 = vmatprep.subr.mxu0 %v1969_v42  ;;  %v2141_v42 = vld [vmem:[#allocation9 + $0x938] sm:$0xff] }
 0x229   :  { %2322 = vmatpush1.msra.mxu0 %v1968_v44  ;;  %v2140_v44 = vld [vmem:[#allocation9 + $0x930] sm:$0xff] }
 0x242   :  { %v1202_v49 = vpop.f32.mrf.mxu1 }
 0x243   :  { %v1273_v51 = vpop.f32.mrf.mxu0  ;;  %v1203_v52 = vadd.f32 %v1202_v49, %v693_v46  ;;  %v1945_v46 = vld [vmem:[#allocation9 + $0x318] sm:$0xff]  ;;  %v1944_v49 = vld [vmem:[#allocation9 + $0x310] sm:$0xff] }
 0x244   :  { %v1204_v53 = vpop.f32.mrf.mxu1  ;;  %2323 = vmatprep.subr.mxu0 %v1945_v46  ;;  %v2117_v46 = vld [vmem:[#allocation9 + $0x878] sm:$0xff] }
 0x245   :  { %v1274_v54 = vadd.f32 %v1273_v51, %v1203_v52  ;;  %v1205_v55 = vadd.f32 %v1204_v53, %v697_v47  ;;  %v1275_v56 = vpop.f32.mrf.mxu0  ;;  %v1942_v47 = vld [vmem:[#allocation9 + $0x300] sm:$0xff]  ;;  %2324 = vmatpush1.msra.mxu0 %v1944_v49  ;;  %v1919_v51 = vld [vmem:[#allocation9 + $0x248] sm:$0xff]  ;;  %v1921_v52 = vld [vmem:[#allocation9 + $0x258] sm:$0xff] }
 0x246   :  { %2325 = vmatprep.subr.mxu0 %v1921_v52  ;;  %v1918_v53 = vld [vmem:[#allocation9 + $0x240] sm:$0xff]  ;;  %v2116_v49 = vld [vmem:[#allocation9 + $0x870] sm:$0xff]  ;;  %v2093_v52 = vld [vmem:[#allocation9 + $0x7b8] sm:$0xff] }
 0x247   :  { %v1276_v57 = vadd.f32 %v1275_v56, %v1205_v55  ;;  %v1292_v58 = vmul.f32 0.25, %v1274_v54  ;;  %vm1284_vm7 = vcmp.ge.f32.partialorder %v1274_v54, 0.0  ;;  %v1895_v55 = vld [vmem:[#allocation9 + $0x188] sm:$0xff]  ;;  %v1897_v56 = vld [vmem:[#allocation9 + $0x198] sm:$0xff] }
 0x249   :  { %vm1285_vm8 = vcmp.ge.f32.partialorder %v1276_v57, 0.0  ;;  %v1293_v59 = vmul.f32 0.25, %v1276_v57  ;;  %v1300_v61 = vsel %vm1284_vm7, %v1274_v54, %v1292_v58  ;;  %v1920_v54 = vld [vmem:[#allocation9 + $0x250] sm:$0xff] }
 0x24a   :  { %2326 = vmatpush1.msra.mxu0 %v1920_v54  ;;  %v1896_v58 = vld [vmem:[#allocation9 + $0x190] sm:$0xff] }
 0x24b   :  { %v1301_v60 = vsel %vm1285_vm8, %v1276_v57, %v1293_v59  ;;  %2327 = vmatprep.subr.mxu0 %v1897_v56  ;;  %v1894_v57 = vld [vmem:[#allocation9 + $0x180] sm:$0xff]  ;;  %v1871_v59 = vld [vmem:[#allocation9 + $0xc8] sm:$0xff]  ;;  %v2092_v54 = vld [vmem:[#allocation9 + $0x7b0] sm:$0xff] }
 0x24c   :  { %4856 = vmatprep.mubr.msk.f32.mxu1 %vm1554_vm9, %v1301_v60  ;;  %2328 = vmatpush1.msra.mxu0 %v1896_v58  ;;  %v1873_v60 = vld [vmem:[#allocation9 + $0xd8] sm:$0xff]  ;;  %v2068_v58 = vld [vmem:[#allocation9 + $0x6f0] sm:$0xff] }
 0x24d   :  { %1836 = vmatmul.mubr.f32.vlgmr.msra.gmra.mxu1 %v1300_v61  ;;  %2329 = vmatprep.subr.mxu0 %v1873_v60  ;;  %v1870_v61 = vld [vmem:[#allocation9 + $0xc0] sm:$0xff]  ;;  %v2069_v56 = vld [vmem:[#allocation9 + $0x6f8] sm:$0xff] }
 0x24e   :  { %2231 = vmatpush1.msra.mxu1 %v2206_v1  ;;  %2330 = vmatpush1.msra.mxu0 %v1872_v62  ;;  %v1849_v1 = vld [vmem:[#allocation9 + $0x18] sm:$0xff]  ;;  %v2044_v62 = vld [vmem:[#allocation9 + $0x630] sm:$0xff] }
 0x24f   :  { %2232 = vmatprep.subr.mxu1 %v2183_v63  ;;  %2331 = vmatprep.subr.mxu0 %v1849_v1  ;;  %v1848_v63 = vld [vmem:[#allocation9 + $0x10] sm:$0xff]  ;;  %v2045_v60 = vld [vmem:[#allocation9 + $0x638] sm:$0xff] }
 0x250   :  { %2233 = vmatpush1.msra.mxu1 %v2182_v2  ;;  %2332 = vmatpush1.msra.mxu0 %v1848_v63  ;;  %v2213_v2 = vld [vmem:[#allocation9 + $0xb78] sm:$0xff]  ;;  %v2020_v63 = vld [vmem:[#allocation9 + $0x570] sm:$0xff] }
 0x251   :  { %2234 = vmatprep.subr.mxu1 %v2159_v5  ;;  %2294 = vmatprep.mubr.f32.mxu1 %v6831_v4  ;;  %v2021_v1 = vld [vmem:[#allocation9 + $0x578] sm:$0xff] }
 0x252   :  { %2235 = vmatpush1.msra.mxu1 %v2158_v8  ;;  %2443 = vmatprep.subr.mxu0 %v2213_v2  ;;  %v1997_v2 = vld [vmem:[#allocation9 + $0x4b8] sm:$0xff] }
 0x253   :  { %2236 = vmatprep.subr.mxu1 %v2135_v10  ;;  %v1547_v10 = vrot.slane %v1542_v6, %v5843_v33  ;;  %v1996_v6 = vld [vmem:[#allocation9 + $0x4b0] sm:$0xff] }
 0x254   :  { %2237 = vmatpush1.msra.mxu1 %v2134_v12  ;;  %v6079_v33 = vld [vmem:[#allocation10 + $0x10] sm:$0xff] }
 0x255   :  { %2238 = vmatprep.subr.mxu1 %v2111_v3 }
 0x256   :  { %2239 = vmatpush1.msra.mxu1 %v2110_v16 }
 0x257   :  { %2240 = vmatprep.subr.mxu1 %v2087_v20 }
 0x258   :  { %2241 = vmatpush1.msra.mxu1 %v2086_v22 }
 0x259   :  { %2242 = vmatprep.subr.mxu1 %v2063_v24 }
 0x25a   :  { %2243 = vmatpush1.msra.mxu1 %v2062_v26 }
 0x25b   :  { %2244 = vmatprep.subr.mxu1 %v2039_v28 }
 0x25c   :  { %2245 = vmatpush1.msra.mxu1 %v2038_v30  ;;  %v2212_v30 = vld [vmem:[#allocation9 + $0xb70] sm:$0xff] }
 0x25d   :  { %2246 = vmatprep.subr.mxu1 %v2015_v32  ;;  %v2187_v32 = vld [vmem:[#allocation9 + $0xaa8] sm:$0xff] }
 0x25e   :  { %2247 = vmatpush1.msra.mxu1 %v2014_v35  ;;  %v2186_v35 = vld [vmem:[#allocation9 + $0xaa0] sm:$0xff] }
 0x25f   :  { %2248 = vmatprep.subr.mxu1 %v1991_v37  ;;  %v2163_v37 = vld [vmem:[#allocation9 + $0x9e8] sm:$0xff] }
 0x260   :  { %2249 = vmatpush1.msra.mxu1 %v1990_v39  ;;  %v2162_v39 = vld [vmem:[#allocation9 + $0x9e0] sm:$0xff] }
 0x261   :  { %2250 = vmatprep.subr.mxu1 %v1967_v41  ;;  %v2139_v41 = vld [vmem:[#allocation9 + $0x928] sm:$0xff] }
 0x262   :  { %2251 = vmatpush1.msra.mxu1 %v1966_v43  ;;  %v2138_v43 = vld [vmem:[#allocation9 + $0x920] sm:$0xff] }
 0x263   :  { %2252 = vmatprep.subr.mxu1 %v1943_v45  ;;  %v2115_v45 = vld [vmem:[#allocation9 + $0x868] sm:$0xff] }
 0x264   :  { %2253 = vmatpush1.msra.mxu1 %v1942_v47  ;;  %v2114_v47 = vld [vmem:[#allocation9 + $0x860] sm:$0xff] }
 0x265   :  { %2254 = vmatprep.subr.mxu1 %v1919_v51  ;;  %v2091_v51 = vld [vmem:[#allocation9 + $0x7a8] sm:$0xff] }
 0x266   :  { %2255 = vmatpush1.msra.mxu1 %v1918_v53  ;;  %v2090_v53 = vld [vmem:[#allocation9 + $0x7a0] sm:$0xff] }
 0x267   :  { %2256 = vmatprep.subr.mxu1 %v1895_v55  ;;  %v2067_v55 = vld [vmem:[#allocation9 + $0x6e8] sm:$0xff] }
 0x268   :  { %2257 = vmatpush1.msra.mxu1 %v1894_v57  ;;  %v2066_v57 = vld [vmem:[#allocation9 + $0x6e0] sm:$0xff] }
 0x269   :  { %2258 = vmatprep.subr.mxu1 %v1871_v59  ;;  %v2043_v59 = vld [vmem:[#allocation9 + $0x628] sm:$0xff] }
 0x26a   :  { %2259 = vmatpush1.msra.mxu1 %v1870_v61  ;;  %v2042_v61 = vld [vmem:[#allocation9 + $0x620] sm:$0xff] }
 0x26b   :  { %2260 = vmatprep.subr.mxu1 %v1847_v19  ;;  %v2019_v19 = vld [vmem:[#allocation9 + $0x568] sm:$0xff] }
 0x26c   :  { %2261 = vmatpush1.msra.mxu1 %v1846_v48  ;;  %v2018_v48 = vld [vmem:[#allocation9 + $0x560] sm:$0xff] }
 0x26d   :  { %2372 = vmatprep.subr.mxu1 %v2211_v50  ;;  %v1995_v50 = vld [vmem:[#allocation9 + $0x4a8] sm:$0xff] }
 0x283   :  { %v1624_v5 = vpop.f32.mrf.mxu0 }
 0x284   :  { %v1625_v3 = vadd.f32 %v1624_v5, %v1547_v10  ;;  %v1994_v5 = vld [vmem:[#allocation9 + $0x4a0] sm:$0xff] }
 0x285   :  { %v1626_v8 = vpop.f32.mrf.mxu0  ;;  %v1970_v10 = vld [vmem:[#allocation9 + $0x3e0] sm:$0xff] }
 0x286   :  { %v1627_v15 = vadd.f32 %v1626_v8, %v1551_v11  ;;  %v1971_v8 = vld [vmem:[#allocation9 + $0x3e8] sm:$0xff]  ;;  %v1972_v11 = vld [vmem:[#allocation9 + $0x3f0] sm:$0xff] }
 0x291   :  { %v1695_v9 = vpop.f32.mrf.mxu1 }
 0x292   :  { %v1696_v18 = vadd.f32 %v1695_v9, %v1625_v3  ;;  %v1973_v9 = vld [vmem:[#allocation9 + $0x3f8] sm:$0xff]  ;;  %v1946_v3 = vld [vmem:[#allocation9 + $0x320] sm:$0xff] }
 0x293   :  { %v1697_v14 = vpop.f32.mrf.mxu1 }
 0x294   :  { %v1698_v20 = vadd.f32 %v1697_v14, %v1627_v15  ;;  %v1949_v14 = vld [vmem:[#allocation9 + $0x338] sm:$0xff]  ;;  %v1948_v15 = vld [vmem:[#allocation9 + $0x330] sm:$0xff] }
 0x2d4   :  { %v1766_v12 = vpop.f32.mrf.mxu0 }
 0x2d5   :  { %v1767_v22 = vadd.f32 %v1766_v12, %v1696_v18  ;;  %v1947_v12 = vld [vmem:[#allocation9 + $0x328] sm:$0xff]  ;;  %v1925_v18 = vld [vmem:[#allocation9 + $0x278] sm:$0xff] }
 0x2d6   :  { %v1768_v16 = vpop.f32.mrf.mxu0 }
 0x2d7   :  { %v1769_v23 = vadd.f32 %v1768_v16, %v1698_v20  ;;  %v1923_v16 = vld [vmem:[#allocation9 + $0x268] sm:$0xff]  ;;  %v1922_v20 = vld [vmem:[#allocation9 + $0x260] sm:$0xff] }
 0x30d   :  { %v1837_v21 = vpop.f32.mrf.mxu1 }
 0x30e   :  { %v1838_v25 = vadd.f32 %v1837_v21, %v1767_v22  ;;  %v1924_v21 = vld [vmem:[#allocation9 + $0x270] sm:$0xff]  ;;  %v1899_v22 = vld [vmem:[#allocation9 + $0x1a8] sm:$0xff] }
 0x30f   :  { %v1839_v24 = vpop.f32.mrf.mxu1 }
 0x310   :  { %v1840_v26 = vadd.f32 %v1839_v24, %v1769_v23  ;;  %v1901_v23 = vld [vmem:[#allocation9 + $0x1b8] sm:$0xff]  ;;  %v1898_v24 = vld [vmem:[#allocation9 + $0x1a0] sm:$0xff] }
 0x312   :  { %v1842_v27 = vmax.f32 %v1838_v25, %v1840_v26  ;;  %v1900_v25 = vld [vmem:[#allocation9 + $0x1b0] sm:$0xff]  ;;  %v1875_v26 = vld [vmem:[#allocation9 + $0xe8] sm:$0xff] }
 0x314   :  { %vm1843_vm10 = vcmp.ge.f32.partialorder %v1842_v27, 0.0  ;;  %v1844_v28 = vmul.f32 0.25, %v1842_v27 }
 0x316   :  { %v5869_v31 = vsel %vm1843_vm10, %v1842_v27, %v1844_v28  ;;  %v1877_v27 = vld [vmem:[#allocation9 + $0xf8] sm:$0xff]  ;;  %v1874_v28 = vld [vmem:[#allocation9 + $0xe0] sm:$0xff] }
 0x317   :  { %2295 = vmatmul.mubr.f32.vlgmr.msra.gmra.mxu1 %v5869_v31  ;;  %2366 = vmatmul.mubr.f32.vlgmr.msra.gmra.mxu0 %v5869_v31 }
 0x318   :  { %2373 = vmatpush1.msra.mxu1 %v2210_v29  ;;  %2444 = vmatpush1.msra.mxu0 %v2212_v30  ;;  %v1876_v29 = vld [vmem:[#allocation9 + $0xf0] sm:$0xff]  ;;  %v1851_v30 = vld [vmem:[#allocation9 + $0x28] sm:$0xff] }
 0x319   :  { %2374 = vmatprep.subr.mxu1 %v2187_v32  ;;  %2445 = vmatprep.subr.mxu0 %v2189_v34  ;;  %v1853_v32 = vld [vmem:[#allocation9 + $0x38] sm:$0xff]  ;;  %v1850_v34 = vld [vmem:[#allocation9 + $0x20] sm:$0xff] }
 0x31a   :  { %2375 = vmatpush1.msra.mxu1 %v2186_v35  ;;  %2446 = vmatpush1.msra.mxu0 %v2188_v36  ;;  %v1852_v35 = vld [vmem:[#allocation9 + $0x30] sm:$0xff]  ;;  %v2215_v36 = vld [vmem:[#allocation9 + $0xb88] sm:$0xff] }
 0x31b   :  { %2376 = vmatprep.subr.mxu1 %v2163_v37  ;;  %2447 = vmatprep.subr.mxu0 %v2165_v38  ;;  %v2217_v37 = vld [vmem:[#allocation9 + $0xb98] sm:$0xff]  ;;  %v2214_v38 = vld [vmem:[#allocation9 + $0xb80] sm:$0xff] }
 0x31c   :  { %2377 = vmatpush1.msra.mxu1 %v2162_v39  ;;  %2448 = vmatpush1.msra.mxu0 %v2164_v40  ;;  %v2216_v39 = vld [vmem:[#allocation9 + $0xb90] sm:$0xff]  ;;  %v2191_v40 = vld [vmem:[#allocation9 + $0xac8] sm:$0xff] }
 0x31d   :  { %2378 = vmatprep.subr.mxu1 %v2139_v41  ;;  %2449 = vmatprep.subr.mxu0 %v2141_v42  ;;  %v2193_v41 = vld [vmem:[#allocation9 + $0xad8] sm:$0xff]  ;;  %v2190_v42 = vld [vmem:[#allocation9 + $0xac0] sm:$0xff] }
 0x31e   :  { %2379 = vmatpush1.msra.mxu1 %v2138_v43  ;;  %2450 = vmatpush1.msra.mxu0 %v2140_v44  ;;  %v2192_v43 = vld [vmem:[#allocation9 + $0xad0] sm:$0xff]  ;;  %v2167_v44 = vld [vmem:[#allocation9 + $0xa08] sm:$0xff] }
 0x31f   :  { %2380 = vmatprep.subr.mxu1 %v2115_v45  ;;  %2451 = vmatprep.subr.mxu0 %v2117_v46  ;;  %v2169_v45 = vld [vmem:[#allocation9 + $0xa18] sm:$0xff]  ;;  %v2166_v46 = vld [vmem:[#allocation9 + $0xa00] sm:$0xff] }
 0x320   :  { %2381 = vmatpush1.msra.mxu1 %v2114_v47  ;;  %2452 = vmatpush1.msra.mxu0 %v2116_v49  ;;  %v2168_v47 = vld [vmem:[#allocation9 + $0xa10] sm:$0xff]  ;;  %v2143_v49 = vld [vmem:[#allocation9 + $0x948] sm:$0xff] }
 0x321   :  { %2382 = vmatprep.subr.mxu1 %v2091_v51  ;;  %2453 = vmatprep.subr.mxu0 %v2093_v52  ;;  %v2145_v51 = vld [vmem:[#allocation9 + $0x958] sm:$0xff]  ;;  %v2142_v52 = vld [vmem:[#allocation9 + $0x940] sm:$0xff] }
 0x322   :  { %2383 = vmatpush1.msra.mxu1 %v2090_v53  ;;  %2454 = vmatpush1.msra.mxu0 %v2092_v54  ;;  %v2144_v53 = vld [vmem:[#allocation9 + $0x950] sm:$0xff]  ;;  %v2119_v54 = vld [vmem:[#allocation9 + $0x888] sm:$0xff] }
 0x323   :  { %2384 = vmatprep.subr.mxu1 %v2067_v55  ;;  %2455 = vmatprep.subr.mxu0 %v2069_v56  ;;  %v2121_v55 = vld [vmem:[#allocation9 + $0x898] sm:$0xff]  ;;  %v2118_v56 = vld [vmem:[#allocation9 + $0x880] sm:$0xff] }
 0x324   :  { %2385 = vmatpush1.msra.mxu1 %v2066_v57  ;;  %2456 = vmatpush1.msra.mxu0 %v2068_v58  ;;  %v2120_v57 = vld [vmem:[#allocation9 + $0x890] sm:$0xff]  ;;  %v2095_v58 = vld [vmem:[#allocation9 + $0x7c8] sm:$0xff] }
 0x325   :  { %2386 = vmatprep.subr.mxu1 %v2043_v59  ;;  %2457 = vmatprep.subr.mxu0 %v2045_v60  ;;  %v2097_v59 = vld [vmem:[#allocation9 + $0x7d8] sm:$0xff]  ;;  %v2094_v60 = vld [vmem:[#allocation9 + $0x7c0] sm:$0xff] }
 0x326   :  { %2387 = vmatpush1.msra.mxu1 %v2042_v61  ;;  %2458 = vmatpush1.msra.mxu0 %v2044_v62  ;;  %v2096_v61 = vld [vmem:[#allocation9 + $0x7d0] sm:$0xff]  ;;  %v2071_v62 = vld [vmem:[#allocation9 + $0x708] sm:$0xff] }
 0x327   :  { %2388 = vmatprep.subr.mxu1 %v2019_v19  ;;  %2459 = vmatprep.subr.mxu0 %v2021_v1  ;;  %v2073_v19 = vld [vmem:[#allocation9 + $0x718] sm:$0xff]  ;;  %v2070_v1 = vld [vmem:[#allocation9 + $0x700] sm:$0xff] }
 0x328   :  { %2389 = vmatpush1.msra.mxu1 %v2018_v48  ;;  %2460 = vmatpush1.msra.mxu0 %v2020_v63  ;;  %v2072_v48 = vld [vmem:[#allocation9 + $0x710] sm:$0xff]  ;;  %v2047_v63 = vld [vmem:[#allocation9 + $0x648] sm:$0xff] }
 0x329   :  { %2390 = vmatprep.subr.mxu1 %v1995_v50  ;;  %2461 = vmatprep.subr.mxu0 %v1997_v2  ;;  %v2049_v50 = vld [vmem:[#allocation9 + $0x658] sm:$0xff]  ;;  %v2046_v2 = vld [vmem:[#allocation9 + $0x640] sm:$0xff] }
 0x32a   :  { %2391 = vmatpush1.msra.mxu1 %v1994_v5  ;;  %2462 = vmatpush1.msra.mxu0 %v1996_v6  ;;  %v2048_v5 = vld [vmem:[#allocation9 + $0x650] sm:$0xff]  ;;  %v2023_v6 = vld [vmem:[#allocation9 + $0x588] sm:$0xff] }
 0x32b   :  { %2392 = vmatprep.subr.mxu1 %v1971_v8  ;;  %2463 = vmatprep.subr.mxu0 %v1973_v9  ;;  %v2025_v8 = vld [vmem:[#allocation9 + $0x598] sm:$0xff]  ;;  %v2022_v9 = vld [vmem:[#allocation9 + $0x580] sm:$0xff] }
 0x32c   :  { %2393 = vmatpush1.msra.mxu1 %v1970_v10  ;;  %2464 = vmatpush1.msra.mxu0 %v1972_v11  ;;  %v2024_v10 = vld [vmem:[#allocation9 + $0x590] sm:$0xff]  ;;  %v1999_v11 = vld [vmem:[#allocation9 + $0x4c8] sm:$0xff] }
 0x32d   :  { %2394 = vmatprep.subr.mxu1 %v1947_v12  ;;  %2465 = vmatprep.subr.mxu0 %v1949_v14  ;;  %v2001_v12 = vld [vmem:[#allocation9 + $0x4d8] sm:$0xff]  ;;  %v1998_v14 = vld [vmem:[#allocation9 + $0x4c0] sm:$0xff] }
 0x32e   :  { %2395 = vmatpush1.msra.mxu1 %v1946_v3  ;;  %2466 = vmatpush1.msra.mxu0 %v1948_v15  ;;  %v2000_v3 = vld [vmem:[#allocation9 + $0x4d0] sm:$0xff]  ;;  %v1975_v15 = vld [vmem:[#allocation9 + $0x408] sm:$0xff] }
 0x32f   :  { %2396 = vmatprep.subr.mxu1 %v1923_v16  ;;  %2467 = vmatprep.subr.mxu0 %v1925_v18  ;;  %v1977_v16 = vld [vmem:[#allocation9 + $0x418] sm:$0xff]  ;;  %v1974_v18 = vld [vmem:[#allocation9 + $0x400] sm:$0xff] }
 0x330   :  { %2397 = vmatpush1.msra.mxu1 %v1922_v20  ;;  %2468 = vmatpush1.msra.mxu0 %v1924_v21  ;;  %v1976_v20 = vld [vmem:[#allocation9 + $0x410] sm:$0xff]  ;;  %v1951_v21 = vld [vmem:[#allocation9 + $0x348] sm:$0xff] }
 0x331   :  { %2398 = vmatprep.subr.mxu1 %v1899_v22  ;;  %2469 = vmatprep.subr.mxu0 %v1901_v23  ;;  %v1953_v22 = vld [vmem:[#allocation9 + $0x358] sm:$0xff]  ;;  %v1950_v23 = vld [vmem:[#allocation9 + $0x340] sm:$0xff] }
 0x332   :  { %2399 = vmatpush1.msra.mxu1 %v1898_v24  ;;  %2470 = vmatpush1.msra.mxu0 %v1900_v25  ;;  %v1952_v24 = vld [vmem:[#allocation9 + $0x350] sm:$0xff]  ;;  %v1927_v25 = vld [vmem:[#allocation9 + $0x288] sm:$0xff] }
 0x333   :  { %2400 = vmatprep.subr.mxu1 %v1875_v26  ;;  %2471 = vmatprep.subr.mxu0 %v1877_v27  ;;  %v1929_v26 = vld [vmem:[#allocation9 + $0x298] sm:$0xff]  ;;  %v1926_v27 = vld [vmem:[#allocation9 + $0x280] sm:$0xff] }
 0x334   :  { %2401 = vmatpush1.msra.mxu1 %v1874_v28  ;;  %2472 = vmatpush1.msra.mxu0 %v1876_v29  ;;  %v1928_v28 = vld [vmem:[#allocation9 + $0x290] sm:$0xff]  ;;  %v1903_v29 = vld [vmem:[#allocation9 + $0x1c8] sm:$0xff] }
 0x335   :  { %2402 = vmatprep.subr.mxu1 %v1851_v30  ;;  %2473 = vmatprep.subr.mxu0 %v1853_v32  ;;  %v1905_v30 = vld [vmem:[#allocation9 + $0x1d8] sm:$0xff]  ;;  %v1902_v32 = vld [vmem:[#allocation9 + $0x1c0] sm:$0xff] }
 0x336   :  { %2403 = vmatpush1.msra.mxu1 %v1850_v34  ;;  %2436 = vmatprep.mubr.f32.mxu1 %v6831_v4  ;;  %v1904_v34 = vld [vmem:[#allocation9 + $0x1d0] sm:$0xff] }
 0x337   :  { %2474 = vmatpush1.msra.mxu0 %v1852_v35  ;;  %2507 = vmatprep.mubr.f32.mxu0 %v6831_v4  ;;  %v1879_v35 = vld [vmem:[#allocation9 + $0x108] sm:$0xff] }
 0x338   :  { %2437 = vmatmul.mubr.f32.vlgmr.msra.gmra.mxu1 %v5869_v31  ;;  %2508 = vmatmul.mubr.f32.vlgmr.msra.gmra.mxu0 %v5869_v31 }
 0x339   :  { %2514 = vmatprep.subr.mxu1 %v2215_v36  ;;  %2585 = vmatprep.subr.mxu0 %v2217_v37  ;;  %v1881_v36 = vld [vmem:[#allocation9 + $0x118] sm:$0xff]  ;;  %v1878_v37 = vld [vmem:[#allocation9 + $0x100] sm:$0xff] }
 0x33a   :  { %2515 = vmatpush1.msra.mxu1 %v2214_v38  ;;  %2586 = vmatpush1.msra.mxu0 %v2216_v39  ;;  %v1880_v38 = vld [vmem:[#allocation9 + $0x110] sm:$0xff]  ;;  %v1855_v39 = vld [vmem:[#allocation9 + $0x48] sm:$0xff] }
 0x33b   :  { %2516 = vmatprep.subr.mxu1 %v2191_v40  ;;  %2587 = vmatprep.subr.mxu0 %v2193_v41  ;;  %v1857_v40 = vld [vmem:[#allocation9 + $0x58] sm:$0xff]  ;;  %v1854_v41 = vld [vmem:[#allocation9 + $0x40] sm:$0xff] }
 0x33c   :  { %2517 = vmatpush1.msra.mxu1 %v2190_v42  ;;  %2588 = vmatpush1.msra.mxu0 %v2192_v43  ;;  %v1856_v42 = vld [vmem:[#allocation9 + $0x50] sm:$0xff]  ;;  %v2219_v43 = vld [vmem:[#allocation9 + $0xba8] sm:$0xff] }
 0x33d   :  { %2518 = vmatprep.subr.mxu1 %v2167_v44  ;;  %2589 = vmatprep.subr.mxu0 %v2169_v45  ;;  %v2221_v44 = vld [vmem:[#allocation9 + $0xbb8] sm:$0xff]  ;;  %v2218_v45 = vld [vmem:[#allocation9 + $0xba0] sm:$0xff] }
 0x33e   :  { %2519 = vmatpush1.msra.mxu1 %v2166_v46  ;;  %2590 = vmatpush1.msra.mxu0 %v2168_v47  ;;  %v2220_v46 = vld [vmem:[#allocation9 + $0xbb0] sm:$0xff]  ;;  %v2195_v47 = vld [vmem:[#allocation9 + $0xae8] sm:$0xff] }
 0x33f   :  { %2520 = vmatprep.subr.mxu1 %v2143_v49  ;;  %2591 = vmatprep.subr.mxu0 %v2145_v51  ;;  %v2197_v49 = vld [vmem:[#allocation9 + $0xaf8] sm:$0xff]  ;;  %v2194_v51 = vld [vmem:[#allocation9 + $0xae0] sm:$0xff] }
 0x340   :  { %2521 = vmatpush1.msra.mxu1 %v2142_v52  ;;  %2592 = vmatpush1.msra.mxu0 %v2144_v53  ;;  %v2196_v52 = vld [vmem:[#allocation9 + $0xaf0] sm:$0xff]  ;;  %v2171_v53 = vld [vmem:[#allocation9 + $0xa28] sm:$0xff] }
 0x341   :  { %2522 = vmatprep.subr.mxu1 %v2119_v54  ;;  %2593 = vmatprep.subr.mxu0 %v2121_v55  ;;  %v2173_v54 = vld [vmem:[#allocation9 + $0xa38] sm:$0xff]  ;;  %v2170_v55 = vld [vmem:[#allocation9 + $0xa20] sm:$0xff] }
 0x342   :  { %2523 = vmatpush1.msra.mxu1 %v2118_v56  ;;  %2594 = vmatpush1.msra.mxu0 %v2120_v57  ;;  %v2172_v56 = vld [vmem:[#allocation9 + $0xa30] sm:$0xff]  ;;  %v2147_v57 = vld [vmem:[#allocation9 + $0x968] sm:$0xff] }
 0x343   :  { %2524 = vmatprep.subr.mxu1 %v2095_v58  ;;  %2595 = vmatprep.subr.mxu0 %v2097_v59  ;;  %v2149_v58 = vld [vmem:[#allocation9 + $0x978] sm:$0xff]  ;;  %v2146_v59 = vld [vmem:[#allocation9 + $0x960] sm:$0xff] }
 0x344   :  { %2525 = vmatpush1.msra.mxu1 %v2094_v60  ;;  %2596 = vmatpush1.msra.mxu0 %v2096_v61  ;;  %v2148_v60 = vld [vmem:[#allocation9 + $0x970] sm:$0xff]  ;;  %v2123_v61 = vld [vmem:[#allocation9 + $0x8a8] sm:$0xff] }
 0x345   :  { %2526 = vmatprep.subr.mxu1 %v2071_v62  ;;  %2597 = vmatprep.subr.mxu0 %v2073_v19  ;;  %v2125_v62 = vld [vmem:[#allocation9 + $0x8b8] sm:$0xff]  ;;  %v2122_v19 = vld [vmem:[#allocation9 + $0x8a0] sm:$0xff] }
 0x346   :  { %2527 = vmatpush1.msra.mxu1 %v2070_v1  ;;  %2598 = vmatpush1.msra.mxu0 %v2072_v48  ;;  %v2124_v1 = vld [vmem:[#allocation9 + $0x8b0] sm:$0xff]  ;;  %v2099_v48 = vld [vmem:[#allocation9 + $0x7e8] sm:$0xff] }
 0x347   :  { %2528 = vmatprep.subr.mxu1 %v2047_v63  ;;  %2599 = vmatprep.subr.mxu0 %v2049_v50  ;;  %v2101_v63 = vld [vmem:[#allocation9 + $0x7f8] sm:$0xff]  ;;  %v2098_v50 = vld [vmem:[#allocation9 + $0x7e0] sm:$0xff] }
 0x348   :  { %2529 = vmatpush1.msra.mxu1 %v2046_v2  ;;  %2600 = vmatpush1.msra.mxu0 %v2048_v5  ;;  %v2100_v2 = vld [vmem:[#allocation9 + $0x7f0] sm:$0xff]  ;;  %v2075_v5 = vld [vmem:[#allocation9 + $0x728] sm:$0xff] }
 0x349   :  { %2530 = vmatprep.subr.mxu1 %v2023_v6  ;;  %2601 = vmatprep.subr.mxu0 %v2025_v8  ;;  %v2077_v6 = vld [vmem:[#allocation9 + $0x738] sm:$0xff]  ;;  %v2074_v8 = vld [vmem:[#allocation9 + $0x720] sm:$0xff] }
 0x34a   :  { %2531 = vmatpush1.msra.mxu1 %v2022_v9  ;;  %2602 = vmatpush1.msra.mxu0 %v2024_v10  ;;  %v2076_v9 = vld [vmem:[#allocation9 + $0x730] sm:$0xff]  ;;  %v2051_v10 = vld [vmem:[#allocation9 + $0x668] sm:$0xff] }
 0x34b   :  { %2532 = vmatprep.subr.mxu1 %v1999_v11  ;;  %2603 = vmatprep.subr.mxu0 %v2001_v12  ;;  %v2053_v11 = vld [vmem:[#allocation9 + $0x678] sm:$0xff]  ;;  %v2050_v12 = vld [vmem:[#allocation9 + $0x660] sm:$0xff] }
 0x34c   :  { %2533 = vmatpush1.msra.mxu1 %v1998_v14  ;;  %2604 = vmatpush1.msra.mxu0 %v2000_v3  ;;  %v2052_v14 = vld [vmem:[#allocation9 + $0x670] sm:$0xff]  ;;  %v2027_v3 = vld [vmem:[#allocation9 + $0x5a8] sm:$0xff] }
 0x34d   :  { %2534 = vmatprep.subr.mxu1 %v1975_v15  ;;  %2605 = vmatprep.subr.mxu0 %v1977_v16  ;;  %v2029_v15 = vld [vmem:[#allocation9 + $0x5b8] sm:$0xff]  ;;  %v2026_v16 = vld [vmem:[#allocation9 + $0x5a0] sm:$0xff] }
 0x34e   :  { %2535 = vmatpush1.msra.mxu1 %v1974_v18  ;;  %2606 = vmatpush1.msra.mxu0 %v1976_v20  ;;  %v2028_v18 = vld [vmem:[#allocation9 + $0x5b0] sm:$0xff]  ;;  %v2003_v20 = vld [vmem:[#allocation9 + $0x4e8] sm:$0xff] }
 0x34f   :  { %2536 = vmatprep.subr.mxu1 %v1951_v21  ;;  %2607 = vmatprep.subr.mxu0 %v1953_v22  ;;  %v2005_v21 = vld [vmem:[#allocation9 + $0x4f8] sm:$0xff]  ;;  %v2002_v22 = vld [vmem:[#allocation9 + $0x4e0] sm:$0xff] }
 0x350   :  { %2537 = vmatpush1.msra.mxu1 %v1950_v23  ;;  %2608 = vmatpush1.msra.mxu0 %v1952_v24  ;;  %v2004_v23 = vld [vmem:[#allocation9 + $0x4f0] sm:$0xff]  ;;  %v1979_v24 = vld [vmem:[#allocation9 + $0x428] sm:$0xff] }
 0x351   :  { %2538 = vmatprep.subr.mxu1 %v1927_v25  ;;  %2609 = vmatprep.subr.mxu0 %v1929_v26  ;;  %v1981_v25 = vld [vmem:[#allocation9 + $0x438] sm:$0xff]  ;;  %v1978_v26 = vld [vmem:[#allocation9 + $0x420] sm:$0xff] }
 0x352   :  { %2539 = vmatpush1.msra.mxu1 %v1926_v27  ;;  %2610 = vmatpush1.msra.mxu0 %v1928_v28  ;;  %v1980_v27 = vld [vmem:[#allocation9 + $0x430] sm:$0xff]  ;;  %v1955_v28 = vld [vmem:[#allocation9 + $0x368] sm:$0xff] }
 0x353   :  { %2540 = vmatprep.subr.mxu1 %v1903_v29  ;;  %2611 = vmatprep.subr.mxu0 %v1905_v30  ;;  %v1957_v29 = vld [vmem:[#allocation9 + $0x378] sm:$0xff]  ;;  %v1954_v30 = vld [vmem:[#allocation9 + $0x360] sm:$0xff] }
 0x354   :  { %2541 = vmatpush1.msra.mxu1 %v1902_v32  ;;  %2612 = vmatpush1.msra.mxu0 %v1904_v34  ;;  %v1956_v32 = vld [vmem:[#allocation9 + $0x370] sm:$0xff]  ;;  %v1931_v34 = vld [vmem:[#allocation9 + $0x2a8] sm:$0xff] }
 0x355   :  { %2542 = vmatprep.subr.mxu1 %v1879_v35  ;;  %2613 = vmatprep.subr.mxu0 %v1881_v36  ;;  %v1933_v35 = vld [vmem:[#allocation9 + $0x2b8] sm:$0xff]  ;;  %v1930_v36 = vld [vmem:[#allocation9 + $0x2a0] sm:$0xff] }
 0x356   :  { %2543 = vmatpush1.msra.mxu1 %v1878_v37  ;;  %2614 = vmatpush1.msra.mxu0 %v1880_v38  ;;  %v1932_v37 = vld [vmem:[#allocation9 + $0x2b0] sm:$0xff]  ;;  %v1907_v38 = vld [vmem:[#allocation9 + $0x1e8] sm:$0xff] }
 0x357   :  { %2544 = vmatprep.subr.mxu1 %v1855_v39  ;;  %2615 = vmatprep.subr.mxu0 %v1857_v40  ;;  %v1909_v39 = vld [vmem:[#allocation9 + $0x1f8] sm:$0xff]  ;;  %v1906_v40 = vld [vmem:[#allocation9 + $0x1e0] sm:$0xff] }
 0x358   :  { %2545 = vmatpush1.msra.mxu1 %v1854_v41  ;;  %2578 = vmatprep.mubr.f32.mxu1 %v6831_v4  ;;  %v1908_v41 = vld [vmem:[#allocation9 + $0x1f0] sm:$0xff] }
 0x359   :  { %2616 = vmatpush1.msra.mxu0 %v1856_v42  ;;  %2649 = vmatprep.mubr.f32.mxu0 %v6831_v4  ;;  %v1883_v42 = vld [vmem:[#allocation9 + $0x128] sm:$0xff] }
 0x35a   :  { %2579 = vmatmul.mubr.f32.vlgmr.msra.gmra.mxu1 %v5869_v31  ;;  %2650 = vmatmul.mubr.f32.vlgmr.msra.gmra.mxu0 %v5869_v31 }
 0x35b   :  { %2656 = vmatprep.subr.mxu1 %v2219_v43  ;;  %2727 = vmatprep.subr.mxu0 %v2221_v44  ;;  %v1885_v43 = vld [vmem:[#allocation9 + $0x138] sm:$0xff]  ;;  %v1882_v44 = vld [vmem:[#allocation9 + $0x120] sm:$0xff] }
 0x35c   :  { %2657 = vmatpush1.msra.mxu1 %v2218_v45  ;;  %2728 = vmatpush1.msra.mxu0 %v2220_v46  ;;  %v1884_v45 = vld [vmem:[#allocation9 + $0x130] sm:$0xff]  ;;  %v1859_v46 = vld [vmem:[#allocation9 + $0x68] sm:$0xff] }
 0x35d   :  { %2658 = vmatprep.subr.mxu1 %v2195_v47  ;;  %2729 = vmatprep.subr.mxu0 %v2197_v49  ;;  %v1861_v47 = vld [vmem:[#allocation9 + $0x78] sm:$0xff]  ;;  %v1858_v49 = vld [vmem:[#allocation9 + $0x60] sm:$0xff] }
 0x35e   :  { %2659 = vmatpush1.msra.mxu1 %v2194_v51  ;;  %2730 = vmatpush1.msra.mxu0 %v2196_v52  ;;  %v1860_v51 = vld [vmem:[#allocation9 + $0x70] sm:$0xff]  ;;  %v2223_v52 = vld [vmem:[#allocation9 + $0xbc8] sm:$0xff] }
 0x35f   :  { %2660 = vmatprep.subr.mxu1 %v2171_v53  ;;  %2731 = vmatprep.subr.mxu0 %v2173_v54  ;;  %v2225_v53 = vld [vmem:[#allocation9 + $0xbd8] sm:$0xff]  ;;  %v2222_v54 = vld [vmem:[#allocation9 + $0xbc0] sm:$0xff] }
 0x360   :  { %2661 = vmatpush1.msra.mxu1 %v2170_v55  ;;  %2732 = vmatpush1.msra.mxu0 %v2172_v56  ;;  %v2224_v55 = vld [vmem:[#allocation9 + $0xbd0] sm:$0xff]  ;;  %v2199_v56 = vld [vmem:[#allocation9 + $0xb08] sm:$0xff] }
 0x361   :  { %2662 = vmatprep.subr.mxu1 %v2147_v57  ;;  %2733 = vmatprep.subr.mxu0 %v2149_v58  ;;  %v2201_v57 = vld [vmem:[#allocation9 + $0xb18] sm:$0xff]  ;;  %v2198_v58 = vld [vmem:[#allocation9 + $0xb00] sm:$0xff] }
 0x362   :  { %2663 = vmatpush1.msra.mxu1 %v2146_v59  ;;  %2734 = vmatpush1.msra.mxu0 %v2148_v60  ;;  %v2200_v59 = vld [vmem:[#allocation9 + $0xb10] sm:$0xff]  ;;  %v2175_v60 = vld [vmem:[#allocation9 + $0xa48] sm:$0xff] }
 0x363   :  { %2664 = vmatprep.subr.mxu1 %v2123_v61  ;;  %2735 = vmatprep.subr.mxu0 %v2125_v62  ;;  %v2177_v61 = vld [vmem:[#allocation9 + $0xa58] sm:$0xff]  ;;  %v2174_v62 = vld [vmem:[#allocation9 + $0xa40] sm:$0xff] }
 0x364   :  { %2665 = vmatpush1.msra.mxu1 %v2122_v19  ;;  %2736 = vmatpush1.msra.mxu0 %v2124_v1  ;;  %v2176_v19 = vld [vmem:[#allocation9 + $0xa50] sm:$0xff]  ;;  %v2151_v1 = vld [vmem:[#allocation9 + $0x988] sm:$0xff] }
 0x365   :  { %2666 = vmatprep.subr.mxu1 %v2099_v48  ;;  %2737 = vmatprep.subr.mxu0 %v2101_v63  ;;  %v2153_v48 = vld [vmem:[#allocation9 + $0x998] sm:$0xff]  ;;  %v2150_v63 = vld [vmem:[#allocation9 + $0x980] sm:$0xff] }
 0x366   :  { %2667 = vmatpush1.msra.mxu1 %v2098_v50  ;;  %2738 = vmatpush1.msra.mxu0 %v2100_v2  ;;  %v2152_v50 = vld [vmem:[#allocation9 + $0x990] sm:$0xff]  ;;  %v2127_v2 = vld [vmem:[#allocation9 + $0x8c8] sm:$0xff] }
 0x367   :  { %2668 = vmatprep.subr.mxu1 %v2075_v5  ;;  %2739 = vmatprep.subr.mxu0 %v2077_v6  ;;  %v2129_v5 = vld [vmem:[#allocation9 + $0x8d8] sm:$0xff]  ;;  %v2126_v6 = vld [vmem:[#allocation9 + $0x8c0] sm:$0xff] }
 0x368   :  { %2669 = vmatpush1.msra.mxu1 %v2074_v8  ;;  %2740 = vmatpush1.msra.mxu0 %v2076_v9  ;;  %v2128_v8 = vld [vmem:[#allocation9 + $0x8d0] sm:$0xff]  ;;  %v2103_v9 = vld [vmem:[#allocation9 + $0x808] sm:$0xff] }
 0x369   :  { %2670 = vmatprep.subr.mxu1 %v2051_v10  ;;  %2741 = vmatprep.subr.mxu0 %v2053_v11  ;;  %v2105_v10 = vld [vmem:[#allocation9 + $0x818] sm:$0xff]  ;;  %v2102_v11 = vld [vmem:[#allocation9 + $0x800] sm:$0xff] }
 0x36a   :  { %2671 = vmatpush1.msra.mxu1 %v2050_v12  ;;  %2742 = vmatpush1.msra.mxu0 %v2052_v14  ;;  %v2104_v12 = vld [vmem:[#allocation9 + $0x810] sm:$0xff]  ;;  %v2079_v14 = vld [vmem:[#allocation9 + $0x748] sm:$0xff] }
 0x36b   :  { %2672 = vmatprep.subr.mxu1 %v2027_v3  ;;  %2743 = vmatprep.subr.mxu0 %v2029_v15  ;;  %v2081_v3 = vld [vmem:[#allocation9 + $0x758] sm:$0xff]  ;;  %v2078_v15 = vld [vmem:[#allocation9 + $0x740] sm:$0xff] }
 0x36c   :  { %2673 = vmatpush1.msra.mxu1 %v2026_v16  ;;  %2744 = vmatpush1.msra.mxu0 %v2028_v18  ;;  %v2080_v16 = vld [vmem:[#allocation9 + $0x750] sm:$0xff]  ;;  %v2055_v18 = vld [vmem:[#allocation9 + $0x688] sm:$0xff] }
 0x36d   :  { %2674 = vmatprep.subr.mxu1 %v2003_v20  ;;  %2745 = vmatprep.subr.mxu0 %v2005_v21  ;;  %v2057_v20 = vld [vmem:[#allocation9 + $0x698] sm:$0xff]  ;;  %v2054_v21 = vld [vmem:[#allocation9 + $0x680] sm:$0xff] }
 0x36e   :  { %2675 = vmatpush1.msra.mxu1 %v2002_v22  ;;  %2746 = vmatpush1.msra.mxu0 %v2004_v23  ;;  %v2056_v22 = vld [vmem:[#allocation9 + $0x690] sm:$0xff]  ;;  %v2031_v23 = vld [vmem:[#allocation9 + $0x5c8] sm:$0xff] }
 0x36f   :  { %2676 = vmatprep.subr.mxu1 %v1979_v24  ;;  %2747 = vmatprep.subr.mxu0 %v1981_v25  ;;  %v2033_v24 = vld [vmem:[#allocation9 + $0x5d8] sm:$0xff]  ;;  %v2030_v25 = vld [vmem:[#allocation9 + $0x5c0] sm:$0xff] }
 0x370   :  { %2677 = vmatpush1.msra.mxu1 %v1978_v26  ;;  %2748 = vmatpush1.msra.mxu0 %v1980_v27  ;;  %v2032_v26 = vld [vmem:[#allocation9 + $0x5d0] sm:$0xff]  ;;  %v2007_v27 = vld [vmem:[#allocation9 + $0x508] sm:$0xff] }
 0x371   :  { %2678 = vmatprep.subr.mxu1 %v1955_v28  ;;  %2749 = vmatprep.subr.mxu0 %v1957_v29  ;;  %v2009_v28 = vld [vmem:[#allocation9 + $0x518] sm:$0xff]  ;;  %v2006_v29 = vld [vmem:[#allocation9 + $0x500] sm:$0xff] }
 0x372   :  { %2679 = vmatpush1.msra.mxu1 %v1954_v30  ;;  %2750 = vmatpush1.msra.mxu0 %v1956_v32  ;;  %v2008_v30 = vld [vmem:[#allocation9 + $0x510] sm:$0xff]  ;;  %v1983_v32 = vld [vmem:[#allocation9 + $0x448] sm:$0xff] }
 0x373   :  { %2680 = vmatprep.subr.mxu1 %v1931_v34  ;;  %2751 = vmatprep.subr.mxu0 %v1933_v35  ;;  %v1985_v34 = vld [vmem:[#allocation9 + $0x458] sm:$0xff]  ;;  %v1982_v35 = vld [vmem:[#allocation9 + $0x440] sm:$0xff] }
 0x374   :  { %2681 = vmatpush1.msra.mxu1 %v1930_v36  ;;  %2752 = vmatpush1.msra.mxu0 %v1932_v37  ;;  %v1984_v36 = vld [vmem:[#allocation9 + $0x450] sm:$0xff]  ;;  %v1959_v37 = vld [vmem:[#allocation9 + $0x388] sm:$0xff] }
 0x375   :  { %2682 = vmatprep.subr.mxu1 %v1907_v38  ;;  %2753 = vmatprep.subr.mxu0 %v1909_v39  ;;  %v1961_v38 = vld [vmem:[#allocation9 + $0x398] sm:$0xff]  ;;  %v1958_v39 = vld [vmem:[#allocation9 + $0x380] sm:$0xff] }
 0x376   :  { %2683 = vmatpush1.msra.mxu1 %v1906_v40  ;;  %2754 = vmatpush1.msra.mxu0 %v1908_v41  ;;  %v1960_v40 = vld [vmem:[#allocation9 + $0x390] sm:$0xff]  ;;  %v1935_v41 = vld [vmem:[#allocation9 + $0x2c8] sm:$0xff] }
 0x377   :  { %2684 = vmatprep.subr.mxu1 %v1883_v42  ;;  %2755 = vmatprep.subr.mxu0 %v1885_v43  ;;  %v1937_v42 = vld [vmem:[#allocation9 + $0x2d8] sm:$0xff]  ;;  %v1934_v43 = vld [vmem:[#allocation9 + $0x2c0] sm:$0xff] }
 0x378   :  { %2685 = vmatpush1.msra.mxu1 %v1882_v44  ;;  %2756 = vmatpush1.msra.mxu0 %v1884_v45  ;;  %v1936_v44 = vld [vmem:[#allocation9 + $0x2d0] sm:$0xff]  ;;  %v1911_v45 = vld [vmem:[#allocation9 + $0x208] sm:$0xff] }
 0x379   :  { %2686 = vmatprep.subr.mxu1 %v1859_v46  ;;  %2757 = vmatprep.subr.mxu0 %v1861_v47  ;;  %v1913_v46 = vld [vmem:[#allocation9 + $0x218] sm:$0xff]  ;;  %v1910_v47 = vld [vmem:[#allocation9 + $0x200] sm:$0xff] }
 0x37a   :  { %2687 = vmatpush1.msra.mxu1 %v1858_v49  ;;  %2720 = vmatprep.mubr.f32.mxu1 %v6831_v4  ;;  %v1912_v49 = vld [vmem:[#allocation9 + $0x210] sm:$0xff] }
 0x37b   :  { %2758 = vmatpush1.msra.mxu0 %v1860_v51  ;;  %2791 = vmatprep.mubr.f32.mxu0 %v6831_v4  ;;  %v1887_v51 = vld [vmem:[#allocation9 + $0x148] sm:$0xff] }
 0x37c   :  { %2721 = vmatmul.mubr.f32.vlgmr.msra.gmra.mxu1 %v5869_v31  ;;  %2792 = vmatmul.mubr.f32.vlgmr.msra.gmra.mxu0 %v5869_v31 }
 0x37d   :  { %2798 = vmatprep.subr.mxu1 %v2223_v52  ;;  %2869 = vmatprep.subr.mxu0 %v2225_v53  ;;  %v1889_v52 = vld [vmem:[#allocation9 + $0x158] sm:$0xff]  ;;  %v1886_v53 = vld [vmem:[#allocation9 + $0x140] sm:$0xff] }
 0x37e   :  { %2799 = vmatpush1.msra.mxu1 %v2222_v54  ;;  %2870 = vmatpush1.msra.mxu0 %v2224_v55  ;;  %v1888_v54 = vld [vmem:[#allocation9 + $0x150] sm:$0xff]  ;;  %v1863_v55 = vld [vmem:[#allocation9 + $0x88] sm:$0xff] }
 0x37f   :  { %2800 = vmatprep.subr.mxu1 %v2199_v56  ;;  %2871 = vmatprep.subr.mxu0 %v2201_v57  ;;  %v1865_v56 = vld [vmem:[#allocation9 + $0x98] sm:$0xff]  ;;  %v1862_v57 = vld [vmem:[#allocation9 + $0x80] sm:$0xff] }
 0x380   :  { %2801 = vmatpush1.msra.mxu1 %v2198_v58  ;;  %2872 = vmatpush1.msra.mxu0 %v2200_v59  ;;  %v1864_v58 = vld [vmem:[#allocation9 + $0x90] sm:$0xff]  ;;  %v2227_v59 = vld [vmem:[#allocation9 + $0xbe8] sm:$0xff] }
 0x381   :  { %2802 = vmatprep.subr.mxu1 %v2175_v60  ;;  %2873 = vmatprep.subr.mxu0 %v2177_v61  ;;  %v2229_v60 = vld [vmem:[#allocation9 + $0xbf8] sm:$0xff]  ;;  %v2226_v61 = vld [vmem:[#allocation9 + $0xbe0] sm:$0xff] }
 0x382   :  { %2803 = vmatpush1.msra.mxu1 %v2174_v62  ;;  %2874 = vmatpush1.msra.mxu0 %v2176_v19  ;;  %v2228_v62 = vld [vmem:[#allocation9 + $0xbf0] sm:$0xff]  ;;  %v2203_v19 = vld [vmem:[#allocation9 + $0xb28] sm:$0xff] }
 0x383   :  { %2804 = vmatprep.subr.mxu1 %v2151_v1  ;;  %2875 = vmatprep.subr.mxu0 %v2153_v48  ;;  %v2205_v1 = vld [vmem:[#allocation9 + $0xb38] sm:$0xff]  ;;  %v2202_v48 = vld [vmem:[#allocation9 + $0xb20] sm:$0xff] }
 0x384   :  { %2805 = vmatpush1.msra.mxu1 %v2150_v63  ;;  %2876 = vmatpush1.msra.mxu0 %v2152_v50  ;;  %v2204_v63 = vld [vmem:[#allocation9 + $0xb30] sm:$0xff]  ;;  %v2179_v50 = vld [vmem:[#allocation9 + $0xa68] sm:$0xff] }
 0x385   :  { %2806 = vmatprep.subr.mxu1 %v2127_v2  ;;  %2877 = vmatprep.subr.mxu0 %v2129_v5  ;;  %v2181_v2 = vld [vmem:[#allocation9 + $0xa78] sm:$0xff]  ;;  %v2178_v5 = vld [vmem:[#allocation9 + $0xa60] sm:$0xff] }
 0x386   :  { %2807 = vmatpush1.msra.mxu1 %v2126_v6  ;;  %2878 = vmatpush1.msra.mxu0 %v2128_v8  ;;  %v2180_v6 = vld [vmem:[#allocation9 + $0xa70] sm:$0xff]  ;;  %v2155_v8 = vld [vmem:[#allocation9 + $0x9a8] sm:$0xff] }
 0x387   :  { %2808 = vmatprep.subr.mxu1 %v2103_v9  ;;  %2879 = vmatprep.subr.mxu0 %v2105_v10  ;;  %v2157_v9 = vld [vmem:[#allocation9 + $0x9b8] sm:$0xff]  ;;  %v2154_v10 = vld [vmem:[#allocation9 + $0x9a0] sm:$0xff] }
 0x388   :  { %2809 = vmatpush1.msra.mxu1 %v2102_v11  ;;  %2880 = vmatpush1.msra.mxu0 %v2104_v12  ;;  %v2156_v11 = vld [vmem:[#allocation9 + $0x9b0] sm:$0xff]  ;;  %v2131_v12 = vld [vmem:[#allocation9 + $0x8e8] sm:$0xff] }
 0x389   :  { %2810 = vmatprep.subr.mxu1 %v2079_v14  ;;  %2881 = vmatprep.subr.mxu0 %v2081_v3  ;;  %v2133_v14 = vld [vmem:[#allocation9 + $0x8f8] sm:$0xff]  ;;  %v2130_v3 = vld [vmem:[#allocation9 + $0x8e0] sm:$0xff] }
 0x38a   :  { %2811 = vmatpush1.msra.mxu1 %v2078_v15  ;;  %2882 = vmatpush1.msra.mxu0 %v2080_v16  ;;  %v2132_v15 = vld [vmem:[#allocation9 + $0x8f0] sm:$0xff]  ;;  %v2107_v16 = vld [vmem:[#allocation9 + $0x828] sm:$0xff] }
 0x38b   :  { %2812 = vmatprep.subr.mxu1 %v2055_v18  ;;  %2883 = vmatprep.subr.mxu0 %v2057_v20  ;;  %v2109_v18 = vld [vmem:[#allocation9 + $0x838] sm:$0xff]  ;;  %v2106_v20 = vld [vmem:[#allocation9 + $0x820] sm:$0xff] }
 0x38c   :  { %2813 = vmatpush1.msra.mxu1 %v2054_v21  ;;  %2884 = vmatpush1.msra.mxu0 %v2056_v22  ;;  %v2108_v21 = vld [vmem:[#allocation9 + $0x830] sm:$0xff]  ;;  %v2083_v22 = vld [vmem:[#allocation9 + $0x768] sm:$0xff] }
 0x38d   :  { %2814 = vmatprep.subr.mxu1 %v2031_v23  ;;  %2885 = vmatprep.subr.mxu0 %v2033_v24  ;;  %v2085_v23 = vld [vmem:[#allocation9 + $0x778] sm:$0xff]  ;;  %v2082_v24 = vld [vmem:[#allocation9 + $0x760] sm:$0xff] }
 0x38e   :  { %2815 = vmatpush1.msra.mxu1 %v2030_v25  ;;  %2886 = vmatpush1.msra.mxu0 %v2032_v26  ;;  %v2084_v25 = vld [vmem:[#allocation9 + $0x770] sm:$0xff]  ;;  %v2059_v26 = vld [vmem:[#allocation9 + $0x6a8] sm:$0xff] }
 0x38f   :  { %2816 = vmatprep.subr.mxu1 %v2007_v27  ;;  %2887 = vmatprep.subr.mxu0 %v2009_v28  ;;  %v2061_v27 = vld [vmem:[#allocation9 + $0x6b8] sm:$0xff]  ;;  %v2058_v28 = vld [vmem:[#allocation9 + $0x6a0] sm:$0xff] }
 0x390   :  { %2817 = vmatpush1.msra.mxu1 %v2006_v29  ;;  %2888 = vmatpush1.msra.mxu0 %v2008_v30  ;;  %v2060_v29 = vld [vmem:[#allocation9 + $0x6b0] sm:$0xff]  ;;  %v2035_v30 = vld [vmem:[#allocation9 + $0x5e8] sm:$0xff] }
 0x391   :  { %2818 = vmatprep.subr.mxu1 %v1983_v32  ;;  %2889 = vmatprep.subr.mxu0 %v1985_v34  ;;  %v2037_v32 = vld [vmem:[#allocation9 + $0x5f8] sm:$0xff]  ;;  %v2034_v34 = vld [vmem:[#allocation9 + $0x5e0] sm:$0xff] }
 0x392   :  { %2819 = vmatpush1.msra.mxu1 %v1982_v35  ;;  %2890 = vmatpush1.msra.mxu0 %v1984_v36  ;;  %v2036_v35 = vld [vmem:[#allocation9 + $0x5f0] sm:$0xff]  ;;  %v2011_v36 = vld [vmem:[#allocation9 + $0x528] sm:$0xff] }
 0x393   :  { %2820 = vmatprep.subr.mxu1 %v1959_v37  ;;  %2891 = vmatprep.subr.mxu0 %v1961_v38  ;;  %v2013_v37 = vld [vmem:[#allocation9 + $0x538] sm:$0xff]  ;;  %v2010_v38 = vld [vmem:[#allocation9 + $0x520] sm:$0xff] }
 0x394   :  { %2821 = vmatpush1.msra.mxu1 %v1958_v39  ;;  %2892 = vmatpush1.msra.mxu0 %v1960_v40  ;;  %v2012_v39 = vld [vmem:[#allocation9 + $0x530] sm:$0xff]  ;;  %v1987_v40 = vld [vmem:[#allocation9 + $0x468] sm:$0xff] }
 0x395   :  { %2822 = vmatprep.subr.mxu1 %v1935_v41  ;;  %2893 = vmatprep.subr.mxu0 %v1937_v42  ;;  %v1989_v41 = vld [vmem:[#allocation9 + $0x478] sm:$0xff]  ;;  %v1986_v42 = vld [vmem:[#allocation9 + $0x460] sm:$0xff] }
 0x396   :  { %2823 = vmatpush1.msra.mxu1 %v1934_v43  ;;  %2894 = vmatpush1.msra.mxu0 %v1936_v44  ;;  %v1988_v43 = vld [vmem:[#allocation9 + $0x470] sm:$0xff]  ;;  %v1963_v44 = vld [vmem:[#allocation9 + $0x3a8] sm:$0xff] }
 0x397   :  { %2824 = vmatprep.subr.mxu1 %v1911_v45  ;;  %2895 = vmatprep.subr.mxu0 %v1913_v46  ;;  %v1965_v45 = vld [vmem:[#allocation9 + $0x3b8] sm:$0xff]  ;;  %v1962_v46 = vld [vmem:[#allocation9 + $0x3a0] sm:$0xff] }
 0x398   :  { %2825 = vmatpush1.msra.mxu1 %v1910_v47  ;;  %2896 = vmatpush1.msra.mxu0 %v1912_v49  ;;  %v1964_v47 = vld [vmem:[#allocation9 + $0x3b0] sm:$0xff]  ;;  %v1939_v49 = vld [vmem:[#allocation9 + $0x2e8] sm:$0xff] }
 0x399   :  { %2826 = vmatprep.subr.mxu1 %v1887_v51  ;;  %2897 = vmatprep.subr.mxu0 %v1889_v52  ;;  %v1941_v51 = vld [vmem:[#allocation9 + $0x2f8] sm:$0xff]  ;;  %v1938_v52 = vld [vmem:[#allocation9 + $0x2e0] sm:$0xff] }
 0x39a   :  { %2827 = vmatpush1.msra.mxu1 %v1886_v53  ;;  %2898 = vmatpush1.msra.mxu0 %v1888_v54  ;;  %v1940_v53 = vld [vmem:[#allocation9 + $0x2f0] sm:$0xff]  ;;  %v1915_v54 = vld [vmem:[#allocation9 + $0x228] sm:$0xff] }
 0x39b   :  { %2828 = vmatprep.subr.mxu1 %v1863_v55  ;;  %2899 = vmatprep.subr.mxu0 %v1865_v56  ;;  %v1917_v55 = vld [vmem:[#allocation9 + $0x238] sm:$0xff]  ;;  %v1914_v56 = vld [vmem:[#allocation9 + $0x220] sm:$0xff] }
 0x39c   :  { %2829 = vmatpush1.msra.mxu1 %v1862_v57  ;;  %2862 = vmatprep.mubr.f32.mxu1 %v6831_v4  ;;  %v1916_v57 = vld [vmem:[#allocation9 + $0x230] sm:$0xff] }
 0x39d   :  { %2900 = vmatpush1.msra.mxu0 %v1864_v58  ;;  %2933 = vmatprep.mubr.f32.mxu0 %v6831_v4  ;;  %v1891_v58 = vld [vmem:[#allocation9 + $0x168] sm:$0xff] }
 0x39e   :  { %2863 = vmatmul.mubr.f32.vlgmr.msra.gmra.mxu1 %v5869_v31  ;;  %2934 = vmatmul.mubr.f32.vlgmr.msra.gmra.mxu0 %v5869_v31 }
 0x39f   :  { %2940 = vmatprep.subr.mxu1 %v2227_v59  ;;  %3011 = vmatprep.subr.mxu0 %v2229_v60  ;;  %v1893_v59 = vld [vmem:[#allocation9 + $0x178] sm:$0xff]  ;;  %v1890_v60 = vld [vmem:[#allocation9 + $0x160] sm:$0xff] }
 0x3a0   :  { %2941 = vmatpush1.msra.mxu1 %v2226_v61  ;;  %3012 = vmatpush1.msra.mxu0 %v2228_v62  ;;  %v1892_v61 = vld [vmem:[#allocation9 + $0x170] sm:$0xff]  ;;  %v1867_v62 = vld [vmem:[#allocation9 + $0xa8] sm:$0xff] }
 0x3a1   :  { %2942 = vmatprep.subr.mxu1 %v2203_v19  ;;  %3013 = vmatprep.subr.mxu0 %v2205_v1  ;;  %v1869_v19 = vld [vmem:[#allocation9 + $0xb8] sm:$0xff]  ;;  %v1866_v1 = vld [vmem:[#allocation9 + $0xa0] sm:$0xff] }
 0x3a2   :  { %2943 = vmatpush1.msra.mxu1 %v2202_v48  ;;  %3014 = vmatpush1.msra.mxu0 %v2204_v63  ;;  %v1868_v48 = vld [vmem:[#allocation9 + $0xb0] sm:$0xff]  ;;  %v5890_v63 = vld [vmem:[#allocation10 + $0x1e8] sm:$0xff] }
 0x3a3   :  { %2944 = vmatprep.subr.mxu1 %v2179_v50  ;;  %3015 = vmatprep.subr.mxu0 %v2181_v2  ;;  %v5892_v50 = vld [vmem:[#allocation10 + $0x1f8] sm:$0xff]  ;;  %v5895_v2 = vld [vmem:[#allocation10 + $0x1e0] sm:$0xff] }
 0x3a4   :  { %2945 = vmatpush1.msra.mxu1 %v2178_v5  ;;  %3016 = vmatpush1.msra.mxu0 %v2180_v6  ;;  %v5897_v5 = vld [vmem:[#allocation10 + $0x1f0] sm:$0xff]  ;;  %v5901_v6 = vld [vmem:[#allocation10 + $0x1c8] sm:$0xff] }
 0x3a5   :  { %2946 = vmatprep.subr.mxu1 %v2155_v8  ;;  %3017 = vmatprep.subr.mxu0 %v2157_v9  ;;  %v5903_v8 = vld [vmem:[#allocation10 + $0x1d8] sm:$0xff]  ;;  %v5907_v9 = vld [vmem:[#allocation10 + $0x1c0] sm:$0xff] }
 0x3a6   :  { %2947 = vmatpush1.msra.mxu1 %v2154_v10  ;;  %3018 = vmatpush1.msra.mxu0 %v2156_v11  ;;  %v5909_v10 = vld [vmem:[#allocation10 + $0x1d0] sm:$0xff]  ;;  %v5913_v11 = vld [vmem:[#allocation10 + $0x1a8] sm:$0xff] }
 0x3a7   :  { %2948 = vmatprep.subr.mxu1 %v2131_v12  ;;  %3019 = vmatprep.subr.mxu0 %v2133_v14  ;;  %v5915_v12 = vld [vmem:[#allocation10 + $0x1b8] sm:$0xff]  ;;  %v5921_v14 = vld [vmem:[#allocation10 + $0x1b0] sm:$0xff] }
 0x3a8   :  { %2949 = vmatpush1.msra.mxu1 %v2130_v3  ;;  %3020 = vmatpush1.msra.mxu0 %v2132_v15  ;;  %v5925_v3 = vld [vmem:[#allocation10 + $0x188] sm:$0xff]  ;;  %v5927_v15 = vld [vmem:[#allocation10 + $0x198] sm:$0xff] }
 0x3a9   :  { %2950 = vmatprep.subr.mxu1 %v2107_v16  ;;  %3021 = vmatprep.subr.mxu0 %v2109_v18  ;;  %6918 = vst [vmem:[#allocation29_spill] sm:$0xff] %v5925_v3  ;;  %v5931_v16 = vld [vmem:[#allocation10 + $0x180] sm:$0xff]  ;;  %v5933_v18 = vld [vmem:[#allocation10 + $0x190] sm:$0xff] }
 0x3aa   :  { %2951 = vmatpush1.msra.mxu1 %v2106_v20  ;;  %3022 = vmatpush1.msra.mxu0 %v2108_v21  ;;  %6919 = vst [vmem:[#allocation30_spill] sm:$0xff] %v5931_v16  ;;  %v5937_v20 = vld [vmem:[#allocation10 + $0x168] sm:$0xff]  ;;  %v5939_v21 = vld [vmem:[#allocation10 + $0x178] sm:$0xff] }
 0x3ab   :  { %2952 = vmatprep.subr.mxu1 %v2083_v22  ;;  %3023 = vmatprep.subr.mxu0 %v2085_v23  ;;  %6920 = vst [vmem:[#allocation31_spill] sm:$0xff] %v5937_v20  ;;  %v5943_v22 = vld [vmem:[#allocation10 + $0x160] sm:$0xff]  ;;  %v5945_v23 = vld [vmem:[#allocation10 + $0x170] sm:$0xff] }
 0x3ac   :  { %2953 = vmatpush1.msra.mxu1 %v2082_v24  ;;  %3024 = vmatpush1.msra.mxu0 %v2084_v25  ;;  %6921 = vst [vmem:[#allocation32_spill] sm:$0xff] %v5943_v22  ;;  %v5949_v24 = vld [vmem:[#allocation10 + $0x148] sm:$0xff]  ;;  %v5951_v25 = vld [vmem:[#allocation10 + $0x158] sm:$0xff] }
 0x3ad   :  { %2954 = vmatprep.subr.mxu1 %v2059_v26  ;;  %3025 = vmatprep.subr.mxu0 %v2061_v27  ;;  %6922 = vst [vmem:[#allocation33_spill] sm:$0xff] %v5949_v24  ;;  %v5955_v26 = vld [vmem:[#allocation10 + $0x140] sm:$0xff]  ;;  %v5957_v27 = vld [vmem:[#allocation10 + $0x150] sm:$0xff] }
 0x3ae   :  { %2955 = vmatpush1.msra.mxu1 %v2058_v28  ;;  %3026 = vmatpush1.msra.mxu0 %v2060_v29  ;;  %6923 = vst [vmem:[#allocation34_spill] sm:$0xff] %v5955_v26  ;;  %v5961_v28 = vld [vmem:[#allocation10 + $0x128] sm:$0xff]  ;;  %v5963_v29 = vld [vmem:[#allocation10 + $0x138] sm:$0xff] }
 0x3af   :  { %2956 = vmatprep.subr.mxu1 %v2035_v30  ;;  %3027 = vmatprep.subr.mxu0 %v2037_v32  ;;  %6924 = vst [vmem:[#allocation35_spill] sm:$0xff] %v5961_v28  ;;  %v5967_v30 = vld [vmem:[#allocation10 + $0x120] sm:$0xff]  ;;  %v5969_v32 = vld [vmem:[#allocation10 + $0x130] sm:$0xff] }
 0x3b0   :  { %2957 = vmatpush1.msra.mxu1 %v2034_v34  ;;  %3028 = vmatpush1.msra.mxu0 %v2036_v35  ;;  %6925 = vst [vmem:[#allocation36_spill] sm:$0xff] %v5967_v30  ;;  %v5973_v34 = vld [vmem:[#allocation10 + $0x108] sm:$0xff]  ;;  %v5975_v35 = vld [vmem:[#allocation10 + $0x118] sm:$0xff] }
 0x3b1   :  { %2958 = vmatprep.subr.mxu1 %v2011_v36  ;;  %3029 = vmatprep.subr.mxu0 %v2013_v37  ;;  %6926 = vst [vmem:[#allocation37_spill] sm:$0xff] %v5973_v34  ;;  %v5979_v36 = vld [vmem:[#allocation10 + $0x100] sm:$0xff]  ;;  %v5981_v37 = vld [vmem:[#allocation10 + $0x110] sm:$0xff] }
 0x3b2   :  { %2959 = vmatpush1.msra.mxu1 %v2010_v38  ;;  %3030 = vmatpush1.msra.mxu0 %v2012_v39  ;;  %6927 = vst [vmem:[#allocation38_spill] sm:$0xff] %v5979_v36  ;;  %v5985_v38 = vld [vmem:[#allocation10 + $0xe8] sm:$0xff]  ;;  %v5987_v39 = vld [vmem:[#allocation10 + $0xf8] sm:$0xff] }
 0x3b3   :  { %2960 = vmatprep.subr.mxu1 %v1987_v40  ;;  %3031 = vmatprep.subr.mxu0 %v1989_v41  ;;  %6928 = vst [vmem:[#allocation39_spill] sm:$0xff] %v5985_v38  ;;  %v5991_v40 = vld [vmem:[#allocation10 + $0xe0] sm:$0xff]  ;;  %v5993_v41 = vld [vmem:[#allocation10 + $0xf0] sm:$0xff] }
 0x3b4   :  { %2961 = vmatpush1.msra.mxu1 %v1986_v42  ;;  %3032 = vmatpush1.msra.mxu0 %v1988_v43  ;;  %6929 = vst [vmem:[#allocation40_spill] sm:$0xff] %v5991_v40  ;;  %v5997_v42 = vld [vmem:[#allocation10 + $0xc8] sm:$0xff]  ;;  %v5999_v43 = vld [vmem:[#allocation10 + $0xd8] sm:$0xff] }
 0x3b5   :  { %2962 = vmatprep.subr.mxu1 %v1963_v44  ;;  %3033 = vmatprep.subr.mxu0 %v1965_v45  ;;  %6930 = vst [vmem:[#allocation41_spill] sm:$0xff] %v5997_v42  ;;  %v6003_v44 = vld [vmem:[#allocation10 + $0xc0] sm:$0xff]  ;;  %v6005_v45 = vld [vmem:[#allocation10 + $0xd0] sm:$0xff] }
 0x3b6   :  { %2963 = vmatpush1.msra.mxu1 %v1962_v46  ;;  %3034 = vmatpush1.msra.mxu0 %v1964_v47  ;;  %6931 = vst [vmem:[#allocation42_spill] sm:$0xff] %v6003_v44  ;;  %v6009_v46 = vld [vmem:[#allocation10 + $0xa8] sm:$0xff]  ;;  %v6011_v47 = vld [vmem:[#allocation10 + $0xb8] sm:$0xff] }
 0x3b7   :  { %2964 = vmatprep.subr.mxu1 %v1939_v49  ;;  %3035 = vmatprep.subr.mxu0 %v1941_v51  ;;  %6932 = vst [vmem:[#allocation43_spill] sm:$0xff] %v6009_v46  ;;  %v6015_v49 = vld [vmem:[#allocation10 + $0xa0] sm:$0xff]  ;;  %v6017_v51 = vld [vmem:[#allocation10 + $0xb0] sm:$0xff] }
 0x3b8   :  { %2965 = vmatpush1.msra.mxu1 %v1938_v52  ;;  %3036 = vmatpush1.msra.mxu0 %v1940_v53  ;;  %6933 = vst [vmem:[#allocation44_spill] sm:$0xff] %v6015_v49  ;;  %v6021_v52 = vld [vmem:[#allocation10 + $0x88] sm:$0xff]  ;;  %v6023_v53 = vld [vmem:[#allocation10 + $0x98] sm:$0xff] }
 0x3b9   :  { %2966 = vmatprep.subr.mxu1 %v1915_v54  ;;  %3037 = vmatprep.subr.mxu0 %v1917_v55  ;;  %6934 = vst [vmem:[#allocation45_spill] sm:$0xff] %v6021_v52  ;;  %v6027_v54 = vld [vmem:[#allocation10 + $0x80] sm:$0xff]  ;;  %v6029_v55 = vld [vmem:[#allocation10 + $0x90] sm:$0xff] }
 0x3ba   :  { %2967 = vmatpush1.msra.mxu1 %v1914_v56  ;;  %3038 = vmatpush1.msra.mxu0 %v1916_v57  ;;  %6935 = vst [vmem:[#allocation46_spill] sm:$0xff] %v6027_v54  ;;  %v6033_v56 = vld [vmem:[#allocation10 + $0x68] sm:$0xff]  ;;  %v6035_v57 = vld [vmem:[#allocation10 + $0x78] sm:$0xff] }
 0x3bb   :  { %2968 = vmatprep.subr.mxu1 %v1891_v58  ;;  %3039 = vmatprep.subr.mxu0 %v1893_v59  ;;  %6936 = vst [vmem:[#allocation47_spill] sm:$0xff] %v6033_v56  ;;  %v6039_v58 = vld [vmem:[#allocation10 + $0x60] sm:$0xff]  ;;  %v6041_v59 = vld [vmem:[#allocation10 + $0x70] sm:$0xff] }
 0x3bc   :  { %2969 = vmatpush1.msra.mxu1 %v1890_v60  ;;  %3040 = vmatpush1.msra.mxu0 %v1892_v61  ;;  %6937 = vst [vmem:[#allocation48_spill] sm:$0xff] %v6039_v58  ;;  %v6045_v60 = vld [vmem:[#allocation10 + $0x48] sm:$0xff]  ;;  %v6047_v61 = vld [vmem:[#allocation10 + $0x58] sm:$0xff] }
 0x3bd   :  { %2970 = vmatprep.subr.mxu1 %v1867_v62  ;;  %3041 = vmatprep.subr.mxu0 %v1869_v19  ;;  %6938 = vst [vmem:[#allocation49_spill] sm:$0xff] %v6045_v60  ;;  %v6051_v62 = vld [vmem:[#allocation10 + $0x40] sm:$0xff]  ;;  %v6053_v19 = vld [vmem:[#allocation10 + $0x50] sm:$0xff] }
 0x3be   :  { %2971 = vmatpush1.msra.mxu1 %v1866_v1  ;;  %3004 = vmatprep.mubr.f32.mxu1 %v6831_v4  ;;  %6939 = vst [vmem:[#allocation50_spill] sm:$0xff] %v6051_v62  ;;  %v6057_v1 = vld [vmem:[#allocation10 + $0x28] sm:$0xff] }
 0x3bf   :  { %3042 = vmatpush1.msra.mxu0 %v1868_v48  ;;  %3075 = vmatprep.mubr.f32.mxu0 %v6831_v4  ;;  %6940 = vst [vmem:[#allocation51_spill] sm:$0xff] %v6057_v1  ;;  %v6059_v48 = vld [vmem:[#allocation10 + $0x38] sm:$0xff]  ;;  %v6069_v4 = vld [vmem:[#allocation10 + $0x8] sm:$0xff] }
 0x3c0   :  { %3005 = vmatmul.mubr.f32.vlgmr.msra.gmra.mxu1 %v5869_v31  ;;  %3076 = vmatmul.mubr.f32.vlgmr.msra.gmra.mxu0 %v5869_v31  ;;  %v5919_v31 = vld [vmem:[#allocation10 + $0x1a0] sm:$0xff]  ;;  %6942 = vst [vmem:[#allocation53_spill] sm:$0xff] %v6069_v4 }
 0x3c1   :  { %3147 = vmatprep.subr.mxu1 %v5890_v63  ;;  %3218 = vmatprep.subr.mxu0 %v5892_v50  ;;  %6917 = vst [vmem:[#allocation28_spill] sm:$0xff] %v5919_v31 }
 0x3c2   :  { %3148 = vmatpush1.msra.mxu1 %v5895_v2  ;;  %3219 = vmatpush1.msra.mxu0 %v5897_v5 }
 0x3c3   :  { %3149 = vmatprep.subr.mxu1 %v5901_v6  ;;  %3220 = vmatprep.subr.mxu0 %v5903_v8 }
 0x3c4   :  { %3150 = vmatpush1.msra.mxu1 %v5907_v9  ;;  %3221 = vmatpush1.msra.mxu0 %v5909_v10 }
 0x3c5   :  { %3151 = vmatprep.subr.mxu1 %v5913_v11  ;;  %3222 = vmatprep.subr.mxu0 %v5915_v12 }
 0x3c6   :  { %3152 = vmatpush1.msra.mxu1 %v5919_v31  ;;  %3223 = vmatpush1.msra.mxu0 %v5921_v14 }
 0x3c7   :  { %3153 = vmatprep.subr.mxu1 %v5925_v3  ;;  %3224 = vmatprep.subr.mxu0 %v5927_v15 }
 0x3c8   :  { %3154 = vmatpush1.msra.mxu1 %v5931_v16  ;;  %3225 = vmatpush1.msra.mxu0 %v5933_v18 }
 0x3c9   :  { %3155 = vmatprep.subr.mxu1 %v5937_v20  ;;  %3226 = vmatprep.subr.mxu0 %v5939_v21 }
 0x3ca   :  { %3156 = vmatpush1.msra.mxu1 %v5943_v22  ;;  %3227 = vmatpush1.msra.mxu0 %v5945_v23 }
 0x3cb   :  { %3157 = vmatprep.subr.mxu1 %v5949_v24  ;;  %3228 = vmatprep.subr.mxu0 %v5951_v25 }
 0x3cc   :  { %3158 = vmatpush1.msra.mxu1 %v5955_v26  ;;  %3229 = vmatpush1.msra.mxu0 %v5957_v27 }
 0x3cd   :  { %3159 = vmatprep.subr.mxu1 %v5961_v28  ;;  %3230 = vmatprep.subr.mxu0 %v5963_v29 }
 0x3ce   :  { %3160 = vmatpush1.msra.mxu1 %v5967_v30  ;;  %3231 = vmatpush1.msra.mxu0 %v5969_v32 }
 0x3cf   :  { %3161 = vmatprep.subr.mxu1 %v5973_v34  ;;  %3232 = vmatprep.subr.mxu0 %v5975_v35 }
 0x3d0   :  { %3162 = vmatpush1.msra.mxu1 %v5979_v36  ;;  %3233 = vmatpush1.msra.mxu0 %v5981_v37 }
 0x3d1   :  { %3163 = vmatprep.subr.mxu1 %v5985_v38  ;;  %3234 = vmatprep.subr.mxu0 %v5987_v39 }
 0x3d2   :  { %3164 = vmatpush1.msra.mxu1 %v5991_v40  ;;  %3235 = vmatpush1.msra.mxu0 %v5993_v41 }
 0x3d3   :  { %3165 = vmatprep.subr.mxu1 %v5997_v42  ;;  %3236 = vmatprep.subr.mxu0 %v5999_v43 }
 0x3d4   :  { %3166 = vmatpush1.msra.mxu1 %v6003_v44  ;;  %3237 = vmatpush1.msra.mxu0 %v6005_v45 }
 0x3d5   :  { %3167 = vmatprep.subr.mxu1 %v6009_v46  ;;  %3238 = vmatprep.subr.mxu0 %v6011_v47 }
 0x3d6   :  { %3168 = vmatpush1.msra.mxu1 %v6015_v49  ;;  %3239 = vmatpush1.msra.mxu0 %v6017_v51 }
 0x3d7   :  { %3169 = vmatprep.subr.mxu1 %v6021_v52  ;;  %3240 = vmatprep.subr.mxu0 %v6023_v53 }
 0x3d8   :  { %3170 = vmatpush1.msra.mxu1 %v6027_v54  ;;  %3241 = vmatpush1.msra.mxu0 %v6029_v55 }
 0x3d9   :  { %3171 = vmatprep.subr.mxu1 %v6033_v56  ;;  %3242 = vmatprep.subr.mxu0 %v6035_v57 }
 0x3da   :  { %3172 = vmatpush1.msra.mxu1 %v6039_v58  ;;  %3243 = vmatpush1.msra.mxu0 %v6041_v59 }
 0x3db   :  { %3173 = vmatprep.subr.mxu1 %v6045_v60  ;;  %3244 = vmatprep.subr.mxu0 %v6047_v61 }
 0x3dc   :  { %3174 = vmatpush1.msra.mxu1 %v6051_v62  ;;  %3245 = vmatpush1.msra.mxu0 %v6053_v19  ;;  %v6944_v62 = vmov 0.0  }
 0x3dd   :  { %3175 = vmatprep.subr.mxu1 %v6057_v1  ;;  %3246 = vmatprep.subr.mxu0 %v6059_v48 }
 0x3de   :  { %3176 = vmatpush1.msra.mxu1 %v6063_v13  ;;  %3247 = vmatpush1.msra.mxu0 %v6065_v17 }
 0x3df   :  { %3177 = vmatprep.subr.mxu1 %v6069_v4  ;;  %3248 = vmatprep.subr.mxu0 %v6071_v0 }
 0x3e0   :  { %3178 = vmatpush1.msra.mxu1 %v6075_v7  ;;  %3211 = vmatprep.mubr.f32.mxu1 %v6944_v62 }
 0x3e1   :  { %3249 = vmatpush1.msra.mxu0 %v6079_v33  ;;  %3282 = vmatprep.mubr.f32.mxu0 %v6944_v62 }
 0x3e2   :  { %3212 = vmatmul.mubr.f32.vlgmr.msra.gmra.mxu1 %v6944_v62  ;;  %3283 = vmatmul.mubr.f32.vlgmr.msra.gmra.mxu0 %v6944_v62 }
 0x3e3   :  { %3429 = vmatprep.subr.mxu0 %v5892_v50  ;;  %3358 = vmatprep.subr.mxu1 %v5890_v63 }
 0x3e4   :  { %3430 = vmatpush1.msra.mxu0 %v5897_v5  ;;  %3359 = vmatpush1.msra.mxu1 %v5895_v2 }
 0x3e5   :  { %3431 = vmatprep.subr.mxu0 %v5903_v8  ;;  %3360 = vmatprep.subr.mxu1 %v5901_v6 }
 0x3e6   :  { %3432 = vmatpush1.msra.mxu0 %v5909_v10  ;;  %3361 = vmatpush1.msra.mxu1 %v5907_v9 }
 0x3e7   :  { %3433 = vmatprep.subr.mxu0 %v5915_v12  ;;  %3362 = vmatprep.subr.mxu1 %v5913_v11 }
 0x3e8   :  { %3434 = vmatpush1.msra.mxu0 %v5921_v14  ;;  %3363 = vmatpush1.msra.mxu1 %v5919_v31 }
 0x3e9   :  { %3435 = vmatprep.subr.mxu0 %v5927_v15  ;;  %3364 = vmatprep.subr.mxu1 %v5925_v3 }
 0x3ea   :  { %3436 = vmatpush1.msra.mxu0 %v5933_v18  ;;  %3365 = vmatpush1.msra.mxu1 %v5931_v16 }
 0x3eb   :  { %3437 = vmatprep.subr.mxu0 %v5939_v21  ;;  %3366 = vmatprep.subr.mxu1 %v5937_v20 }
 0x3ec   :  { %3438 = vmatpush1.msra.mxu0 %v5945_v23  ;;  %3367 = vmatpush1.msra.mxu1 %v5943_v22 }
 0x3ed   :  { %3439 = vmatprep.subr.mxu0 %v5951_v25  ;;  %3368 = vmatprep.subr.mxu1 %v5949_v24 }
 0x3ee   :  { %3440 = vmatpush1.msra.mxu0 %v5957_v27  ;;  %3369 = vmatpush1.msra.mxu1 %v5955_v26 }
 0x3ef   :  { %3441 = vmatprep.subr.mxu0 %v5963_v29  ;;  %3370 = vmatprep.subr.mxu1 %v5961_v28  ;;  %v3146_v28 = vld [vmem:[#allocation12] sm:$0xf] }
 0x3f0   :  { %3442 = vmatpush1.msra.mxu0 %v5969_v32  ;;  %3371 = vmatpush1.msra.mxu1 %v5967_v30 }
 0x3f1   :  { %3443 = vmatprep.subr.mxu0 %v5975_v35  ;;  %3372 = vmatprep.subr.mxu1 %v5973_v34 }
 0x3f2   :  { %3444 = vmatpush1.msra.mxu0 %v5981_v37  ;;  %3373 = vmatpush1.msra.mxu1 %v5979_v36 }
 0x3f3   :  { %3445 = vmatprep.subr.mxu0 %v5987_v39  ;;  %3374 = vmatprep.subr.mxu1 %v5985_v38 }
 0x3f4   :  { %3446 = vmatpush1.msra.mxu0 %v5993_v41  ;;  %3375 = vmatpush1.msra.mxu1 %v5991_v40 }
 0x3f5   :  { %3447 = vmatprep.subr.mxu0 %v5999_v43  ;;  %3376 = vmatprep.subr.mxu1 %v5997_v42 }
 0x3f6   :  { %3448 = vmatpush1.msra.mxu0 %v6005_v45  ;;  %3377 = vmatpush1.msra.mxu1 %v6003_v44 }
 0x3f7   :  { %3449 = vmatprep.subr.mxu0 %v6011_v47  ;;  %3378 = vmatprep.subr.mxu1 %v6009_v46 }
 0x3f8   :  { %3450 = vmatpush1.msra.mxu0 %v6017_v51  ;;  %3379 = vmatpush1.msra.mxu1 %v6015_v49  ;;  %v6945_v49 = vld [vmem:[#allocation50_spill] sm:$0xff] }
 0x3f9   :  { %3451 = vmatprep.subr.mxu0 %v6023_v53  ;;  %3380 = vmatprep.subr.mxu1 %v6021_v52 }
 0x3fa   :  { %3452 = vmatpush1.msra.mxu0 %v6029_v55  ;;  %3381 = vmatpush1.msra.mxu1 %v6027_v54 }
 0x3fb   :  { %3453 = vmatprep.subr.mxu0 %v6035_v57  ;;  %3382 = vmatprep.subr.mxu1 %v6033_v56 }
 0x3fc   :  { %3454 = vmatpush1.msra.mxu0 %v6041_v59  ;;  %3383 = vmatpush1.msra.mxu1 %v6039_v58 }
 0x3fd   :  { %3455 = vmatprep.subr.mxu0 %v6047_v61  ;;  %3384 = vmatprep.subr.mxu1 %v6045_v60 }
 0x3fe   :  { %3456 = vmatpush1.msra.mxu0 %v6053_v19  ;;  %3385 = vmatpush1.msra.mxu1 %v6945_v49 }
 0x3ff   :  { %3457 = vmatprep.subr.mxu0 %v6059_v48  ;;  %3386 = vmatprep.subr.mxu1 %v6057_v1  ;;  %v2296_v1 = vpop.f32.mrf.mxu1 }
 0x400   :  { %3458 = vmatpush1.msra.mxu0 %v6065_v17  ;;  %3387 = vmatpush1.msra.mxu1 %v6063_v13  ;;  %v2367_v13 = vpop.f32.mrf.mxu0 }
 0x401   :  { %3459 = vmatprep.subr.mxu0 %v6071_v0  ;;  %3388 = vmatprep.subr.mxu1 %v6069_v4  ;;  %v2298_v49 = vpop.f32.mrf.mxu1 }
 0x402   :  { %3460 = vmatpush1.msra.mxu0 %v6079_v33  ;;  %3389 = vmatpush1.msra.mxu1 %v6075_v7  ;;  %v2369_v4 = vpop.f32.mrf.mxu0 }
 0x403   :  { %3422 = vmatprep.mubr.f32.mxu1 %v6944_v62  ;;  %3493 = vmatprep.mubr.f32.mxu0 %v6944_v62  ;;  %v6157_v60 = vpop.f32.mrf.mxu1 }
 0x404   :  { %5031 = vmatprep.subr.mxu0 %v6944_v62  ;;  %4996 = vmatprep.subr.mxu1 %v6944_v62  ;;  %v6163_v54 = vpop.f32.mrf.mxu0 }
 0x405   :  { %v6159_v58 = vpop.f32.mrf.mxu1 }
 0x406   :  { %v6167_v52 = vpop.f32.mrf.mxu0 }
 0x41a   :  { %v6161_v56 = vpop.f32.mrf.mxu1  ;;  %v6171_v44 = vpop.f32.mrf.mxu0 }
 0x41b   :  { %6946 = vst [vmem:[#allocation55_spill] sm:$0xff] %v6161_v56  ;;  %6949 = vst [vmem:[#allocation58_spill] sm:$0xff] %v6171_v44  ;;  %v6959_v44 = vld [vmem:[#allocation27_spill] sm:$0xff] }
 0x41c   :  { %v6165_v7 = vpop.f32.mrf.mxu1  ;;  %v6175_v40 = vpop.f32.mrf.mxu0  ;;  %v6192_v26 = vrot.slane %v3146_v28, %v6959_v44 }
 0x41d   :  { %6947 = vst [vmem:[#allocation56_spill] sm:$0xff] %v6165_v7  ;;  %6951 = vst [vmem:[#allocation60_spill] sm:$0xff] %v6175_v40 }
 0x43c   :  { %v6169_v46 = vpop.f32.mrf.mxu1  ;;  %v6179_v36 = vpop.f32.mrf.mxu0 }
 0x43d   :  { %6948 = vst [vmem:[#allocation57_spill] sm:$0xff] %v6169_v46  ;;  %6953 = vst [vmem:[#allocation62_spill] sm:$0xff] %v6179_v36 }
 0x43e   :  { %v6173_v42 = vpop.f32.mrf.mxu1  ;;  %v6183_v56 = vpop.f32.mrf.mxu0 }
 0x43f   :  { %6950 = vst [vmem:[#allocation59_spill] sm:$0xff] %v6173_v42  ;;  %6955 = vst [vmem:[#allocation64_spill] sm:$0xff] %v6183_v56 }
 0x45e   :  { %v6177_v38 = vpop.f32.mrf.mxu1  ;;  %v6187_v7 = vpop.f32.mrf.mxu0 }
 0x45f   :  { %6952 = vst [vmem:[#allocation61_spill] sm:$0xff] %v6177_v38  ;;  %6957 = vst [vmem:[#allocation66_spill] sm:$0xff] %v6187_v7  ;;  %v6961_v38 = vld [vmem:[#allocation26_spill] sm:$0xff] }
 0x460   :  { %v6181_v34 = vpop.f32.mrf.mxu1  ;;  %v6194_v42 = vpop.f32.mrf.mxu0  ;;  %v6197_v24 = vrot.slane %v3146_v28, %v6961_v38 }
 0x461   :  { %6954 = vst [vmem:[#allocation63_spill] sm:$0xff] %v6181_v34  ;;  %6960 = vst [vmem:[#allocation27_spill] sm:$0xff] %v6194_v42  ;;  %v6964_v42 = vld [vmem:[#allocation25_spill] sm:$0xff] }
 0x462   :  { %v6965_v3 = vsub.s32 2, %v6964_v42 }
 0x464   :  { %v6207_v38 = vrot.slane %v3146_v28, %v6965_v3 }
 0x480   :  { %v6185_v30 = vpop.f32.mrf.mxu1  ;;  %v6199_v36 = vpop.f32.mrf.mxu0 }
 0x481   :  { %6956 = vst [vmem:[#allocation65_spill] sm:$0xff] %v6185_v30  ;;  %6962 = vst [vmem:[#allocation26_spill] sm:$0xff] %v6199_v36 }
 0x482   :  { %v6189_v46 = vpop.f32.mrf.mxu1  ;;  %v6202_v7 = vpop.f32.mrf.mxu0 }
 0x483   :  { %6958 = vst [vmem:[#allocation67_spill] sm:$0xff] %v6189_v46  ;;  %6963 = vst [vmem:[#allocation68_spill] sm:$0xff] %v6202_v7 }
 0x4a2   :  { %v3213_v40 = vpop.f32.mrf.mxu1  ;;  %v3284_v44 = vpop.f32.mrf.mxu0 }
 0x4a3   :  { %v3289_v34 = vadd.f32 %v3213_v40, %v2296_v1  ;;  %v3291_v31 = vadd.f32 %v3284_v44, %v2367_v13 }
 0x4a4   :  { %v3215_v56 = vpop.f32.mrf.mxu1  ;;  %v3286_v36 = vpop.f32.mrf.mxu0 }
 0x4a5   :  { %v3314_v30 = vadd.f32 %v6192_v26, %v3289_v34  ;;  %v3290_v22 = vadd.f32 %v3215_v56, %v2298_v49  ;;  %v3316_v40 = vadd.f32 %v6207_v38, %v3291_v31  ;;  %v6966_v34 = vsub.s32 3, %v6964_v42 }
 0x4a6   :  { %v3292_v56 = vadd.f32 %v3286_v36, %v2369_v4 }
 0x4a7   :  { %v4857_v20 = vmul.f32 -1.442695, %v3314_v30  ;;  %v3315_v46 = vadd.f32 %v6197_v24, %v3290_v22  ;;  %v6212_v49 = vrot.slane %v3146_v28, %v6966_v34  ;;  %v4859_v30 = vmul.f32 -1.442695, %v3316_v40 }
 0x4a9   :  { %5264 = vpow2.f32 %v4857_v20  ;;  %v4858_v16 = vmul.f32 -1.442695, %v3315_v46  ;;  %v3317_v20 = vadd.f32 %v6212_v49, %v3292_v56  ;;  %v3357_v56 = vld [vmem:[#allocation13 + $0x78] sm:$0xff] }
 0x4ab   :  { %5266 = vpow2.f32 %v4858_v16 }
 0x4ac   :  { %5268 = vpow2.f32 %v4859_v30  ;;  %v3356_v30 = vld [vmem:[#allocation13 + $0x70] sm:$0xff] }
 0x4b6   :  { %v5265_v1 = vpop.eup %5264 }
 0x4b7   :  { %v3327_v22 = vadd.f32 1.0, %v5265_v1  ;;  %v3355_v1 = vld [vmem:[#allocation13 + $0x68] sm:$0xff] }
 0x4b8   :  { %v5267_v46 = vpop.eup %5266 }
 0x4b9   :  { %5270 = vrcp.f32 %v3327_v22  ;;  %v3328_v16 = vadd.f32 1.0, %v5267_v46  ;;  %v5269_v13 = vpop.eup %5268  ;;  %v3352_v22 = vld [vmem:[#allocation13 + $0x50] sm:$0xff]  ;;  %v3351_v46 = vld [vmem:[#allocation13 + $0x48] sm:$0xff] }
 0x4ba   :  { %5272 = vtanh.f32 %v3317_v20  ;;  %v3329_v7 = vadd.f32 1.0, %v5269_v13  ;;  %v3353_v20 = vld [vmem:[#allocation13 + $0x58] sm:$0xff] }
 0x4bb   :  { %5274 = vrcp.f32 %v3328_v16  ;;  %v3350_v16 = vld [vmem:[#allocation13 + $0x40] sm:$0xff]  ;;  %v3349_v13 = vld [vmem:[#allocation13 + $0x38] sm:$0xff] }
 0x4bc   :  { %5276 = vrcp.f32 %v3329_v7  ;;  %v3354_v7 = vld [vmem:[#allocation13 + $0x60] sm:$0xff] }
 0x4c6   :  { %v5271_v3 = vpop.eup %5270 }
 0x4c7   :  { %v5273_v44 = vpop.eup %5272 }
 0x4c8   :  { %v5275_v31 = vpop.eup %5274  ;;  %v3338_v28 = vmul.f32 %v5273_v44, %v5271_v3  ;;  %v3348_v3 = vld [vmem:[#allocation13 + $0x30] sm:$0xff]  ;;  %v3347_v44 = vld [vmem:[#allocation13 + $0x28] sm:$0xff] }
 0x4c9   :  { %v3337_v42 = vmul.f32 0.0, %v5275_v31  ;;  %v5277_v4 = vpop.eup %5276  ;;  %v3346_v31 = vld [vmem:[#allocation13 + $0x20] sm:$0xff] }
 0x4cb   :  { %v6215_v34 = vadd.f32 %v3338_v28, %v3337_v42  ;;  %v3345_v42 = vld [vmem:[#allocation13 + $0x18] sm:$0xff]  ;;  %v3344_v28 = vld [vmem:[#allocation13 + $0x10] sm:$0xff] }
 0x4cd   :  { %5278 = vtanh.f32 %v6215_v34 }
 0x4da   :  { %v5279_v36 = vpop.eup %5278 }
 0x4db   :  { %v3341_v40 = vmul.f32 %v5279_v36, %v5277_v4  ;;  %v3343_v4 = vld [vmem:[#allocation13 + $0x8] sm:$0xff]  ;;  %v3342_v36 = vld [vmem:[#allocation13] sm:$0xff] }
 0x4dd   :  { %3423 = vmatmul.mubr.f32.vlgmr.msra.gmra.mxu1 %v3341_v40  ;;  %3494 = vmatmul.mubr.f32.vlgmr.msra.gmra.mxu0 %v3341_v40 }
 0x4de   :  { %5032 = vmatpush3.msra.mxu0 %v3357_v56  ;;  %5063 = vmatprep.mubr.msk.f32.mxu0 %vm5682_vm11, %v6944_v62 }
 0x4df   :  { %5033 = vmatprep.subr.mxu0 %v6944_v62  ;;  %5028 = vmatprep.mubr.msk.f32.mxu1 %vm5682_vm11, %v6944_v62 }
 0x4e0   :  { %5034 = vmatpush3.msra.mxu0 %v3356_v30 }
 0x4e1   :  { %5035 = vmatprep.subr.mxu0 %v6944_v62 }
 0x4e2   :  { %5036 = vmatpush3.msra.mxu0 %v3355_v1 }
 0x4e3   :  { %5037 = vmatprep.subr.mxu0 %v6944_v62 }
 0x4e4   :  { %5038 = vmatpush3.msra.mxu0 %v3354_v7 }
 0x4e5   :  { %5039 = vmatprep.subr.mxu0 %v6944_v62 }
 0x4e6   :  { %5040 = vmatpush3.msra.mxu0 %v3353_v20 }
 0x4e7   :  { %5041 = vmatprep.subr.mxu0 %v6944_v62 }
 0x4e8   :  { %5042 = vmatpush3.msra.mxu0 %v3352_v22 }
 0x4e9   :  { %5043 = vmatprep.subr.mxu0 %v6944_v62 }
 0x4ea   :  { %5044 = vmatpush3.msra.mxu0 %v3351_v46 }
 0x4eb   :  { %5045 = vmatprep.subr.mxu0 %v6944_v62 }
 0x4ec   :  { %5046 = vmatpush3.msra.mxu0 %v3350_v16 }
 0x4ed   :  { %5047 = vmatprep.subr.mxu0 %v6944_v62 }
 0x4ee   :  { %5048 = vmatpush3.msra.mxu0 %v3349_v13 }
 0x4ef   :  { %5049 = vmatprep.subr.mxu0 %v6944_v62 }
 0x4f0   :  { %5050 = vmatpush3.msra.mxu0 %v3348_v3 }
 0x4f1   :  { %5051 = vmatprep.subr.mxu0 %v6944_v62 }
 0x4f2   :  { %5052 = vmatpush3.msra.mxu0 %v3347_v44 }
 0x4f3   :  { %5053 = vmatprep.subr.mxu0 %v6944_v62 }
 0x4f4   :  { %5054 = vmatpush3.msra.mxu0 %v3346_v31  ;;  %v6968_v31 = vld [vmem:[#allocation29_spill] sm:$0xff] }
 0x4f5   :  { %5055 = vmatprep.subr.mxu0 %v6944_v62 }
 0x4f6   :  { %5056 = vmatpush3.msra.mxu0 %v3345_v42  ;;  %v6969_v42 = vld [vmem:[#allocation30_spill] sm:$0xff] }
 0x4f7   :  { %5057 = vmatprep.subr.mxu0 %v6944_v62 }
 0x4f8   :  { %5058 = vmatpush3.msra.mxu0 %v3344_v28  ;;  %v6974_v28 = vld [vmem:[#allocation35_spill] sm:$0xff] }
 0x4f9   :  { %5059 = vmatprep.subr.mxu0 %v6944_v62 }
 0x4fa   :  { %5060 = vmatpush3.msra.mxu0 %v3343_v4  ;;  %v6975_v4 = vld [vmem:[#allocation36_spill] sm:$0xff] }
 0x4fb   :  { %5061 = vmatprep.subr.mxu0 %v6944_v62 }
 0x4fc   :  { %5062 = vmatpush3.msra.mxu0 %v3342_v36  ;;  %v6976_v36 = vld [vmem:[#allocation37_spill] sm:$0xff] }
 0x4fd   :  { %5064 = vmatmul.mubr.f32.vlgmr.msra.gmra.mxu0 %v3341_v40  ;;  %3760 = vmatprep.subr.mxu0 %v5892_v50  ;;  %v3548_v50 = vld [vmem:[#allocation13 + $0xf8] sm:$0xff] }
 0x4fe   :  { %3761 = vmatpush1.msra.mxu0 %v5897_v5  ;;  %3824 = vmatprep.mubr.f32.mxu0 %v6944_v62  ;;  %v3547_v5 = vld [vmem:[#allocation13 + $0xf0] sm:$0xff] }
 0x4ff   :  { %3762 = vmatprep.subr.mxu0 %v5903_v8  ;;  %4997 = vmatpush3.msra.mxu1 %v3548_v50  ;;  %v3546_v8 = vld [vmem:[#allocation13 + $0xe8] sm:$0xff] }
 0x500   :  { %3763 = vmatpush1.msra.mxu0 %v5909_v10  ;;  %4998 = vmatprep.subr.mxu1 %v6944_v62  ;;  %v3545_v10 = vld [vmem:[#allocation13 + $0xe0] sm:$0xff]  ;;  %v6977_v50 = vld [vmem:[#allocation38_spill] sm:$0xff] }
 0x501   :  { %3764 = vmatprep.subr.mxu0 %v5915_v12  ;;  %4999 = vmatpush3.msra.mxu1 %v3547_v5  ;;  %v3542_v12 = vld [vmem:[#allocation13 + $0xc8] sm:$0xff]  ;;  %v6978_v5 = vld [vmem:[#allocation39_spill] sm:$0xff] }
 0x502   :  { %3765 = vmatpush1.msra.mxu0 %v5921_v14  ;;  %5000 = vmatprep.subr.mxu1 %v6944_v62  ;;  %v3541_v14 = vld [vmem:[#allocation13 + $0xc0] sm:$0xff] }
 0x503   :  { %3766 = vmatprep.subr.mxu0 %v5927_v15  ;;  %5001 = vmatpush3.msra.mxu1 %v3546_v8  ;;  %v3540_v15 = vld [vmem:[#allocation13 + $0xb8] sm:$0xff] }
 0x504   :  { %3767 = vmatpush1.msra.mxu0 %v5933_v18  ;;  %5002 = vmatprep.subr.mxu1 %v6944_v62  ;;  %v3539_v18 = vld [vmem:[#allocation13 + $0xb0] sm:$0xff]  ;;  %v6979_v8 = vld [vmem:[#allocation40_spill] sm:$0xff] }
 0x505   :  { %3768 = vmatprep.subr.mxu0 %v5939_v21  ;;  %5003 = vmatpush3.msra.mxu1 %v3545_v10  ;;  %v3538_v21 = vld [vmem:[#allocation13 + $0xa8] sm:$0xff] }
 0x506   :  { %3769 = vmatpush1.msra.mxu0 %v5945_v23  ;;  %5004 = vmatprep.subr.mxu1 %v6944_v62  ;;  %v3537_v23 = vld [vmem:[#allocation13 + $0xa0] sm:$0xff] }
 0x507   :  { %3770 = vmatprep.subr.mxu0 %v5951_v25  ;;  %v3536_v25 = vld [vmem:[#allocation13 + $0x98] sm:$0xff]  ;;  %v6980_v10 = vld [vmem:[#allocation41_spill] sm:$0xff] }
 0x508   :  { %3771 = vmatpush1.msra.mxu0 %v5957_v27  ;;  %v3535_v27 = vld [vmem:[#allocation13 + $0x90] sm:$0xff] }
 0x509   :  { %3772 = vmatprep.subr.mxu0 %v5963_v29  ;;  %v3534_v29 = vld [vmem:[#allocation13 + $0x88] sm:$0xff] }
 0x50a   :  { %3773 = vmatpush1.msra.mxu0 %v5969_v32  ;;  %v3533_v32 = vld [vmem:[#allocation13 + $0x80] sm:$0xff] }
 0x50b   :  { %3774 = vmatprep.subr.mxu0 %v5975_v35 }
 0x50c   :  { %3775 = vmatpush1.msra.mxu0 %v5981_v37 }
 0x50d   :  { %3776 = vmatprep.subr.mxu0 %v5987_v39 }
 0x50e   :  { %3777 = vmatpush1.msra.mxu0 %v5993_v41 }
 0x50f   :  { %3778 = vmatprep.subr.mxu0 %v5999_v43 }
 0x510   :  { %3779 = vmatpush1.msra.mxu0 %v6005_v45 }
 0x511   :  { %3780 = vmatprep.subr.mxu0 %v6011_v47 }
 0x512   :  { %3781 = vmatpush1.msra.mxu0 %v6017_v51 }
 0x513   :  { %3782 = vmatprep.subr.mxu0 %v6023_v53 }
 0x514   :  { %3783 = vmatpush1.msra.mxu0 %v6029_v55 }
 0x515   :  { %3784 = vmatprep.subr.mxu0 %v6035_v57 }
 0x516   :  { %3785 = vmatpush1.msra.mxu0 %v6041_v59 }
 0x517   :  { %3786 = vmatprep.subr.mxu0 %v6047_v61 }
 0x518   :  { %3787 = vmatpush1.msra.mxu0 %v6053_v19 }
 0x519   :  { %3788 = vmatprep.subr.mxu0 %v6059_v48 }
 0x51a   :  { %3789 = vmatpush1.msra.mxu0 %v6065_v17  ;;  %v3543_v17 = vld [vmem:[#allocation13 + $0xd0] sm:$0xff] }
 0x51b   :  { %3790 = vmatprep.subr.mxu0 %v6071_v0  ;;  %v3544_v0 = vld [vmem:[#allocation13 + $0xd8] sm:$0xff] }
 0x51c   :  { %3791 = vmatpush1.msra.mxu0 %v6079_v33  ;;  %5005 = vmatpush3.msra.mxu1 %v3544_v0  ;;  %v6981_v0 = vld [vmem:[#allocation42_spill] sm:$0xff] }
 0x51d   :  { %3951 = vmatprep.subr.mxu0 %v5890_v63  ;;  %5006 = vmatprep.subr.mxu1 %v6944_v62 }
 0x51e   :  { %5007 = vmatpush3.msra.mxu1 %v3543_v17  ;;  %v6982_v17 = vld [vmem:[#allocation43_spill] sm:$0xff] }
 0x51f   :  { %5008 = vmatprep.subr.mxu1 %v6944_v62 }
 0x520   :  { %5009 = vmatpush3.msra.mxu1 %v3542_v12  ;;  %v6983_v12 = vld [vmem:[#allocation44_spill] sm:$0xff] }
 0x521   :  { %5010 = vmatprep.subr.mxu1 %v6944_v62 }
 0x522   :  { %5011 = vmatpush3.msra.mxu1 %v3541_v14  ;;  %v6984_v14 = vld [vmem:[#allocation45_spill] sm:$0xff] }
 0x523   :  { %5012 = vmatprep.subr.mxu1 %v6944_v62 }
 0x524   :  { %5013 = vmatpush3.msra.mxu1 %v3540_v15  ;;  %v6985_v15 = vld [vmem:[#allocation46_spill] sm:$0xff] }
 0x525   :  { %5014 = vmatprep.subr.mxu1 %v6944_v62 }
 0x526   :  { %5015 = vmatpush3.msra.mxu1 %v3539_v18  ;;  %v6986_v18 = vld [vmem:[#allocation47_spill] sm:$0xff] }
 0x527   :  { %5016 = vmatprep.subr.mxu1 %v6944_v62 }
 0x528   :  { %5017 = vmatpush3.msra.mxu1 %v3538_v21  ;;  %v6987_v21 = vld [vmem:[#allocation48_spill] sm:$0xff] }
 0x529   :  { %5018 = vmatprep.subr.mxu1 %v6944_v62 }
 0x52a   :  { %5019 = vmatpush3.msra.mxu1 %v3537_v23  ;;  %v6988_v23 = vld [vmem:[#allocation49_spill] sm:$0xff] }
 0x52b   :  { %5020 = vmatprep.subr.mxu1 %v6944_v62 }
 0x52c   :  { %5021 = vmatpush3.msra.mxu1 %v3536_v25  ;;  %v6989_v25 = vld [vmem:[#allocation50_spill] sm:$0xff] }
 0x52d   :  { %5022 = vmatprep.subr.mxu1 %v6944_v62 }
 0x52e   :  { %5023 = vmatpush3.msra.mxu1 %v3535_v27  ;;  %v6990_v27 = vld [vmem:[#allocation51_spill] sm:$0xff] }
 0x52f   :  { %5024 = vmatprep.subr.mxu1 %v6944_v62 }
 0x530   :  { %5025 = vmatpush3.msra.mxu1 %v3534_v29  ;;  %v6991_v29 = vld [vmem:[#allocation52_spill] sm:$0xff] }
 0x531   :  { %5026 = vmatprep.subr.mxu1 %v6944_v62 }
 0x532   :  { %5027 = vmatpush3.msra.mxu1 %v3533_v32  ;;  %v6992_v32 = vld [vmem:[#allocation53_spill] sm:$0xff] }
 0x533   :  { %3689 = vmatprep.subr.mxu1 %v5890_v63 }
 0x59d   :  { %v3424_v35 = vpop.f32.mrf.mxu1  ;;  %v3495_v51 = vpop.f32.mrf.mxu0 }
 0x59e   :  { %v3500_v37 = vadd.f32 %v3424_v35, %v6157_v60  ;;  %v3502_v55 = vadd.f32 %v3495_v51, %v6163_v54  ;;  %v6993_v35 = vld [vmem:[#allocation54_spill] sm:$0xff] }
 0x59f   :  { %v3426_v39 = vpop.f32.mrf.mxu1  ;;  %v3497_v57 = vpop.f32.mrf.mxu0  ;;  %v3873_v51 = vld [vmem:[#allocation13 + $0x148] sm:$0xff] }
 0x5a0   :  { %v3504_v41 = vadd.f32 %v3500_v37, %v6192_v26  ;;  %v3501_v43 = vadd.f32 %v3426_v39, %v6159_v58  ;;  %v3506_v63 = vadd.f32 %v3502_v55, %v6207_v38  ;;  %v3503_v59 = vadd.f32 %v3497_v57, %v6167_v52  ;;  %v3879_v37 = vld [vmem:[#allocation13 + $0x178] sm:$0xff]  ;;  %v3878_v39 = vld [vmem:[#allocation13 + $0x170] sm:$0xff] }
 0x5a1   :  { %v3871_v55 = vld [vmem:[#allocation13 + $0x138] sm:$0xff]  ;;  %v3870_v57 = vld [vmem:[#allocation13 + $0x130] sm:$0xff] }
 0x5a2   :  { %v4860_v45 = vmul.f32 -1.442695, %v3504_v41  ;;  %v3505_v47 = vadd.f32 %v3501_v43, %v6197_v24  ;;  %v4862_v60 = vmul.f32 -1.442695, %v3506_v63  ;;  %v3507_v19 = vadd.f32 %v3503_v59, %v6212_v49  ;;  %v3877_v41 = vld [vmem:[#allocation13 + $0x168] sm:$0xff]  ;;  %v3876_v43 = vld [vmem:[#allocation13 + $0x160] sm:$0xff] }
 0x5a3   :  { %v3869_v63 = vld [vmem:[#allocation13 + $0x128] sm:$0xff]  ;;  %v3868_v59 = vld [vmem:[#allocation13 + $0x120] sm:$0xff] }
 0x5a4   :  { %5280 = vpow2.f32 %v4860_v45  ;;  %v4861_v53 = vmul.f32 -1.442695, %v3505_v47  ;;  %v3875_v45 = vld [vmem:[#allocation13 + $0x158] sm:$0xff]  ;;  %v3874_v47 = vld [vmem:[#allocation13 + $0x150] sm:$0xff] }
 0x5a6   :  { %5282 = vpow2.f32 %v4861_v53  ;;  %v3872_v53 = vld [vmem:[#allocation13 + $0x140] sm:$0xff] }
 0x5a7   :  { %5284 = vpow2.f32 %v4862_v60  ;;  %v3867_v60 = vld [vmem:[#allocation13 + $0x118] sm:$0xff] }
 0x5b1   :  { %v5281_v61 = vpop.eup %5280 }
 0x5b2   :  { %v3517_v48 = vadd.f32 1.0, %v5281_v61  ;;  %v3866_v61 = vld [vmem:[#allocation13 + $0x110] sm:$0xff] }
 0x5b3   :  { %v5283_v58 = vpop.eup %5282 }
 0x5b4   :  { %5286 = vrcp.f32 %v3517_v48  ;;  %v3518_v40 = vadd.f32 1.0, %v5283_v58  ;;  %v5285_v54 = vpop.eup %5284  ;;  %v3864_v48 = vld [vmem:[#allocation13 + $0x100] sm:$0xff]  ;;  %v6389_v58 = vld [vmem:[#allocation10 + $0x1f8] sm:$0xff] }
 0x5b5   :  { %5288 = vtanh.f32 %v3507_v19  ;;  %v3519_v22 = vadd.f32 1.0, %v5285_v54  ;;  %v3865_v19 = vld [vmem:[#allocation13 + $0x108] sm:$0xff]  ;;  %6994 = vst [vmem:[#allocation25_spill] sm:$0xff] %v6389_v58 }
 0x5b6   :  { %5290 = vrcp.f32 %v3518_v40 }
 0x5b7   :  { %5292 = vrcp.f32 %v3519_v22 }
 0x5bd   :  { %v6295_v56 = vpop.f32.mrf.mxu0 }
 0x5bf   :  { %v5065_v30 = vpop.f32.mrf.mxu0 }
 0x5c1   :  { %v5287_v1 = vpop.eup %5286 }
 0x5c2   :  { %v5289_v7 = vpop.eup %5288 }
 0x5c3   :  { %v5291_v20 = vpop.eup %5290  ;;  %v3528_v46 = vmul.f32 %v5289_v7, %v5287_v1  ;;  %v6995_v1 = vld [vmem:[#allocation55_spill] sm:$0xff] }
 0x5c4   :  { %v3527_v52 = vmul.f32 %v5291_v20, %v6215_v34  ;;  %v5293_v13 = vpop.eup %5292  ;;  %v6967_v34 = vld [vmem:[#allocation28_spill] sm:$0xff] }
 0x5c6   :  { %v6298_v16 = vadd.f32 %v3528_v46, %v3527_v52  ;;  %v6996_v52 = vld [vmem:[#allocation56_spill] sm:$0xff] }
 0x5c8   :  { %5294 = vtanh.f32 %v6298_v16 }
 0x5d5   :  { %v5295_v3 = vpop.eup %5294 }
 0x5d6   :  { %v6301_v44 = vmul.f32 %v5295_v3, %v5293_v13 }
 0x5d8   :  { %5029 = vmatmul.mubr.f32.vlgmr.msra.gmra.mxu1 %v6301_v44  ;;  %3825 = vmatmul.mubr.f32.vlgmr.msra.gmra.mxu0 %v6301_v44 }
 0x5d9   :  { %3690 = vmatpush1.msra.mxu1 %v5895_v2  ;;  %3753 = vmatprep.mubr.f32.mxu1 %v6944_v62 }
 0x5da   :  { %3691 = vmatprep.subr.mxu1 %v5901_v6  ;;  %3952 = vmatpush1.msra.mxu0 %v5895_v2  ;;  %v6970_v2 = vld [vmem:[#allocation31_spill] sm:$0xff] }
 0x5db   :  { %3692 = vmatpush1.msra.mxu1 %v5907_v9  ;;  %3953 = vmatprep.subr.mxu0 %v5901_v6  ;;  %v6971_v6 = vld [vmem:[#allocation32_spill] sm:$0xff] }
 0x5dc   :  { %3693 = vmatprep.subr.mxu1 %v5913_v11  ;;  %3954 = vmatpush1.msra.mxu0 %v5907_v9  ;;  %v6972_v9 = vld [vmem:[#allocation33_spill] sm:$0xff] }
 0x5dd   :  { %3694 = vmatpush1.msra.mxu1 %v6967_v34  ;;  %3955 = vmatprep.subr.mxu0 %v5913_v11  ;;  %v6973_v11 = vld [vmem:[#allocation34_spill] sm:$0xff] }
 0x5de   :  { %3695 = vmatprep.subr.mxu1 %v6968_v31  ;;  %3956 = vmatpush1.msra.mxu0 %v6967_v34 }
 0x5df   :  { %3696 = vmatpush1.msra.mxu1 %v6969_v42  ;;  %3957 = vmatprep.subr.mxu0 %v6968_v31  ;;  %v6997_v31 = vld [vmem:[#allocation58_spill] sm:$0xff] }
 0x5e0   :  { %3697 = vmatprep.subr.mxu1 %v6970_v2  ;;  %3958 = vmatpush1.msra.mxu0 %v6969_v42 }
 0x5e1   :  { %3698 = vmatpush1.msra.mxu1 %v6971_v6  ;;  %3959 = vmatprep.subr.mxu0 %v6970_v2 }
 0x5e2   :  { %3699 = vmatprep.subr.mxu1 %v6972_v9  ;;  %3960 = vmatpush1.msra.mxu0 %v6971_v6 }
 0x5e3   :  { %3700 = vmatpush1.msra.mxu1 %v6973_v11  ;;  %3961 = vmatprep.subr.mxu0 %v6972_v9  ;;  %v6998_v9 = vld [vmem:[#allocation60_spill] sm:$0xff] }
 0x5e4   :  { %3701 = vmatprep.subr.mxu1 %v6974_v28  ;;  %3962 = vmatpush1.msra.mxu0 %v6973_v11 }
 0x5e5   :  { %3702 = vmatpush1.msra.mxu1 %v6975_v4  ;;  %3963 = vmatprep.subr.mxu0 %v6974_v28 }
 0x5e6   :  { %3703 = vmatprep.subr.mxu1 %v6976_v36  ;;  %3964 = vmatpush1.msra.mxu0 %v6975_v4 }
 0x5e7   :  { %3704 = vmatpush1.msra.mxu1 %v6977_v50  ;;  %3965 = vmatprep.subr.mxu0 %v6976_v36 }
 0x5e8   :  { %3705 = vmatprep.subr.mxu1 %v6978_v5  ;;  %3966 = vmatpush1.msra.mxu0 %v6977_v50 }
 0x5e9   :  { %3706 = vmatpush1.msra.mxu1 %v6979_v8  ;;  %3967 = vmatprep.subr.mxu0 %v6978_v5 }
 0x5ea   :  { %3707 = vmatprep.subr.mxu1 %v6980_v10  ;;  %3968 = vmatpush1.msra.mxu0 %v6979_v8 }
 0x5eb   :  { %3708 = vmatpush1.msra.mxu1 %v6981_v0  ;;  %3969 = vmatprep.subr.mxu0 %v6980_v10 }
 0x5ec   :  { %3709 = vmatprep.subr.mxu1 %v6982_v17  ;;  %3970 = vmatpush1.msra.mxu0 %v6981_v0 }
 0x5ed   :  { %3710 = vmatpush1.msra.mxu1 %v6983_v12  ;;  %3971 = vmatprep.subr.mxu0 %v6982_v17 }
 0x5ee   :  { %3711 = vmatprep.subr.mxu1 %v6984_v14  ;;  %3972 = vmatpush1.msra.mxu0 %v6983_v12 }
 0x5ef   :  { %3712 = vmatpush1.msra.mxu1 %v6985_v15  ;;  %3973 = vmatprep.subr.mxu0 %v6984_v14 }
 0x5f0   :  { %3713 = vmatprep.subr.mxu1 %v6986_v18  ;;  %3974 = vmatpush1.msra.mxu0 %v6985_v15 }
 0x5f1   :  { %3714 = vmatpush1.msra.mxu1 %v6987_v21  ;;  %3975 = vmatprep.subr.mxu0 %v6986_v18 }
 0x5f2   :  { %3715 = vmatprep.subr.mxu1 %v6988_v23  ;;  %3976 = vmatpush1.msra.mxu0 %v6987_v21 }
 0x5f3   :  { %3716 = vmatpush1.msra.mxu1 %v6989_v25  ;;  %3977 = vmatprep.subr.mxu0 %v6988_v23 }
 0x5f4   :  { %3717 = vmatprep.subr.mxu1 %v6990_v27  ;;  %3978 = vmatpush1.msra.mxu0 %v6989_v25 }
 0x5f5   :  { %3718 = vmatpush1.msra.mxu1 %v6991_v29  ;;  %3979 = vmatprep.subr.mxu0 %v6990_v27 }
 0x5f6   :  { %3719 = vmatprep.subr.mxu1 %v6992_v32  ;;  %3980 = vmatpush1.msra.mxu0 %v6991_v29  ;;  %v6410_v29 = vld [vmem:[#allocation10 + $0x1f0] sm:$0xff] }
 0x5f7   :  { %3720 = vmatpush1.msra.mxu1 %v6993_v35  ;;  %3981 = vmatprep.subr.mxu0 %v6992_v32  ;;  %v6419_v32 = vld [vmem:[#allocation10 + $0x1d0] sm:$0xff] }
 0x5f8   :  { %3754 = vmatmul.mubr.f32.vlgmr.msra.gmra.mxu1 %v6301_v44  ;;  %5066 = vmatprep.subr.mxu1 %v6944_v62 }
 0x5f9   :  { %5098 = vmatprep.mubr.msk.f32.mxu1 %vm5682_vm11, %v6944_v62  ;;  %3982 = vmatpush1.msra.mxu0 %v6993_v35  ;;  %v6422_v35 = vld [vmem:[#allocation10 + $0x1b8] sm:$0xff] }
 0x5fa   :  { %4015 = vmatprep.mubr.f32.mxu0 %v6944_v62  ;;  %5101 = vmatprep.subr.mxu0 %v6944_v62 }
 0x5fb   :  { %5067 = vmatpush3.msra.mxu1 %v3879_v37  ;;  %v6425_v37 = vld [vmem:[#allocation10 + $0x1b0] sm:$0xff] }
 0x5fc   :  { %5068 = vmatprep.subr.mxu1 %v6944_v62 }
 0x5fd   :  { %5069 = vmatpush3.msra.mxu1 %v3878_v39  ;;  %v6428_v39 = vld [vmem:[#allocation10 + $0x198] sm:$0xff] }
 0x5fe   :  { %5070 = vmatprep.subr.mxu1 %v6944_v62 }
 0x5ff   :  { %5071 = vmatpush3.msra.mxu1 %v3877_v41  ;;  %v6431_v41 = vld [vmem:[#allocation10 + $0x190] sm:$0xff] }
 0x600   :  { %5072 = vmatprep.subr.mxu1 %v6944_v62 }
 0x601   :  { %5073 = vmatpush3.msra.mxu1 %v3876_v43  ;;  %v6434_v43 = vld [vmem:[#allocation10 + $0x178] sm:$0xff] }
 0x602   :  { %5074 = vmatprep.subr.mxu1 %v6944_v62 }
 0x603   :  { %5075 = vmatpush3.msra.mxu1 %v3875_v45  ;;  %v6437_v45 = vld [vmem:[#allocation10 + $0x170] sm:$0xff] }
 0x604   :  { %5076 = vmatprep.subr.mxu1 %v6944_v62 }
 0x605   :  { %5077 = vmatpush3.msra.mxu1 %v3874_v47  ;;  %v6440_v47 = vld [vmem:[#allocation10 + $0x158] sm:$0xff] }
 0x606   :  { %5078 = vmatprep.subr.mxu1 %v6944_v62 }
 0x607   :  { %5079 = vmatpush3.msra.mxu1 %v3873_v51  ;;  %v6443_v51 = vld [vmem:[#allocation10 + $0x150] sm:$0xff] }
 0x608   :  { %5080 = vmatprep.subr.mxu1 %v6944_v62 }
 0x609   :  { %5081 = vmatpush3.msra.mxu1 %v3872_v53  ;;  %v6446_v53 = vld [vmem:[#allocation10 + $0x138] sm:$0xff] }
 0x60a   :  { %5082 = vmatprep.subr.mxu1 %v6944_v62 }
 0x60b   :  { %5083 = vmatpush3.msra.mxu1 %v3871_v55  ;;  %v6449_v55 = vld [vmem:[#allocation10 + $0x130] sm:$0xff] }
 0x60c   :  { %5084 = vmatprep.subr.mxu1 %v6944_v62 }
 0x60d   :  { %5085 = vmatpush3.msra.mxu1 %v3870_v57  ;;  %v6452_v57 = vld [vmem:[#allocation10 + $0x118] sm:$0xff] }
 0x60e   :  { %5086 = vmatprep.subr.mxu1 %v6944_v62 }
 0x60f   :  { %5087 = vmatpush3.msra.mxu1 %v3869_v63  ;;  %v6455_v63 = vld [vmem:[#allocation10 + $0x110] sm:$0xff] }
 0x610   :  { %5088 = vmatprep.subr.mxu1 %v6944_v62 }
 0x611   :  { %5089 = vmatpush3.msra.mxu1 %v3868_v59  ;;  %v6458_v59 = vld [vmem:[#allocation10 + $0xf8] sm:$0xff] }
 0x612   :  { %5090 = vmatprep.subr.mxu1 %v6944_v62 }
 0x613   :  { %5091 = vmatpush3.msra.mxu1 %v3867_v60  ;;  %v6461_v60 = vld [vmem:[#allocation10 + $0xf0] sm:$0xff] }
 0x614   :  { %5092 = vmatprep.subr.mxu1 %v6944_v62 }
 0x615   :  { %5093 = vmatpush3.msra.mxu1 %v3866_v61  ;;  %v6464_v61 = vld [vmem:[#allocation10 + $0xd8] sm:$0xff] }
 0x616   :  { %5094 = vmatprep.subr.mxu1 %v6944_v62 }
 0x617   :  { %5095 = vmatpush3.msra.mxu1 %v3865_v19  ;;  %v6467_v19 = vld [vmem:[#allocation10 + $0xd0] sm:$0xff] }
 0x618   :  { %5096 = vmatprep.subr.mxu1 %v6944_v62 }
 0x619   :  { %5097 = vmatpush3.msra.mxu1 %v3864_v48  ;;  %v6470_v48 = vld [vmem:[#allocation10 + $0xb8] sm:$0xff] }
 0x61a   :  { %4022 = vmatprep.subr.mxu1 %v6389_v58 }
 0x698   :  { %v6392_v40 = vpop.f32.mrf.mxu1  ;;  %v3826_v44 = vpop.f32.mrf.mxu0 }
 0x699   :  { %v3833_v42 = vadd.f32 %v3826_v44, %v6997_v31  ;;  %v6505_v44 = vld [vmem:[#allocation10 + $0x1e8] sm:$0xff] }
 0x69a   :  { %v5030_v30 = vpop.f32.mrf.mxu1  ;;  %v3828_v2 = vpop.f32.mrf.mxu0  ;;  %v6512_v31 = vld [vmem:[#allocation10 + $0x1c8] sm:$0xff] }
 0x69b   :  { %v3837_v6 = vadd.f32 %v3833_v42, %v6207_v38  ;;  %v3834_v11 = vadd.f32 %v3828_v2, %v6998_v9  ;;  %v6473_v30 = vld [vmem:[#allocation10 + $0xb0] sm:$0xff]  ;;  %v6515_v42 = vld [vmem:[#allocation10 + $0x1c0] sm:$0xff] }
 0x69c   :  { %v6521_v2 = vld [vmem:[#allocation10 + $0x1a0] sm:$0xff] }
 0x69d   :  { %v4865_v28 = vmul.f32 -1.442695, %v3837_v6  ;;  %v3838_v36 = vadd.f32 %v3834_v11, %v6212_v49  ;;  %v6524_v6 = vld [vmem:[#allocation10 + $0x188] sm:$0xff]  ;;  %v6527_v9 = vld [vmem:[#allocation10 + $0x180] sm:$0xff] }
 0x69e   :  { %v6530_v11 = vld [vmem:[#allocation10 + $0x168] sm:$0xff] }
 0x6b8   :  { %v3755_v54 = vpop.f32.mrf.mxu1 }
 0x6b9   :  { %v3831_v7 = vadd.f32 %v3755_v54, %v6995_v1  ;;  %v6476_v54 = vld [vmem:[#allocation10 + $0x98] sm:$0xff]  ;;  %v6479_v1 = vld [vmem:[#allocation10 + $0x90] sm:$0xff] }
 0x6ba   :  { %v3757_v20 = vpop.f32.mrf.mxu1 }
 0x6bb   :  { %v3835_v22 = vadd.f32 %v3831_v7, %v6192_v26  ;;  %v3832_v46 = vadd.f32 %v3757_v20, %v6996_v52  ;;  %v6482_v7 = vld [vmem:[#allocation10 + $0x78] sm:$0xff]  ;;  %v6485_v20 = vld [vmem:[#allocation10 + $0x70] sm:$0xff] }
 0x6bc   :  { %v6491_v52 = vld [vmem:[#allocation10 + $0x50] sm:$0xff] }
 0x6bd   :  { %v4863_v13 = vmul.f32 -1.442695, %v3835_v22  ;;  %v3836_v3 = vadd.f32 %v3832_v46, %v6197_v24  ;;  %v6488_v22 = vld [vmem:[#allocation10 + $0x58] sm:$0xff] }
 0x6be   :  { %v6494_v46 = vld [vmem:[#allocation10 + $0x38] sm:$0xff] }
 0x6bf   :  { %5296 = vpow2.f32 %v4863_v13  ;;  %v4864_v34 = vmul.f32 -1.442695, %v3836_v3  ;;  %v6497_v13 = vld [vmem:[#allocation10 + $0x30] sm:$0xff]  ;;  %v6500_v3 = vld [vmem:[#allocation10 + $0x18] sm:$0xff] }
 0x6c1   :  { %5298 = vpow2.f32 %v4864_v34  ;;  %v6508_v34 = vld [vmem:[#allocation10 + $0x1e0] sm:$0xff] }
 0x6c2   :  { %5300 = vpow2.f32 %v4865_v28  ;;  %v6533_v28 = vld [vmem:[#allocation10 + $0x160] sm:$0xff] }
 0x6cc   :  { %v5297_v4 = vpop.eup %5296 }
 0x6cd   :  { %v3848_v50 = vadd.f32 1.0, %v5297_v4  ;;  %v6536_v4 = vld [vmem:[#allocation10 + $0x148] sm:$0xff] }
 0x6ce   :  { %v5299_v5 = vpop.eup %5298  ;;  %6999 = vst [vmem:[#allocation28_spill] sm:$0xff] %v6536_v4 }
 0x6cf   :  { %5302 = vrcp.f32 %v3848_v50  ;;  %v3849_v8 = vadd.f32 1.0, %v5299_v5  ;;  %v5301_v10 = vpop.eup %5300  ;;  %v6542_v50 = vld [vmem:[#allocation10 + $0x128] sm:$0xff]  ;;  %v6545_v5 = vld [vmem:[#allocation10 + $0x120] sm:$0xff] }
 0x6d0   :  { %5304 = vtanh.f32 %v3838_v36  ;;  %v3850_v14 = vadd.f32 1.0, %v5301_v10  ;;  %v6539_v36 = vld [vmem:[#allocation10 + $0x140] sm:$0xff]  ;;  %7001 = vst [vmem:[#allocation30_spill] sm:$0xff] %v6542_v50  ;;  %7002 = vst [vmem:[#allocation31_spill] sm:$0xff] %v6545_v5 }
 0x6d1   :  { %5306 = vrcp.f32 %v3849_v8  ;;  %7000 = vst [vmem:[#allocation29_spill] sm:$0xff] %v6539_v36  ;;  %v6548_v8 = vld [vmem:[#allocation10 + $0x108] sm:$0xff]  ;;  %v6551_v10 = vld [vmem:[#allocation10 + $0x100] sm:$0xff] }
 0x6d2   :  { %5308 = vrcp.f32 %v3850_v14  ;;  %7003 = vst [vmem:[#allocation32_spill] sm:$0xff] %v6548_v8  ;;  %7004 = vst [vmem:[#allocation33_spill] sm:$0xff] %v6551_v10  ;;  %v6563_v14 = vld [vmem:[#allocation10 + $0xc0] sm:$0xff] }
 0x6d3   :  { %7008 = vst [vmem:[#allocation37_spill] sm:$0xff] %v6563_v14 }
 0x6dc   :  { %v5303_v0 = vpop.eup %5302 }
 0x6dd   :  { %v5305_v17 = vpop.eup %5304 }
 0x6de   :  { %v5307_v12 = vpop.eup %5306  ;;  %v3859_v15 = vmul.f32 %v5305_v17, %v5303_v0  ;;  %v6554_v0 = vld [vmem:[#allocation10 + $0xe8] sm:$0xff]  ;;  %v6557_v17 = vld [vmem:[#allocation10 + $0xe0] sm:$0xff] }
 0x6df   :  { %v3858_v18 = vmul.f32 %v5307_v12, %v6298_v16  ;;  %v5309_v23 = vpop.eup %5308  ;;  %v6414_v16 = vld [vmem:[#allocation10 + $0x1d8] sm:$0xff]  ;;  %7005 = vst [vmem:[#allocation34_spill] sm:$0xff] %v6554_v0  ;;  %7006 = vst [vmem:[#allocation35_spill] sm:$0xff] %v6557_v17  ;;  %v6560_v12 = vld [vmem:[#allocation10 + $0xc8] sm:$0xff] }
 0x6e0   :  { %7007 = vst [vmem:[#allocation36_spill] sm:$0xff] %v6560_v12 }
 0x6e1   :  { %v6403_v21 = vadd.f32 %v3859_v15, %v3858_v18  ;;  %v6566_v15 = vld [vmem:[#allocation10 + $0xa8] sm:$0xff]  ;;  %v6569_v18 = vld [vmem:[#allocation10 + $0xa0] sm:$0xff] }
 0x6e2   :  { %7009 = vst [vmem:[#allocation38_spill] sm:$0xff] %v6566_v15  ;;  %7010 = vst [vmem:[#allocation39_spill] sm:$0xff] %v6569_v18 }
 0x6e3   :  { %5310 = vtanh.f32 %v6403_v21 }
 0x6f0   :  { %v5311_v25 = vpop.eup %5310 }
 0x6f1   :  { %v6406_v27 = vmul.f32 %v5311_v25, %v5309_v23  ;;  %v6572_v23 = vld [vmem:[#allocation10 + $0x88] sm:$0xff]  ;;  %v6575_v25 = vld [vmem:[#allocation10 + $0x80] sm:$0xff] }
 0x6f2   :  { %7011 = vst [vmem:[#allocation40_spill] sm:$0xff] %v6572_v23  ;;  %7012 = vst [vmem:[#allocation41_spill] sm:$0xff] %v6575_v25 }
 0x6f3   :  { %5099 = vmatmul.mubr.f32.vlgmr.msra.gmra.mxu1 %v6406_v27  ;;  %4016 = vmatmul.mubr.f32.vlgmr.msra.gmra.mxu0 %v6406_v27 }
 0x6f4   :  { %4023 = vmatpush1.msra.mxu1 %v6410_v29  ;;  %4086 = vmatprep.mubr.f32.mxu1 %v6944_v62 }
 0x6f5   :  { %4024 = vmatprep.subr.mxu1 %v6414_v16  ;;  %5133 = vmatprep.mubr.msk.f32.mxu0 %vm5682_vm11, %v6944_v62 }
 0x6f6   :  { %4025 = vmatpush1.msra.mxu1 %v6419_v32 }
 0x6f7   :  { %4026 = vmatprep.subr.mxu1 %v6422_v35 }
 0x6f8   :  { %4027 = vmatpush1.msra.mxu1 %v6425_v37 }
 0x6f9   :  { %4028 = vmatprep.subr.mxu1 %v6428_v39 }
 0x6fa   :  { %4029 = vmatpush1.msra.mxu1 %v6431_v41 }
 0x6fb   :  { %4030 = vmatprep.subr.mxu1 %v6434_v43 }
 0x6fc   :  { %4031 = vmatpush1.msra.mxu1 %v6437_v45 }
 0x6fd   :  { %4032 = vmatprep.subr.mxu1 %v6440_v47 }
 0x6fe   :  { %4033 = vmatpush1.msra.mxu1 %v6443_v51 }
 0x6ff   :  { %4034 = vmatprep.subr.mxu1 %v6446_v53 }
 0x700   :  { %4035 = vmatpush1.msra.mxu1 %v6449_v55 }
 0x701   :  { %4036 = vmatprep.subr.mxu1 %v6452_v57 }
 0x702   :  { %4037 = vmatpush1.msra.mxu1 %v6455_v63 }
 0x703   :  { %4038 = vmatprep.subr.mxu1 %v6458_v59 }
 0x704   :  { %4039 = vmatpush1.msra.mxu1 %v6461_v60 }
 0x705   :  { %4040 = vmatprep.subr.mxu1 %v6464_v61 }
 0x706   :  { %4041 = vmatpush1.msra.mxu1 %v6467_v19 }
 0x707   :  { %4042 = vmatprep.subr.mxu1 %v6470_v48 }
 0x708   :  { %4043 = vmatpush1.msra.mxu1 %v6473_v30 }
 0x709   :  { %4044 = vmatprep.subr.mxu1 %v6476_v54 }
 0x70a   :  { %4045 = vmatpush1.msra.mxu1 %v6479_v1 }
 0x70b   :  { %4046 = vmatprep.subr.mxu1 %v6482_v7 }
 0x70c   :  { %4047 = vmatpush1.msra.mxu1 %v6485_v20 }
 0x70d   :  { %4048 = vmatprep.subr.mxu1 %v6488_v22 }
 0x70e   :  { %4049 = vmatpush1.msra.mxu1 %v6491_v52 }
 0x70f   :  { %4050 = vmatprep.subr.mxu1 %v6494_v46 }
 0x710   :  { %4051 = vmatpush1.msra.mxu1 %v6497_v13 }
 0x711   :  { %4052 = vmatprep.subr.mxu1 %v6500_v3 }
 0x712   :  { %4053 = vmatpush1.msra.mxu1 %v6079_v33  ;;  %v6518_v33 = vld [vmem:[#allocation10 + $0x1a8] sm:$0xff] }
 0x713   :  { %4087 = vmatmul.mubr.f32.vlgmr.msra.gmra.mxu1 %v6406_v27  ;;  %4213 = vmatprep.subr.mxu1 %v6505_v44  ;;  %v6578_v27 = vld [vmem:[#allocation10 + $0x68] sm:$0xff] }
 0x714   :  { %4214 = vmatpush1.msra.mxu1 %v6508_v34  ;;  %4277 = vmatprep.mubr.f32.mxu1 %v6944_v62  ;;  %7013 = vst [vmem:[#allocation42_spill] sm:$0xff] %v6578_v27 }
 0x715   :  { %4215 = vmatprep.subr.mxu1 %v6512_v31 }
 0x716   :  { %4216 = vmatpush1.msra.mxu1 %v6515_v42 }
 0x717   :  { %4217 = vmatprep.subr.mxu1 %v6518_v33 }
 0x718   :  { %4218 = vmatpush1.msra.mxu1 %v6521_v2 }
 0x719   :  { %4219 = vmatprep.subr.mxu1 %v6524_v6 }
 0x71a   :  { %4220 = vmatpush1.msra.mxu1 %v6527_v9 }
 0x71b   :  { %4221 = vmatprep.subr.mxu1 %v6530_v11 }
 0x71c   :  { %4222 = vmatpush1.msra.mxu1 %v6533_v28 }
 0x71d   :  { %4223 = vmatprep.subr.mxu1 %v6536_v4 }
 0x71e   :  { %4224 = vmatpush1.msra.mxu1 %v6539_v36 }
 0x71f   :  { %4225 = vmatprep.subr.mxu1 %v6542_v50 }
 0x720   :  { %4226 = vmatpush1.msra.mxu1 %v6545_v5 }
 0x721   :  { %4227 = vmatprep.subr.mxu1 %v6548_v8  ;;  %v7023_v8 = vld [vmem:[#allocation59_spill] sm:$0xff] }
 0x722   :  { %4228 = vmatpush1.msra.mxu1 %v6551_v10  ;;  %v7022_v10 = vld [vmem:[#allocation57_spill] sm:$0xff] }
 0x723   :  { %4229 = vmatprep.subr.mxu1 %v6554_v0 }
 0x724   :  { %4230 = vmatpush1.msra.mxu1 %v6557_v17 }
 0x725   :  { %4231 = vmatprep.subr.mxu1 %v6560_v12  ;;  %v4126_v12 = vld [vmem:[#allocation13 + $0x180] sm:$0xff] }
 0x726   :  { %4232 = vmatpush1.msra.mxu1 %v6563_v14  ;;  %v6581_v14 = vld [vmem:[#allocation10 + $0x60] sm:$0xff] }
 0x727   :  { %4233 = vmatprep.subr.mxu1 %v6566_v15  ;;  %7014 = vst [vmem:[#allocation43_spill] sm:$0xff] %v6581_v14  ;;  %v6584_v15 = vld [vmem:[#allocation10 + $0x48] sm:$0xff] }
 0x728   :  { %4234 = vmatpush1.msra.mxu1 %v6569_v18  ;;  %7015 = vst [vmem:[#allocation44_spill] sm:$0xff] %v6584_v15  ;;  %v6587_v18 = vld [vmem:[#allocation10 + $0x40] sm:$0xff] }
 0x729   :  { %4235 = vmatprep.subr.mxu1 %v6572_v23  ;;  %7016 = vst [vmem:[#allocation45_spill] sm:$0xff] %v6587_v18  ;;  %v6590_v23 = vld [vmem:[#allocation10 + $0x28] sm:$0xff] }
 0x72a   :  { %4236 = vmatpush1.msra.mxu1 %v6575_v25  ;;  %7017 = vst [vmem:[#allocation46_spill] sm:$0xff] %v6590_v23  ;;  %v6593_v25 = vld [vmem:[#allocation10 + $0x20] sm:$0xff] }
 0x72b   :  { %4237 = vmatprep.subr.mxu1 %v6578_v27  ;;  %7018 = vst [vmem:[#allocation47_spill] sm:$0xff] %v6593_v25  ;;  %v6596_v27 = vld [vmem:[#allocation10 + $0x8] sm:$0xff] }
 0x72c   :  { %4238 = vmatpush1.msra.mxu1 %v6581_v14  ;;  %7019 = vst [vmem:[#allocation48_spill] sm:$0xff] %v6596_v27  ;;  %v6599_v14 = vld [vmem:[#allocation10] sm:$0xff] }
 0x72d   :  { %4239 = vmatprep.subr.mxu1 %v6584_v15  ;;  %7020 = vst [vmem:[#allocation49_spill] sm:$0xff] %v6599_v14  ;;  %v4141_v15 = vld [vmem:[#allocation13 + $0x1f8] sm:$0xff] }
 0x72e   :  { %4240 = vmatpush1.msra.mxu1 %v6587_v18  ;;  %5102 = vmatpush3.msra.mxu0 %v4141_v15  ;;  %v4140_v18 = vld [vmem:[#allocation13 + $0x1f0] sm:$0xff]  ;;  %v4135_v15 = vld [vmem:[#allocation13 + $0x1c8] sm:$0xff] }
 0x72f   :  { %4241 = vmatprep.subr.mxu1 %v6590_v23  ;;  %5103 = vmatprep.subr.mxu0 %v6944_v62  ;;  %v4139_v23 = vld [vmem:[#allocation13 + $0x1e8] sm:$0xff] }
 0x730   :  { %4242 = vmatpush1.msra.mxu1 %v6593_v25  ;;  %5104 = vmatpush3.msra.mxu0 %v4140_v18  ;;  %v4138_v25 = vld [vmem:[#allocation13 + $0x1e0] sm:$0xff] }
 0x731   :  { %4243 = vmatprep.subr.mxu1 %v6596_v27  ;;  %5105 = vmatprep.subr.mxu0 %v6944_v62  ;;  %v4137_v27 = vld [vmem:[#allocation13 + $0x1d8] sm:$0xff]  ;;  %v4134_v18 = vld [vmem:[#allocation13 + $0x1c0] sm:$0xff] }
 0x732   :  { %4244 = vmatpush1.msra.mxu1 %v6599_v14  ;;  %5106 = vmatpush3.msra.mxu0 %v4139_v23  ;;  %v4136_v14 = vld [vmem:[#allocation13 + $0x1d0] sm:$0xff]  ;;  %v4133_v23 = vld [vmem:[#allocation13 + $0x1b8] sm:$0xff] }
 0x733   :  { %5136 = vmatprep.subr.mxu1 %v6944_v62  ;;  %5107 = vmatprep.subr.mxu0 %v6944_v62 }
 0x734   :  { %5108 = vmatpush3.msra.mxu0 %v4138_v25  ;;  %v4132_v25 = vld [vmem:[#allocation13 + $0x1b0] sm:$0xff] }
 0x735   :  { %5109 = vmatprep.subr.mxu0 %v6944_v62 }
 0x736   :  { %5110 = vmatpush3.msra.mxu0 %v4137_v27  ;;  %v4131_v27 = vld [vmem:[#allocation13 + $0x1a8] sm:$0xff] }
 0x737   :  { %5111 = vmatprep.subr.mxu0 %v6944_v62 }
 0x738   :  { %5112 = vmatpush3.msra.mxu0 %v4136_v14  ;;  %v4130_v14 = vld [vmem:[#allocation13 + $0x1a0] sm:$0xff] }
 0x739   :  { %5113 = vmatprep.subr.mxu0 %v6944_v62 }
 0x73a   :  { %5114 = vmatpush3.msra.mxu0 %v4135_v15  ;;  %v4129_v15 = vld [vmem:[#allocation13 + $0x198] sm:$0xff] }
 0x73b   :  { %5115 = vmatprep.subr.mxu0 %v6944_v62 }
 0x73c   :  { %5116 = vmatpush3.msra.mxu0 %v4134_v18  ;;  %v4128_v18 = vld [vmem:[#allocation13 + $0x190] sm:$0xff] }
 0x73d   :  { %5117 = vmatprep.subr.mxu0 %v6944_v62 }
 0x73e   :  { %5118 = vmatpush3.msra.mxu0 %v4133_v23  ;;  %v4127_v23 = vld [vmem:[#allocation13 + $0x188] sm:$0xff] }
 0x73f   :  { %5119 = vmatprep.subr.mxu0 %v6944_v62 }
 0x740   :  { %5120 = vmatpush3.msra.mxu0 %v4132_v25  ;;  %v3686_v25 = vadd.f32 %v6295_v56, %v6392_v40 }
 0x741   :  { %5121 = vmatprep.subr.mxu0 %v6944_v62 }
 0x742   :  { %5122 = vmatpush3.msra.mxu0 %v4131_v27 }
 0x743   :  { %5123 = vmatprep.subr.mxu0 %v6944_v62 }
 0x744   :  { %5124 = vmatpush3.msra.mxu0 %v4130_v14 }
 0x745   :  { %5125 = vmatprep.subr.mxu0 %v6944_v62 }
 0x746   :  { %5126 = vmatpush3.msra.mxu0 %v4129_v15 }
 0x747   :  { %5127 = vmatprep.subr.mxu0 %v6944_v62 }
 0x748   :  { %5128 = vmatpush3.msra.mxu0 %v4128_v18 }
 0x749   :  { %5129 = vmatprep.subr.mxu0 %v6944_v62 }
 0x74a   :  { %5130 = vmatpush3.msra.mxu0 %v4127_v23 }
 0x74b   :  { %5131 = vmatprep.subr.mxu0 %v6944_v62 }
 0x74c   :  { %5132 = vmatpush3.msra.mxu0 %v4126_v12 }
 0x74d   :  { %4284 = vmatprep.subr.mxu0 %v6389_v58 }
 0x7b3   :  { %v3946_v27 = vpop.f32.mrf.mxu1  ;;  %v4017_v14 = vpop.f32.mrf.mxu0 }
 0x7b4   :  { %v6621_v17 = vadd.f32 %v3946_v27, %v3686_v25  ;;  %v4093_v18 = vadd.f32 %v4017_v14, %v7022_v10  ;;  %v7024_v25 = vld [vmem:[#allocation62_spill] sm:$0xff]  ;;  %v7025_v14 = vld [vmem:[#allocation64_spill] sm:$0xff] }
 0x7b5   :  { %v5100_v15 = vpop.f32.mrf.mxu1  ;;  %v4019_v0 = vpop.f32.mrf.mxu0 }
 0x7b6   :  { %7021 = vst [vmem:[#allocation50_spill] sm:$0xff] %v6621_v17  ;;  %v4094_v5 = vadd.f32 %v4019_v0, %v7023_v8  ;;  %v4097_v23 = vadd.f32 %v4093_v18, %v6192_v26 }
 0x7b8   :  { %v4098_v50 = vadd.f32 %v4094_v5, %v6197_v24  ;;  %v4866_v12 = vmul.f32 -1.442695, %v4097_v23 }
 0x7ba   :  { %v4867_v36 = vmul.f32 -1.442695, %v4098_v50  ;;  %5312 = vpow2.f32 %v4866_v12 }
 0x7bc   :  { %5314 = vpow2.f32 %v4867_v36 }
 0x7c7   :  { %v5313_v58 = vpop.eup %5312 }
 0x7c8   :  { %v4110_v4 = vadd.f32 1.0, %v5313_v58 }
 0x7c9   :  { %v5315_v56 = vpop.eup %5314 }
 0x7ca   :  { %v4111_v15 = vadd.f32 1.0, %v5315_v56  ;;  %5316 = vrcp.f32 %v4110_v4 }
 0x7cc   :  { %5318 = vrcp.f32 %v4111_v15  ;;  %v7037_v15 = vld [vmem:[#allocation39_spill] sm:$0xff] }
 0x7d3   :  { %v4088_v40 = vpop.f32.mrf.mxu1 }
 0x7d4   :  { %v4095_v27 = vadd.f32 %v4088_v40, %v7024_v25 }
 0x7d5   :  { %v4090_v17 = vpop.f32.mrf.mxu1 }
 0x7d6   :  { %v4099_v10 = vadd.f32 %v4095_v27, %v6207_v38  ;;  %v4096_v8 = vadd.f32 %v4090_v17, %v7025_v14  ;;  %v7028_v27 = vld [vmem:[#allocation30_spill] sm:$0xff]  ;;  %v7039_v14 = vld [vmem:[#allocation41_spill] sm:$0xff] }
 0x7d7   :  { %v5317_v36 = vpop.eup %5316 }
 0x7d8   :  { %v4868_v0 = vmul.f32 -1.442695, %v4099_v10  ;;  %v4100_v5 = vadd.f32 %v4096_v8, %v6212_v49  ;;  %v7038_v10 = vld [vmem:[#allocation40_spill] sm:$0xff]  ;;  %v7040_v8 = vld [vmem:[#allocation42_spill] sm:$0xff] }
 0x7d9   :  { %v5319_v50 = vpop.eup %5318 }
 0x7da   :  { %5320 = vpow2.f32 %v4868_v0  ;;  %v4120_v12 = vmul.f32 %v5319_v50, %v6403_v21  ;;  %v6668_v21 = vld [vmem:[#allocation10 + $0x10] sm:$0xff]  ;;  %v7041_v0 = vld [vmem:[#allocation43_spill] sm:$0xff] }
 0x7db   :  { %5322 = vtanh.f32 %v4100_v5  ;;  %v7042_v5 = vld [vmem:[#allocation44_spill] sm:$0xff]  ;;  %v7044_v50 = vld [vmem:[#allocation46_spill] sm:$0xff] }
 0x7e7   :  { %v5321_v18 = vpop.eup %5320 }
 0x7e8   :  { %v5323_v23 = vpop.eup %5322  ;;  %v4112_v58 = vadd.f32 1.0, %v5321_v18  ;;  %v7045_v18 = vld [vmem:[#allocation47_spill] sm:$0xff] }
 0x7e9   :  { %v4121_v56 = vmul.f32 %v5323_v23, %v5317_v36  ;;  %v7043_v36 = vld [vmem:[#allocation45_spill] sm:$0xff]  ;;  %v7046_v23 = vld [vmem:[#allocation48_spill] sm:$0xff] }
 0x7ea   :  { %5324 = vrcp.f32 %v4112_v58  ;;  %v7047_v58 = vld [vmem:[#allocation49_spill] sm:$0xff] }
 0x7eb   :  { %v6632_v40 = vadd.f32 %v4121_v56, %v4120_v12  ;;  %v4403_v12 = vld [vmem:[#allocation13 + $0x278] sm:$0xff]  ;;  %v4402_v56 = vld [vmem:[#allocation13 + $0x270] sm:$0xff] }
 0x7ed   :  { %5326 = vtanh.f32 %v6632_v40 }
 0x7f7   :  { %v5325_v4 = vpop.eup %5324 }
 0x7fa   :  { %v5327_v17 = vpop.eup %5326 }
 0x7fb   :  { %v4124_v25 = vmul.f32 %v5327_v17, %v5325_v4  ;;  %v4401_v4 = vld [vmem:[#allocation13 + $0x268] sm:$0xff]  ;;  %v4400_v17 = vld [vmem:[#allocation13 + $0x260] sm:$0xff] }
 0x7fd   :  { %5134 = vmatmul.mubr.f32.vlgmr.msra.gmra.mxu0 %v4124_v25  ;;  %4278 = vmatmul.mubr.f32.vlgmr.msra.gmra.mxu1 %v4124_v25 }
 0x7fe   :  { %4285 = vmatpush1.msra.mxu0 %v6410_v29  ;;  %4348 = vmatprep.mubr.f32.mxu0 %v6944_v62 }
 0x7ff   :  { %4286 = vmatprep.subr.mxu0 %v6414_v16  ;;  %5168 = vmatprep.mubr.msk.f32.mxu1 %vm5682_vm11, %v6944_v62 }
 0x800   :  { %4287 = vmatpush1.msra.mxu0 %v6419_v32  ;;  %5137 = vmatpush3.msra.mxu1 %v4403_v12 }
 0x801   :  { %4288 = vmatprep.subr.mxu0 %v6422_v35  ;;  %5138 = vmatprep.subr.mxu1 %v6944_v62 }
 0x802   :  { %4289 = vmatpush1.msra.mxu0 %v6425_v37  ;;  %5139 = vmatpush3.msra.mxu1 %v4402_v56 }
 0x803   :  { %4290 = vmatprep.subr.mxu0 %v6428_v39  ;;  %5140 = vmatprep.subr.mxu1 %v6944_v62 }
 0x804   :  { %4291 = vmatpush1.msra.mxu0 %v6431_v41  ;;  %5141 = vmatpush3.msra.mxu1 %v4401_v4 }
 0x805   :  { %4292 = vmatprep.subr.mxu0 %v6434_v43  ;;  %5142 = vmatprep.subr.mxu1 %v6944_v62 }
 0x806   :  { %4293 = vmatpush1.msra.mxu0 %v6437_v45  ;;  %5143 = vmatpush3.msra.mxu1 %v4400_v17 }
 0x807   :  { %4294 = vmatprep.subr.mxu0 %v6440_v47  ;;  %5144 = vmatprep.subr.mxu1 %v6944_v62 }
 0x808   :  { %4295 = vmatpush1.msra.mxu0 %v6443_v51 }
 0x809   :  { %4296 = vmatprep.subr.mxu0 %v6446_v53 }
 0x80a   :  { %4297 = vmatpush1.msra.mxu0 %v6449_v55 }
 0x80b   :  { %4298 = vmatprep.subr.mxu0 %v6452_v57 }
 0x80c   :  { %4299 = vmatpush1.msra.mxu0 %v6455_v63 }
 0x80d   :  { %4300 = vmatprep.subr.mxu0 %v6458_v59 }
 0x80e   :  { %4301 = vmatpush1.msra.mxu0 %v6461_v60 }
 0x80f   :  { %4302 = vmatprep.subr.mxu0 %v6464_v61 }
 0x810   :  { %4303 = vmatpush1.msra.mxu0 %v6467_v19 }
 0x811   :  { %4304 = vmatprep.subr.mxu0 %v6470_v48 }
 0x812   :  { %4305 = vmatpush1.msra.mxu0 %v6473_v30 }
 0x813   :  { %4306 = vmatprep.subr.mxu0 %v6476_v54 }
 0x814   :  { %4307 = vmatpush1.msra.mxu0 %v6479_v1 }
 0x815   :  { %4308 = vmatprep.subr.mxu0 %v6482_v7 }
 0x816   :  { %4309 = vmatpush1.msra.mxu0 %v6485_v20 }
 0x817   :  { %4310 = vmatprep.subr.mxu0 %v6488_v22 }
 0x818   :  { %4311 = vmatpush1.msra.mxu0 %v6491_v52 }
 0x819   :  { %4312 = vmatprep.subr.mxu0 %v6494_v46 }
 0x81a   :  { %4313 = vmatpush1.msra.mxu0 %v6497_v13 }
 0x81b   :  { %4314 = vmatprep.subr.mxu0 %v6500_v3 }
 0x81c   :  { %4315 = vmatpush1.msra.mxu0 %v6668_v21 }
 0x81d   :  { %4349 = vmatmul.mubr.f32.vlgmr.msra.gmra.mxu0 %v4124_v25  ;;  %4475 = vmatprep.subr.mxu0 %v6505_v44  ;;  %v7026_v44 = vld [vmem:[#allocation28_spill] sm:$0xff] }
 0x81e   :  { %4476 = vmatpush1.msra.mxu0 %v6508_v34  ;;  %4539 = vmatprep.mubr.f32.mxu0 %v6944_v62  ;;  %v7027_v34 = vld [vmem:[#allocation29_spill] sm:$0xff]  ;;  %v4399_v25 = vld [vmem:[#allocation13 + $0x258] sm:$0xff] }
 0x81f   :  { %4477 = vmatprep.subr.mxu0 %v6512_v31  ;;  %v7029_v31 = vld [vmem:[#allocation31_spill] sm:$0xff]  ;;  %5145 = vmatpush3.msra.mxu1 %v4399_v25 }
 0x820   :  { %4478 = vmatpush1.msra.mxu0 %v6515_v42  ;;  %v7030_v42 = vld [vmem:[#allocation32_spill] sm:$0xff]  ;;  %5146 = vmatprep.subr.mxu1 %v6944_v62 }
 0x821   :  { %4479 = vmatprep.subr.mxu0 %v6518_v33  ;;  %v7031_v33 = vld [vmem:[#allocation33_spill] sm:$0xff] }
 0x822   :  { %4480 = vmatpush1.msra.mxu0 %v6521_v2  ;;  %v7032_v2 = vld [vmem:[#allocation34_spill] sm:$0xff] }
 0x823   :  { %4481 = vmatprep.subr.mxu0 %v6524_v6  ;;  %v7033_v6 = vld [vmem:[#allocation35_spill] sm:$0xff] }
 0x824   :  { %4482 = vmatpush1.msra.mxu0 %v6527_v9  ;;  %v7034_v9 = vld [vmem:[#allocation36_spill] sm:$0xff] }
 0x825   :  { %4483 = vmatprep.subr.mxu0 %v6530_v11  ;;  %v7035_v11 = vld [vmem:[#allocation37_spill] sm:$0xff] }
 0x826   :  { %4484 = vmatpush1.msra.mxu0 %v6533_v28  ;;  %v7036_v28 = vld [vmem:[#allocation38_spill] sm:$0xff] }
 0x827   :  { %4485 = vmatprep.subr.mxu0 %v7026_v44  ;;  %v4398_v44 = vld [vmem:[#allocation13 + $0x250] sm:$0xff] }
 0x828   :  { %4486 = vmatpush1.msra.mxu0 %v7027_v34  ;;  %5147 = vmatpush3.msra.mxu1 %v4398_v44  ;;  %v4397_v34 = vld [vmem:[#allocation13 + $0x248] sm:$0xff] }
 0x829   :  { %4487 = vmatprep.subr.mxu0 %v7028_v27  ;;  %5148 = vmatprep.subr.mxu1 %v6944_v62  ;;  %v4396_v27 = vld [vmem:[#allocation13 + $0x240] sm:$0xff] }
 0x82a   :  { %4488 = vmatpush1.msra.mxu0 %v7029_v31  ;;  %5149 = vmatpush3.msra.mxu1 %v4397_v34  ;;  %v4395_v31 = vld [vmem:[#allocation13 + $0x238] sm:$0xff] }
 0x82b   :  { %4489 = vmatprep.subr.mxu0 %v7030_v42  ;;  %5150 = vmatprep.subr.mxu1 %v6944_v62  ;;  %v4394_v42 = vld [vmem:[#allocation13 + $0x230] sm:$0xff] }
 0x82c   :  { %4490 = vmatpush1.msra.mxu0 %v7031_v33  ;;  %5151 = vmatpush3.msra.mxu1 %v4396_v27  ;;  %v4393_v33 = vld [vmem:[#allocation13 + $0x228] sm:$0xff] }
 0x82d   :  { %4491 = vmatprep.subr.mxu0 %v7032_v2  ;;  %5152 = vmatprep.subr.mxu1 %v6944_v62  ;;  %v4392_v2 = vld [vmem:[#allocation13 + $0x220] sm:$0xff] }
 0x82e   :  { %4492 = vmatpush1.msra.mxu0 %v7033_v6  ;;  %5153 = vmatpush3.msra.mxu1 %v4395_v31  ;;  %v4391_v6 = vld [vmem:[#allocation13 + $0x218] sm:$0xff]  ;;  %v7052_v31 = vld [vmem:[#allocation66_spill] sm:$0xff] }
 0x82f   :  { %4493 = vmatprep.subr.mxu0 %v7034_v9  ;;  %5154 = vmatprep.subr.mxu1 %v6944_v62  ;;  %v4390_v9 = vld [vmem:[#allocation13 + $0x210] sm:$0xff] }
 0x830   :  { %4494 = vmatpush1.msra.mxu0 %v7035_v11  ;;  %5155 = vmatpush3.msra.mxu1 %v4394_v42  ;;  %v4389_v11 = vld [vmem:[#allocation13 + $0x208] sm:$0xff] }
 0x831   :  { %4495 = vmatprep.subr.mxu0 %v7036_v28  ;;  %5156 = vmatprep.subr.mxu1 %v6944_v62  ;;  %v4388_v28 = vld [vmem:[#allocation13 + $0x200] sm:$0xff] }
 0x832   :  { %4496 = vmatpush1.msra.mxu0 %v7037_v15  ;;  %5157 = vmatpush3.msra.mxu1 %v4393_v33  ;;  %v7048_v15 = vld [vmem:[#allocation25_spill] sm:$0xff] }
 0x833   :  { %4497 = vmatprep.subr.mxu0 %v7038_v10  ;;  %5158 = vmatprep.subr.mxu1 %v6944_v62 }
 0x834   :  { %4498 = vmatpush1.msra.mxu0 %v7039_v14  ;;  %5159 = vmatpush3.msra.mxu1 %v4392_v2 }
 0x835   :  { %4499 = vmatprep.subr.mxu0 %v7040_v8  ;;  %5160 = vmatprep.subr.mxu1 %v6944_v62  ;;  %v7049_v8 = vld [vmem:[#allocation50_spill] sm:$0xff] }
 0x836   :  { %4500 = vmatpush1.msra.mxu0 %v7041_v0  ;;  %5161 = vmatpush3.msra.mxu1 %v4391_v6 }
 0x837   :  { %4501 = vmatprep.subr.mxu0 %v7042_v5  ;;  %5162 = vmatprep.subr.mxu1 %v6944_v62 }
 0x838   :  { %4502 = vmatpush1.msra.mxu0 %v7043_v36  ;;  %5163 = vmatpush3.msra.mxu1 %v4390_v9  ;;  %v7053_v9 = vld [vmem:[#allocation27_spill] sm:$0xff] }
 0x839   :  { %4503 = vmatprep.subr.mxu0 %v7044_v50  ;;  %5164 = vmatprep.subr.mxu1 %v6944_v62  ;;  %v7050_v50 = vld [vmem:[#allocation61_spill] sm:$0xff] }
 0x83a   :  { %4504 = vmatpush1.msra.mxu0 %v7045_v18  ;;  %5165 = vmatpush3.msra.mxu1 %v4389_v11 }
 0x83b   :  { %4505 = vmatprep.subr.mxu0 %v7046_v23  ;;  %5166 = vmatprep.subr.mxu1 %v6944_v62  ;;  %v7051_v23 = vld [vmem:[#allocation63_spill] sm:$0xff] }
 0x83c   :  { %4506 = vmatpush1.msra.mxu0 %v7047_v58  ;;  %5167 = vmatpush3.msra.mxu1 %v4388_v28 }
 0x83d   :  { %5171 = vmatprep.subr.mxu0 %v6944_v62  ;;  %4546 = vmatprep.subr.mxu1 %v7048_v15 }
 0x8bd   :  { %v4208_v10 = vpop.f32.mrf.mxu0  ;;  %v4279_v14 = vpop.f32.mrf.mxu1 }
 0x8be   :  { %v6722_v0 = vadd.f32 %v4208_v10, %v7049_v8  ;;  %v4355_v18 = vadd.f32 %v4279_v14, %v7050_v50 }
 0x8bf   :  { %v5135_v5 = vpop.f32.mrf.mxu0  ;;  %v4281_v36 = vpop.f32.mrf.mxu1 }
 0x8c0   :  { %v4356_v58 = vadd.f32 %v4281_v36, %v7051_v23  ;;  %v4359_v12 = vadd.f32 %v4355_v18, %v6192_v26 }
 0x8c2   :  { %v4360_v56 = vadd.f32 %v4356_v58, %v6197_v24  ;;  %v4869_v4 = vmul.f32 -1.442695, %v4359_v12 }
 0x8c4   :  { %v4870_v17 = vmul.f32 -1.442695, %v4360_v56  ;;  %5328 = vpow2.f32 %v4869_v4 }
 0x8c6   :  { %5330 = vpow2.f32 %v4870_v17  ;;  %v7054_v17 = vld [vmem:[#allocation65_spill] sm:$0xff] }
 0x8d1   :  { %v5329_v25 = vpop.eup %5328 }
 0x8d2   :  { %v4372_v27 = vadd.f32 1.0, %v5329_v25 }
 0x8d3   :  { %v5331_v44 = vpop.eup %5330 }
 0x8d4   :  { %v4373_v33 = vadd.f32 1.0, %v5331_v44  ;;  %5332 = vrcp.f32 %v4372_v27  ;;  %v7055_v44 = vld [vmem:[#allocation67_spill] sm:$0xff] }
 0x8d6   :  { %5334 = vrcp.f32 %v4373_v33 }
 0x8dd   :  { %v4350_v34 = vpop.f32.mrf.mxu0 }
 0x8de   :  { %v4357_v42 = vadd.f32 %v4350_v34, %v7052_v31 }
 0x8df   :  { %v4352_v2 = vpop.f32.mrf.mxu0 }
 0x8e0   :  { %v4361_v6 = vadd.f32 %v4357_v42, %v6207_v38  ;;  %v4358_v11 = vadd.f32 %v4352_v2, %v7053_v9 }
 0x8e1   :  { %v5333_v10 = vpop.eup %5332 }
 0x8e2   :  { %v4871_v28 = vmul.f32 -1.442695, %v4361_v6  ;;  %v4362_v15 = vadd.f32 %v4358_v11, %v6212_v49 }
 0x8e3   :  { %v5335_v14 = vpop.eup %5334 }
 0x8e4   :  { %5336 = vpow2.f32 %v4871_v28  ;;  %v4382_v50 = vmul.f32 %v5335_v14, %v6632_v40  ;;  %v7056_v28 = vld [vmem:[#allocation26_spill] sm:$0xff] }
 0x8e5   :  { %5338 = vtanh.f32 %v4362_v15 }
 0x8f1   :  { %v5337_v8 = vpop.eup %5336 }
 0x8f2   :  { %v5339_v5 = vpop.eup %5338  ;;  %v4374_v36 = vadd.f32 1.0, %v5337_v8  ;;  %v7057_v8 = vld [vmem:[#allocation68_spill] sm:$0xff] }
 0x8f3   :  { %v4383_v18 = vmul.f32 %v5339_v5, %v5333_v10 }
 0x8f4   :  { %5340 = vrcp.f32 %v4374_v36 }
 0x8f5   :  { %v6733_v23 = vadd.f32 %v4383_v18, %v4382_v50 }
 0x8f7   :  { %5342 = vtanh.f32 %v6733_v23 }
 0x901   :  { %v5341_v58 = vpop.eup %5340 }
 0x904   :  { %v5343_v12 = vpop.eup %5342 }
 0x905   :  { %v4386_v56 = vmul.f32 %v5343_v12, %v5341_v58 }
 0x907   :  { %5169 = vmatmul.mubr.f32.vlgmr.msra.gmra.mxu1 %v4386_v56  ;;  %4540 = vmatmul.mubr.f32.vlgmr.msra.gmra.mxu0 %v4386_v56 }
 0x908   :  { %4547 = vmatpush1.msra.mxu1 %v6410_v29  ;;  %4610 = vmatprep.mubr.f32.mxu1 %v6944_v62  ;;  %v4665_v29 = vld [vmem:[#allocation13 + $0x2f8] sm:$0xff] }
 0x909   :  { %4548 = vmatprep.subr.mxu1 %v6414_v16  ;;  %5203 = vmatprep.mubr.msk.f32.mxu0 %vm5682_vm11, %v6944_v62  ;;  %v4664_v16 = vld [vmem:[#allocation13 + $0x2f0] sm:$0xff] }
 0x90a   :  { %4549 = vmatpush1.msra.mxu1 %v6419_v32  ;;  %5172 = vmatpush3.msra.mxu0 %v4665_v29  ;;  %v4663_v32 = vld [vmem:[#allocation13 + $0x2e8] sm:$0xff] }
 0x90b   :  { %4550 = vmatprep.subr.mxu1 %v6422_v35  ;;  %5173 = vmatprep.subr.mxu0 %v6944_v62  ;;  %v4662_v35 = vld [vmem:[#allocation13 + $0x2e0] sm:$0xff] }
 0x90c   :  { %4551 = vmatpush1.msra.mxu1 %v6425_v37  ;;  %5174 = vmatpush3.msra.mxu0 %v4664_v16  ;;  %v4661_v37 = vld [vmem:[#allocation13 + $0x2d8] sm:$0xff] }
 0x90d   :  { %4552 = vmatprep.subr.mxu1 %v6428_v39  ;;  %5175 = vmatprep.subr.mxu0 %v6944_v62  ;;  %v4660_v39 = vld [vmem:[#allocation13 + $0x2d0] sm:$0xff] }
 0x90e   :  { %4553 = vmatpush1.msra.mxu1 %v6431_v41  ;;  %5176 = vmatpush3.msra.mxu0 %v4663_v32  ;;  %v4659_v41 = vld [vmem:[#allocation13 + $0x2c8] sm:$0xff] }
 0x90f   :  { %4554 = vmatprep.subr.mxu1 %v6434_v43  ;;  %5177 = vmatprep.subr.mxu0 %v6944_v62  ;;  %v4658_v43 = vld [vmem:[#allocation13 + $0x2c0] sm:$0xff] }
 0x910   :  { %4555 = vmatpush1.msra.mxu1 %v6437_v45  ;;  %5178 = vmatpush3.msra.mxu0 %v4662_v35  ;;  %v4657_v45 = vld [vmem:[#allocation13 + $0x2b8] sm:$0xff] }
 0x911   :  { %4556 = vmatprep.subr.mxu1 %v6440_v47  ;;  %5179 = vmatprep.subr.mxu0 %v6944_v62  ;;  %v4656_v47 = vld [vmem:[#allocation13 + $0x2b0] sm:$0xff] }
 0x912   :  { %4557 = vmatpush1.msra.mxu1 %v6443_v51  ;;  %5180 = vmatpush3.msra.mxu0 %v4661_v37  ;;  %v4655_v51 = vld [vmem:[#allocation13 + $0x2a8] sm:$0xff]  ;;  %v4751_v37 = vld [vmem:[#allocation16 + $0x18] sm:$0xff] }
 0x913   :  { %4558 = vmatprep.subr.mxu1 %v6446_v53  ;;  %5181 = vmatprep.subr.mxu0 %v6944_v62  ;;  %v4654_v53 = vld [vmem:[#allocation13 + $0x2a0] sm:$0xff] }
 0x914   :  { %4559 = vmatpush1.msra.mxu1 %v6449_v55  ;;  %5182 = vmatpush3.msra.mxu0 %v4660_v39  ;;  %v4653_v55 = vld [vmem:[#allocation13 + $0x298] sm:$0xff]  ;;  %v4749_v39 = vld [vmem:[#allocation16 + $0x8] sm:$0xff] }
 0x915   :  { %4560 = vmatprep.subr.mxu1 %v6452_v57  ;;  %5183 = vmatprep.subr.mxu0 %v6944_v62  ;;  %v4652_v57 = vld [vmem:[#allocation13 + $0x290] sm:$0xff] }
 0x916   :  { %4561 = vmatpush1.msra.mxu1 %v6455_v63  ;;  %5184 = vmatpush3.msra.mxu0 %v4659_v41  ;;  %v4651_v63 = vld [vmem:[#allocation13 + $0x288] sm:$0xff] }
 0x917   :  { %4562 = vmatprep.subr.mxu1 %v6458_v59  ;;  %5185 = vmatprep.subr.mxu0 %v6944_v62  ;;  %v4650_v59 = vld [vmem:[#allocation13 + $0x280] sm:$0xff] }
 0x918   :  { %4563 = vmatpush1.msra.mxu1 %v6461_v60  ;;  %5186 = vmatpush3.msra.mxu0 %v4658_v43  ;;  %v4763_v60 = vld [vmem:[#allocation16 + $0x78] sm:$0xff]  ;;  %v4748_v41 = vld [vmem:[#allocation16] sm:$0xff] }
 0x919   :  { %4564 = vmatprep.subr.mxu1 %v6464_v61  ;;  %5187 = vmatprep.subr.mxu0 %v6944_v62  ;;  %v4762_v61 = vld [vmem:[#allocation16 + $0x70] sm:$0xff]  ;;  %v4875_v43 = vld [vmem:[#allocation15] ss:$0 sm:$0xff] }
 0x91a   :  { %4565 = vmatpush1.msra.mxu1 %v6467_v19  ;;  %5188 = vmatpush3.msra.mxu0 %v4657_v45  ;;  %v4761_v19 = vld [vmem:[#allocation16 + $0x68] sm:$0xff] }
 0x91b   :  { %4566 = vmatprep.subr.mxu1 %v6470_v48  ;;  %5189 = vmatprep.subr.mxu0 %v6944_v62  ;;  %v4760_v48 = vld [vmem:[#allocation16 + $0x60] sm:$0xff] }
 0x91c   :  { %4567 = vmatpush1.msra.mxu1 %v6473_v30  ;;  %5190 = vmatpush3.msra.mxu0 %v4656_v47  ;;  %v4759_v30 = vld [vmem:[#allocation16 + $0x58] sm:$0xff] }
 0x91d   :  { %4568 = vmatprep.subr.mxu1 %v6476_v54  ;;  %5191 = vmatprep.subr.mxu0 %v6944_v62  ;;  %v4758_v54 = vld [vmem:[#allocation16 + $0x50] sm:$0xff] }
 0x91e   :  { %4569 = vmatpush1.msra.mxu1 %v6479_v1  ;;  %5192 = vmatpush3.msra.mxu0 %v4655_v51  ;;  %v4757_v1 = vld [vmem:[#allocation16 + $0x48] sm:$0xff] }
 0x91f   :  { %4570 = vmatprep.subr.mxu1 %v6482_v7  ;;  %5193 = vmatprep.subr.mxu0 %v6944_v62  ;;  %v4756_v7 = vld [vmem:[#allocation16 + $0x40] sm:$0xff] }
 0x920   :  { %4571 = vmatpush1.msra.mxu1 %v6485_v20  ;;  %5194 = vmatpush3.msra.mxu0 %v4654_v53  ;;  %v4755_v20 = vld [vmem:[#allocation16 + $0x38] sm:$0xff] }
 0x921   :  { %4572 = vmatprep.subr.mxu1 %v6488_v22  ;;  %5195 = vmatprep.subr.mxu0 %v6944_v62  ;;  %v4754_v22 = vld [vmem:[#allocation16 + $0x30] sm:$0xff] }
 0x922   :  { %4573 = vmatpush1.msra.mxu1 %v6491_v52  ;;  %5196 = vmatpush3.msra.mxu0 %v4653_v55  ;;  %v4753_v52 = vld [vmem:[#allocation16 + $0x28] sm:$0xff] }
 0x923   :  { %4574 = vmatprep.subr.mxu1 %v6494_v46  ;;  %5197 = vmatprep.subr.mxu0 %v6944_v62  ;;  %v4752_v46 = vld [vmem:[#allocation16 + $0x20] sm:$0xff] }
 0x924   :  { %4575 = vmatpush1.msra.mxu1 %v6497_v13  ;;  %5198 = vmatpush3.msra.mxu0 %v4652_v57  ;;  %v4876_v57 = vld [vmem:[#allocation18] ss:$0 sm:$0xff] }
 0x925   :  { %4576 = vmatprep.subr.mxu1 %v6500_v3  ;;  %5199 = vmatprep.subr.mxu0 %v6944_v62 }
 0x926   :  { %4577 = vmatpush1.msra.mxu1 %v6668_v21  ;;  %5200 = vmatpush3.msra.mxu0 %v4651_v63 }
 0x927   :  { %4611 = vmatmul.mubr.f32.vlgmr.msra.gmra.mxu1 %v4386_v56  ;;  %5206 = vmatprep.subr.mxu1 %v6944_v62 }
 0x928   :  { %5238 = vmatprep.mubr.msk.f32.mxu1 %vm5682_vm11, %v6944_v62  ;;  %5201 = vmatprep.subr.mxu0 %v6944_v62 }
 0x929   :  { %5202 = vmatpush3.msra.mxu0 %v4650_v59  ;;  %5207 = vmatpush3.msra.mxu1 %v4763_v60 }
 0x92a   :  { %5208 = vmatprep.subr.mxu1 %v6944_v62 }
 0x92b   :  { %5209 = vmatpush3.msra.mxu1 %v4762_v61 }
 0x92c   :  { %5210 = vmatprep.subr.mxu1 %v6944_v62 }
 0x92d   :  { %5211 = vmatpush3.msra.mxu1 %v4761_v19 }
 0x92e   :  { %5212 = vmatprep.subr.mxu1 %v6944_v62 }
 0x92f   :  { %5213 = vmatpush3.msra.mxu1 %v4760_v48 }
 0x930   :  { %5214 = vmatprep.subr.mxu1 %v6944_v62 }
 0x931   :  { %5215 = vmatpush3.msra.mxu1 %v4759_v30 }
 0x932   :  { %5216 = vmatprep.subr.mxu1 %v6944_v62 }
 0x933   :  { %5217 = vmatpush3.msra.mxu1 %v4758_v54 }
 0x934   :  { %5218 = vmatprep.subr.mxu1 %v6944_v62 }
 0x935   :  { %5219 = vmatpush3.msra.mxu1 %v4757_v1 }
 0x936   :  { %5220 = vmatprep.subr.mxu1 %v6944_v62 }
 0x937   :  { %5221 = vmatpush3.msra.mxu1 %v4756_v7 }
 0x938   :  { %5222 = vmatprep.subr.mxu1 %v6944_v62 }
 0x939   :  { %5223 = vmatpush3.msra.mxu1 %v4755_v20 }
 0x93a   :  { %5224 = vmatprep.subr.mxu1 %v6944_v62 }
 0x93b   :  { %5225 = vmatpush3.msra.mxu1 %v4754_v22 }
 0x93c   :  { %5226 = vmatprep.subr.mxu1 %v6944_v62 }
 0x93d   :  { %5227 = vmatpush3.msra.mxu1 %v4753_v52 }
 0x93e   :  { %5228 = vmatprep.subr.mxu1 %v6944_v62 }
 0x93f   :  { %5229 = vmatpush3.msra.mxu1 %v4752_v46 }
 0x940   :  { %5230 = vmatprep.subr.mxu1 %v6944_v62 }
 0x941   :  { %5231 = vmatpush3.msra.mxu1 %v4751_v37 }
 0x942   :  { %5232 = vmatprep.subr.mxu1 %v6944_v62 }
 0x9c7   :  { %v4470_v13 = vpop.f32.mrf.mxu1  ;;  %v4541_v3 = vpop.f32.mrf.mxu0 }
 0x9c8   :  { %v4474_v40 = vadd.f32 %v4470_v13, %v6722_v0  ;;  %v4617_v25 = vadd.f32 %v4541_v3, %v7054_v17 }
 0x9c9   :  { %v5170_v21 = vpop.f32.mrf.mxu1  ;;  %v4543_v4 = vpop.f32.mrf.mxu0 }
 0x9ca   :  { %v4618_v34 = vadd.f32 %v4543_v4, %v7055_v44  ;;  %v4621_v27 = vadd.f32 %v4617_v25, %v6192_v26 }
 0x9cc   :  { %v4622_v31 = vadd.f32 %v4618_v34, %v6197_v24  ;;  %v4872_v42 = vmul.f32 -1.442695, %v4621_v27 }
 0x9ce   :  { %v4873_v33 = vmul.f32 -1.442695, %v4622_v31  ;;  %5344 = vpow2.f32 %v4872_v42 }
 0x9d0   :  { %5346 = vpow2.f32 %v4873_v33 }
 0x9db   :  { %v5345_v2 = vpop.eup %5344 }
 0x9dc   :  { %v4634_v11 = vadd.f32 1.0, %v5345_v2 }
 0x9dd   :  { %v5347_v6 = vpop.eup %5346 }
 0x9de   :  { %v4635_v15 = vadd.f32 1.0, %v5347_v6  ;;  %5348 = vrcp.f32 %v4634_v11 }
 0x9e0   :  { %5350 = vrcp.f32 %v4635_v15 }
 0x9e7   :  { %v4612_v9 = vpop.f32.mrf.mxu1 }
 0x9e8   :  { %v4619_v0 = vadd.f32 %v4612_v9, %v7056_v28 }
 0x9e9   :  { %v4614_v10 = vpop.f32.mrf.mxu1 }
 0x9ea   :  { %v4623_v14 = vadd.f32 %v4619_v0, %v6207_v38  ;;  %v4620_v5 = vadd.f32 %v4614_v10, %v7057_v8 }
 0x9eb   :  { %v5349_v36 = vpop.eup %5348 }
 0x9ec   :  { %v4874_v26 = vmul.f32 -1.442695, %v4623_v14  ;;  %v4624_v24 = vadd.f32 %v4620_v5, %v6212_v49  ;;  %v4750_v49 = vld [vmem:[#allocation16 + $0x10] sm:$0xff] }
 0x9ed   :  { %v5351_v50 = vpop.eup %5350  ;;  %5233 = vmatpush3.msra.mxu1 %v4750_v49 }
 0x9ee   :  { %5352 = vpow2.f32 %v4874_v26  ;;  %v4644_v56 = vmul.f32 %v5351_v50, %v6733_v23  ;;  %5234 = vmatprep.subr.mxu1 %v6944_v62 }
 0x9ef   :  { %5354 = vtanh.f32 %v4624_v24  ;;  %5235 = vmatpush3.msra.mxu1 %v4749_v39 }
 0x9f0   :  { %5236 = vmatprep.subr.mxu1 %v6944_v62 }
 0x9f1   :  { %5237 = vmatpush3.msra.mxu1 %v4748_v41 }
 0x9fb   :  { %v5353_v18 = vpop.eup %5352 }
 0x9fc   :  { %v5355_v58 = vpop.eup %5354  ;;  %v4636_v12 = vadd.f32 1.0, %v5353_v18 }
 0x9fd   :  { %v4645_v29 = vmul.f32 %v5355_v58, %v5349_v36 }
 0x9fe   :  { %5356 = vrcp.f32 %v4636_v12 }
 0x9ff   :  { %v4646_v16 = vadd.f32 %v4645_v29, %v4644_v56 }
 0xa01   :  { %5358 = vtanh.f32 %v4646_v16 }
 0xa0b   :  { %v5357_v38 = vpop.eup %5356 }
 0xa0e   :  { %v5359_v32 = vpop.eup %5358 }
 0xa0f   :  { %v4648_v35 = vmul.f32 %v5359_v32, %v5357_v38 }
 0xa11   :  { %5204 = vmatmul.mubr.f32.vlgmr.msra.gmra.mxu0 %v4648_v35 }
 0xad1   :  { %v4732_v23 = vpop.f32.mrf.mxu0 }
 0xad2   :  { %v4736_v45 = vadd.f32 %v4732_v23, %v4474_v40 }
 0xad3   :  { %v5205_v47 = vpop.f32.mrf.mxu0 }
 0xad4   :  { %v4744_v51 = vadd.f32 %v4875_v43, %v4736_v45 }
 0xad6   :  { %v4746_v53 = vmul.f32 0.25, %v4744_v51  ;;  %vm4745_vm12 = vcmp.ge.f32.partialorder %v4744_v51, 0.0 }
 0xad8   :  { %v4747_v55 = vsel %vm4745_vm12, %v4744_v51, %v4746_v53 }
 0xad9   :  { %5239 = vmatmul.mubr.f32.vlgmr.msra.gmra.mxu1 %v4747_v55 }
 0xb99   :  { %v4837_v63 = vpop.f32.mrf.mxu1 }
 0xb9a   :  { %v4838_v59 = vadd.f32 %v4876_v57, %v4837_v63 }
 0xb9b   :  { %v5240_v60 = vpop.f32.mrf.mxu1 }
 0xb9c   :  { %4841 = vst [vmem:[%s6828_s12] sm:$0xff] %v4838_v59 }
 0xb9d   :  { %4846 = vsyncpa [#allocation3], 1 }
 0xb9e   :  { %4847 = vsyncpa [#allocation5], 1 }
 0xb9f   :  { %4848 = vsyncpa [#allocation8], 1 }
 0xba0   :  { %4849 = vsyncpa [#allocation11], 1 }
 0xba1   :  { %4850 = vsyncpa [#allocation14], 1 }
 0xba2   :  { %4851 = vsyncpa [#allocation17], 1 }

</bundles_post_ra>
